<compile_context>
chip_gen: v7x
topology: tpu7x:2x2x1
jax: 0.10.0
libtpu: 0.0.40
codegen_flags: <defaults>
</compile_context>

<pallas_src>
import functools
import math

import jax
import jax.numpy as jnp
from jax import lax
from jax.experimental import pallas as pl
from jax.experimental.pallas import tpu as pltpu


_VMEM_LIMIT = 48 * 1024 * 1024  # safe on v5e/v6e (128 MiB) and v7x (64 MiB)


def _layer_norm(x, g, b, eps):
    mu = jnp.mean(x, axis=-1, keepdims=True)
    var = jnp.mean((x - mu) ** 2, axis=-1, keepdims=True)
    return (x - mu) * lax.rsqrt(var + eps) * g + b


def _bf16(x):
    return x.astype(jnp.bfloat16)


# ------------------- fused GraphStructuralEncoder kernel ------------------- #

def _encoder_block_kernel(x_ref,
                          wq_ref, bq_ref, wk_ref, bk_ref, wv_ref, bv_ref,
                          wo_ref, bo_ref,
                          wf1_ref, bf1_ref, wf2_ref, bf2_ref,
                          g1_ref, be1_ref, g2_ref, be2_ref,
                          o_ref, *, nhead, eps):
    nb, L, E = x_ref.shape
    dh = E // nhead
    scale = 1.0 / math.sqrt(dh)

    x3 = x_ref[...]                              # (nb, L, E) f32
    x2 = x3.reshape(nb * L, E)
    xb = _bf16(x2)

    # QKV in-projection (bf16 operands, f32 accumulation on the MXU)
    q = jnp.dot(xb, wq_ref[...], preferred_element_type=jnp.float32) + bq_ref[...]
    k = jnp.dot(xb, wk_ref[...], preferred_element_type=jnp.float32) + bk_ref[...]
    v = jnp.dot(xb, wv_ref[...], preferred_element_type=jnp.float32) + bv_ref[...]

    # cast once, then slice per head (batch dim stays leading -> no transposes)
    qb = _bf16(q.reshape(nb, L, E))
    kb = _bf16(k.reshape(nb, L, E))
    vb = _bf16(v.reshape(nb, L, E))

    heads = []
    for h in range(nhead):
        lo, hi = h * dh, (h + 1) * dh
        qh = qb[:, :, lo:hi]
        kh = kb[:, :, lo:hi]
        vh = vb[:, :, lo:hi]
        s = jnp.einsum("nld,nmd->nlm", qh, kh,
                       preferred_element_type=jnp.float32) * scale
        s = s - jnp.max(s, axis=-1, keepdims=True)
        p = jnp.exp(s)
        p = p * pl.reciprocal(jnp.sum(p, axis=-1, keepdims=True), approx=True)
        heads.append(jnp.einsum("nlm,nmd->nld", _bf16(p), vh,
                                preferred_element_type=jnp.float32))
    attn = jnp.concatenate(heads, axis=-1).reshape(nb * L, E)

    # output projection
    attn = jnp.dot(_bf16(attn), wo_ref[...],
                   preferred_element_type=jnp.float32) + bo_ref[...]

    # Add & LayerNorm 1
    src1 = _layer_norm(x2 + attn, g1_ref[...], be1_ref[...], eps)

    # FFN (Linear -> ReLU -> Linear)
    hmid = jnp.dot(_bf16(src1), wf1_ref[...],
                   preferred_element_type=jnp.float32) + bf1_ref[...]
    hmid = jnp.maximum(hmid, 0.0)
    ff = jnp.dot(_bf16(hmid), wf2_ref[...],
                 preferred_element_type=jnp.float32) + bf2_ref[...]

    # Add & LayerNorm 2
    out = _layer_norm(src1 + ff, g2_ref[...], be2_ref[...], eps)
    o_ref[...] = out.reshape(nb, L, E).astype(o_ref.dtype)


_ENC_PARAM_NAMES = ("wq", "bq", "wk", "bk", "wv", "bv", "wo", "bo",
                    "wf1", "bf1", "wf2", "bf2", "g1", "be1", "g2", "be2")


def encoder_block(x, p, nhead=4, eps=1e-5):
    """One fused GraphStructuralEncoder block. x: (batch, seq, embed)."""
    N, L, E = x.shape
    nb = max(1, -(-N // 2))                     # split batch over 2 grid steps
    grid = (pl.cdiv(N, nb),)

    x_spec = pl.BlockSpec((nb, L, E), lambda i: (i, 0, 0))
    # weights: block == full array, index fixed at (0,0) -> DMA'd once, resident
    w_specs = [pl.BlockSpec(p[n].shape, lambda i: (0, 0))
               for n in _ENC_PARAM_NAMES]

    return pl.pallas_call(
        functools.partial(_encoder_block_kernel, nhead=nhead, eps=eps),
        grid=grid,
        in_specs=[x_spec] + w_specs,
        out_specs=x_spec,
        out_shape=jax.ShapeDtypeStruct((N, L, E), jnp.float32),
        compiler_params=pltpu.CompilerParams(
            dimension_semantics=("parallel",),
            vmem_limit_bytes=_VMEM_LIMIT),
    )(x, *[p[n] for n in _ENC_PARAM_NAMES])


# ------------- fused mix + DeepFc + LayerNorm + decoders kernel ------------- #

def _head_kernel(a_ref, b_ref, p_ref,
                 w1_ref, b1_ref, w2_ref, b2_ref, w3_ref, b3_ref,
                 g_ref, gb_ref,
                 ws_ref, bs_ref, wt_ref, btb_ref,
                 os_ref, ot_ref, *, eps, slope):
    # mix: out = cross * para2 + multi_pattern_emb * para1 (scalars from SMEM)
    x = a_ref[...] * p_ref[0] + b_ref[...] * p_ref[1]

    # DeepFc: Linear -> Linear -> LeakyReLU(0.3) -> Linear -> LeakyReLU(0.3)
    h = jnp.dot(_bf16(x), w1_ref[...], preferred_element_type=jnp.float32) + b1_ref[...]
    h = jnp.dot(_bf16(h), w2_ref[...], preferred_element_type=jnp.float32) + b2_ref[...]
    h = jnp.where(h >= 0.0, h, slope * h)
    h = jnp.dot(_bf16(h), w3_ref[...], preferred_element_type=jnp.float32) + b3_ref[...]
    h = jnp.where(h >= 0.0, h, slope * h)

    # trailing LayerNorm
    feat = _layer_norm(h, g_ref[...], gb_ref[...], eps)

    fb = _bf16(feat)
    os_ref[...] = (jnp.dot(fb, ws_ref[...], preferred_element_type=jnp.float32)
                   + bs_ref[...]).astype(os_ref.dtype)
    ot_ref[...] = (jnp.dot(fb, wt_ref[...], preferred_element_type=jnp.float32)
                   + btb_ref[...]).astype(ot_ref.dtype)


def head_fused(a, b, paras, enc, params, eps=1e-5, slope=0.3):
    R, in_dim = a.shape
    out_dim = params["dec_s_w"].shape[1]
    rb = min(R, max(8, ((-(-R // 2)) + 7) // 8 * 8))   # 8-aligned row block
    grid = (pl.cdiv(R, rb),)

    def row_spec(n_cols):
        return pl.BlockSpec((rb, n_cols), lambda i: (i, 0))

    def full_spec(arr):
        return pl.BlockSpec(arr.shape, lambda i: (0, 0))

    weights = (enc["fc_w1"], enc["fc_b1"], enc["fc_w2"], enc["fc_b2"],
               enc["fc_w3"], enc["fc_b3"], enc["ln_g"], enc["ln_b"],
               params["dec_s_w"], params["dec_s_b"],
               params["dec_t_w"], params["dec_t_b"])

    in_specs = ([row_spec(in_dim), row_spec(in_dim),
                 pl.BlockSpec(memory_space=pltpu.MemorySpace.SMEM)]
                + [full_spec(w) for w in weights])
    out_specs = (row_spec(out_dim), row_spec(out_dim))
    out_shape = (jax.ShapeDtypeStruct((R, out_dim), jnp.float32),
                 jax.ShapeDtypeStruct((R, out_dim), jnp.float32))

    return pl.pallas_call(
        functools.partial(_head_kernel, eps=eps, slope=slope),
        grid=grid,
        in_specs=in_specs,
        out_specs=out_specs,
        out_shape=out_shape,
        compiler_params=pltpu.CompilerParams(
            dimension_semantics=("parallel",),
            vmem_limit_bytes=_VMEM_LIMIT),
    )(a, b, paras, *weights)


# --------------------------- model forward (glue) --------------------------- #

def mgfn_forward(x, params):
    """x: (graph_num, node_num, node_num) -> (out_s, out_t), each (node_num, output_dim)."""
    G, Nn, E = x.shape
    enc = params["encoder"]

    # multi-pattern blocks: torch layout (seq=G, batch=Nn, E) -> (batch, seq, E)
    out = jnp.transpose(x, (1, 0, 2))                    # (Nn, G, E)
    for blk in enc["multi_pattern"]:
        out = encoder_block(out, blk)

    # back to torch layout; this tensor is both multi_pattern_emb and the
    # batch-major input of the cross-graph block (only 2 XLA transposes total).
    multi_emb = jnp.transpose(out, (1, 0, 2))            # (G, Nn, E)
    out = multi_emb
    for blk in enc["cross_graph"]:
        out = encoder_block(out, blk)                    # (G, Nn, E) == torch out after transpose-back

    # para-mix + view(-1, node_num*graph_num) + DeepFc + LayerNorm + decoders
    a_flat = out.reshape(Nn, Nn * G)                     # row-major flatten, same as torch .view
    b_flat = multi_emb.reshape(Nn, Nn * G)
    paras = jnp.stack([enc["para2"], enc["para1"]]).astype(jnp.float32)
    return head_fused(a_flat, b_flat, paras, enc, params)


# ------------------------------ param init --------------------------------- #

def init_params(key, graph_num, node_num, output_dim, nhead=4, dim_ff=64):
    E = node_num
    in_dim = graph_num * node_num
    hid = in_dim * 2
    kit = iter(jax.random.split(key, 64))

    def dense(fan_in, fan_out):
        w = (jax.random.normal(next(kit), (fan_in, fan_out), jnp.float32)
             * (1.0 / math.sqrt(fan_in))).astype(jnp.bfloat16)   # bf16 MXU weights
        b = jnp.zeros((1, fan_out), jnp.float32)
        return w, b

    def enc_block():
        wq, bq = dense(E, E)
        wk, bk = dense(E, E)
        wv, bv = dense(E, E)
        wo, bo = dense(E, E)
        wf1, bf1 = dense(E, dim_ff)
        wf2, bf2 = dense(dim_ff, E)
        return dict(wq=wq, bq=bq, wk=wk, bk=bk, wv=wv, bv=bv, wo=wo, bo=bo,
                    wf1=wf1, bf1=bf1, wf2=wf2, bf2=bf2,
                    g1=jnp.ones((1, E), jnp.float32), be1=jnp.zeros((1, E), jnp.float32),
                    g2=jnp.ones((1, E), jnp.float32), be2=jnp.zeros((1, E), jnp.float32))

    enc = dict(
        multi_pattern=[enc_block() for _ in range(3)],
        cross_graph=[enc_block() for _ in range(1)],
        para1=jnp.array(0.7, jnp.float32),
        para2=jnp.array(0.3, jnp.float32),
    )
    enc["fc_w1"], enc["fc_b1"] = dense(in_dim, hid)
    enc["fc_w2"], enc["fc_b2"] = dense(hid, hid)
    enc["fc_w3"], enc["fc_b3"] = dense(hid, output_dim)
    enc["ln_g"] = jnp.ones((1, output_dim), jnp.float32)
    enc["ln_b"] = jnp.zeros((1, output_dim), jnp.float32)

    dec_s_w, dec_s_b = dense(output_dim, output_dim)
    dec_t_w, dec_t_b = dense(output_dim, output_dim)
    return dict(encoder=enc, dec_s_w=dec_s_w, dec_s_b=dec_s_b,
                dec_t_w=dec_t_w, dec_t_b=dec_t_b)


# ---------------------------------- main ------------------------------------ #

if __name__ == "__main__":
    # Small analog of (graph_num=7, node_num=180, output_dim=144),
    # picked lane-friendly: in_dim = 4*32 = 128, hid = 256, output_dim = 128.
    graph_num, node_num, output_dim = 4, 32, 128

    key = jax.random.PRNGKey(0)
    kx, kp = jax.random.split(key)
    x = jax.random.normal(kx, (graph_num, node_num, node_num), jnp.float32)
    params = init_params(kp, graph_num, node_num, output_dim)

    fwd = jax.jit(mgfn_forward)
    out_s, out_t = fwd(x, params)
    jax.block_until_ready((out_s, out_t))

    assert out_s.shape == (node_num, output_dim), out_s.shape
    assert out_t.shape == (node_num, output_dim), out_t.shape
    assert bool(jnp.all(jnp.isfinite(out_s))) and bool(jnp.all(jnp.isfinite(out_t)))
    print("KERNEL_OK")
</pallas_src>

<mosaic_0001>
module attributes {stable_mosaic.version = 11 : i64} {
  func.func @_encoder_block_kernel(%arg0: i32, %arg1: memref<16x4x32xf32, #tpu.memory_space<vmem>>, %arg2: memref<32x32xbf16, #tpu.memory_space<vmem>>, %arg3: memref<1x32xf32, #tpu.memory_space<vmem>>, %arg4: memref<32x32xbf16, #tpu.memory_space<vmem>>, %arg5: memref<1x32xf32, #tpu.memory_space<vmem>>, %arg6: memref<32x32xbf16, #tpu.memory_space<vmem>>, %arg7: memref<1x32xf32, #tpu.memory_space<vmem>>, %arg8: memref<32x32xbf16, #tpu.memory_space<vmem>>, %arg9: memref<1x32xf32, #tpu.memory_space<vmem>>, %arg10: memref<32x64xbf16, #tpu.memory_space<vmem>>, %arg11: memref<1x64xf32, #tpu.memory_space<vmem>>, %arg12: memref<64x32xbf16, #tpu.memory_space<vmem>>, %arg13: memref<1x32xf32, #tpu.memory_space<vmem>>, %arg14: memref<1x32xf32, #tpu.memory_space<vmem>>, %arg15: memref<1x32xf32, #tpu.memory_space<vmem>>, %arg16: memref<1x32xf32, #tpu.memory_space<vmem>>, %arg17: memref<1x32xf32, #tpu.memory_space<vmem>>, %arg18: memref<16x4x32xf32, #tpu.memory_space<vmem>>) attributes {dimension_semantics = [#tpu.dimension_semantics<parallel>], iteration_bounds = array<i64: 2>, scalar_prefetch = 0 : i64, scratch_operands = 0 : i64, tpu.core_type = #tpu.core_type<tc>, window_params = [{transform_indices = @transform_0, window_bounds = array<i64: 16, 4, 32>}, {pipeline_mode = #tpu.pipeline_mode<synchronous>, transform_indices = @transform_1, window_bounds = array<i64: 32, 32>}, {pipeline_mode = #tpu.pipeline_mode<synchronous>, transform_indices = @transform_2, window_bounds = array<i64: 1, 32>}, {pipeline_mode = #tpu.pipeline_mode<synchronous>, transform_indices = @transform_3, window_bounds = array<i64: 32, 32>}, {pipeline_mode = #tpu.pipeline_mode<synchronous>, transform_indices = @transform_4, window_bounds = array<i64: 1, 32>}, {pipeline_mode = #tpu.pipeline_mode<synchronous>, transform_indices = @transform_5, window_bounds = array<i64: 32, 32>}, {pipeline_mode = #tpu.pipeline_mode<synchronous>, transform_indices = @transform_6, window_bounds = array<i64: 1, 32>}, {pipeline_mode = #tpu.pipeline_mode<synchronous>, transform_indices = @transform_7, window_bounds = array<i64: 32, 32>}, {pipeline_mode = #tpu.pipeline_mode<synchronous>, transform_indices = @transform_8, window_bounds = array<i64: 1, 32>}, {pipeline_mode = #tpu.pipeline_mode<synchronous>, transform_indices = @transform_9, window_bounds = array<i64: 32, 64>}, {pipeline_mode = #tpu.pipeline_mode<synchronous>, transform_indices = @transform_10, window_bounds = array<i64: 1, 64>}, {pipeline_mode = #tpu.pipeline_mode<synchronous>, transform_indices = @transform_11, window_bounds = array<i64: 64, 32>}, {pipeline_mode = #tpu.pipeline_mode<synchronous>, transform_indices = @transform_12, window_bounds = array<i64: 1, 32>}, {pipeline_mode = #tpu.pipeline_mode<synchronous>, transform_indices = @transform_13, window_bounds = array<i64: 1, 32>}, {pipeline_mode = #tpu.pipeline_mode<synchronous>, transform_indices = @transform_14, window_bounds = array<i64: 1, 32>}, {pipeline_mode = #tpu.pipeline_mode<synchronous>, transform_indices = @transform_15, window_bounds = array<i64: 1, 32>}, {pipeline_mode = #tpu.pipeline_mode<synchronous>, transform_indices = @transform_16, window_bounds = array<i64: 1, 32>}, {transform_indices = @transform_17, window_bounds = array<i64: 16, 4, 32>}]} {
    %c0 = arith.constant 0 : index
    %c0_0 = arith.constant 0 : index
    %c0_1 = arith.constant 0 : index
    %0 = vector.load %arg1[%c0, %c0_0, %c0_1] : memref<16x4x32xf32, #tpu.memory_space<vmem>>, vector<16x4x32xf32>
    %1 = vector.shape_cast %0 : vector<16x4x32xf32> to vector<64x32xf32>
    %2 = arith.truncf %1 : vector<64x32xf32> to vector<64x32xbf16>
    %c0_2 = arith.constant 0 : index
    %c0_3 = arith.constant 0 : index
    %3 = vector.load %arg2[%c0_2, %c0_3] : memref<32x32xbf16, #tpu.memory_space<vmem>>, vector<32x32xbf16>
    %cst = arith.constant dense<0.000000e+00> : vector<64x32xf32>
    %4 = tpu.matmul %2, %3, %cst {dimension_numbers = #tpu.dot_dimension_numbers<[1], [0], [0], [1], [0, 0, 1, 1], [], []>} : vector<64x32xbf16>, vector<32x32xbf16>, vector<64x32xf32> -> vector<64x32xf32>
    %c0_4 = arith.constant 0 : index
    %c0_5 = arith.constant 0 : index
    %5 = vector.load %arg3[%c0_4, %c0_5] : memref<1x32xf32, #tpu.memory_space<vmem>>, vector<1x32xf32>
    %6 = vector.broadcast %5 : vector<1x32xf32> to vector<64x32xf32>
    %7 = arith.addf %4, %6 : vector<64x32xf32>
    %c0_6 = arith.constant 0 : index
    %c0_7 = arith.constant 0 : index
    %8 = vector.load %arg4[%c0_6, %c0_7] : memref<32x32xbf16, #tpu.memory_space<vmem>>, vector<32x32xbf16>
    %cst_8 = arith.constant dense<0.000000e+00> : vector<64x32xf32>
    %9 = tpu.matmul %2, %8, %cst_8 {dimension_numbers = #tpu.dot_dimension_numbers<[1], [0], [0], [1], [0, 0, 1, 1], [], []>} : vector<64x32xbf16>, vector<32x32xbf16>, vector<64x32xf32> -> vector<64x32xf32>
    %c0_9 = arith.constant 0 : index
    %c0_10 = arith.constant 0 : index
    %10 = vector.load %arg5[%c0_9, %c0_10] : memref<1x32xf32, #tpu.memory_space<vmem>>, vector<1x32xf32>
    %11 = vector.broadcast %10 : vector<1x32xf32> to vector<64x32xf32>
    %12 = arith.addf %9, %11 : vector<64x32xf32>
    %c0_11 = arith.constant 0 : index
    %c0_12 = arith.constant 0 : index
    %13 = vector.load %arg6[%c0_11, %c0_12] : memref<32x32xbf16, #tpu.memory_space<vmem>>, vector<32x32xbf16>
    %cst_13 = arith.constant dense<0.000000e+00> : vector<64x32xf32>
    %14 = tpu.matmul %2, %13, %cst_13 {dimension_numbers = #tpu.dot_dimension_numbers<[1], [0], [0], [1], [0, 0, 1, 1], [], []>} : vector<64x32xbf16>, vector<32x32xbf16>, vector<64x32xf32> -> vector<64x32xf32>
    %c0_14 = arith.constant 0 : index
    %c0_15 = arith.constant 0 : index
    %15 = vector.load %arg7[%c0_14, %c0_15] : memref<1x32xf32, #tpu.memory_space<vmem>>, vector<1x32xf32>
    %16 = vector.broadcast %15 : vector<1x32xf32> to vector<64x32xf32>
    %17 = arith.addf %14, %16 : vector<64x32xf32>
    %18 = vector.shape_cast %7 : vector<64x32xf32> to vector<16x4x32xf32>
    %19 = arith.truncf %18 : vector<16x4x32xf32> to vector<16x4x32xbf16>
    %20 = vector.shape_cast %12 : vector<64x32xf32> to vector<16x4x32xf32>
    %21 = arith.truncf %20 : vector<16x4x32xf32> to vector<16x4x32xbf16>
    %22 = vector.shape_cast %17 : vector<64x32xf32> to vector<16x4x32xf32>
    %23 = arith.truncf %22 : vector<16x4x32xf32> to vector<16x4x32xbf16>
    %24 = vector.extract_strided_slice %19 {offsets = [0, 0, 0], sizes = [16, 4, 8], strides = [1, 1, 1]} : vector<16x4x32xbf16> to vector<16x4x8xbf16>
    %25 = vector.extract_strided_slice %21 {offsets = [0, 0, 0], sizes = [16, 4, 8], strides = [1, 1, 1]} : vector<16x4x32xbf16> to vector<16x4x8xbf16>
    %26 = vector.extract_strided_slice %23 {offsets = [0, 0, 0], sizes = [16, 4, 8], strides = [1, 1, 1]} : vector<16x4x32xbf16> to vector<16x4x8xbf16>
    "tpu.trace_start"() <{level = 10 : i32, message = "nld,nmd->nlm"}> : () -> ()
    %cst_16 = arith.constant dense<0.000000e+00> : vector<16x4x4xf32>
    %27 = tpu.matmul %24, %25, %cst_16 {dimension_numbers = #tpu.dot_dimension_numbers<[2], [2], [1], [1], [0, 0, 0, 1, 1, 1], [0], [0]>} : vector<16x4x8xbf16>, vector<16x4x8xbf16>, vector<16x4x4xf32> -> vector<16x4x4xf32>
    "tpu.trace_stop"() : () -> ()
    %cst_17 = arith.constant 0.353553385 : f32
    %28 = vector.broadcast %cst_17 : f32 to vector<16x4x4xf32>
    %29 = arith.mulf %27, %28 : vector<16x4x4xf32>
    %cst_18 = arith.constant dense<0xFF800000> : vector<16x4xf32>
    %30 = vector.multi_reduction <maximumf>, %29, %cst_18 [2] : vector<16x4x4xf32> to vector<16x4xf32>
    %31 = vector.shape_cast %30 : vector<16x4xf32> to vector<16x4x1xf32>
    %32 = vector.broadcast %31 : vector<16x4x1xf32> to vector<16x4x4xf32>
    %33 = arith.subf %29, %32 : vector<16x4x4xf32>
    %34 = math.exp %33 : vector<16x4x4xf32>
    %cst_19 = arith.constant dense<0.000000e+00> : vector<16x4xf32>
    %35 = vector.multi_reduction <add>, %34, %cst_19 [2] : vector<16x4x4xf32> to vector<16x4xf32>
    %36 = vector.shape_cast %35 : vector<16x4xf32> to vector<16x4x1xf32>
    %37 = tpu.reciprocal %36 {approx = true} : vector<16x4x1xf32> -> vector<16x4x1xf32>
    %38 = vector.broadcast %37 : vector<16x4x1xf32> to vector<16x4x4xf32>
    %39 = arith.mulf %34, %38 : vector<16x4x4xf32>
    %40 = arith.truncf %39 : vector<16x4x4xf32> to vector<16x4x4xbf16>
    "tpu.trace_start"() <{level = 10 : i32, message = "nlm,nmd->nld"}> : () -> ()
    %cst_20 = arith.constant dense<0.000000e+00> : vector<16x4x8xf32>
    %41 = tpu.matmul %40, %26, %cst_20 {dimension_numbers = #tpu.dot_dimension_numbers<[2], [1], [1], [2], [0, 0, 0, 1, 1, 2], [0], [0]>} : vector<16x4x4xbf16>, vector<16x4x8xbf16>, vector<16x4x8xf32> -> vector<16x4x8xf32>
    "tpu.trace_stop"() : () -> ()
    %42 = vector.extract_strided_slice %19 {offsets = [0, 0, 8], sizes = [16, 4, 8], strides = [1, 1, 1]} : vector<16x4x32xbf16> to vector<16x4x8xbf16>
    %43 = vector.extract_strided_slice %21 {offsets = [0, 0, 8], sizes = [16, 4, 8], strides = [1, 1, 1]} : vector<16x4x32xbf16> to vector<16x4x8xbf16>
    %44 = vector.extract_strided_slice %23 {offsets = [0, 0, 8], sizes = [16, 4, 8], strides = [1, 1, 1]} : vector<16x4x32xbf16> to vector<16x4x8xbf16>
    "tpu.trace_start"() <{level = 10 : i32, message = "nld,nmd->nlm"}> : () -> ()
    %cst_21 = arith.constant dense<0.000000e+00> : vector<16x4x4xf32>
    %45 = tpu.matmul %42, %43, %cst_21 {dimension_numbers = #tpu.dot_dimension_numbers<[2], [2], [1], [1], [0, 0, 0, 1, 1, 1], [0], [0]>} : vector<16x4x8xbf16>, vector<16x4x8xbf16>, vector<16x4x4xf32> -> vector<16x4x4xf32>
    "tpu.trace_stop"() : () -> ()
    %cst_22 = arith.constant 0.353553385 : f32
    %46 = vector.broadcast %cst_22 : f32 to vector<16x4x4xf32>
    %47 = arith.mulf %45, %46 : vector<16x4x4xf32>
    %cst_23 = arith.constant dense<0xFF800000> : vector<16x4xf32>
    %48 = vector.multi_reduction <maximumf>, %47, %cst_23 [2] : vector<16x4x4xf32> to vector<16x4xf32>
    %49 = vector.shape_cast %48 : vector<16x4xf32> to vector<16x4x1xf32>
    %50 = vector.broadcast %49 : vector<16x4x1xf32> to vector<16x4x4xf32>
    %51 = arith.subf %47, %50 : vector<16x4x4xf32>
    %52 = math.exp %51 : vector<16x4x4xf32>
    %cst_24 = arith.constant dense<0.000000e+00> : vector<16x4xf32>
    %53 = vector.multi_reduction <add>, %52, %cst_24 [2] : vector<16x4x4xf32> to vector<16x4xf32>
    %54 = vector.shape_cast %53 : vector<16x4xf32> to vector<16x4x1xf32>
    %55 = tpu.reciprocal %54 {approx = true} : vector<16x4x1xf32> -> vector<16x4x1xf32>
    %56 = vector.broadcast %55 : vector<16x4x1xf32> to vector<16x4x4xf32>
    %57 = arith.mulf %52, %56 : vector<16x4x4xf32>
    %58 = arith.truncf %57 : vector<16x4x4xf32> to vector<16x4x4xbf16>
    "tpu.trace_start"() <{level = 10 : i32, message = "nlm,nmd->nld"}> : () -> ()
    %cst_25 = arith.constant dense<0.000000e+00> : vector<16x4x8xf32>
    %59 = tpu.matmul %58, %44, %cst_25 {dimension_numbers = #tpu.dot_dimension_numbers<[2], [1], [1], [2], [0, 0, 0, 1, 1, 2], [0], [0]>} : vector<16x4x4xbf16>, vector<16x4x8xbf16>, vector<16x4x8xf32> -> vector<16x4x8xf32>
    "tpu.trace_stop"() : () -> ()
    %60 = vector.extract_strided_slice %19 {offsets = [0, 0, 16], sizes = [16, 4, 8], strides = [1, 1, 1]} : vector<16x4x32xbf16> to vector<16x4x8xbf16>
    %61 = vector.extract_strided_slice %21 {offsets = [0, 0, 16], sizes = [16, 4, 8], strides = [1, 1, 1]} : vector<16x4x32xbf16> to vector<16x4x8xbf16>
    %62 = vector.extract_strided_slice %23 {offsets = [0, 0, 16], sizes = [16, 4, 8], strides = [1, 1, 1]} : vector<16x4x32xbf16> to vector<16x4x8xbf16>
    "tpu.trace_start"() <{level = 10 : i32, message = "nld,nmd->nlm"}> : () -> ()
    %cst_26 = arith.constant dense<0.000000e+00> : vector<16x4x4xf32>
    %63 = tpu.matmul %60, %61, %cst_26 {dimension_numbers = #tpu.dot_dimension_numbers<[2], [2], [1], [1], [0, 0, 0, 1, 1, 1], [0], [0]>} : vector<16x4x8xbf16>, vector<16x4x8xbf16>, vector<16x4x4xf32> -> vector<16x4x4xf32>
    "tpu.trace_stop"() : () -> ()
    %cst_27 = arith.constant 0.353553385 : f32
    %64 = vector.broadcast %cst_27 : f32 to vector<16x4x4xf32>
    %65 = arith.mulf %63, %64 : vector<16x4x4xf32>
    %cst_28 = arith.constant dense<0xFF800000> : vector<16x4xf32>
    %66 = vector.multi_reduction <maximumf>, %65, %cst_28 [2] : vector<16x4x4xf32> to vector<16x4xf32>
    %67 = vector.shape_cast %66 : vector<16x4xf32> to vector<16x4x1xf32>
    %68 = vector.broadcast %67 : vector<16x4x1xf32> to vector<16x4x4xf32>
    %69 = arith.subf %65, %68 : vector<16x4x4xf32>
    %70 = math.exp %69 : vector<16x4x4xf32>
    %cst_29 = arith.constant dense<0.000000e+00> : vector<16x4xf32>
    %71 = vector.multi_reduction <add>, %70, %cst_29 [2] : vector<16x4x4xf32> to vector<16x4xf32>
    %72 = vector.shape_cast %71 : vector<16x4xf32> to vector<16x4x1xf32>
    %73 = tpu.reciprocal %72 {approx = true} : vector<16x4x1xf32> -> vector<16x4x1xf32>
    %74 = vector.broadcast %73 : vector<16x4x1xf32> to vector<16x4x4xf32>
    %75 = arith.mulf %70, %74 : vector<16x4x4xf32>
    %76 = arith.truncf %75 : vector<16x4x4xf32> to vector<16x4x4xbf16>
    "tpu.trace_start"() <{level = 10 : i32, message = "nlm,nmd->nld"}> : () -> ()
    %cst_30 = arith.constant dense<0.000000e+00> : vector<16x4x8xf32>
    %77 = tpu.matmul %76, %62, %cst_30 {dimension_numbers = #tpu.dot_dimension_numbers<[2], [1], [1], [2], [0, 0, 0, 1, 1, 2], [0], [0]>} : vector<16x4x4xbf16>, vector<16x4x8xbf16>, vector<16x4x8xf32> -> vector<16x4x8xf32>
    "tpu.trace_stop"() : () -> ()
    %78 = vector.extract_strided_slice %19 {offsets = [0, 0, 24], sizes = [16, 4, 8], strides = [1, 1, 1]} : vector<16x4x32xbf16> to vector<16x4x8xbf16>
    %79 = vector.extract_strided_slice %21 {offsets = [0, 0, 24], sizes = [16, 4, 8], strides = [1, 1, 1]} : vector<16x4x32xbf16> to vector<16x4x8xbf16>
    %80 = vector.extract_strided_slice %23 {offsets = [0, 0, 24], sizes = [16, 4, 8], strides = [1, 1, 1]} : vector<16x4x32xbf16> to vector<16x4x8xbf16>
    "tpu.trace_start"() <{level = 10 : i32, message = "nld,nmd->nlm"}> : () -> ()
    %cst_31 = arith.constant dense<0.000000e+00> : vector<16x4x4xf32>
    %81 = tpu.matmul %78, %79, %cst_31 {dimension_numbers = #tpu.dot_dimension_numbers<[2], [2], [1], [1], [0, 0, 0, 1, 1, 1], [0], [0]>} : vector<16x4x8xbf16>, vector<16x4x8xbf16>, vector<16x4x4xf32> -> vector<16x4x4xf32>
    "tpu.trace_stop"() : () -> ()
    %cst_32 = arith.constant 0.353553385 : f32
    %82 = vector.broadcast %cst_32 : f32 to vector<16x4x4xf32>
    %83 = arith.mulf %81, %82 : vector<16x4x4xf32>
    %cst_33 = arith.constant dense<0xFF800000> : vector<16x4xf32>
    %84 = vector.multi_reduction <maximumf>, %83, %cst_33 [2] : vector<16x4x4xf32> to vector<16x4xf32>
    %85 = vector.shape_cast %84 : vector<16x4xf32> to vector<16x4x1xf32>
    %86 = vector.broadcast %85 : vector<16x4x1xf32> to vector<16x4x4xf32>
    %87 = arith.subf %83, %86 : vector<16x4x4xf32>
    %88 = math.exp %87 : vector<16x4x4xf32>
    %cst_34 = arith.constant dense<0.000000e+00> : vector<16x4xf32>
    %89 = vector.multi_reduction <add>, %88, %cst_34 [2] : vector<16x4x4xf32> to vector<16x4xf32>
    %90 = vector.shape_cast %89 : vector<16x4xf32> to vector<16x4x1xf32>
    %91 = tpu.reciprocal %90 {approx = true} : vector<16x4x1xf32> -> vector<16x4x1xf32>
    %92 = vector.broadcast %91 : vector<16x4x1xf32> to vector<16x4x4xf32>
    %93 = arith.mulf %88, %92 : vector<16x4x4xf32>
    %94 = arith.truncf %93 : vector<16x4x4xf32> to vector<16x4x4xbf16>
    "tpu.trace_start"() <{level = 10 : i32, message = "nlm,nmd->nld"}> : () -> ()
    %cst_35 = arith.constant dense<0.000000e+00> : vector<16x4x8xf32>
    %95 = tpu.matmul %94, %80, %cst_35 {dimension_numbers = #tpu.dot_dimension_numbers<[2], [1], [1], [2], [0, 0, 0, 1, 1, 2], [0], [0]>} : vector<16x4x4xbf16>, vector<16x4x8xbf16>, vector<16x4x8xf32> -> vector<16x4x8xf32>
    "tpu.trace_stop"() : () -> ()
    %96 = tpu.concatenate %41, %59, %77, %95 in 2 : vector<16x4x8xf32>, vector<16x4x8xf32>, vector<16x4x8xf32>, vector<16x4x8xf32> -> vector<16x4x32xf32>
    %97 = vector.shape_cast %96 : vector<16x4x32xf32> to vector<64x32xf32>
    %98 = arith.truncf %97 : vector<64x32xf32> to vector<64x32xbf16>
    %c0_36 = arith.constant 0 : index
    %c0_37 = arith.constant 0 : index
    %99 = vector.load %arg8[%c0_36, %c0_37] : memref<32x32xbf16, #tpu.memory_space<vmem>>, vector<32x32xbf16>
    %cst_38 = arith.constant dense<0.000000e+00> : vector<64x32xf32>
    %100 = tpu.matmul %98, %99, %cst_38 {dimension_numbers = #tpu.dot_dimension_numbers<[1], [0], [0], [1], [0, 0, 1, 1], [], []>} : vector<64x32xbf16>, vector<32x32xbf16>, vector<64x32xf32> -> vector<64x32xf32>
    %c0_39 = arith.constant 0 : index
    %c0_40 = arith.constant 0 : index
    %101 = vector.load %arg9[%c0_39, %c0_40] : memref<1x32xf32, #tpu.memory_space<vmem>>, vector<1x32xf32>
    %102 = vector.broadcast %101 : vector<1x32xf32> to vector<64x32xf32>
    %103 = arith.addf %100, %102 : vector<64x32xf32>
    %104 = arith.addf %1, %103 : vector<64x32xf32>
    %c0_41 = arith.constant 0 : index
    %c0_42 = arith.constant 0 : index
    %105 = vector.load %arg14[%c0_41, %c0_42] : memref<1x32xf32, #tpu.memory_space<vmem>>, vector<1x32xf32>
    %c0_43 = arith.constant 0 : index
    %c0_44 = arith.constant 0 : index
    %106 = vector.load %arg15[%c0_43, %c0_44] : memref<1x32xf32, #tpu.memory_space<vmem>>, vector<1x32xf32>
    %cst_45 = arith.constant dense<0.000000e+00> : vector<64xf32>
    %107 = vector.multi_reduction <add>, %104, %cst_45 [1] : vector<64x32xf32> to vector<64xf32>
    %108 = vector.shape_cast %107 : vector<64xf32> to vector<64x1xf32>
    %cst_46 = arith.constant 3.200000e+01 : f32
    %109 = vector.broadcast %cst_46 : f32 to vector<64x1xf32>
    %110 = arith.divf %108, %109 : vector<64x1xf32>
    %111 = vector.broadcast %110 : vector<64x1xf32> to vector<64x32xf32>
    %112 = arith.subf %104, %111 : vector<64x32xf32>
    %113 = arith.mulf %112, %112 : vector<64x32xf32>
    %cst_47 = arith.constant dense<0.000000e+00> : vector<64xf32>
    %114 = vector.multi_reduction <add>, %113, %cst_47 [1] : vector<64x32xf32> to vector<64xf32>
    %115 = vector.shape_cast %114 : vector<64xf32> to vector<64x1xf32>
    %cst_48 = arith.constant 3.200000e+01 : f32
    %116 = vector.broadcast %cst_48 : f32 to vector<64x1xf32>
    %117 = arith.divf %115, %116 : vector<64x1xf32>
    %118 = vector.broadcast %110 : vector<64x1xf32> to vector<64x32xf32>
    %119 = arith.subf %104, %118 : vector<64x32xf32>
    %cst_49 = arith.constant 9.99999974E-6 : f32
    %120 = vector.broadcast %cst_49 : f32 to vector<64x1xf32>
    %121 = arith.addf %117, %120 : vector<64x1xf32>
    %122 = math.rsqrt %121 : vector<64x1xf32>
    %123 = vector.broadcast %122 : vector<64x1xf32> to vector<64x32xf32>
    %124 = arith.mulf %119, %123 : vector<64x32xf32>
    %125 = vector.broadcast %105 : vector<1x32xf32> to vector<64x32xf32>
    %126 = arith.mulf %124, %125 : vector<64x32xf32>
    %127 = vector.broadcast %106 : vector<1x32xf32> to vector<64x32xf32>
    %128 = arith.addf %126, %127 : vector<64x32xf32>
    %129 = arith.truncf %128 : vector<64x32xf32> to vector<64x32xbf16>
    %c0_50 = arith.constant 0 : index
    %c0_51 = arith.constant 0 : index
    %130 = vector.load %arg10[%c0_50, %c0_51] : memref<32x64xbf16, #tpu.memory_space<vmem>>, vector<32x64xbf16>
    %cst_52 = arith.constant dense<0.000000e+00> : vector<64x64xf32>
    %131 = tpu.matmul %129, %130, %cst_52 {dimension_numbers = #tpu.dot_dimension_numbers<[1], [0], [0], [1], [0, 0, 1, 1], [], []>} : vector<64x32xbf16>, vector<32x64xbf16>, vector<64x64xf32> -> vector<64x64xf32>
    %c0_53 = arith.constant 0 : index
    %c0_54 = arith.constant 0 : index
    %132 = vector.load %arg11[%c0_53, %c0_54] : memref<1x64xf32, #tpu.memory_space<vmem>>, vector<1x64xf32>
    %133 = vector.broadcast %132 : vector<1x64xf32> to vector<64x64xf32>
    %134 = arith.addf %131, %133 : vector<64x64xf32>
    %cst_55 = arith.constant 0.000000e+00 : f32
    %135 = vector.broadcast %cst_55 : f32 to vector<64x64xf32>
    %136 = arith.maximumf %134, %135 : vector<64x64xf32>
    %137 = arith.truncf %136 : vector<64x64xf32> to vector<64x64xbf16>
    %c0_56 = arith.constant 0 : index
    %c0_57 = arith.constant 0 : index
    %138 = vector.load %arg12[%c0_56, %c0_57] : memref<64x32xbf16, #tpu.memory_space<vmem>>, vector<64x32xbf16>
    %cst_58 = arith.constant dense<0.000000e+00> : vector<64x32xf32>
    %139 = tpu.matmul %137, %138, %cst_58 {dimension_numbers = #tpu.dot_dimension_numbers<[1], [0], [0], [1], [0, 0, 1, 1], [], []>} : vector<64x64xbf16>, vector<64x32xbf16>, vector<64x32xf32> -> vector<64x32xf32>
    %c0_59 = arith.constant 0 : index
    %c0_60 = arith.constant 0 : index
    %140 = vector.load %arg13[%c0_59, %c0_60] : memref<1x32xf32, #tpu.memory_space<vmem>>, vector<1x32xf32>
    %141 = vector.broadcast %140 : vector<1x32xf32> to vector<64x32xf32>
    %142 = arith.addf %139, %141 : vector<64x32xf32>
    %143 = arith.addf %128, %142 : vector<64x32xf32>
    %c0_61 = arith.constant 0 : index
    %c0_62 = arith.constant 0 : index
    %144 = vector.load %arg16[%c0_61, %c0_62] : memref<1x32xf32, #tpu.memory_space<vmem>>, vector<1x32xf32>
    %c0_63 = arith.constant 0 : index
    %c0_64 = arith.constant 0 : index
    %145 = vector.load %arg17[%c0_63, %c0_64] : memref<1x32xf32, #tpu.memory_space<vmem>>, vector<1x32xf32>
    %cst_65 = arith.constant dense<0.000000e+00> : vector<64xf32>
    %146 = vector.multi_reduction <add>, %143, %cst_65 [1] : vector<64x32xf32> to vector<64xf32>
    %147 = vector.shape_cast %146 : vector<64xf32> to vector<64x1xf32>
    %cst_66 = arith.constant 3.200000e+01 : f32
    %148 = vector.broadcast %cst_66 : f32 to vector<64x1xf32>
    %149 = arith.divf %147, %148 : vector<64x1xf32>
    %150 = vector.broadcast %149 : vector<64x1xf32> to vector<64x32xf32>
    %151 = arith.subf %143, %150 : vector<64x32xf32>
    %152 = arith.mulf %151, %151 : vector<64x32xf32>
    %cst_67 = arith.constant dense<0.000000e+00> : vector<64xf32>
    %153 = vector.multi_reduction <add>, %152, %cst_67 [1] : vector<64x32xf32> to vector<64xf32>
    %154 = vector.shape_cast %153 : vector<64xf32> to vector<64x1xf32>
    %cst_68 = arith.constant 3.200000e+01 : f32
    %155 = vector.broadcast %cst_68 : f32 to vector<64x1xf32>
    %156 = arith.divf %154, %155 : vector<64x1xf32>
    %157 = vector.broadcast %149 : vector<64x1xf32> to vector<64x32xf32>
    %158 = arith.subf %143, %157 : vector<64x32xf32>
    %cst_69 = arith.constant 9.99999974E-6 : f32
    %159 = vector.broadcast %cst_69 : f32 to vector<64x1xf32>
    %160 = arith.addf %156, %159 : vector<64x1xf32>
    %161 = math.rsqrt %160 : vector<64x1xf32>
    %162 = vector.broadcast %161 : vector<64x1xf32> to vector<64x32xf32>
    %163 = arith.mulf %158, %162 : vector<64x32xf32>
    %164 = vector.broadcast %144 : vector<1x32xf32> to vector<64x32xf32>
    %165 = arith.mulf %163, %164 : vector<64x32xf32>
    %166 = vector.broadcast %145 : vector<1x32xf32> to vector<64x32xf32>
    %167 = arith.addf %165, %166 : vector<64x32xf32>
    %168 = vector.shape_cast %167 : vector<64x32xf32> to vector<16x4x32xf32>
    %c0_70 = arith.constant 0 : index
    %c0_71 = arith.constant 0 : index
    %c0_72 = arith.constant 0 : index
    %169 = vector.load %arg18[%c0_70, %c0_71, %c0_72] : memref<16x4x32xf32, #tpu.memory_space<vmem>>, vector<16x4x32xf32>
    tpu.vector_store %arg18[%c0_70, %c0_71, %c0_72], %168 {strides = array<i32>} : memref<16x4x32xf32, #tpu.memory_space<vmem>>, vector<16x4x32xf32>,
    return
  }
  func.func @transform_0(%arg0: i32) -> (i32, i32, i32) {
    %c0_i32 = arith.constant 0 : i32
    %c0_i32_0 = arith.constant 0 : i32
    %c0_i32_1 = arith.constant 0 : i32
    return %arg0, %c0_i32, %c0_i32_0 : i32, i32, i32
  }
  func.func @transform_1(%arg0: i32) -> (i32, i32) {
    %c0_i32 = arith.constant 0 : i32
    %c0_i32_0 = arith.constant 0 : i32
    %c0_i32_1 = arith.constant 0 : i32
    return %c0_i32, %c0_i32_0 : i32, i32
  }
  func.func @transform_2(%arg0: i32) -> (i32, i32) {
    %c0_i32 = arith.constant 0 : i32
    %c0_i32_0 = arith.constant 0 : i32
    %c0_i32_1 = arith.constant 0 : i32
    return %c0_i32, %c0_i32_0 : i32, i32
  }
  func.func @transform_3(%arg0: i32) -> (i32, i32) {
    %c0_i32 = arith.constant 0 : i32
    %c0_i32_0 = arith.constant 0 : i32
    %c0_i32_1 = arith.constant 0 : i32
    return %c0_i32, %c0_i32_0 : i32, i32
  }
  func.func @transform_4(%arg0: i32) -> (i32, i32) {
    %c0_i32 = arith.constant 0 : i32
    %c0_i32_0 = arith.constant 0 : i32
    %c0_i32_1 = arith.constant 0 : i32
    return %c0_i32, %c0_i32_0 : i32, i32
  }
  func.func @transform_5(%arg0: i32) -> (i32, i32) {
    %c0_i32 = arith.constant 0 : i32
    %c0_i32_0 = arith.constant 0 : i32
    %c0_i32_1 = arith.constant 0 : i32
    return %c0_i32, %c0_i32_0 : i32, i32
  }
  func.func @transform_6(%arg0: i32) -> (i32, i32) {
    %c0_i32 = arith.constant 0 : i32
    %c0_i32_0 = arith.constant 0 : i32
    %c0_i32_1 = arith.constant 0 : i32
    return %c0_i32, %c0_i32_0 : i32, i32
  }
  func.func @transform_7(%arg0: i32) -> (i32, i32) {
    %c0_i32 = arith.constant 0 : i32
    %c0_i32_0 = arith.constant 0 : i32
    %c0_i32_1 = arith.constant 0 : i32
    return %c0_i32, %c0_i32_0 : i32, i32
  }
  func.func @transform_8(%arg0: i32) -> (i32, i32) {
    %c0_i32 = arith.constant 0 : i32
    %c0_i32_0 = arith.constant 0 : i32
    %c0_i32_1 = arith.constant 0 : i32
    return %c0_i32, %c0_i32_0 : i32, i32
  }
  func.func @transform_9(%arg0: i32) -> (i32, i32) {
    %c0_i32 = arith.constant 0 : i32
    %c0_i32_0 = arith.constant 0 : i32
    %c0_i32_1 = arith.constant 0 : i32
    return %c0_i32, %c0_i32_0 : i32, i32
  }
  func.func @transform_10(%arg0: i32) -> (i32, i32) {
    %c0_i32 = arith.constant 0 : i32
    %c0_i32_0 = arith.constant 0 : i32
    %c0_i32_1 = arith.constant 0 : i32
    return %c0_i32, %c0_i32_0 : i32, i32
  }
  func.func @transform_11(%arg0: i32) -> (i32, i32) {
    %c0_i32 = arith.constant 0 : i32
    %c0_i32_0 = arith.constant 0 : i32
    %c0_i32_1 = arith.constant 0 : i32
    return %c0_i32, %c0_i32_0 : i32, i32
  }
  func.func @transform_12(%arg0: i32) -> (i32, i32) {
    %c0_i32 = arith.constant 0 : i32
    %c0_i32_0 = arith.constant 0 : i32
    %c0_i32_1 = arith.constant 0 : i32
    return %c0_i32, %c0_i32_0 : i32, i32
  }
  func.func @transform_13(%arg0: i32) -> (i32, i32) {
    %c0_i32 = arith.constant 0 : i32
    %c0_i32_0 = arith.constant 0 : i32
    %c0_i32_1 = arith.constant 0 : i32
    return %c0_i32, %c0_i32_0 : i32, i32
  }
  func.func @transform_14(%arg0: i32) -> (i32, i32) {
    %c0_i32 = arith.constant 0 : i32
    %c0_i32_0 = arith.constant 0 : i32
    %c0_i32_1 = arith.constant 0 : i32
    return %c0_i32, %c0_i32_0 : i32, i32
  }
  func.func @transform_15(%arg0: i32) -> (i32, i32) {
    %c0_i32 = arith.constant 0 : i32
    %c0_i32_0 = arith.constant 0 : i32
    %c0_i32_1 = arith.constant 0 : i32
    return %c0_i32, %c0_i32_0 : i32, i32
  }
  func.func @transform_16(%arg0: i32) -> (i32, i32) {
    %c0_i32 = arith.constant 0 : i32
    %c0_i32_0 = arith.constant 0 : i32
    %c0_i32_1 = arith.constant 0 : i32
    return %c0_i32, %c0_i32_0 : i32, i32
  }
  func.func @transform_17(%arg0: i32) -> (i32, i32, i32) {
    %c0_i32 = arith.constant 0 : i32
    %c0_i32_0 = arith.constant 0 : i32
    %c0_i32_1 = arith.constant 0 : i32
    return %arg0, %c0_i32, %c0_i32_0 : i32, i32, i32
  }
}

module attributes {stable_mosaic.version = 11 : i64} {
  func.func @_encoder_block_kernel(%arg0: i32, %arg1: memref<2x32x32xf32, #tpu.memory_space<vmem>>, %arg2: memref<32x32xbf16, #tpu.memory_space<vmem>>, %arg3: memref<1x32xf32, #tpu.memory_space<vmem>>, %arg4: memref<32x32xbf16, #tpu.memory_space<vmem>>, %arg5: memref<1x32xf32, #tpu.memory_space<vmem>>, %arg6: memref<32x32xbf16, #tpu.memory_space<vmem>>, %arg7: memref<1x32xf32, #tpu.memory_space<vmem>>, %arg8: memref<32x32xbf16, #tpu.memory_space<vmem>>, %arg9: memref<1x32xf32, #tpu.memory_space<vmem>>, %arg10: memref<32x64xbf16, #tpu.memory_space<vmem>>, %arg11: memref<1x64xf32, #tpu.memory_space<vmem>>, %arg12: memref<64x32xbf16, #tpu.memory_space<vmem>>, %arg13: memref<1x32xf32, #tpu.memory_space<vmem>>, %arg14: memref<1x32xf32, #tpu.memory_space<vmem>>, %arg15: memref<1x32xf32, #tpu.memory_space<vmem>>, %arg16: memref<1x32xf32, #tpu.memory_space<vmem>>, %arg17: memref<1x32xf32, #tpu.memory_space<vmem>>, %arg18: memref<2x32x32xf32, #tpu.memory_space<vmem>>) attributes {dimension_semantics = [#tpu.dimension_semantics<parallel>], iteration_bounds = array<i64: 2>, scalar_prefetch = 0 : i64, scratch_operands = 0 : i64, tpu.core_type = #tpu.core_type<tc>, window_params = [{transform_indices = @transform_0, window_bounds = array<i64: 2, 32, 32>}, {pipeline_mode = #tpu.pipeline_mode<synchronous>, transform_indices = @transform_1, window_bounds = array<i64: 32, 32>}, {pipeline_mode = #tpu.pipeline_mode<synchronous>, transform_indices = @transform_2, window_bounds = array<i64: 1, 32>}, {pipeline_mode = #tpu.pipeline_mode<synchronous>, transform_indices = @transform_3, window_bounds = array<i64: 32, 32>}, {pipeline_mode = #tpu.pipeline_mode<synchronous>, transform_indices = @transform_4, window_bounds = array<i64: 1, 32>}, {pipeline_mode = #tpu.pipeline_mode<synchronous>, transform_indices = @transform_5, window_bounds = array<i64: 32, 32>}, {pipeline_mode = #tpu.pipeline_mode<synchronous>, transform_indices = @transform_6, window_bounds = array<i64: 1, 32>}, {pipeline_mode = #tpu.pipeline_mode<synchronous>, transform_indices = @transform_7, window_bounds = array<i64: 32, 32>}, {pipeline_mode = #tpu.pipeline_mode<synchronous>, transform_indices = @transform_8, window_bounds = array<i64: 1, 32>}, {pipeline_mode = #tpu.pipeline_mode<synchronous>, transform_indices = @transform_9, window_bounds = array<i64: 32, 64>}, {pipeline_mode = #tpu.pipeline_mode<synchronous>, transform_indices = @transform_10, window_bounds = array<i64: 1, 64>}, {pipeline_mode = #tpu.pipeline_mode<synchronous>, transform_indices = @transform_11, window_bounds = array<i64: 64, 32>}, {pipeline_mode = #tpu.pipeline_mode<synchronous>, transform_indices = @transform_12, window_bounds = array<i64: 1, 32>}, {pipeline_mode = #tpu.pipeline_mode<synchronous>, transform_indices = @transform_13, window_bounds = array<i64: 1, 32>}, {pipeline_mode = #tpu.pipeline_mode<synchronous>, transform_indices = @transform_14, window_bounds = array<i64: 1, 32>}, {pipeline_mode = #tpu.pipeline_mode<synchronous>, transform_indices = @transform_15, window_bounds = array<i64: 1, 32>}, {pipeline_mode = #tpu.pipeline_mode<synchronous>, transform_indices = @transform_16, window_bounds = array<i64: 1, 32>}, {transform_indices = @transform_17, window_bounds = array<i64: 2, 32, 32>}]} {
    %c0 = arith.constant 0 : index
    %c0_0 = arith.constant 0 : index
    %c0_1 = arith.constant 0 : index
    %0 = vector.load %arg1[%c0, %c0_0, %c0_1] : memref<2x32x32xf32, #tpu.memory_space<vmem>>, vector<2x32x32xf32>
    %1 = vector.shape_cast %0 : vector<2x32x32xf32> to vector<64x32xf32>
    %2 = arith.truncf %1 : vector<64x32xf32> to vector<64x32xbf16>
    %c0_2 = arith.constant 0 : index
    %c0_3 = arith.constant 0 : index
    %3 = vector.load %arg2[%c0_2, %c0_3] : memref<32x32xbf16, #tpu.memory_space<vmem>>, vector<32x32xbf16>
    %cst = arith.constant dense<0.000000e+00> : vector<64x32xf32>
    %4 = tpu.matmul %2, %3, %cst {dimension_numbers = #tpu.dot_dimension_numbers<[1], [0], [0], [1], [0, 0, 1, 1], [], []>} : vector<64x32xbf16>, vector<32x32xbf16>, vector<64x32xf32> -> vector<64x32xf32>
    %c0_4 = arith.constant 0 : index
    %c0_5 = arith.constant 0 : index
    %5 = vector.load %arg3[%c0_4, %c0_5] : memref<1x32xf32, #tpu.memory_space<vmem>>, vector<1x32xf32>
    %6 = vector.broadcast %5 : vector<1x32xf32> to vector<64x32xf32>
    %7 = arith.addf %4, %6 : vector<64x32xf32>
    %c0_6 = arith.constant 0 : index
    %c0_7 = arith.constant 0 : index
    %8 = vector.load %arg4[%c0_6, %c0_7] : memref<32x32xbf16, #tpu.memory_space<vmem>>, vector<32x32xbf16>
    %cst_8 = arith.constant dense<0.000000e+00> : vector<64x32xf32>
    %9 = tpu.matmul %2, %8, %cst_8 {dimension_numbers = #tpu.dot_dimension_numbers<[1], [0], [0], [1], [0, 0, 1, 1], [], []>} : vector<64x32xbf16>, vector<32x32xbf16>, vector<64x32xf32> -> vector<64x32xf32>
    %c0_9 = arith.constant 0 : index
    %c0_10 = arith.constant 0 : index
    %10 = vector.load %arg5[%c0_9, %c0_10] : memref<1x32xf32, #tpu.memory_space<vmem>>, vector<1x32xf32>
    %11 = vector.broadcast %10 : vector<1x32xf32> to vector<64x32xf32>
    %12 = arith.addf %9, %11 : vector<64x32xf32>
    %c0_11 = arith.constant 0 : index
    %c0_12 = arith.constant 0 : index
    %13 = vector.load %arg6[%c0_11, %c0_12] : memref<32x32xbf16, #tpu.memory_space<vmem>>, vector<32x32xbf16>
    %cst_13 = arith.constant dense<0.000000e+00> : vector<64x32xf32>
    %14 = tpu.matmul %2, %13, %cst_13 {dimension_numbers = #tpu.dot_dimension_numbers<[1], [0], [0], [1], [0, 0, 1, 1], [], []>} : vector<64x32xbf16>, vector<32x32xbf16>, vector<64x32xf32> -> vector<64x32xf32>
    %c0_14 = arith.constant 0 : index
    %c0_15 = arith.constant 0 : index
    %15 = vector.load %arg7[%c0_14, %c0_15] : memref<1x32xf32, #tpu.memory_space<vmem>>, vector<1x32xf32>
    %16 = vector.broadcast %15 : vector<1x32xf32> to vector<64x32xf32>
    %17 = arith.addf %14, %16 : vector<64x32xf32>
    %18 = vector.shape_cast %7 : vector<64x32xf32> to vector<2x32x32xf32>
    %19 = arith.truncf %18 : vector<2x32x32xf32> to vector<2x32x32xbf16>
    %20 = vector.shape_cast %12 : vector<64x32xf32> to vector<2x32x32xf32>
    %21 = arith.truncf %20 : vector<2x32x32xf32> to vector<2x32x32xbf16>
    %22 = vector.shape_cast %17 : vector<64x32xf32> to vector<2x32x32xf32>
    %23 = arith.truncf %22 : vector<2x32x32xf32> to vector<2x32x32xbf16>
    %24 = vector.extract_strided_slice %19 {offsets = [0, 0, 0], sizes = [2, 32, 8], strides = [1, 1, 1]} : vector<2x32x32xbf16> to vector<2x32x8xbf16>
    %25 = vector.extract_strided_slice %21 {offsets = [0, 0, 0], sizes = [2, 32, 8], strides = [1, 1, 1]} : vector<2x32x32xbf16> to vector<2x32x8xbf16>
    %26 = vector.extract_strided_slice %23 {offsets = [0, 0, 0], sizes = [2, 32, 8], strides = [1, 1, 1]} : vector<2x32x32xbf16> to vector<2x32x8xbf16>
    "tpu.trace_start"() <{level = 10 : i32, message = "nld,nmd->nlm"}> : () -> ()
    %cst_16 = arith.constant dense<0.000000e+00> : vector<2x32x32xf32>
    %27 = tpu.matmul %24, %25, %cst_16 {dimension_numbers = #tpu.dot_dimension_numbers<[2], [2], [1], [1], [0, 0, 0, 1, 1, 1], [0], [0]>} : vector<2x32x8xbf16>, vector<2x32x8xbf16>, vector<2x32x32xf32> -> vector<2x32x32xf32>
    "tpu.trace_stop"() : () -> ()
    %cst_17 = arith.constant 0.353553385 : f32
    %28 = vector.broadcast %cst_17 : f32 to vector<2x32x32xf32>
    %29 = arith.mulf %27, %28 : vector<2x32x32xf32>
    %cst_18 = arith.constant dense<0xFF800000> : vector<2x32xf32>
    %30 = vector.multi_reduction <maximumf>, %29, %cst_18 [2] : vector<2x32x32xf32> to vector<2x32xf32>
    %31 = vector.shape_cast %30 : vector<2x32xf32> to vector<2x32x1xf32>
    %32 = vector.broadcast %31 : vector<2x32x1xf32> to vector<2x32x32xf32>
    %33 = arith.subf %29, %32 : vector<2x32x32xf32>
    %34 = math.exp %33 : vector<2x32x32xf32>
    %cst_19 = arith.constant dense<0.000000e+00> : vector<2x32xf32>
    %35 = vector.multi_reduction <add>, %34, %cst_19 [2] : vector<2x32x32xf32> to vector<2x32xf32>
    %36 = vector.shape_cast %35 : vector<2x32xf32> to vector<2x32x1xf32>
    %37 = tpu.reciprocal %36 {approx = true} : vector<2x32x1xf32> -> vector<2x32x1xf32>
    %38 = vector.broadcast %37 : vector<2x32x1xf32> to vector<2x32x32xf32>
    %39 = arith.mulf %34, %38 : vector<2x32x32xf32>
    %40 = arith.truncf %39 : vector<2x32x32xf32> to vector<2x32x32xbf16>
    "tpu.trace_start"() <{level = 10 : i32, message = "nlm,nmd->nld"}> : () -> ()
    %cst_20 = arith.constant dense<0.000000e+00> : vector<2x32x8xf32>
    %41 = tpu.matmul %40, %26, %cst_20 {dimension_numbers = #tpu.dot_dimension_numbers<[2], [1], [1], [2], [0, 0, 0, 1, 1, 2], [0], [0]>} : vector<2x32x32xbf16>, vector<2x32x8xbf16>, vector<2x32x8xf32> -> vector<2x32x8xf32>
    "tpu.trace_stop"() : () -> ()
    %42 = vector.extract_strided_slice %19 {offsets = [0, 0, 8], sizes = [2, 32, 8], strides = [1, 1, 1]} : vector<2x32x32xbf16> to vector<2x32x8xbf16>
    %43 = vector.extract_strided_slice %21 {offsets = [0, 0, 8], sizes = [2, 32, 8], strides = [1, 1, 1]} : vector<2x32x32xbf16> to vector<2x32x8xbf16>
    %44 = vector.extract_strided_slice %23 {offsets = [0, 0, 8], sizes = [2, 32, 8], strides = [1, 1, 1]} : vector<2x32x32xbf16> to vector<2x32x8xbf16>
    "tpu.trace_start"() <{level = 10 : i32, message = "nld,nmd->nlm"}> : () -> ()
    %cst_21 = arith.constant dense<0.000000e+00> : vector<2x32x32xf32>
    %45 = tpu.matmul %42, %43, %cst_21 {dimension_numbers = #tpu.dot_dimension_numbers<[2], [2], [1], [1], [0, 0, 0, 1, 1, 1], [0], [0]>} : vector<2x32x8xbf16>, vector<2x32x8xbf16>, vector<2x32x32xf32> -> vector<2x32x32xf32>
    "tpu.trace_stop"() : () -> ()
    %cst_22 = arith.constant 0.353553385 : f32
    %46 = vector.broadcast %cst_22 : f32 to vector<2x32x32xf32>
    %47 = arith.mulf %45, %46 : vector<2x32x32xf32>
    %cst_23 = arith.constant dense<0xFF800000> : vector<2x32xf32>
    %48 = vector.multi_reduction <maximumf>, %47, %cst_23 [2] : vector<2x32x32xf32> to vector<2x32xf32>
    %49 = vector.shape_cast %48 : vector<2x32xf32> to vector<2x32x1xf32>
    %50 = vector.broadcast %49 : vector<2x32x1xf32> to vector<2x32x32xf32>
    %51 = arith.subf %47, %50 : vector<2x32x32xf32>
    %52 = math.exp %51 : vector<2x32x32xf32>
    %cst_24 = arith.constant dense<0.000000e+00> : vector<2x32xf32>
    %53 = vector.multi_reduction <add>, %52, %cst_24 [2] : vector<2x32x32xf32> to vector<2x32xf32>
    %54 = vector.shape_cast %53 : vector<2x32xf32> to vector<2x32x1xf32>
    %55 = tpu.reciprocal %54 {approx = true} : vector<2x32x1xf32> -> vector<2x32x1xf32>
    %56 = vector.broadcast %55 : vector<2x32x1xf32> to vector<2x32x32xf32>
    %57 = arith.mulf %52, %56 : vector<2x32x32xf32>
    %58 = arith.truncf %57 : vector<2x32x32xf32> to vector<2x32x32xbf16>
    "tpu.trace_start"() <{level = 10 : i32, message = "nlm,nmd->nld"}> : () -> ()
    %cst_25 = arith.constant dense<0.000000e+00> : vector<2x32x8xf32>
    %59 = tpu.matmul %58, %44, %cst_25 {dimension_numbers = #tpu.dot_dimension_numbers<[2], [1], [1], [2], [0, 0, 0, 1, 1, 2], [0], [0]>} : vector<2x32x32xbf16>, vector<2x32x8xbf16>, vector<2x32x8xf32> -> vector<2x32x8xf32>
    "tpu.trace_stop"() : () -> ()
    %60 = vector.extract_strided_slice %19 {offsets = [0, 0, 16], sizes = [2, 32, 8], strides = [1, 1, 1]} : vector<2x32x32xbf16> to vector<2x32x8xbf16>
    %61 = vector.extract_strided_slice %21 {offsets = [0, 0, 16], sizes = [2, 32, 8], strides = [1, 1, 1]} : vector<2x32x32xbf16> to vector<2x32x8xbf16>
    %62 = vector.extract_strided_slice %23 {offsets = [0, 0, 16], sizes = [2, 32, 8], strides = [1, 1, 1]} : vector<2x32x32xbf16> to vector<2x32x8xbf16>
    "tpu.trace_start"() <{level = 10 : i32, message = "nld,nmd->nlm"}> : () -> ()
    %cst_26 = arith.constant dense<0.000000e+00> : vector<2x32x32xf32>
    %63 = tpu.matmul %60, %61, %cst_26 {dimension_numbers = #tpu.dot_dimension_numbers<[2], [2], [1], [1], [0, 0, 0, 1, 1, 1], [0], [0]>} : vector<2x32x8xbf16>, vector<2x32x8xbf16>, vector<2x32x32xf32> -> vector<2x32x32xf32>
    "tpu.trace_stop"() : () -> ()
    %cst_27 = arith.constant 0.353553385 : f32
    %64 = vector.broadcast %cst_27 : f32 to vector<2x32x32xf32>
    %65 = arith.mulf %63, %64 : vector<2x32x32xf32>
    %cst_28 = arith.constant dense<0xFF800000> : vector<2x32xf32>
    %66 = vector.multi_reduction <maximumf>, %65, %cst_28 [2] : vector<2x32x32xf32> to vector<2x32xf32>
    %67 = vector.shape_cast %66 : vector<2x32xf32> to vector<2x32x1xf32>
    %68 = vector.broadcast %67 : vector<2x32x1xf32> to vector<2x32x32xf32>
    %69 = arith.subf %65, %68 : vector<2x32x32xf32>
    %70 = math.exp %69 : vector<2x32x32xf32>
    %cst_29 = arith.constant dense<0.000000e+00> : vector<2x32xf32>
    %71 = vector.multi_reduction <add>, %70, %cst_29 [2] : vector<2x32x32xf32> to vector<2x32xf32>
    %72 = vector.shape_cast %71 : vector<2x32xf32> to vector<2x32x1xf32>
    %73 = tpu.reciprocal %72 {approx = true} : vector<2x32x1xf32> -> vector<2x32x1xf32>
    %74 = vector.broadcast %73 : vector<2x32x1xf32> to vector<2x32x32xf32>
    %75 = arith.mulf %70, %74 : vector<2x32x32xf32>
    %76 = arith.truncf %75 : vector<2x32x32xf32> to vector<2x32x32xbf16>
    "tpu.trace_start"() <{level = 10 : i32, message = "nlm,nmd->nld"}> : () -> ()
    %cst_30 = arith.constant dense<0.000000e+00> : vector<2x32x8xf32>
    %77 = tpu.matmul %76, %62, %cst_30 {dimension_numbers = #tpu.dot_dimension_numbers<[2], [1], [1], [2], [0, 0, 0, 1, 1, 2], [0], [0]>} : vector<2x32x32xbf16>, vector<2x32x8xbf16>, vector<2x32x8xf32> -> vector<2x32x8xf32>
    "tpu.trace_stop"() : () -> ()
    %78 = vector.extract_strided_slice %19 {offsets = [0, 0, 24], sizes = [2, 32, 8], strides = [1, 1, 1]} : vector<2x32x32xbf16> to vector<2x32x8xbf16>
    %79 = vector.extract_strided_slice %21 {offsets = [0, 0, 24], sizes = [2, 32, 8], strides = [1, 1, 1]} : vector<2x32x32xbf16> to vector<2x32x8xbf16>
    %80 = vector.extract_strided_slice %23 {offsets = [0, 0, 24], sizes = [2, 32, 8], strides = [1, 1, 1]} : vector<2x32x32xbf16> to vector<2x32x8xbf16>
    "tpu.trace_start"() <{level = 10 : i32, message = "nld,nmd->nlm"}> : () -> ()
    %cst_31 = arith.constant dense<0.000000e+00> : vector<2x32x32xf32>
    %81 = tpu.matmul %78, %79, %cst_31 {dimension_numbers = #tpu.dot_dimension_numbers<[2], [2], [1], [1], [0, 0, 0, 1, 1, 1], [0], [0]>} : vector<2x32x8xbf16>, vector<2x32x8xbf16>, vector<2x32x32xf32> -> vector<2x32x32xf32>
    "tpu.trace_stop"() : () -> ()
    %cst_32 = arith.constant 0.353553385 : f32
    %82 = vector.broadcast %cst_32 : f32 to vector<2x32x32xf32>
    %83 = arith.mulf %81, %82 : vector<2x32x32xf32>
    %cst_33 = arith.constant dense<0xFF800000> : vector<2x32xf32>
    %84 = vector.multi_reduction <maximumf>, %83, %cst_33 [2] : vector<2x32x32xf32> to vector<2x32xf32>
    %85 = vector.shape_cast %84 : vector<2x32xf32> to vector<2x32x1xf32>
    %86 = vector.broadcast %85 : vector<2x32x1xf32> to vector<2x32x32xf32>
    %87 = arith.subf %83, %86 : vector<2x32x32xf32>
    %88 = math.exp %87 : vector<2x32x32xf32>
    %cst_34 = arith.constant dense<0.000000e+00> : vector<2x32xf32>
    %89 = vector.multi_reduction <add>, %88, %cst_34 [2] : vector<2x32x32xf32> to vector<2x32xf32>
    %90 = vector.shape_cast %89 : vector<2x32xf32> to vector<2x32x1xf32>
    %91 = tpu.reciprocal %90 {approx = true} : vector<2x32x1xf32> -> vector<2x32x1xf32>
    %92 = vector.broadcast %91 : vector<2x32x1xf32> to vector<2x32x32xf32>
    %93 = arith.mulf %88, %92 : vector<2x32x32xf32>
    %94 = arith.truncf %93 : vector<2x32x32xf32> to vector<2x32x32xbf16>
    "tpu.trace_start"() <{level = 10 : i32, message = "nlm,nmd->nld"}> : () -> ()
    %cst_35 = arith.constant dense<0.000000e+00> : vector<2x32x8xf32>
    %95 = tpu.matmul %94, %80, %cst_35 {dimension_numbers = #tpu.dot_dimension_numbers<[2], [1], [1], [2], [0, 0, 0, 1, 1, 2], [0], [0]>} : vector<2x32x32xbf16>, vector<2x32x8xbf16>, vector<2x32x8xf32> -> vector<2x32x8xf32>
    "tpu.trace_stop"() : () -> ()
    %96 = tpu.concatenate %41, %59, %77, %95 in 2 : vector<2x32x8xf32>, vector<2x32x8xf32>, vector<2x32x8xf32>, vector<2x32x8xf32> -> vector<2x32x32xf32>
    %97 = vector.shape_cast %96 : vector<2x32x32xf32> to vector<64x32xf32>
    %98 = arith.truncf %97 : vector<64x32xf32> to vector<64x32xbf16>
    %c0_36 = arith.constant 0 : index
    %c0_37 = arith.constant 0 : index
    %99 = vector.load %arg8[%c0_36, %c0_37] : memref<32x32xbf16, #tpu.memory_space<vmem>>, vector<32x32xbf16>
    %cst_38 = arith.constant dense<0.000000e+00> : vector<64x32xf32>
    %100 = tpu.matmul %98, %99, %cst_38 {dimension_numbers = #tpu.dot_dimension_numbers<[1], [0], [0], [1], [0, 0, 1, 1], [], []>} : vector<64x32xbf16>, vector<32x32xbf16>, vector<64x32xf32> -> vector<64x32xf32>
    %c0_39 = arith.constant 0 : index
    %c0_40 = arith.constant 0 : index
    %101 = vector.load %arg9[%c0_39, %c0_40] : memref<1x32xf32, #tpu.memory_space<vmem>>, vector<1x32xf32>
    %102 = vector.broadcast %101 : vector<1x32xf32> to vector<64x32xf32>
    %103 = arith.addf %100, %102 : vector<64x32xf32>
    %104 = arith.addf %1, %103 : vector<64x32xf32>
    %c0_41 = arith.constant 0 : index
    %c0_42 = arith.constant 0 : index
    %105 = vector.load %arg14[%c0_41, %c0_42] : memref<1x32xf32, #tpu.memory_space<vmem>>, vector<1x32xf32>
    %c0_43 = arith.constant 0 : index
    %c0_44 = arith.constant 0 : index
    %106 = vector.load %arg15[%c0_43, %c0_44] : memref<1x32xf32, #tpu.memory_space<vmem>>, vector<1x32xf32>
    %cst_45 = arith.constant dense<0.000000e+00> : vector<64xf32>
    %107 = vector.multi_reduction <add>, %104, %cst_45 [1] : vector<64x32xf32> to vector<64xf32>
    %108 = vector.shape_cast %107 : vector<64xf32> to vector<64x1xf32>
    %cst_46 = arith.constant 3.200000e+01 : f32
    %109 = vector.broadcast %cst_46 : f32 to vector<64x1xf32>
    %110 = arith.divf %108, %109 : vector<64x1xf32>
    %111 = vector.broadcast %110 : vector<64x1xf32> to vector<64x32xf32>
    %112 = arith.subf %104, %111 : vector<64x32xf32>
    %113 = arith.mulf %112, %112 : vector<64x32xf32>
    %cst_47 = arith.constant dense<0.000000e+00> : vector<64xf32>
    %114 = vector.multi_reduction <add>, %113, %cst_47 [1] : vector<64x32xf32> to vector<64xf32>
    %115 = vector.shape_cast %114 : vector<64xf32> to vector<64x1xf32>
    %cst_48 = arith.constant 3.200000e+01 : f32
    %116 = vector.broadcast %cst_48 : f32 to vector<64x1xf32>
    %117 = arith.divf %115, %116 : vector<64x1xf32>
    %118 = vector.broadcast %110 : vector<64x1xf32> to vector<64x32xf32>
    %119 = arith.subf %104, %118 : vector<64x32xf32>
    %cst_49 = arith.constant 9.99999974E-6 : f32
    %120 = vector.broadcast %cst_49 : f32 to vector<64x1xf32>
    %121 = arith.addf %117, %120 : vector<64x1xf32>
    %122 = math.rsqrt %121 : vector<64x1xf32>
    %123 = vector.broadcast %122 : vector<64x1xf32> to vector<64x32xf32>
    %124 = arith.mulf %119, %123 : vector<64x32xf32>
    %125 = vector.broadcast %105 : vector<1x32xf32> to vector<64x32xf32>
    %126 = arith.mulf %124, %125 : vector<64x32xf32>
    %127 = vector.broadcast %106 : vector<1x32xf32> to vector<64x32xf32>
    %128 = arith.addf %126, %127 : vector<64x32xf32>
    %129 = arith.truncf %128 : vector<64x32xf32> to vector<64x32xbf16>
    %c0_50 = arith.constant 0 : index
    %c0_51 = arith.constant 0 : index
    %130 = vector.load %arg10[%c0_50, %c0_51] : memref<32x64xbf16, #tpu.memory_space<vmem>>, vector<32x64xbf16>
    %cst_52 = arith.constant dense<0.000000e+00> : vector<64x64xf32>
    %131 = tpu.matmul %129, %130, %cst_52 {dimension_numbers = #tpu.dot_dimension_numbers<[1], [0], [0], [1], [0, 0, 1, 1], [], []>} : vector<64x32xbf16>, vector<32x64xbf16>, vector<64x64xf32> -> vector<64x64xf32>
    %c0_53 = arith.constant 0 : index
    %c0_54 = arith.constant 0 : index
    %132 = vector.load %arg11[%c0_53, %c0_54] : memref<1x64xf32, #tpu.memory_space<vmem>>, vector<1x64xf32>
    %133 = vector.broadcast %132 : vector<1x64xf32> to vector<64x64xf32>
    %134 = arith.addf %131, %133 : vector<64x64xf32>
    %cst_55 = arith.constant 0.000000e+00 : f32
    %135 = vector.broadcast %cst_55 : f32 to vector<64x64xf32>
    %136 = arith.maximumf %134, %135 : vector<64x64xf32>
    %137 = arith.truncf %136 : vector<64x64xf32> to vector<64x64xbf16>
    %c0_56 = arith.constant 0 : index
    %c0_57 = arith.constant 0 : index
    %138 = vector.load %arg12[%c0_56, %c0_57] : memref<64x32xbf16, #tpu.memory_space<vmem>>, vector<64x32xbf16>
    %cst_58 = arith.constant dense<0.000000e+00> : vector<64x32xf32>
    %139 = tpu.matmul %137, %138, %cst_58 {dimension_numbers = #tpu.dot_dimension_numbers<[1], [0], [0], [1], [0, 0, 1, 1], [], []>} : vector<64x64xbf16>, vector<64x32xbf16>, vector<64x32xf32> -> vector<64x32xf32>
    %c0_59 = arith.constant 0 : index
    %c0_60 = arith.constant 0 : index
    %140 = vector.load %arg13[%c0_59, %c0_60] : memref<1x32xf32, #tpu.memory_space<vmem>>, vector<1x32xf32>
    %141 = vector.broadcast %140 : vector<1x32xf32> to vector<64x32xf32>
    %142 = arith.addf %139, %141 : vector<64x32xf32>
    %143 = arith.addf %128, %142 : vector<64x32xf32>
    %c0_61 = arith.constant 0 : index
    %c0_62 = arith.constant 0 : index
    %144 = vector.load %arg16[%c0_61, %c0_62] : memref<1x32xf32, #tpu.memory_space<vmem>>, vector<1x32xf32>
    %c0_63 = arith.constant 0 : index
    %c0_64 = arith.constant 0 : index
    %145 = vector.load %arg17[%c0_63, %c0_64] : memref<1x32xf32, #tpu.memory_space<vmem>>, vector<1x32xf32>
    %cst_65 = arith.constant dense<0.000000e+00> : vector<64xf32>
    %146 = vector.multi_reduction <add>, %143, %cst_65 [1] : vector<64x32xf32> to vector<64xf32>
    %147 = vector.shape_cast %146 : vector<64xf32> to vector<64x1xf32>
    %cst_66 = arith.constant 3.200000e+01 : f32
    %148 = vector.broadcast %cst_66 : f32 to vector<64x1xf32>
    %149 = arith.divf %147, %148 : vector<64x1xf32>
    %150 = vector.broadcast %149 : vector<64x1xf32> to vector<64x32xf32>
    %151 = arith.subf %143, %150 : vector<64x32xf32>
    %152 = arith.mulf %151, %151 : vector<64x32xf32>
    %cst_67 = arith.constant dense<0.000000e+00> : vector<64xf32>
    %153 = vector.multi_reduction <add>, %152, %cst_67 [1] : vector<64x32xf32> to vector<64xf32>
    %154 = vector.shape_cast %153 : vector<64xf32> to vector<64x1xf32>
    %cst_68 = arith.constant 3.200000e+01 : f32
    %155 = vector.broadcast %cst_68 : f32 to vector<64x1xf32>
    %156 = arith.divf %154, %155 : vector<64x1xf32>
    %157 = vector.broadcast %149 : vector<64x1xf32> to vector<64x32xf32>
    %158 = arith.subf %143, %157 : vector<64x32xf32>
    %cst_69 = arith.constant 9.99999974E-6 : f32
    %159 = vector.broadcast %cst_69 : f32 to vector<64x1xf32>
    %160 = arith.addf %156, %159 : vector<64x1xf32>
    %161 = math.rsqrt %160 : vector<64x1xf32>
    %162 = vector.broadcast %161 : vector<64x1xf32> to vector<64x32xf32>
    %163 = arith.mulf %158, %162 : vector<64x32xf32>
    %164 = vector.broadcast %144 : vector<1x32xf32> to vector<64x32xf32>
    %165 = arith.mulf %163, %164 : vector<64x32xf32>
    %166 = vector.broadcast %145 : vector<1x32xf32> to vector<64x32xf32>
    %167 = arith.addf %165, %166 : vector<64x32xf32>
    %168 = vector.shape_cast %167 : vector<64x32xf32> to vector<2x32x32xf32>
    %c0_70 = arith.constant 0 : index
    %c0_71 = arith.constant 0 : index
    %c0_72 = arith.constant 0 : index
    %169 = vector.load %arg18[%c0_70, %c0_71, %c0_72] : memref<2x32x32xf32, #tpu.memory_space<vmem>>, vector<2x32x32xf32>
    tpu.vector_store %arg18[%c0_70, %c0_71, %c0_72], %168 {strides = array<i32>} : memref<2x32x32xf32, #tpu.memory_space<vmem>>, vector<2x32x32xf32>,
    return
  }
  func.func @transform_0(%arg0: i32) -> (i32, i32, i32) {
    %c0_i32 = arith.constant 0 : i32
    %c0_i32_0 = arith.constant 0 : i32
    %c0_i32_1 = arith.constant 0 : i32
    return %arg0, %c0_i32, %c0_i32_0 : i32, i32, i32
  }
  func.func @transform_1(%arg0: i32) -> (i32, i32) {
    %c0_i32 = arith.constant 0 : i32
    %c0_i32_0 = arith.constant 0 : i32
    %c0_i32_1 = arith.constant 0 : i32
    return %c0_i32, %c0_i32_0 : i32, i32
  }
  func.func @transform_2(%arg0: i32) -> (i32, i32) {
    %c0_i32 = arith.constant 0 : i32
    %c0_i32_0 = arith.constant 0 : i32
    %c0_i32_1 = arith.constant 0 : i32
    return %c0_i32, %c0_i32_0 : i32, i32
  }
  func.func @transform_3(%arg0: i32) -> (i32, i32) {
    %c0_i32 = arith.constant 0 : i32
    %c0_i32_0 = arith.constant 0 : i32
    %c0_i32_1 = arith.constant 0 : i32
    return %c0_i32, %c0_i32_0 : i32, i32
  }
  func.func @transform_4(%arg0: i32) -> (i32, i32) {
    %c0_i32 = arith.constant 0 : i32
    %c0_i32_0 = arith.constant 0 : i32
    %c0_i32_1 = arith.constant 0 : i32
    return %c0_i32, %c0_i32_0 : i32, i32
  }
  func.func @transform_5(%arg0: i32) -> (i32, i32) {
    %c0_i32 = arith.constant 0 : i32
    %c0_i32_0 = arith.constant 0 : i32
    %c0_i32_1 = arith.constant 0 : i32
    return %c0_i32, %c0_i32_0 : i32, i32
  }
  func.func @transform_6(%arg0: i32) -> (i32, i32) {
    %c0_i32 = arith.constant 0 : i32
    %c0_i32_0 = arith.constant 0 : i32
    %c0_i32_1 = arith.constant 0 : i32
    return %c0_i32, %c0_i32_0 : i32, i32
  }
  func.func @transform_7(%arg0: i32) -> (i32, i32) {
    %c0_i32 = arith.constant 0 : i32
    %c0_i32_0 = arith.constant 0 : i32
    %c0_i32_1 = arith.constant 0 : i32
    return %c0_i32, %c0_i32_0 : i32, i32
  }
  func.func @transform_8(%arg0: i32) -> (i32, i32) {
    %c0_i32 = arith.constant 0 : i32
    %c0_i32_0 = arith.constant 0 : i32
    %c0_i32_1 = arith.constant 0 : i32
    return %c0_i32, %c0_i32_0 : i32, i32
  }
  func.func @transform_9(%arg0: i32) -> (i32, i32) {
    %c0_i32 = arith.constant 0 : i32
    %c0_i32_0 = arith.constant 0 : i32
    %c0_i32_1 = arith.constant 0 : i32
    return %c0_i32, %c0_i32_0 : i32, i32
  }
  func.func @transform_10(%arg0: i32) -> (i32, i32) {
    %c0_i32 = arith.constant 0 : i32
    %c0_i32_0 = arith.constant 0 : i32
    %c0_i32_1 = arith.constant 0 : i32
    return %c0_i32, %c0_i32_0 : i32, i32
  }
  func.func @transform_11(%arg0: i32) -> (i32, i32) {
    %c0_i32 = arith.constant 0 : i32
    %c0_i32_0 = arith.constant 0 : i32
    %c0_i32_1 = arith.constant 0 : i32
    return %c0_i32, %c0_i32_0 : i32, i32
  }
  func.func @transform_12(%arg0: i32) -> (i32, i32) {
    %c0_i32 = arith.constant 0 : i32
    %c0_i32_0 = arith.constant 0 : i32
    %c0_i32_1 = arith.constant 0 : i32
    return %c0_i32, %c0_i32_0 : i32, i32
  }
  func.func @transform_13(%arg0: i32) -> (i32, i32) {
    %c0_i32 = arith.constant 0 : i32
    %c0_i32_0 = arith.constant 0 : i32
    %c0_i32_1 = arith.constant 0 : i32
    return %c0_i32, %c0_i32_0 : i32, i32
  }
  func.func @transform_14(%arg0: i32) -> (i32, i32) {
    %c0_i32 = arith.constant 0 : i32
    %c0_i32_0 = arith.constant 0 : i32
    %c0_i32_1 = arith.constant 0 : i32
    return %c0_i32, %c0_i32_0 : i32, i32
  }
  func.func @transform_15(%arg0: i32) -> (i32, i32) {
    %c0_i32 = arith.constant 0 : i32
    %c0_i32_0 = arith.constant 0 : i32
    %c0_i32_1 = arith.constant 0 : i32
    return %c0_i32, %c0_i32_0 : i32, i32
  }
  func.func @transform_16(%arg0: i32) -> (i32, i32) {
    %c0_i32 = arith.constant 0 : i32
    %c0_i32_0 = arith.constant 0 : i32
    %c0_i32_1 = arith.constant 0 : i32
    return %c0_i32, %c0_i32_0 : i32, i32
  }
  func.func @transform_17(%arg0: i32) -> (i32, i32, i32) {
    %c0_i32 = arith.constant 0 : i32
    %c0_i32_0 = arith.constant 0 : i32
    %c0_i32_1 = arith.constant 0 : i32
    return %arg0, %c0_i32, %c0_i32_0 : i32, i32, i32
  }
}

module attributes {stable_mosaic.version = 11 : i64} {
  func.func @_head_kernel(%arg0: i32, %arg1: memref<16x128xf32, #tpu.memory_space<vmem>>, %arg2: memref<16x128xf32, #tpu.memory_space<vmem>>, %arg3: memref<2xf32, #tpu.memory_space<smem>>, %arg4: memref<128x256xbf16, #tpu.memory_space<vmem>>, %arg5: memref<1x256xf32, #tpu.memory_space<vmem>>, %arg6: memref<256x256xbf16, #tpu.memory_space<vmem>>, %arg7: memref<1x256xf32, #tpu.memory_space<vmem>>, %arg8: memref<256x128xbf16, #tpu.memory_space<vmem>>, %arg9: memref<1x128xf32, #tpu.memory_space<vmem>>, %arg10: memref<1x128xf32, #tpu.memory_space<vmem>>, %arg11: memref<1x128xf32, #tpu.memory_space<vmem>>, %arg12: memref<128x128xbf16, #tpu.memory_space<vmem>>, %arg13: memref<1x128xf32, #tpu.memory_space<vmem>>, %arg14: memref<128x128xbf16, #tpu.memory_space<vmem>>, %arg15: memref<1x128xf32, #tpu.memory_space<vmem>>, %arg16: memref<16x128xf32, #tpu.memory_space<vmem>>, %arg17: memref<16x128xf32, #tpu.memory_space<vmem>>) attributes {dimension_semantics = [#tpu.dimension_semantics<parallel>], iteration_bounds = array<i64: 2>, scalar_prefetch = 0 : i64, scratch_operands = 0 : i64, tpu.core_type = #tpu.core_type<tc>, window_params = [{transform_indices = @transform_0, window_bounds = array<i64: 16, 128>}, {transform_indices = @transform_1, window_bounds = array<i64: 16, 128>}, {transform_indices = @transform_2, window_bounds = array<i64: 2>}, {pipeline_mode = #tpu.pipeline_mode<synchronous>, transform_indices = @transform_3, window_bounds = array<i64: 128, 256>}, {pipeline_mode = #tpu.pipeline_mode<synchronous>, transform_indices = @transform_4, window_bounds = array<i64: 1, 256>}, {pipeline_mode = #tpu.pipeline_mode<synchronous>, transform_indices = @transform_5, window_bounds = array<i64: 256, 256>}, {pipeline_mode = #tpu.pipeline_mode<synchronous>, transform_indices = @transform_6, window_bounds = array<i64: 1, 256>}, {pipeline_mode = #tpu.pipeline_mode<synchronous>, transform_indices = @transform_7, window_bounds = array<i64: 256, 128>}, {pipeline_mode = #tpu.pipeline_mode<synchronous>, transform_indices = @transform_8, window_bounds = array<i64: 1, 128>}, {pipeline_mode = #tpu.pipeline_mode<synchronous>, transform_indices = @transform_9, window_bounds = array<i64: 1, 128>}, {pipeline_mode = #tpu.pipeline_mode<synchronous>, transform_indices = @transform_10, window_bounds = array<i64: 1, 128>}, {pipeline_mode = #tpu.pipeline_mode<synchronous>, transform_indices = @transform_11, window_bounds = array<i64: 128, 128>}, {pipeline_mode = #tpu.pipeline_mode<synchronous>, transform_indices = @transform_12, window_bounds = array<i64: 1, 128>}, {pipeline_mode = #tpu.pipeline_mode<synchronous>, transform_indices = @transform_13, window_bounds = array<i64: 128, 128>}, {pipeline_mode = #tpu.pipeline_mode<synchronous>, transform_indices = @transform_14, window_bounds = array<i64: 1, 128>}, {transform_indices = @transform_15, window_bounds = array<i64: 16, 128>}, {transform_indices = @transform_16, window_bounds = array<i64: 16, 128>}]} {
    %c0 = arith.constant 0 : index
    %c0_0 = arith.constant 0 : index
    %0 = vector.load %arg1[%c0, %c0_0] : memref<16x128xf32, #tpu.memory_space<vmem>>, vector<16x128xf32>
    %c0_1 = arith.constant 0 : index
    %1 = memref.load %arg3[%c0_1] : memref<2xf32, #tpu.memory_space<smem>>
    %2 = vector.broadcast %1 : f32 to vector<16x128xf32>
    %3 = arith.mulf %0, %2 : vector<16x128xf32>
    %c0_2 = arith.constant 0 : index
    %c0_3 = arith.constant 0 : index
    %4 = vector.load %arg2[%c0_2, %c0_3] : memref<16x128xf32, #tpu.memory_space<vmem>>, vector<16x128xf32>
    %c1 = arith.constant 1 : index
    %5 = memref.load %arg3[%c1] : memref<2xf32, #tpu.memory_space<smem>>
    %6 = vector.broadcast %5 : f32 to vector<16x128xf32>
    %7 = arith.mulf %4, %6 : vector<16x128xf32>
    %8 = arith.addf %3, %7 : vector<16x128xf32>
    %9 = arith.truncf %8 : vector<16x128xf32> to vector<16x128xbf16>
    %c0_4 = arith.constant 0 : index
    %c0_5 = arith.constant 0 : index
    %10 = vector.load %arg4[%c0_4, %c0_5] : memref<128x256xbf16, #tpu.memory_space<vmem>>, vector<128x256xbf16>
    %cst = arith.constant dense<0.000000e+00> : vector<16x256xf32>
    %11 = tpu.matmul %9, %10, %cst {dimension_numbers = #tpu.dot_dimension_numbers<[1], [0], [0], [1], [0, 0, 1, 1], [], []>} : vector<16x128xbf16>, vector<128x256xbf16>, vector<16x256xf32> -> vector<16x256xf32>
    %c0_6 = arith.constant 0 : index
    %c0_7 = arith.constant 0 : index
    %12 = vector.load %arg5[%c0_6, %c0_7] : memref<1x256xf32, #tpu.memory_space<vmem>>, vector<1x256xf32>
    %13 = vector.broadcast %12 : vector<1x256xf32> to vector<16x256xf32>
    %14 = arith.addf %11, %13 : vector<16x256xf32>
    %15 = arith.truncf %14 : vector<16x256xf32> to vector<16x256xbf16>
    %c0_8 = arith.constant 0 : index
    %c0_9 = arith.constant 0 : index
    %16 = vector.load %arg6[%c0_8, %c0_9] : memref<256x256xbf16, #tpu.memory_space<vmem>>, vector<256x256xbf16>
    %cst_10 = arith.constant dense<0.000000e+00> : vector<16x256xf32>
    %17 = tpu.matmul %15, %16, %cst_10 {dimension_numbers = #tpu.dot_dimension_numbers<[1], [0], [0], [1], [0, 0, 1, 1], [], []>} : vector<16x256xbf16>, vector<256x256xbf16>, vector<16x256xf32> -> vector<16x256xf32>
    %c0_11 = arith.constant 0 : index
    %c0_12 = arith.constant 0 : index
    %18 = vector.load %arg7[%c0_11, %c0_12] : memref<1x256xf32, #tpu.memory_space<vmem>>, vector<1x256xf32>
    %19 = vector.broadcast %18 : vector<1x256xf32> to vector<16x256xf32>
    %20 = arith.addf %17, %19 : vector<16x256xf32>
    %cst_13 = arith.constant 0.000000e+00 : f32
    %21 = vector.broadcast %cst_13 : f32 to vector<16x256xf32>
    %22 = arith.cmpf oge, %20, %21 : vector<16x256xf32>
    %cst_14 = arith.constant 3.000000e-01 : f32
    %23 = vector.broadcast %cst_14 : f32 to vector<16x256xf32>
    %24 = arith.mulf %23, %20 : vector<16x256xf32>
    %25 = arith.select %22, %20, %24 : vector<16x256xi1>, vector<16x256xf32>
    %26 = arith.truncf %25 : vector<16x256xf32> to vector<16x256xbf16>
    %c0_15 = arith.constant 0 : index
    %c0_16 = arith.constant 0 : index
    %27 = vector.load %arg8[%c0_15, %c0_16] : memref<256x128xbf16, #tpu.memory_space<vmem>>, vector<256x128xbf16>
    %cst_17 = arith.constant dense<0.000000e+00> : vector<16x128xf32>
    %28 = tpu.matmul %26, %27, %cst_17 {dimension_numbers = #tpu.dot_dimension_numbers<[1], [0], [0], [1], [0, 0, 1, 1], [], []>} : vector<16x256xbf16>, vector<256x128xbf16>, vector<16x128xf32> -> vector<16x128xf32>
    %c0_18 = arith.constant 0 : index
    %c0_19 = arith.constant 0 : index
    %29 = vector.load %arg9[%c0_18, %c0_19] : memref<1x128xf32, #tpu.memory_space<vmem>>, vector<1x128xf32>
    %30 = vector.broadcast %29 : vector<1x128xf32> to vector<16x128xf32>
    %31 = arith.addf %28, %30 : vector<16x128xf32>
    %cst_20 = arith.constant 0.000000e+00 : f32
    %32 = vector.broadcast %cst_20 : f32 to vector<16x128xf32>
    %33 = arith.cmpf oge, %31, %32 : vector<16x128xf32>
    %cst_21 = arith.constant 3.000000e-01 : f32
    %34 = vector.broadcast %cst_21 : f32 to vector<16x128xf32>
    %35 = arith.mulf %34, %31 : vector<16x128xf32>
    %36 = arith.select %33, %31, %35 : vector<16x128xi1>, vector<16x128xf32>
    %c0_22 = arith.constant 0 : index
    %c0_23 = arith.constant 0 : index
    %37 = vector.load %arg10[%c0_22, %c0_23] : memref<1x128xf32, #tpu.memory_space<vmem>>, vector<1x128xf32>
    %c0_24 = arith.constant 0 : index
    %c0_25 = arith.constant 0 : index
    %38 = vector.load %arg11[%c0_24, %c0_25] : memref<1x128xf32, #tpu.memory_space<vmem>>, vector<1x128xf32>
    %cst_26 = arith.constant dense<0.000000e+00> : vector<16xf32>
    %39 = vector.multi_reduction <add>, %36, %cst_26 [1] : vector<16x128xf32> to vector<16xf32>
    %40 = vector.shape_cast %39 : vector<16xf32> to vector<16x1xf32>
    %cst_27 = arith.constant 1.280000e+02 : f32
    %41 = vector.broadcast %cst_27 : f32 to vector<16x1xf32>
    %42 = arith.divf %40, %41 : vector<16x1xf32>
    %43 = vector.broadcast %42 : vector<16x1xf32> to vector<16x128xf32>
    %44 = arith.subf %36, %43 : vector<16x128xf32>
    %45 = arith.mulf %44, %44 : vector<16x128xf32>
    %cst_28 = arith.constant dense<0.000000e+00> : vector<16xf32>
    %46 = vector.multi_reduction <add>, %45, %cst_28 [1] : vector<16x128xf32> to vector<16xf32>
    %47 = vector.shape_cast %46 : vector<16xf32> to vector<16x1xf32>
    %cst_29 = arith.constant 1.280000e+02 : f32
    %48 = vector.broadcast %cst_29 : f32 to vector<16x1xf32>
    %49 = arith.divf %47, %48 : vector<16x1xf32>
    %50 = vector.broadcast %42 : vector<16x1xf32> to vector<16x128xf32>
    %51 = arith.subf %36, %50 : vector<16x128xf32>
    %cst_30 = arith.constant 9.99999974E-6 : f32
    %52 = vector.broadcast %cst_30 : f32 to vector<16x1xf32>
    %53 = arith.addf %49, %52 : vector<16x1xf32>
    %54 = math.rsqrt %53 : vector<16x1xf32>
    %55 = vector.broadcast %54 : vector<16x1xf32> to vector<16x128xf32>
    %56 = arith.mulf %51, %55 : vector<16x128xf32>
    %57 = vector.broadcast %37 : vector<1x128xf32> to vector<16x128xf32>
    %58 = arith.mulf %56, %57 : vector<16x128xf32>
    %59 = vector.broadcast %38 : vector<1x128xf32> to vector<16x128xf32>
    %60 = arith.addf %58, %59 : vector<16x128xf32>
    %61 = arith.truncf %60 : vector<16x128xf32> to vector<16x128xbf16>
    %c0_31 = arith.constant 0 : index
    %c0_32 = arith.constant 0 : index
    %62 = vector.load %arg12[%c0_31, %c0_32] : memref<128x128xbf16, #tpu.memory_space<vmem>>, vector<128x128xbf16>
    %cst_33 = arith.constant dense<0.000000e+00> : vector<16x128xf32>
    %63 = tpu.matmul %61, %62, %cst_33 {dimension_numbers = #tpu.dot_dimension_numbers<[1], [0], [0], [1], [0, 0, 1, 1], [], []>} : vector<16x128xbf16>, vector<128x128xbf16>, vector<16x128xf32> -> vector<16x128xf32>
    %c0_34 = arith.constant 0 : index
    %c0_35 = arith.constant 0 : index
    %64 = vector.load %arg13[%c0_34, %c0_35] : memref<1x128xf32, #tpu.memory_space<vmem>>, vector<1x128xf32>
    %65 = vector.broadcast %64 : vector<1x128xf32> to vector<16x128xf32>
    %66 = arith.addf %63, %65 : vector<16x128xf32>
    %c0_36 = arith.constant 0 : index
    %c0_37 = arith.constant 0 : index
    %67 = vector.load %arg16[%c0_36, %c0_37] : memref<16x128xf32, #tpu.memory_space<vmem>>, vector<16x128xf32>
    tpu.vector_store %arg16[%c0_36, %c0_37], %66 {strides = array<i32>} : memref<16x128xf32, #tpu.memory_space<vmem>>, vector<16x128xf32>,
    %c0_38 = arith.constant 0 : index
    %c0_39 = arith.constant 0 : index
    %68 = vector.load %arg14[%c0_38, %c0_39] : memref<128x128xbf16, #tpu.memory_space<vmem>>, vector<128x128xbf16>
    %cst_40 = arith.constant dense<0.000000e+00> : vector<16x128xf32>
    %69 = tpu.matmul %61, %68, %cst_40 {dimension_numbers = #tpu.dot_dimension_numbers<[1], [0], [0], [1], [0, 0, 1, 1], [], []>} : vector<16x128xbf16>, vector<128x128xbf16>, vector<16x128xf32> -> vector<16x128xf32>
    %c0_41 = arith.constant 0 : index
    %c0_42 = arith.constant 0 : index
    %70 = vector.load %arg15[%c0_41, %c0_42] : memref<1x128xf32, #tpu.memory_space<vmem>>, vector<1x128xf32>
    %71 = vector.broadcast %70 : vector<1x128xf32> to vector<16x128xf32>
    %72 = arith.addf %69, %71 : vector<16x128xf32>
    %c0_43 = arith.constant 0 : index
    %c0_44 = arith.constant 0 : index
    %73 = vector.load %arg17[%c0_43, %c0_44] : memref<16x128xf32, #tpu.memory_space<vmem>>, vector<16x128xf32>
    tpu.vector_store %arg17[%c0_43, %c0_44], %72 {strides = array<i32>} : memref<16x128xf32, #tpu.memory_space<vmem>>, vector<16x128xf32>,
    return
  }
  func.func @transform_0(%arg0: i32) -> (i32, i32) {
    %c0_i32 = arith.constant 0 : i32
    %c0_i32_0 = arith.constant 0 : i32
    return %arg0, %c0_i32 : i32, i32
  }
  func.func @transform_1(%arg0: i32) -> (i32, i32) {
    %c0_i32 = arith.constant 0 : i32
    %c0_i32_0 = arith.constant 0 : i32
    return %arg0, %c0_i32 : i32, i32
  }
  func.func @transform_2(%arg0: i32) -> i32 {
    %c0_i32 = arith.constant 0 : i32
    %c0_i32_0 = arith.constant 0 : i32
    return %c0_i32 : i32
  }
  func.func @transform_3(%arg0: i32) -> (i32, i32) {
    %c0_i32 = arith.constant 0 : i32
    %c0_i32_0 = arith.constant 0 : i32
    %c0_i32_1 = arith.constant 0 : i32
    return %c0_i32, %c0_i32_0 : i32, i32
  }
  func.func @transform_4(%arg0: i32) -> (i32, i32) {
    %c0_i32 = arith.constant 0 : i32
    %c0_i32_0 = arith.constant 0 : i32
    %c0_i32_1 = arith.constant 0 : i32
    return %c0_i32, %c0_i32_0 : i32, i32
  }
  func.func @transform_5(%arg0: i32) -> (i32, i32) {
    %c0_i32 = arith.constant 0 : i32
    %c0_i32_0 = arith.constant 0 : i32
    %c0_i32_1 = arith.constant 0 : i32
    return %c0_i32, %c0_i32_0 : i32, i32
  }
  func.func @transform_6(%arg0: i32) -> (i32, i32) {
    %c0_i32 = arith.constant 0 : i32
    %c0_i32_0 = arith.constant 0 : i32
    %c0_i32_1 = arith.constant 0 : i32
    return %c0_i32, %c0_i32_0 : i32, i32
  }
  func.func @transform_7(%arg0: i32) -> (i32, i32) {
    %c0_i32 = arith.constant 0 : i32
    %c0_i32_0 = arith.constant 0 : i32
    %c0_i32_1 = arith.constant 0 : i32
    return %c0_i32, %c0_i32_0 : i32, i32
  }
  func.func @transform_8(%arg0: i32) -> (i32, i32) {
    %c0_i32 = arith.constant 0 : i32
    %c0_i32_0 = arith.constant 0 : i32
    %c0_i32_1 = arith.constant 0 : i32
    return %c0_i32, %c0_i32_0 : i32, i32
  }
  func.func @transform_9(%arg0: i32) -> (i32, i32) {
    %c0_i32 = arith.constant 0 : i32
    %c0_i32_0 = arith.constant 0 : i32
    %c0_i32_1 = arith.constant 0 : i32
    return %c0_i32, %c0_i32_0 : i32, i32
  }
  func.func @transform_10(%arg0: i32) -> (i32, i32) {
    %c0_i32 = arith.constant 0 : i32
    %c0_i32_0 = arith.constant 0 : i32
    %c0_i32_1 = arith.constant 0 : i32
    return %c0_i32, %c0_i32_0 : i32, i32
  }
  func.func @transform_11(%arg0: i32) -> (i32, i32) {
    %c0_i32 = arith.constant 0 : i32
    %c0_i32_0 = arith.constant 0 : i32
    %c0_i32_1 = arith.constant 0 : i32
    return %c0_i32, %c0_i32_0 : i32, i32
  }
  func.func @transform_12(%arg0: i32) -> (i32, i32) {
    %c0_i32 = arith.constant 0 : i32
    %c0_i32_0 = arith.constant 0 : i32
    %c0_i32_1 = arith.constant 0 : i32
    return %c0_i32, %c0_i32_0 : i32, i32
  }
  func.func @transform_13(%arg0: i32) -> (i32, i32) {
    %c0_i32 = arith.constant 0 : i32
    %c0_i32_0 = arith.constant 0 : i32
    %c0_i32_1 = arith.constant 0 : i32
    return %c0_i32, %c0_i32_0 : i32, i32
  }
  func.func @transform_14(%arg0: i32) -> (i32, i32) {
    %c0_i32 = arith.constant 0 : i32
    %c0_i32_0 = arith.constant 0 : i32
    %c0_i32_1 = arith.constant 0 : i32
    return %c0_i32, %c0_i32_0 : i32, i32
  }
  func.func @transform_15(%arg0: i32) -> (i32, i32) {
    %c0_i32 = arith.constant 0 : i32
    %c0_i32_0 = arith.constant 0 : i32
    return %arg0, %c0_i32 : i32, i32
  }
  func.func @transform_16(%arg0: i32) -> (i32, i32) {
    %c0_i32 = arith.constant 0 : i32
    %c0_i32_0 = arith.constant 0 : i32
    return %arg0, %c0_i32 : i32, i32
  }
}

</mosaic_0001>

<bundles_post_ra>
// kernel: mgfn_forward.9
= control target key start
LH: loop header
LB: loop body
LE: loop exit
PB: predicated region body
PF: predicated region fallthrough
CT: control target
= control target key end

     0   :  { %s2600_s0 = inlined_call_operand.vmem [shape: f32[32,128], index: 0, kind: input, shape index: {}]   ;;  %s2601_s1 = inlined_call_operand.vmem [shape: f32[32,128], index: 1, kind: input, shape index: {}]   ;;  %s2602_s2 = inlined_call_operand.vmem [shape: f32[2], index: 2, kind: input, shape index: {}]   ;;  %s2603_s3 = inlined_call_operand.vmem [shape: bf16[128,256], index: 3, kind: input, shape index: {}]   ;;  %s2604_s4 = inlined_call_operand.vmem [shape: f32[1,256], index: 4, kind: input, shape index: {}]   ;;  %s2605_s5 = inlined_call_operand.vmem [shape: bf16[256,256], index: 5, kind: input, shape index: {}]   ;;  %s2606_s6 = inlined_call_operand.vmem [shape: f32[1,256], index: 6, kind: input, shape index: {}]   ;;  %s2607_s7 = inlined_call_operand.vmem [shape: bf16[256,128], index: 7, kind: input, shape index: {}]   ;;  %s2608_s8 = inlined_call_operand.vmem [shape: f32[1,128], index: 8, kind: input, shape index: {}]   ;;  %s2609_s9 = inlined_call_operand.vmem [shape: f32[1,128], index: 9, kind: input, shape index: {}]   ;;  %s2610_s10 = inlined_call_operand.vmem [shape: f32[1,128], index: 10, kind: input, shape index: {}]   ;;  %s2611_s11 = inlined_call_operand.vmem [shape: bf16[128,128], index: 11, kind: input, shape index: {}]   ;;  %s2612_s12 = inlined_call_operand.vmem [shape: f32[1,128], index: 12, kind: input, shape index: {}]   ;;  %s2613_s13 = inlined_call_operand.vmem [shape: bf16[128,128], index: 13, kind: input, shape index: {}]   ;;  %s2614_s14 = inlined_call_operand.vmem [shape: f32[1,128], index: 14, kind: input, shape index: {}]   ;;  %s2615_s15 = inlined_call_operand.hbm [shape: f32[32,128], index: 15, kind: output, shape index: {0}]   ;;  %s2616_s16 = inlined_call_operand.hbm [shape: f32[32,128], index: 16, kind: output, shape index: {1}]  }
   0x1   :  { %2625 = sst [smem:[#allocation17_spill]] %s2600_s0 }
   0x2   :  { %2626 = sst [smem:[#allocation18_spill]] %s2601_s1 }
   0x3   :  { %2627 = sst [smem:[#allocation19_spill]] %s2602_s2 }
   0x4   :  { %2628 = sst [smem:[#allocation20_spill]] %s2603_s3 }
   0x5   :  { %2629 = sst [smem:[#allocation21_spill]] %s2615_s15 }
   0x6   :  { %2630 = sst [smem:[#allocation22_spill]] %s2616_s16 }
   0x7   :  { %22 = vsyncpa [#allocation4], 0 }
   0x8   :  { %23 = vsyncpa [#allocation3], 0 }
   0x9   :  { %25 = vsyncpa [#allocation3 + $0x1], 0 }
   0xa   :  { %26 = vsyncpa [#allocation7], 0 }
   0xb   :  { %28 = vsyncpa [#allocation7 + $0x1], 0  ;;  %s2170_s21 = smov 0   ;;  %s2172_s22 = smov 0  }
   0xc   :  { %s2174_s23 = smov 0   ;;  %s2176_s24 = smov 0  }
   0xd LB: > { %2631 = sst [smem:[#allocation11_spill]] %s2063_s21  ;;  %s2191_s25 = sadd.s32 4294967295, %s2075_s24   ;;  %s2075_s24 = sphi %s2176_s24, %s2649_s24   ;;  %s2071_s23 = sphi %s2174_s23, %s2651_s23   ;;  %s2067_s22 = sphi %s2172_s22, %s2653_s22   ;;  %s2063_s21 = sphi %s2170_s21, %s2652_s21  }
   0xe   : > { %2632 = sst [smem:[#allocation12_spill]] %s2071_s23  ;;  %s1606_s26 = sadd.s32 4294967294, %s2075_s24  }
   0xf   : > { %2633 = sst [smem:[#allocation13_spill]] %s2075_s24  ;;  %s2195_s27 = sadd.s32 1, %s2075_s24  }
  0x10   : > { %2634 = sst [smem:[#allocation14_spill]] %s2195_s27  ;;  %s366_s28 = sadd.s32 1, %s2071_s23 }
  0x11   : > { %s363_s29 = ssub.s32 %s2075_s24, %s2195_s27  ;;  %p376_p0 = scmp.ne.s32.totalorder %s2071_s23, %s2067_s22 }
  0x12   : > { %p364_p1 = scmp.eq.s32.totalorder %s363_s29, 0  ;;  %p377_p2 = scmp.eq.s32.totalorder %s2191_s25, 1 }
  0x13   : > { %p382_p3 = scmp.ne.s32.totalorder %s2067_s22, %s2063_s21  ;;  %p383_p4 = scmp.eq.s32.totalorder %s1606_s26, 1 }
  0x14   : > { %s2206_s30 = scalar_select %p364_p1, %s2071_s23, %s366_s28  }
  0x15   : > { %p2208_p5 = por %p377_p2, %p376_p0  ;;  %p2212_p6 = por %p383_p4, %p382_p3 }
  0x16   : > { %2635 = sst [smem:[#allocation15_spill]] %s2206_s30  ;;  %p1607_p7 = scmp.ge.s32.totalorder %s2075_s24, 1 }
  0x17   : > { %s2637_s17 = scalar_select %p2212_p6, 1, 0 }
  0x18   : > { %p416_p8 = scmp.lt.s32.totalorder %s2075_s24, 3  ;;  %p1813_p9 = scmp.eq.s32.totalorder %s2191_s25, 0 }
  0x19   : > { %2638 = sst [smem:[#allocation16_spill]] %s2637_s17  ;;  %s2640_s2 = sld [smem:[#allocation19_spill]] }
  0x1a   : > { %p2219_p10 = pnand %p1607_p7, %p416_p8 }
  0x1c   : > { %p1802_p11 = pneg %p2219_p10 }
  0x1e   : > { %p1803_p12 = pnand %p1813_p9, %p1802_p11 }
  0x1f   : > { %s429_s26 = sshll.u32 %s2640_s2, 4  ;;  %s430_s26 = int_to_ptr.vmem [resolvable:$true] %s429_s26 }
  0x20   : > { %s1962_s28 = scalar_lea.vmem %s430_s26, 16  ;;  %p1964_p0 = pneg %p1803_p12 }
  0x21   : > { %p1963_p13 = scmp.ne.s32.totalorder %s430_s26, %s1962_s28  ;;  %p1970_p3 = scmp.lt.s32.totalorder %s430_s26, %s430_s26 }
  0x22   : > { %p1971_p4 = scmp.lt.s32.totalorder %s1962_s28, %s1962_s28 }
  0x23   : > { %p1965_p1 = pnand %p1964_p0, %p1963_p13 }
  0x24   : > { %p1972_p7 = por %p1971_p4, %p1970_p3 }
  0x25   : > { %p1966_p2 = pneg %p1965_p1 }
  0x27   : > { %p1973_p8 = pnand %p1972_p7, %p1966_p2 }
  0x29   : > { %1976 = shalt.err (!%p1973_p8)
}
  0x2a   : > { %s2077_s29 = smov [#allocation2]   ;;  %496 = sbr.rel (%p2219_p10) target bundleno = 1325 (0x52d), region = 80 }
  0x2b   : > { %1805 = dma.vmem_to_smem (!%p1803_p12), %s430_s26, 16, %s2077_s29, [#allocation4]  }
  0x31   : > { %2050 = dma.done.wait (%p1813_p9), [#allocation4], 16  }
  0x32   : > { %2052 = vsyncadd (%p1813_p9), [#allocation4], 4294967280 }
  0x33   : > { %502 = sfence }
  0x34   : > { %s2641_s3 = sld [smem:[#allocation20_spill]]  ;;  %s1614_s28 = sshll.u32 %s2191_s25, 1  ;;  %v2078_v2 = vmov 0   ;;  %v1878_v10 = vld [vmem:[%s2605_s5 + $0x4] ss:$8 sps:$4 sm:$0xff]   ;;  %vm2080_vm6 = vmmov 0  }
  0x35   : > { %727 = vmatprep.mubr.bf16.mxu0 %v2078_v2  ;;  %p558_p9 = scmp.lt.s32.totalorder %s1614_s28, 3  ;;  %s2261_s29 = sld [smem:[#allocation2]]  ;;  %v1880_v11 = vld [vmem:[%s2605_s5] ss:$8 sps:$4 sm:$0xff]   ;;  %944 = vmatprep.subr.bf16.mxu1 %v1878_v10  ;;  %v1881_v13 = vld [vmem:[%s2605_s5 + $0x14] ss:$8 sps:$4 sm:$0xff]  }
  0x36   : > { %s2266_s2 = sld [smem:[#allocation2 + $0x1]]  ;;  %s2642_s19 = sld [smem:[#allocation17_spill]]  ;;  %945 = vmatpush1.bf16.msra.mxu1 %v1880_v11  ;;  %v1883_v15 = vld [vmem:[%s2605_s5 + $0x10] ss:$8 sps:$4 sm:$0xff]   ;;  %v1884_v16 = vld [vmem:[%s2605_s5 + $0x24] ss:$8 sps:$4 sm:$0xff]  }
  0x37   : > { %s2655_s28 = smov (!%p558_p9, %s1614_s28), 3  ;;  %s2643_s1 = sld [smem:[#allocation18_spill]]  ;;  %946 = vmatprep.subr.bf16.mxu1 %v1881_v13  ;;  %v1886_v25 = vld [vmem:[%s2605_s5 + $0x20] ss:$8 sps:$4 sm:$0xff]   ;;  %v1887_v26 = vld [vmem:[%s2605_s5 + $0x34] ss:$8 sps:$4 sm:$0xff]  }
  0x38   : > { %s1615_s17 = sshll.u32 %s2655_s28, 3  ;;  %v1889_v33 = vld [vmem:[%s2605_s5 + $0x30] ss:$8 sps:$4 sm:$0xff]   ;;  %v1890_v34 = vld [vmem:[%s2605_s5 + $0x44] ss:$8 sps:$4 sm:$0xff]   ;;  %s2505_s30 = sand.u32 1, %s2067_s22  }
  0x39   : > { %v1892_v38 = vld [vmem:[%s2605_s5 + $0x40] ss:$8 sps:$4 sm:$0xff]   ;;  %v1893_v39 = vld [vmem:[%s2605_s5 + $0x54] ss:$8 sps:$4 sm:$0xff]   ;;  %v1895_v41 = vld [vmem:[%s2605_s5 + $0x50] ss:$8 sps:$4 sm:$0xff]  }
  0x3a   : > { %v1854_v0 = vld [vmem:[%s2641_s3 + $0x4] ss:$8 sps:$4 sm:$0xff]   ;;  %v1856_v1 = vld [vmem:[%s2641_s3] ss:$8 sps:$4 sm:$0xff]   ;;  %v1857_v3 = vld [vmem:[%s2641_s3 + $0x14] ss:$8 sps:$4 sm:$0xff]   ;;  %947 = vmatpush1.bf16.msra.mxu1 %v1883_v15 }
  0x3b   : > { %695 = vmatprep.subr.bf16.mxu0 %v1854_v0  ;;  %v1859_v4 = vld [vmem:[%s2641_s3 + $0x10] ss:$8 sps:$4 sm:$0xff]   ;;  %v1860_v5 = vld [vmem:[%s2641_s3 + $0x24] ss:$8 sps:$4 sm:$0xff]   ;;  %v1862_v6 = vld [vmem:[%s2641_s3 + $0x20] ss:$8 sps:$4 sm:$0xff]   ;;  %v575_v21 = vstv %s2261_s29  ;;  %948 = vmatprep.subr.bf16.mxu1 %v1884_v16 }
  0x3c   : > { %696 = vmatpush1.bf16.msra.mxu0 %v1856_v1  ;;  %v1863_v7 = vld [vmem:[%s2641_s3 + $0x34] ss:$8 sps:$4 sm:$0xff]   ;;  %v1865_v8 = vld [vmem:[%s2641_s3 + $0x30] ss:$8 sps:$4 sm:$0xff]   ;;  %v1866_v9 = vld [vmem:[%s2641_s3 + $0x44] ss:$8 sps:$4 sm:$0xff]   ;;  %s561_s28 = scalar_lea.vmem %s2642_s19, %s1615_s17  ;;  %v581_v24 = vstv %s2266_s2 }
  0x3d   : > { %697 = vmatprep.subr.bf16.mxu0 %v1857_v3  ;;  %v1868_v12 = vld [vmem:[%s2641_s3 + $0x40] ss:$8 sps:$4 sm:$0xff]   ;;  %v1869_v14 = vld [vmem:[%s2641_s3 + $0x54] ss:$8 sps:$4 sm:$0xff]   ;;  %s567_s27 = scalar_lea.vmem %s2643_s1, %s1615_s17  ;;  %v1871_v17 = vld [vmem:[%s2641_s3 + $0x50] ss:$8 sps:$4 sm:$0xff]  }
  0x3e   : > { %v572_v18 = vld [vmem:[%s561_s28] sm:$0xff]  ;;  %v573_v20 = vld [vmem:[%s561_s28 + $0x8] sm:$0xff]  ;;  %v1875_v32 = vld [vmem:[%s2641_s3 + $0x74] ss:$8 sps:$4 sm:$0xff]   ;;  %949 = vmatpush1.bf16.msra.mxu1 %v1886_v25  ;;  %s1612_s17 = sshll.u32 %s2505_s30, 4  ;;  %s1712_s2 = sshll.u32 %s2191_s25, 8 }
  0x3f   : > { %v1872_v19 = vld [vmem:[%s2641_s3 + $0x64] ss:$8 sps:$4 sm:$0xff]   ;;  %v1874_v27 = vld [vmem:[%s2641_s3 + $0x60] ss:$8 sps:$4 sm:$0xff]   ;;  %v576_v28 = vmul.f32 %v575_v21, %v572_v18  ;;  %v577_v29 = vmul.f32 %v575_v21, %v573_v20  ;;  %950 = vmatprep.subr.bf16.mxu1 %v1887_v26  ;;  %v1877_v37 = vld [vmem:[%s2641_s3 + $0x70] ss:$8 sps:$4 sm:$0xff]  }
  0x40   : > { %698 = vmatpush1.bf16.msra.mxu0 %v1859_v4  ;;  %v578_v22 = vld [vmem:[%s567_s27] sm:$0xff]  ;;  %v579_v23 = vld [vmem:[%s567_s27 + $0x8] sm:$0xff]  ;;  %v1899_v44 = vld [vmem:[%s2605_s5 + $0x74] ss:$8 sps:$4 sm:$0xff]   ;;  %s549_s24 = scalar_lea.vmem [#allocation5], %s1612_s17  ;;  %s556_s28 = scalar_lea.vmem [#allocation6], %s1612_s17 }
  0x41   : > { %699 = vmatprep.subr.bf16.mxu0 %v1860_v5  ;;  %v582_v30 = vmul.f32 %v581_v24, %v578_v22  ;;  %v583_v31 = vmul.f32 %v581_v24, %v579_v23  ;;  %v1896_v42 = vld [vmem:[%s2605_s5 + $0x64] ss:$8 sps:$4 sm:$0xff]   ;;  %v1898_v43 = vld [vmem:[%s2605_s5 + $0x60] ss:$8 sps:$4 sm:$0xff]   ;;  %v1901_v45 = vld [vmem:[%s2605_s5 + $0x70] ss:$8 sps:$4 sm:$0xff]  }
  0x42   : > { %951 = vmatpush1.bf16.msra.mxu1 %v1889_v33  ;;  %v1902_v46 = vld [vmem:[%s2605_s5 + $0x84] ss:$8 sps:$4 sm:$0xff]   ;;  %v1904_v47 = vld [vmem:[%s2605_s5 + $0x80] ss:$8 sps:$4 sm:$0xff]   ;;  %v1905_v48 = vld [vmem:[%s2605_s5 + $0x94] ss:$8 sps:$4 sm:$0xff]  }
  0x43   : > { %v584_v35 = vadd.f32 %v582_v30, %v576_v28  ;;  %v585_v36 = vadd.f32 %v583_v31, %v577_v29  ;;  %952 = vmatprep.subr.bf16.mxu1 %v1890_v34  ;;  %v1907_v49 = vld [vmem:[%s2605_s5 + $0x90] ss:$8 sps:$4 sm:$0xff]   ;;  %v1908_v50 = vld [vmem:[%s2605_s5 + $0xa4] ss:$8 sps:$4 sm:$0xff]   ;;  %v1910_v51 = vld [vmem:[%s2605_s5 + $0xa0] ss:$8 sps:$4 sm:$0xff]  }
  0x44   : > { %700 = vmatpush1.bf16.msra.mxu0 %v1862_v6  ;;  %v1911_v52 = vld [vmem:[%s2605_s5 + $0xb4] ss:$8 sps:$4 sm:$0xff]   ;;  %v1913_v53 = vld [vmem:[%s2605_s5 + $0xb0] ss:$8 sps:$4 sm:$0xff]   ;;  %v1914_v54 = vld [vmem:[%s2605_s5 + $0xc4] ss:$8 sps:$4 sm:$0xff]  }
  0x45   : > { %701 = vmatprep.subr.bf16.mxu0 %v1863_v7  ;;  %v586_v40 = vpack.c.bf16 %v585_v36, %v584_v35  ;;  %v1916_v55 = vld [vmem:[%s2605_s5 + $0xc0] ss:$8 sps:$4 sm:$0xff]   ;;  %v1917_v56 = vld [vmem:[%s2605_s5 + $0xd4] ss:$8 sps:$4 sm:$0xff]   ;;  %v1919_v57 = vld [vmem:[%s2605_s5 + $0xd0] ss:$8 sps:$4 sm:$0xff]  }
  0x46   : > { %953 = vmatpush1.bf16.msra.mxu1 %v1892_v38  ;;  %v1920_v58 = vld [vmem:[%s2605_s5 + $0xe4] ss:$8 sps:$4 sm:$0xff]   ;;  %v1922_v59 = vld [vmem:[%s2605_s5 + $0xe0] ss:$8 sps:$4 sm:$0xff]   ;;  %v1923_v60 = vld [vmem:[%s2605_s5 + $0xf4] ss:$8 sps:$4 sm:$0xff]  }
  0x47   : > { %954 = vmatprep.subr.bf16.mxu1 %v1893_v39  ;;  %v1925_v61 = vld [vmem:[%s2605_s5 + $0xf0] ss:$8 sps:$4 sm:$0xff]   ;;  %v1926_v62 = vld [vmem:[%s2607_s7 + $0x40] sm:$0xff]   ;;  %v1928_v0 = vld [vmem:[%s2607_s7 + $0x48] sm:$0xff]   ;;  %s1472_s29 = sshll.u32 %s549_s24, 4  ;;  %s1488_s27 = sshll.u32 %s556_s28, 4  ;;  %s2515_s29 = int_to_ptr.vmem [resolvable:$true] %s1472_s29  ;;  %s2522_s27 = int_to_ptr.vmem [resolvable:$true] %s1488_s27 }
  0x48   : > { %702 = vmatpush1.bf16.msra.mxu0 %v1865_v8  ;;  %v1927_v63 = vld [vmem:[%s2607_s7] sm:$0xff]   ;;  %v1929_v1 = vld [vmem:[%s2607_s7 + $0x8] sm:$0xff]   ;;  %v1930_v2 = vld [vmem:[%s2607_s7 + $0x50] sm:$0xff]   ;;  %v605_v8 = vlaneseq  ;;  %s2644_s19 = sld [smem:[#allocation21_spill]]  ;;  %s2645_s18 = sld [smem:[#allocation22_spill]] }
  0x49   : > { %703 = vmatprep.subr.bf16.mxu0 %v1866_v9  ;;  %v1931_v3 = vld [vmem:[%s2607_s7 + $0x10] sm:$0xff]   ;;  %v1932_v4 = vld [vmem:[%s2607_s7 + $0x58] sm:$0xff]   ;;  %v1934_v6 = vld [vmem:[%s2607_s7 + $0x60] sm:$0xff]   ;;  %s1454_s23 = scalar_lea.sflag [#allocation3], %s2505_s30  ;;  %s1977_s16 = scalar_lea.vmem %s2515_s29, 256 }
  0x4a   : > { %955 = vmatpush1.bf16.msra.mxu1 %v1895_v41  ;;  %v1933_v5 = vld [vmem:[%s2607_s7 + $0x18] sm:$0xff]   ;;  %v1935_v7 = vld [vmem:[%s2607_s7 + $0x20] sm:$0xff]   ;;  %v606_v9 = vshrl.u32 %v605_v8, 7  ;;  %v1936_v25 = vld [vmem:[%s2607_s7 + $0x68] sm:$0xff]   ;;  %p1978_p10 = scmp.ne.s32.totalorder %s2515_s29, %s1977_s16  ;;  %s2081_s1 = smov [#allocation5]  }
  0x4b   : > { %956 = vmatprep.subr.bf16.mxu1 %v1896_v42  ;;  %v603_v11 = vld [vmem:[%s2604_s4] sm:$0x3]  ;;  %v1937_v26 = vld [vmem:[%s2607_s7 + $0x28] sm:$0xff]   ;;  %v1939_v28 = vld [vmem:[%s2607_s7 + $0x30] sm:$0xff]   ;;  %s1981_s3 = sshll.u32 %s2081_s1, 4  ;;  %s1982_s3 = int_to_ptr.vmem [resolvable:$false] %s1981_s3 }
  0x4c   : > { %704 = vmatpush1.bf16.msra.mxu0 %v1868_v12  ;;  %v607_v10 = vsub.s32 0, %v606_v9  ;;  %v611_v12 = vsub.s32 1, %v606_v9  ;;  %v1940_v29 = vld [vmem:[%s2607_s7 + $0x78] sm:$0xff]   ;;  %v772_v31 = vld [vmem:[%s2606_s6] sm:$0x3]  ;;  %p1979_p11 = pnand %p1978_p10, %p2208_p5  ;;  %s1983_s25 = scalar_lea.vmem %s1982_s3, 512 }
  0x4d   : > { %705 = vmatprep.subr.bf16.mxu0 %v1869_v14  ;;  %v1941_v30 = vld [vmem:[%s2607_s7 + $0x38] sm:$0xff]   ;;  %p1984_p13 = scmp.lt.s32.totalorder %s2515_s29, %s1982_s3  ;;  %p1985_p0 = scmp.lt.s32.totalorder %s1983_s25, %s1977_s16 }
  0x4e   : > { %957 = vmatpush1.bf16.msra.mxu1 %v1898_v43  ;;  %v608_v13 = vrot.slane %v603_v11, %v607_v10  ;;  %v612_v15 = vrot.slane %v603_v11, %v611_v12  ;;  %v781_v33 = vrot.slane %v772_v31, %v611_v12  ;;  %v1944_v12 = vld [vmem:[%s2611_s11 + $0x8] sm:$0xff]   ;;  %s2520_s20 = scalar_lea.hbm %s2644_s19, %s1712_s2  ;;  %s2527_s26 = scalar_lea.hbm %s2645_s18, %s1712_s2 }
  0x4f   : > { %958 = vmatprep.subr.bf16.mxu1 %v1899_v44  ;;  %p1980_p12 = pneg %p1979_p11  ;;  %p1986_p1 = por %p1985_p0, %p1984_p13 }
  0x50   : > { %706 = vmatpush1.bf16.msra.mxu0 %v1871_v17 }
  0x51   : > { %707 = vmatprep.subr.bf16.mxu0 %v1872_v19  ;;  %p1987_p2 = pnand %p1986_p1, %p1980_p12 }
  0x52   : > { %959 = vmatpush1.bf16.msra.mxu1 %v1901_v45 }
  0x53   : > { %960 = vmatprep.subr.bf16.mxu1 %v1902_v46 }
  0x54   : > { %708 = vmatpush1.bf16.msra.mxu0 %v1874_v27  ;;  %v1938_v27 = vld [vmem:[%s2607_s7 + $0x70] sm:$0xff]  }
  0x55   : > { %709 = vmatprep.subr.bf16.mxu0 %v1875_v32  ;;  %v777_v32 = vrot.slane %v772_v31, %v607_v10 }
  0x56   : > { %961 = vmatpush1.bf16.msra.mxu1 %v1904_v47 }
  0x57   : > { %962 = vmatprep.subr.bf16.mxu1 %v1905_v48 }
  0x58   : > { %710 = vmatpush1.bf16.msra.mxu0 %v1877_v37 }
  0x59   : > { %1714 = vmatprep.subr.bf16.mxu0 %v1926_v62 }
  0x5a   : > { %963 = vmatpush1.bf16.msra.mxu1 %v1907_v49 }
  0x5b   : > { %728 = vmatmul.mubr.bf16.vlgmr.msra.gmra.mrb[0].mxu0 %v586_v40  ;;  %964 = vmatprep.subr.bf16.mxu1 %v1908_v50 }
  0x5c   : > { %1715 = vmatpush3.bf16.msra.mxu0 %v1927_v63 }
  0x5d   : > { %1716 = vmatprep.subr.bf16.mxu0 %v1928_v0 }
  0x5e   : > { %965 = vmatpush1.bf16.msra.mxu1 %v1910_v51 }
  0x5f   : > { %966 = vmatprep.subr.bf16.mxu1 %v1911_v52 }
  0x60   : > { %1717 = vmatpush3.bf16.msra.mxu0 %v1929_v1  ;;  %v1942_v1 = vld [vmem:[%s2611_s11] sm:$0xff]  }
  0x61   : > { %1718 = vmatprep.subr.bf16.mxu0 %v1930_v2  ;;  %v1943_v2 = vld [vmem:[%s2613_s13] sm:$0xff]  }
  0x62   : > { %967 = vmatpush1.bf16.msra.mxu1 %v1913_v53  ;;  %v1667_v53 = vld [vmem:[%s2608_s8] ss:$0 sm:$0xff] }
  0x63   : > { %968 = vmatprep.subr.bf16.mxu1 %v1914_v54 }
  0x64   : > { %1719 = vmatpush3.bf16.msra.mxu0 %v1931_v3  ;;  %v2079_v3 = vmov 0.0  }
  0x65   : > { %1720 = vmatprep.subr.bf16.mxu0 %v1932_v4 }
  0x66   : > { %969 = vmatpush1.bf16.msra.mxu1 %v1916_v55 }
  0x67   : > { %970 = vmatprep.subr.bf16.mxu1 %v1917_v56 }
  0x68   : > { %1721 = vmatpush3.bf16.msra.mxu0 %v1933_v5 }
  0x69   : > { %1722 = vmatprep.subr.bf16.mxu0 %v1934_v6 }
  0x6a   : > { %971 = vmatpush1.bf16.msra.mxu1 %v1919_v57 }
  0x6b   : > { %972 = vmatprep.subr.bf16.mxu1 %v1920_v58 }
  0x6c   : > { %1723 = vmatpush3.bf16.msra.mxu0 %v1935_v7 }
  0x6d   : > { %1724 = vmatprep.subr.bf16.mxu0 %v1936_v25  ;;  %v1957_v25 = vld [vmem:[%s2613_s13 + $0x38] sm:$0xff]  }
  0x6e   : > { %973 = vmatpush1.bf16.msra.mxu1 %v1922_v59 }
  0x6f   : > { %974 = vmatprep.subr.bf16.mxu1 %v1923_v60 }
  0x70   : > { %1725 = vmatpush3.bf16.msra.mxu0 %v1937_v26 }
  0x71   : > { %1726 = vmatprep.subr.bf16.mxu0 %v1938_v27 }
  0x72   : > { %975 = vmatpush1.bf16.msra.mxu1 %v1925_v61 }
  0x73   : > { %1774 = vmatprep.subr.bf16.mxu1 %v2079_v3 }
  0x74   : > { %1727 = vmatpush3.bf16.msra.mxu0 %v1939_v28 }
  0x75   : > { %1728 = vmatprep.subr.bf16.mxu0 %v1940_v29 }
  0x78   : > { %1729 = vmatpush3.bf16.msra.mxu0 %v1941_v30 }
  0x79   : > { %1754 = vmatprep.subr.bf16.mxu0 %v2079_v3 }
 0x12e   : > { %v729_v14 = vpop.f32.mrb[0].mxu0 }
 0x12f   : > { %v731_v16 = vpop.f32.mrb[1].mxu0  ;;  %v730_v18 = vadd.f32 %v729_v14, %v608_v13  ;;  %v1946_v14 = vld [vmem:[%s2611_s11 + $0x10] sm:$0xff]  }
 0x130   : > { %v733_v17 = vpop.f32.mrb[2].mxu0  ;;  %v732_v21 = vadd.f32 %v731_v16, %v612_v15  ;;  %v1948_v16 = vld [vmem:[%s2611_s11 + $0x18] sm:$0xff]  }
 0x131   : > { %v734_v19 = vadd.f32 %v733_v17, %v608_v13  ;;  %v735_v20 = vpop.f32.mrb[3].mxu0  ;;  %v1945_v13 = vld [vmem:[%s2613_s13 + $0x8] sm:$0xff]   ;;  %v1949_v17 = vld [vmem:[%s2613_s13 + $0x18] sm:$0xff]  }
 0x132   : > { %v736_v22 = vadd.f32 %v735_v20, %v612_v15  ;;  %v1947_v15 = vld [vmem:[%s2613_s13 + $0x10] sm:$0xff]   ;;  %v1952_v20 = vld [vmem:[%s2611_s11 + $0x28] sm:$0xff]  }
 0x133   : > { %v738_v23 = vpack.c.bf16 %v734_v19, %v730_v18  ;;  %v1950_v18 = vld [vmem:[%s2611_s11 + $0x20] sm:$0xff]  }
 0x134   : > { %v739_v24 = vpack.c.bf16 %v736_v22, %v732_v21  ;;  %v1951_v19 = vld [vmem:[%s2613_s13 + $0x20] sm:$0xff]   ;;  %v1953_v21 = vld [vmem:[%s2613_s13 + $0x28] sm:$0xff]   ;;  %v1954_v22 = vld [vmem:[%s2611_s11 + $0x30] sm:$0xff]  }
 0x136   : > { %976 = vmatprep.mubr.bf16.mxu1 %v739_v24  ;;  %v1956_v24 = vld [vmem:[%s2611_s11 + $0x38] sm:$0xff]  }
 0x137   : > { %977 = vmatmul.mubr.bf16.vlgmr.msra.gmra.mrb[0].mxu1 %v738_v23  ;;  %v1955_v23 = vld [vmem:[%s2613_s13 + $0x30] sm:$0xff]  }
 0x138   : > { %1775 = vmatpush3.bf16.msra.mxu1 %v1943_v2  ;;  %1790 = vmatprep.mubr.msk.bf16.mxu1 %vm2080_vm6, %v2079_v3 }
 0x139   : > { %1776 = vmatprep.subr.bf16.mxu1 %v2079_v3 }
 0x13c   : > { %1777 = vmatpush3.bf16.msra.mxu1 %v1945_v13 }
 0x13d   : > { %1778 = vmatprep.subr.bf16.mxu1 %v2079_v3 }
 0x140   : > { %1779 = vmatpush3.bf16.msra.mxu1 %v1947_v15 }
 0x141   : > { %1780 = vmatprep.subr.bf16.mxu1 %v2079_v3 }
 0x144   : > { %1781 = vmatpush3.bf16.msra.mxu1 %v1949_v17 }
 0x145   : > { %1782 = vmatprep.subr.bf16.mxu1 %v2079_v3 }
 0x148   : > { %1783 = vmatpush3.bf16.msra.mxu1 %v1951_v19 }
 0x149   : > { %1784 = vmatprep.subr.bf16.mxu1 %v2079_v3 }
 0x14c   : > { %1785 = vmatpush3.bf16.msra.mxu1 %v1953_v21 }
 0x14d   : > { %1786 = vmatprep.subr.bf16.mxu1 %v2079_v3 }
 0x150   : > { %1787 = vmatpush3.bf16.msra.mxu1 %v1955_v23 }
 0x151   : > { %1788 = vmatprep.subr.bf16.mxu1 %v2079_v3 }
 0x154   : > { %1789 = vmatpush3.bf16.msra.mxu1 %v1957_v25 }
 0x20a   : > { %v978_v34 = vpop.f32.mrb[0].mxu1 }
 0x20b   : > { %v979_v35 = vadd.f32 %v978_v34, %v777_v32  ;;  %v980_v36 = vpop.f32.mrb[1].mxu1  ;;  %v1684_v34 = vld [vmem:[%s2609_s9] ss:$0 sm:$0xff] }
 0x20c   : > { %v981_v37 = vadd.f32 %v980_v36, %v781_v33  ;;  %v982_v38 = vpop.f32.mrb[2].mxu1 }
 0x20d   : > { %v991_v39 = vmul.f32 0.3, %v979_v35  ;;  %v983_v40 = vadd.f32 %v982_v38, %v777_v32  ;;  %v984_v41 = vpop.f32.mrb[3].mxu1  ;;  %vm987_vm0 = vcmp.ge.f32.partialorder %v979_v35, 0.0  ;;  %v1685_v38 = vld [vmem:[%s2610_s10] ss:$0 sm:$0xff] }
 0x20e   : > { %v992_v42 = vmul.f32 0.3, %v981_v37  ;;  %v985_v43 = vadd.f32 %v984_v41, %v781_v33  ;;  %vm988_vm1 = vcmp.ge.f32.partialorder %v981_v37, 0.0 }
 0x20f   : > { %vm989_vm2 = vcmp.ge.f32.partialorder %v983_v40, 0.0  ;;  %v993_v44 = vmul.f32 0.3, %v983_v40  ;;  %v995_v46 = vsel %vm987_vm0, %v979_v35, %v991_v39 }
 0x210   : > { %vm990_vm3 = vcmp.ge.f32.partialorder %v985_v43, 0.0  ;;  %v994_v45 = vmul.f32 0.3, %v985_v43  ;;  %v996_v49 = vsel %vm988_vm1, %v981_v37, %v992_v42 }
 0x211   : > { %v997_v47 = vsel %vm989_vm2, %v983_v40, %v993_v44  ;;  %v1695_v44 = vld [vmem:[%s2614_s14] ss:$0 sm:$0xff] }
 0x212   : > { %v999_v48 = vpack.c.bf16 %v997_v47, %v995_v46  ;;  %v998_v50 = vsel %vm990_vm3, %v985_v43, %v994_v45  ;;  %v1686_v43 = vld [vmem:[%s2612_s12] ss:$0 sm:$0xff] }
 0x213   : > { %v1000_v51 = vpack.c.bf16 %v998_v50, %v996_v49 }
 0x215   : > { %1168 = vmatprep.mubr.bf16.mxu0 %v1000_v51 }
 0x216   : > { %1169 = vmatmul.mubr.bf16.vlgmr.msra.gmra.mrb[4].mxu0 %v999_v48 }
 0x217   : > { %1755 = vmatpush3.bf16.msra.mxu0 %v1942_v1  ;;  %1770 = vmatprep.mubr.msk.bf16.mxu0 %vm2080_vm6, %v2079_v3 }
 0x218   : > { %1756 = vmatprep.subr.bf16.mxu0 %v2079_v3 }
 0x21b   : > { %1757 = vmatpush3.bf16.msra.mxu0 %v1944_v12 }
 0x21c   : > { %1758 = vmatprep.subr.bf16.mxu0 %v2079_v3 }
 0x21f   : > { %1759 = vmatpush3.bf16.msra.mxu0 %v1946_v14 }
 0x220   : > { %1760 = vmatprep.subr.bf16.mxu0 %v2079_v3 }
 0x223   : > { %1761 = vmatpush3.bf16.msra.mxu0 %v1948_v16 }
 0x224   : > { %1762 = vmatprep.subr.bf16.mxu0 %v2079_v3 }
 0x227   : > { %1763 = vmatpush3.bf16.msra.mxu0 %v1950_v18 }
 0x228   : > { %1764 = vmatprep.subr.bf16.mxu0 %v2079_v3 }
 0x22b   : > { %1765 = vmatpush3.bf16.msra.mxu0 %v1952_v20 }
 0x22c   : > { %1766 = vmatprep.subr.bf16.mxu0 %v2079_v3 }
 0x22f   : > { %1767 = vmatpush3.bf16.msra.mxu0 %v1954_v22 }
 0x230   : > { %1768 = vmatprep.subr.bf16.mxu0 %v2079_v3 }
 0x233   : > { %1769 = vmatpush3.bf16.msra.mxu0 %v1956_v24 }
 0x2e9   : > { %v1730_v52 = vpop.f32.mrb[4].mxu0 }
 0x2ea   : > { %v1731_v54 = vpop.f32.mrb[5].mxu0 }
 0x2eb   : > { %v1732_v55 = vadd.f32 %v1731_v54, %v1730_v52  ;;  %v1733_v56 = vpop.f32.mrb[6].mxu0 }
 0x2ec   : > { %v1734_v57 = vpop.f32.mrb[7].mxu0 }
 0x2ed   : > { %v1171_v58 = vadd.f32 %v1732_v55, %v1667_v53  ;;  %v1735_v59 = vadd.f32 %v1734_v57, %v1733_v56 }
 0x2ef   : > { %v1174_v60 = vadd.f32 %v1735_v59, %v1667_v53  ;;  %vm1177_vm4 = vcmp.ge.f32.partialorder %v1171_v58, 0.0  ;;  %v1179_v61 = vmul.f32 0.3, %v1171_v58 }
 0x2f1   : > { %v1181_v62 = vsel %vm1177_vm4, %v1171_v58, %v1179_v61  ;;  %v1180_v63 = vmul.f32 0.3, %v1174_v60  ;;  %vm1178_vm5 = vcmp.ge.f32.partialorder %v1174_v60, 0.0 }
 0x2f2   : > { %1185 = vadd.xlane.f32.xlu0 %v1181_v62 }
 0x2f3   : > { %v1182_v0 = vsel %vm1178_vm5, %v1174_v60, %v1180_v63 }
 0x2f6   : > { %1187 = vadd.xlane.f32.xlu0 %v1182_v0 }
 0x37f   : > { %v1186_v4 = vpop.xlane.xlu0 %1185 }
 0x380   : > { %v1190_v5 = vmul.f32 0.0078125, %v1186_v4 }
 0x382   : > { %v1192_v6 = vsub.f32 %v1181_v62, %v1190_v5 }
 0x383   : > { %v1188_v7 = vpop.xlane.xlu0 %1187 }
 0x384   : > { %v1191_v8 = vmul.f32 0.0078125, %v1188_v7  ;;  %v1194_v9 = vmul.f32 %v1192_v6, %v1192_v6 }
 0x386   : > { %v1193_v10 = vsub.f32 %v1182_v0, %v1191_v8  ;;  %1196 = vadd.xlane.f32.xlu1 %v1194_v9 }
 0x388   : > { %v1195_v11 = vmul.f32 %v1193_v10, %v1193_v10 }
 0x38a   : > { %1198 = vadd.xlane.f32.xlu1 %v1195_v11 }
 0x413   : > { %v1197_v26 = vpop.xlane.xlu1 %1196 }
 0x414   : > { %v1200_v27 = vmul.f32 0.0078125, %v1197_v26 }
 0x416   : > { %v1202_v28 = vadd.f32 1e-05, %v1200_v27 }
 0x417   : > { %v1199_v29 = vpop.xlane.xlu1 %1198 }
 0x418   : > { %1958 = vrsqrt.f32 %v1202_v28  ;;  %v1201_v30 = vmul.f32 0.0078125, %v1199_v29 }
 0x41a   : > { %v1203_v31 = vadd.f32 1e-05, %v1201_v30 }
 0x41c   : > { %1960 = vrsqrt.f32 %v1203_v31 }
 0x422   : > { %v1959_v32 = vpop.eup %1958 }
 0x423   : > { %v1206_v33 = vmul.f32 %v1959_v32, %v1192_v6 }
 0x425   : > { %v1214_v37 = vmul.f32 %v1684_v34, %v1206_v33 }
 0x426   : > { %v1961_v35 = vpop.eup %1960 }
 0x427   : > { %v1207_v36 = vmul.f32 %v1961_v35, %v1193_v10  ;;  %v1222_v40 = vadd.f32 %v1685_v38, %v1214_v37 }
 0x429   : > { %v1215_v39 = vmul.f32 %v1684_v34, %v1207_v36 }
 0x42b   : > { %v1223_v41 = vadd.f32 %v1685_v38, %v1215_v39 }
 0x42d   : > { %v1224_v42 = vpack.c.bf16 %v1223_v41, %v1222_v40 }
 0x42f   : > { %1771 = vmatmul.mubr.bf16.vlgmr.msra.gmra.mrb[8].mxu0 %v1224_v42  ;;  %1791 = vmatmul.mubr.bf16.vlgmr.msra.gmra.mrb[4].mxu1 %v1224_v42 }
 0x502   : > { %v1330_v45 = vpop.f32.mrb[8].mxu0  ;;  %v1444_v46 = vpop.f32.mrb[4].mxu1 }
 0x503   : > { %v1331_v47 = vadd.f32 %v1686_v43, %v1330_v45  ;;  %v1445_v48 = vadd.f32 %v1695_v44, %v1444_v46  ;;  %v1772_v49 = vpop.f32.mrb[9].mxu0  ;;  %v1792_v50 = vpop.f32.mrb[5].mxu1 }
 0x504   : > { %v1333_v51 = vpop.f32.mrb[10].mxu0  ;;  %v1447_v52 = vpop.f32.mrb[6].mxu1 }
 0x505   : > { %1337 = vst [vmem:[%s549_s24] sm:$0xff] %v1331_v47  ;;  %1451 = vst [vmem:[%s556_s28] sm:$0xff] %v1445_v48  ;;  %v1334_v53 = vadd.f32 %v1686_v43, %v1333_v51  ;;  %v1448_v54 = vadd.f32 %v1695_v44, %v1447_v52  ;;  %v1773_v55 = vpop.f32.mrb[11].mxu0  ;;  %v1793_v56 = vpop.f32.mrb[7].mxu1 }
 0x507   : > { %1338 = vst [vmem:[%s549_s24 + $0x8] sm:$0xff] %v1334_v53  ;;  %1452 = vst [vmem:[%s556_s28 + $0x8] sm:$0xff] %v1448_v54 }
 0x508   : > { %1990 = shalt.err (!%p1987_p2)
}
 0x509   : > { %s1991_s24 = scalar_lea.hbm %s2520_s20, 256  ;;  %s1995_s1 = scalar_lea.hbm %s2644_s19, 512 }
 0x50a   : > { %p1992_p3 = scmp.ne.s32.totalorder %s2520_s20, %s1991_s24  ;;  %p1996_p8 = scmp.lt.u32.totalorder %s2520_s20, %s2644_s19 }
 0x50b   : > { %p1997_p9 = scmp.lt.u32.totalorder %s1995_s1, %s1991_s24  ;;  %p1999_p11 = scmp.lt.u32.totalorder %s1991_s24, %s2520_s20 }
 0x50c   : > { %p1993_p4 = pnand %p1992_p3, %p2208_p5 }
 0x50d   : > { %p1998_p10 = por %p1997_p9, %p1996_p8 }
 0x50e   : > { %p1994_p7 = pneg %p1993_p4 }
 0x50f   : > { %p2000_p12 = por %p1999_p11, %p1998_p10 }
 0x511   : > { %p2001_p13 = pnand %p2000_p12, %p1994_p7 }
 0x513   : > { %2004 = shalt.err (!%p2001_p13)
}
 0x514   : > { %s2082_s21 = smov 128   ;;  %s2083_s17 = smov 8  }
 0x515   : > { %1798 = dma.vmem_to_hbm [thread:$0]  (%p2208_p5), %s2515_s29, 256, %s2520_s20, %s1454_s23, %s2082_s21, %s2082_s21, %s2083_s17  }
 0x516   : > { %s1459_s16 = scalar_lea.sflag [#allocation7], %s2505_s30  ;;  %s2005_s25 = scalar_lea.vmem %s2522_s27, 256 }
 0x517   : > { %p2006_p0 = scmp.ne.s32.totalorder %s2522_s27, %s2005_s25  ;;  %s2084_s24 = smov [#allocation6]  }
 0x518   : > { %s2009_s2 = sshll.u32 %s2084_s24, 4  ;;  %s2010_s2 = int_to_ptr.vmem [resolvable:$false] %s2009_s2 }
 0x519   : > { %p2007_p1 = pnand %p2006_p0, %p2208_p5  ;;  %s2011_s28 = scalar_lea.vmem %s2010_s2, 512 }
 0x51a   : > { %p2012_p3 = scmp.lt.s32.totalorder %s2522_s27, %s2010_s2  ;;  %p2013_p4 = scmp.lt.s32.totalorder %s2011_s28, %s2005_s25 }
 0x51b   : > { %p2008_p2 = pneg %p2007_p1 }
 0x51c   : > { %p2014_p7 = por %p2013_p4, %p2012_p3 }
 0x51e   : > { %p2015_p8 = pnand %p2014_p7, %p2008_p2 }
 0x520   : > { %2018 = shalt.err (!%p2015_p8)
}
 0x521   : > { %s2019_s29 = scalar_lea.hbm %s2527_s26, 256  ;;  %s2023_s1 = scalar_lea.hbm %s2645_s18, 512 }
 0x522   : > { %p2020_p9 = scmp.ne.s32.totalorder %s2527_s26, %s2019_s29  ;;  %p2024_p12 = scmp.lt.u32.totalorder %s2527_s26, %s2645_s18 }
 0x523   : > { %p2025_p13 = scmp.lt.u32.totalorder %s2023_s1, %s2019_s29  ;;  %p2027_p1 = scmp.lt.u32.totalorder %s2019_s29, %s2527_s26 }
 0x524   : > { %p2021_p10 = pnand %p2020_p9, %p2208_p5 }
 0x525   : > { %p2026_p0 = por %p2025_p13, %p2024_p12 }
 0x526   : > { %p2022_p11 = pneg %p2021_p10 }
 0x527   : > { %p2028_p2 = por %p2027_p1, %p2026_p0 }
 0x529   : > { %p2029_p3 = pnand %p2028_p2, %p2022_p11 }
 0x52b   : > { %2032 = shalt.err (!%p2029_p3)
}
 0x52c   : > { %1799 = dma.vmem_to_hbm [thread:$0]  (%p2208_p5), %s2522_s27, 256, %s2527_s26, %s1459_s16, %s2082_s21, %s2082_s21, %s2083_s17  }
 0x52d PF: > { %s2646_s25 = sld [smem:[#allocation13_spill]]  ;;  %s2647_s24 = sld [smem:[#allocation11_spill]] }
 0x533   : > { %p1815_p4 = scmp.ge.s32.totalorder %s2646_s25, 2  ;;  %s1503_s28 = sand.u32 1, %s2647_s24  }
 0x534   : > { %s1504_s29 = scalar_lea.sflag [#allocation3], %s1503_s28 }
 0x535   : > { %p1807_p7 = pnand %p1815_p4, %p2212_p6 }
 0x537   : > { %2054 = dma.done.wait (!%p1807_p7), %s1504_s29, 256  }
 0x538   : > { %2056 = vsyncadd (!%p1807_p7), %s1504_s29, 4294967040  ;;  %s1513_s0 = scalar_lea.sflag [#allocation7], %s1503_s28 }
 0x539   : > { %2058 = dma.done.wait (!%p1807_p7), %s1513_s0, 256  }
 0x53a   : > { %2060 = vsyncadd (!%p1807_p7), %s1513_s0, 4294967040  ;;  %s2649_s24 = sld [smem:[#allocation14_spill]]  ;;  %s2650_s30 = sld [smem:[#allocation12_spill]] }
 0x53b   : > { %s2651_s23 = sld [smem:[#allocation15_spill]]  ;;  %s2652_s21 = smov %s2067_s22 }
 0x540   : > { %p31_p5 = scmp.ge.s32.totalorder %s2649_s24, 4   ;;  %s2653_s22 = smov %s2650_s30 }
 0x542   :  { %33 = sbr.rel (!%p31_p5) target bundleno = 13 (0xd), region = 140 }
 0x549   :  { %1518 = vsyncpa [#allocation3], 1 }
 0x54a   :  { %1520 = vsyncpa [#allocation3 + $0x1], 1 }
 0x54b   :  { %1521 = vsyncpa [#allocation7], 1 }
 0x54c   :  { %1523 = vsyncpa [#allocation7 + $0x1], 1 }
 0x54d   :  { %1524 = vsyncpa [#allocation4], 1 }
 0x54e   :  { %1526 = vsyncpa [#allocation4 + $0x1], 1 }

// kernel: mgfn_forward.8
= control target key start
LH: loop header
LB: loop body
LE: loop exit
PB: predicated region body
PF: predicated region fallthrough
CT: control target
= control target key end

     0   :  { %s3875_s24 = smov 0   ;;  %s4629_s0 = inlined_call_operand.vmem [shape: f32[4,32,32], index: 0, kind: input, shape index: {}]   ;;  %s4630_s1 = inlined_call_operand.vmem [shape: bf16[32,32], index: 1, kind: input, shape index: {}]   ;;  %s4631_s2 = inlined_call_operand.vmem [shape: f32[1,32], index: 2, kind: input, shape index: {}]   ;;  %s4632_s3 = inlined_call_operand.vmem [shape: bf16[32,32], index: 3, kind: input, shape index: {}]   ;;  %s4633_s4 = inlined_call_operand.vmem [shape: f32[1,32], index: 4, kind: input, shape index: {}]   ;;  %s4634_s5 = inlined_call_operand.vmem [shape: bf16[32,32], index: 5, kind: input, shape index: {}]   ;;  %s4635_s6 = inlined_call_operand.vmem [shape: f32[1,32], index: 6, kind: input, shape index: {}]   ;;  %s4636_s7 = inlined_call_operand.vmem [shape: bf16[32,32], index: 7, kind: input, shape index: {}]   ;;  %s4637_s8 = inlined_call_operand.vmem [shape: f32[1,32], index: 8, kind: input, shape index: {}]   ;;  %s4638_s9 = inlined_call_operand.vmem [shape: bf16[32,64], index: 9, kind: input, shape index: {}]   ;;  %s4639_s10 = inlined_call_operand.vmem [shape: f32[1,64], index: 10, kind: input, shape index: {}]   ;;  %s4640_s11 = inlined_call_operand.vmem [shape: bf16[64,32], index: 11, kind: input, shape index: {}]   ;;  %s4641_s12 = inlined_call_operand.vmem [shape: f32[1,32], index: 12, kind: input, shape index: {}]   ;;  %s4642_s13 = inlined_call_operand.vmem [shape: f32[1,32], index: 13, kind: input, shape index: {}]   ;;  %s4643_s14 = inlined_call_operand.vmem [shape: f32[1,32], index: 14, kind: input, shape index: {}]   ;;  %s4644_s15 = inlined_call_operand.vmem [shape: f32[1,32], index: 15, kind: input, shape index: {}]   ;;  %s4645_s16 = inlined_call_operand.vmem [shape: f32[1,32], index: 16, kind: input, shape index: {}]   ;;  %s4646_s17 = inlined_call_operand.vmem [shape: f32[4,32,32], index: 17, kind: output, shape index: {}]  }
   0x1   :  { %4648 = sst [smem:[#allocation2_spill]] %s4629_s0 }
   0x2   :  { %4649 = sst [smem:[#allocation3_spill]] %s4630_s1 }
   0x3 LB: > { %s3094_s25 = sadd.s32 4294967295, %s3777_s24   ;;  %p3098_p0 = scmp.ge.s32.totalorder %s3777_s24, 1  ;;  %s3777_s24 = sphi %s3875_s24, %s27_s24  }
   0x4   : > { %p489_p1 = scmp.lt.s32.totalorder %s3777_s24, 3 }
   0x6   : > { %p490_p2 = pnand %p3098_p0, %p489_p1 }
   0x7   : > { %s4650_s28 = sld [smem:[#allocation3_spill]] (!%p490_p2)  ;;  %s3099_s29 = sshll.u32 (!%p490_p2), %s3094_s25, 1  ;;  %v3591_v2 = vld [vmem:[%s4632_s3] sm:$0xff] (!%p490_p2)   ;;  %vm593_vm0 = vcmask (!%p490_p2), 261120   ;;  %v3592_v7 = vld [vmem:[%s4632_s3 + $0x8] sm:$0xff] (!%p490_p2)   ;;  %vm859_vm1 = vcmask (!%p490_p2), 64512  }
   0x8   : > { %493 = sbr.rel (%p490_p2) target bundleno = 4286 (0x10be), region = 88  ;;  %p544_p3 = scmp.lt.s32.totalorder (!%p490_p2), %s3099_s29, 3  ;;  %v3593_v3 = vld [vmem:[%s4634_s5] sm:$0xff] (!%p490_p2)   ;;  %v3594_v16 = vld [vmem:[%s4634_s5 + $0x8] sm:$0xff] (!%p490_p2)   ;;  %vm2388_vm2 = vcmask (!%p490_p2), 130048   ;;  %vm2397_vm3 = vcmask (!%p490_p2), 195584  }
   0x9   : > { %s4651_s25 = sld [smem:[#allocation2_spill]] (!%p490_p2)  ;;  %v3105_v18 = vld [vmem:[%s4631_s2] ss:$0 sm:$0xff] (!%p490_p2)  ;;  %s3779_s27 = smov (!%p490_p2), 120   ;;  %vm2808_vm4 = vcmask (!%p490_p2), 523264  }
   0xa   : > { %v3112_v39 = vld [vmem:[%s4633_s4] ss:$0 sm:$0xff] (!%p490_p2)  ;;  %s3780_s0 = smov (!%p490_p2), 112   ;;  %s3781_s30 = smov (!%p490_p2), 104  }
   0xb   : > { %s3782_s18 = smov (!%p490_p2), 8   ;;  %s3783_s19 = smov (!%p490_p2), 16  }
   0xd   : > { %v3589_v0 = vld [vmem:[%s4650_s28] sm:$0xff] (!%p490_p2)   ;;  %v3590_v1 = vld [vmem:[%s4650_s28 + $0x8] sm:$0xff] (!%p490_p2)  }
   0xe   : > { %3495 = vmatprep.subr.bf16.mxu1 (!%p490_p2), %v3589_v0  ;;  %3291 = vmatprep.subr.bf16.mxu0 (!%p490_p2), %v3589_v0 }
   0xf   : > { %3497 = vmatpush3.bf16.msra.mxu1 %v3589_v0  ;;  %s4653_s29 = smov (!%p544_p3, %s3099_s29), 3  ;;  %3292 = vmatpush3.bf16.msra.mxu0 %v3589_v0 }
  0x10   : > { %3496 = vmatprep.subr.bf16.mxu1 %v3590_v1  ;;  %3293 = vmatprep.subr.bf16.mxu0 %v3590_v1  ;;  %s3187_s21 = sshll.u32 %s4653_s29, 5 }
  0x11   : > { %s3903_s26 = scalar_lea.vmem %s4651_s25, %s3187_s21  ;;  %s3784_s25 = smov 24  }
  0x12   : > { %v562_v4 = vld [vmem:[%s3903_s26 + $0x20] sm:$0xff]  ;;  %v563_v5 = vld [vmem:[%s3903_s26 + $0x28] sm:$0xff]  ;;  %v564_v6 = vld [vmem:[%s3903_s26 + $0x30] sm:$0xff]  ;;  %s4602_s1 = scalar_lea.vmem %s4646_s17, %s3187_s21 }
  0x13   : > { %3498 = vmatpush3.bf16.msra.mxu1 %v3590_v1  ;;  %3294 = vmatpush3.bf16.msra.mxu0 %v3590_v1  ;;  %v568_v8 = vpack.c.bf16 %v563_v5, %v562_v4  ;;  %v565_v9 = vld [vmem:[%s3903_s26 + $0x38] sm:$0xff]  ;;  %v558_v10 = vld [vmem:[%s3903_s26] sm:$0xff]  ;;  %v559_v11 = vld [vmem:[%s3903_s26 + $0x8] sm:$0xff] }
  0x14   : > { %3303 = vmatprep.subr.bf16.mxu1 %v3591_v2  ;;  %3315 = vmatprep.subr.bf16.mxu0 %v3593_v3  ;;  %v569_v12 = vpack.c.bf16 %v565_v9, %v564_v6  ;;  %v566_v13 = vpack.c.bf16 %v559_v11, %v558_v10  ;;  %v560_v14 = vld [vmem:[%s3903_s26 + $0x10] sm:$0xff]  ;;  %v561_v15 = vld [vmem:[%s3903_s26 + $0x18] sm:$0xff]  ;;  %v3119_v1 = vld [vmem:[%s4635_s6] ss:$0 sm:$0xff] }
  0x15   : > { %3299 = vmatprep.mubr.msk.bf16.mxu1 %vm593_vm0, %v568_v8  ;;  %v567_v17 = vpack.c.bf16 %v561_v15, %v560_v14 }
  0x16   : > { %3300 = vmatmul.mubr.msk.bf16.vlgmr.msra.gmra.mrb[0].mxu1 %vm593_vm0, %v569_v12  ;;  %3295 = vmatprep.mubr.msk.bf16.mxu0 %vm593_vm0, %v566_v13 }
  0x17   : > { %3304 = vmatpush3.bf16.msra.mxu1 %v3591_v2  ;;  %3307 = vmatprep.mubr.msk.bf16.mxu1 %vm593_vm0, %v566_v13 }
  0x18   : > { %3305 = vmatprep.subr.bf16.mxu1 %v3592_v7  ;;  %3296 = vmatmul.mubr.msk.bf16.vlgmr.msra.gmra.mrb[0].mxu0 %vm593_vm0, %v567_v17 }
  0x19   : > { %3316 = vmatpush3.bf16.msra.mxu0 %v3593_v3  ;;  %3319 = vmatprep.mubr.msk.bf16.mxu0 %vm593_vm0, %v566_v13 }
  0x1a   : > { %3317 = vmatprep.subr.bf16.mxu0 %v3594_v16 }
  0x1b   : > { %3306 = vmatpush3.bf16.msra.mxu1 %v3592_v7 }
  0x1d   : > { %3318 = vmatpush3.bf16.msra.mxu0 %v3594_v16 }
  0x1e   : > { %3308 = vmatmul.mubr.msk.bf16.vlgmr.msra.gmra.mrb[4].mxu1 %vm593_vm0, %v567_v17 }
  0x1f   : > { %3311 = vmatprep.mubr.msk.bf16.mxu1 %vm593_vm0, %v568_v8 }
  0x20   : > { %3320 = vmatmul.mubr.msk.bf16.vlgmr.msra.gmra.mrb[4].mxu0 %vm593_vm0, %v567_v17 }
  0x21   : > { %3323 = vmatprep.mubr.msk.bf16.mxu0 %vm593_vm0, %v568_v8 }
  0x26   : > { %3312 = vmatmul.mubr.msk.bf16.gmra.mrb[8].mxu1 %vm593_vm0, %v569_v12 }
  0x28   : > { %3324 = vmatmul.mubr.msk.bf16.gmra.mrb[8].mxu0 %vm593_vm0, %v569_v12 }
  0xe9   : > { %v3301_v19 = vpop.f32.mrb[0].mxu1 }
  0xea   : > { %v656_v20 = vpop.f32.mrb[1].mxu1  ;;  %v665_v23 = vadd.f32 %v3301_v19, %v3105_v18 }
  0xeb   : > { %v3302_v21 = vpop.f32.mrb[2].mxu1  ;;  %v3297_v22 = vpop.f32.mrb[0].mxu0  ;;  %v657_v28 = vadd.f32 %v3105_v18, %v656_v20 }
  0xec   : > { %v668_v24 = vadd.f32 %v3302_v21, %v3105_v18  ;;  %v659_v25 = vpop.f32.mrb[3].mxu1  ;;  %v649_v26 = vadd.f32 %v3297_v22, %v3105_v18  ;;  %v640_v27 = vpop.f32.mrb[1].mxu0 }
  0xed   : > { %v660_v29 = vadd.f32 %v3105_v18, %v659_v25  ;;  %v641_v30 = vadd.f32 %v3105_v18, %v640_v27  ;;  %v3298_v31 = vpop.f32.mrb[2].mxu0 }
  0xee   : > { %v3934_v32 = vpack.c.bf16 %v668_v24, %v665_v23  ;;  %v652_v33 = vadd.f32 %v3298_v31, %v3105_v18  ;;  %v643_v34 = vpop.f32.mrb[3].mxu0 }
  0xef   : > { %v3936_v35 = vpack.c.bf16 %v660_v29, %v657_v28  ;;  %v644_v36 = vadd.f32 %v3105_v18, %v643_v34 }
  0xf0   : > { %v3938_v37 = vpack.c.bf16 %v652_v33, %v649_v26 }
  0xf1   : > { %v3309_v38 = vpop.f32.mrb[4].mxu1  ;;  %3339 = vmatprep.mubr.msk.bf16.mxu0 %vm859_vm1, %v3936_v35  ;;  %v3945_v40 = vpack.c.bf16 %v644_v36, %v641_v30 }
  0xf2   : > { %v728_v41 = vpop.f32.mrb[5].mxu1  ;;  %v737_v44 = vadd.f32 %v3309_v38, %v3112_v39 }
  0xf3   : > { %v3310_v42 = vpop.f32.mrb[6].mxu1  ;;  %3331 = vmatprep.mubr.msk.bf16.mxu1 %vm859_vm1, %v3945_v40  ;;  %v3321_v43 = vpop.f32.mrb[4].mxu0  ;;  %v729_v47 = vadd.f32 %v3112_v39, %v728_v41 }
  0xf4   : > { %v740_v45 = vadd.f32 %v3310_v42, %v3112_v39  ;;  %v731_v46 = vpop.f32.mrb[7].mxu1  ;;  %v825_v2 = vadd.f32 %v3321_v43, %v3119_v1  ;;  %v816_v3 = vpop.f32.mrb[5].mxu0 }
  0xf5   : > { %v732_v48 = vadd.f32 %v3112_v39, %v731_v46  ;;  %v817_v4 = vadd.f32 %v3119_v1, %v816_v3  ;;  %v3322_v5 = vpop.f32.mrb[6].mxu0 }
  0xf6   : > { %v3949_v49 = vpack.c.bf16 %v740_v45, %v737_v44  ;;  %v828_v6 = vadd.f32 %v3322_v5, %v3119_v1  ;;  %v819_v7 = vpop.f32.mrb[7].mxu0 }
  0xf7   : > { %v3951_v50 = vpack.c.bf16 %v732_v48, %v729_v47  ;;  %v820_v8 = vadd.f32 %v3119_v1, %v819_v7 }
  0xf8   : > { %v870_v62 = vsel %vm859_vm1, %v3949_v49, 0  ;;  %v3980_v10 = vpack.c.bf16 %v828_v6, %v825_v2 }
  0xf9   : > { %v3313_v51 = vpop.f32.mrb[8].mxu1  ;;  %3499 = vmatprep.subr.msk.bf16.mxu1 %vm859_vm1, %v3951_v50  ;;  %v867_v52 = vsel %vm859_vm1, %v3951_v50, 0  ;;  %v3982_v13 = vpack.c.bf16 %v820_v8, %v817_v4 }
  0xfa   : > { %v753_v53 = vadd.f32 %v3313_v51, %v3112_v39  ;;  %v744_v54 = vpop.f32.mrb[9].mxu1  ;;  %3328 = vmatpush3.bf16.xpose.msra.mxu1 %v867_v52 }
  0xfb   : > { %v745_v55 = vadd.f32 %v3112_v39, %v744_v54  ;;  %v3314_v56 = vpop.f32.mrb[10].mxu1  ;;  %3500 = vmatprep.subr.msk.bf16.mxu1 %vm859_vm1, %v3949_v49  ;;  %v3325_v9 = vpop.f32.mrb[8].mxu0 }
  0xfc   : > { %v756_v57 = vadd.f32 %v3314_v56, %v3112_v39  ;;  %v747_v58 = vpop.f32.mrb[11].mxu1  ;;  %v841_v11 = vadd.f32 %v3325_v9, %v3119_v1  ;;  %v832_v12 = vpop.f32.mrb[9].mxu0 }
  0xfd   : > { %v748_v59 = vadd.f32 %v3112_v39, %v747_v58  ;;  %v833_v14 = vadd.f32 %v3119_v1, %v832_v12  ;;  %v3326_v15 = vpop.f32.mrb[10].mxu0 }
  0xfe   : > { %v3959_v60 = vpack.c.bf16 %v756_v57, %v753_v53  ;;  %v844_v16 = vadd.f32 %v3326_v15, %v3119_v1  ;;  %v835_v17 = vpop.f32.mrb[11].mxu0 }
  0xff   : > { %v3961_v61 = vpack.c.bf16 %v748_v59, %v745_v55  ;;  %v836_v18 = vadd.f32 %v3119_v1, %v835_v17 }
 0x100   : > { %v931_v0 = vsel %vm859_vm1, %v3959_v60, 0  ;;  %v3985_v19 = vpack.c.bf16 %v844_v16, %v841_v11 }
 0x101   : > { %3501 = vmatprep.subr.msk.bf16.mxu0 %vm859_vm1, %v3961_v61  ;;  %v928_v63 = vsel %vm859_vm1, %v3961_v61, 0  ;;  %v3988_v20 = vpack.c.bf16 %v836_v18, %v833_v14 }
 0x102   : > { %3330 = vmatpush3.bf16.xpose.msra.mxu1 %v870_v62  ;;  %3336 = vmatpush3.bf16.xpose.msra.mxu0 %v928_v63 }
 0x103   : > { %3502 = vmatprep.subr.msk.bf16.mxu0 %vm859_vm1, %v3959_v60  ;;  %3343 = vmatprep.subr.bf16.mxu1 %v3982_v13 }
 0x109   : > { %3332 = vmatmul.mubr.msk.bf16.vlgmr.msra.gmra.mrb[12].mxu1 %vm859_vm1, %v3938_v37 }
 0x10a   : > { %3338 = vmatpush3.bf16.xpose.msra.mxu0 %v931_v0  ;;  %3344 = vmatpush3.bf16.msra.mxu1 %v3982_v13 }
 0x10b   : > { %3345 = vmatprep.subr.bf16.mxu1 %v3980_v10 }
 0x10e   : > { %3346 = vmatpush3.bf16.msra.mxu1 %v3980_v10 }
 0x10f   : > { %3351 = vmatprep.subr.bf16.mxu1 %v3988_v20 }
 0x111   : > { %3340 = vmatmul.mubr.msk.bf16.vlgmr.msra.gmra.mrb[12].mxu0 %vm859_vm1, %v3934_v32 }
 0x1dc   : > { %v3333_v21 = vpop.f32.mrb[12].mxu1 }
 0x1dd   : > { %v984_v22 = vmul.f32 0.35355338, %v3333_v21  ;;  %v906_v23 = vpop.f32.mrb[13].mxu1 }
 0x1de   : > { %v982_v24 = vmul.f32 0.35355338, %v906_v23  ;;  %v3334_v25 = vpop.f32.mrb[14].mxu1 }
 0x1df   : > { %v985_v26 = vmul.f32 0.35355338, %v3334_v25  ;;  %v909_v27 = vpop.f32.mrb[15].mxu1  ;;  %v996_v28 = vsel %vm593_vm0, %v984_v22, -inf }
 0x1e0   : > { %v983_v29 = vmul.f32 0.35355338, %v909_v27  ;;  %997 = vmax.xlane.f32.xlu1 %v996_v28  ;;  %v990_v30 = vsel %vm593_vm0, %v982_v24, -inf }
 0x1e1   : > { %991 = vmax.xlane.f32.xlu0 %v990_v30  ;;  %v999_v31 = vsel %vm593_vm0, %v985_v26, -inf }
 0x1e2   : > { %v993_v34 = vsel %vm593_vm0, %v983_v29, -inf }
 0x1e4   : > { %v3341_v33 = vpop.f32.mrb[12].mxu0  ;;  %1000 = vmax.xlane.f32.xlu1 %v999_v31 }
 0x1e5   : > { %v967_v36 = vpop.f32.mrb[13].mxu0  ;;  %994 = vmax.xlane.f32.xlu0 %v993_v34  ;;  %v988_v42 = vmul.f32 0.35355338, %v3341_v33 }
 0x1e6   : > { %v986_v38 = vmul.f32 0.35355338, %v967_v36  ;;  %v3342_v39 = vpop.f32.mrb[14].mxu0 }
 0x1e7   : > { %v970_v41 = vpop.f32.mrb[15].mxu0  ;;  %v989_v45 = vmul.f32 0.35355338, %v3342_v39  ;;  %v1008_v47 = vsel %vm593_vm0, %v988_v42, -inf }
 0x1e8   : > { %v3997_v43 = vmul.f32 0.35355338, %v970_v41  ;;  %v1002_v44 = vsel %vm593_vm0, %v986_v38, -inf }
 0x1e9   : > { %1003 = vmax.xlane.f32.xlu0 %v1002_v44  ;;  %v1011_v48 = vsel %vm593_vm0, %v989_v45, -inf }
 0x1ea   : > { %v1005_v46 = vsel %vm593_vm0, %v3997_v43, -inf }
 0x1eb   : > { %1006 = vmax.xlane.f32.xlu1 %v1005_v46 }
 0x1ed   : > { %1009 = vmax.xlane.f32.xlu0 %v1008_v47 }
 0x1ef   : > { %1012 = vmax.xlane.f32.xlu1 %v1011_v48 }
 0x26d   : > { %v998_v51 = vpop.xlane.xlu1 %997 }
 0x26e   : > { %v1016_v52 = vsub.f32 %v984_v22, %v998_v51  ;;  %v992_v53 = vpop.xlane.xlu0 %991 }
 0x26f   : > { %v1014_v54 = vsub.f32 %v982_v24, %v992_v53 }
 0x270   : > { %v1026_v55 = vmul.f32 1.442695, %v1016_v52 }
 0x271   : > { %v1022_v56 = vmul.f32 1.442695, %v1014_v54  ;;  %v1001_v57 = vpop.xlane.xlu1 %1000 }
 0x272   : > { %3603 = vpow2.f32 %v1026_v55  ;;  %v1017_v58 = vsub.f32 %v985_v26, %v1001_v57  ;;  %v995_v59 = vpop.xlane.xlu0 %994 }
 0x273   : > { %v1015_v62 = vsub.f32 %v983_v29, %v995_v59  ;;  %3605 = vpow2.f32 %v1022_v56 }
 0x274   : > { %v1028_v63 = vmul.f32 1.442695, %v1017_v58 }
 0x275   : > { %v1024_v0 = vmul.f32 1.442695, %v1015_v62 }
 0x276   : > { %3607 = vpow2.f32 %v1028_v63  ;;  %v1004_v1 = vpop.xlane.xlu0 %1003 }
 0x277   : > { %3609 = vpow2.f32 %v1024_v0  ;;  %v1018_v2 = vsub.f32 %v986_v38, %v1004_v1 }
 0x278   : > { %v1007_v23 = vpop.xlane.xlu1 %1006 }
 0x279   : > { %v1030_v6 = vmul.f32 1.442695, %v1018_v2  ;;  %v1019_v26 = vsub.f32 %v3997_v43, %v1007_v23 }
 0x27a   : > { %v1010_v3 = vpop.xlane.xlu0 %1009 }
 0x27b   : > { %v1020_v4 = vsub.f32 %v988_v42, %v1010_v3  ;;  %v1032_v28 = vmul.f32 1.442695, %v1019_v26 }
 0x27c   : > { %v3604_v5 = vpop.eup %3603  ;;  %v1013_v24 = vpop.xlane.xlu1 %1012 }
 0x27d   : > { %v1034_v7 = vmul.f32 1.442695, %v1020_v4  ;;  %v1044_v8 = vsel %vm593_vm0, %v3604_v5, 0.0  ;;  %v3606_v9 = vpop.eup %3605  ;;  %v1021_v25 = vsub.f32 %v989_v45, %v1013_v24 }
 0x27e   : > { %1045 = vadd.xlane.f32.xlu0 %v1044_v8  ;;  %v1038_v14 = vsel %vm593_vm0, %v3606_v9, 0.0 }
 0x27f   : > { %3611 = vpow2.f32 %v1034_v7  ;;  %v1036_v27 = vmul.f32 1.442695, %v1021_v25 }
 0x280   : > { %v3608_v11 = vpop.eup %3607  ;;  %3613 = vpow2.f32 %v1030_v6 }
 0x281   : > { %v1047_v12 = vsel %vm593_vm0, %v3608_v11, 0.0  ;;  %v3610_v15 = vpop.eup %3609  ;;  %3615 = vpow2.f32 %v1036_v27 }
 0x282   : > { %1048 = vadd.xlane.f32.xlu1 %v1047_v12  ;;  %1039 = vadd.xlane.f32.xlu0 %v1038_v14  ;;  %v1041_v16 = vsel %vm593_vm0, %v3610_v15, 0.0  ;;  %3617 = vpow2.f32 %v1032_v28 }
 0x286   : > { %1042 = vadd.xlane.f32.xlu1 %v1041_v16 }
 0x289   : > { %v4008_v17 = vpop.eup %3611 }
 0x28a   : > { %v1056_v18 = vsel %vm593_vm0, %v4008_v17, 0.0  ;;  %v4012_v21 = vpop.eup %3613 }
 0x28b   : > { %1057 = vadd.xlane.f32.xlu0 %v1056_v18  ;;  %v1050_v22 = vsel %vm593_vm0, %v4012_v21, 0.0  ;;  %v3616_v29 = vpop.eup %3615 }
 0x28c   : > { %v1059_v30 = vsel %vm593_vm0, %v3616_v29, 0.0  ;;  %v3618_v31 = vpop.eup %3617 }
 0x28d   : > { %v1053_v33 = vsel %vm593_vm0, %v3618_v31, 0.0 }
 0x28f   : > { %1051 = vadd.xlane.f32.xlu0 %v1050_v22 }
 0x297   : > { %1202 = vrot.lane.b32.xlu1 %v3949_v49, %s3779_s27 }
 0x29b   : > { %1273 = vrot.lane.b32.xlu1 %v3961_v61, %s3779_s27 }
 0x2a5   : > { %1200 = vrot.lane.b32.xlu0 %v3951_v50, %s3779_s27 }
 0x2a9   : > { %1196 = vrot.lane.b32.xlu0 %v3938_v37, %s3779_s27 }
 0x2ad   : > { %1267 = vrot.lane.b32.xlu0 %v3936_v35, %s3779_s27 }
 0x2bf   : > { %1060 = vadd.xlane.f32.xlu1 %v1059_v30 }
 0x2c3   : > { %1054 = vadd.xlane.f32.xlu1 %v1053_v33 }
 0x2d4   : > { %1194 = vrot.lane.b32.xlu1 %v3945_v40, %s3779_s27 }
 0x2d8   : > { %1275 = vrot.lane.b32.xlu1 %v3959_v60, %s3779_s27 }
 0x2dc   : > { %1269 = vrot.lane.b32.xlu1 %v3934_v32, %s3779_s27 }
 0x30b   : > { %v1046_v34 = vpop.xlane.xlu0 %1045 }
 0x30f   : > { %v1049_v36 = vpop.xlane.xlu1 %1048  ;;  %v1040_v38 = vpop.xlane.xlu0 %1039 }
 0x310   : > { %3619 = vrcp.f32 %v1049_v36 }
 0x311   : > { %3621 = vrcp.f32 %v1040_v38 }
 0x312   : > { %3623 = vrcp.f32 %v1046_v34 }
 0x313   : > { %v1043_v39 = vpop.xlane.xlu1 %1042 }
 0x314   : > { %3625 = vrcp.f32 %v1043_v39 }
 0x317   : > { %v1203_v56 = vpop.permute.xlu1 %1202 }
 0x318   : > { %v1058_v41 = vpop.xlane.xlu0 %1057  ;;  %v1214_v59 = vsel %vm859_vm1, %v1203_v56, 0 }
 0x31a   : > { %v3620_v42 = vpop.eup %3619 }
 0x31b   : > { %v3622_v43 = vpop.eup %3621  ;;  %v1073_v47 = vmul.f32 %v3620_v42, %v3608_v11  ;;  %v1274_v58 = vpop.permute.xlu1 %1273 }
 0x31c   : > { %v1052_v44 = vpop.xlane.xlu0 %1051  ;;  %v3624_v45 = vpop.eup %3623  ;;  %v1070_v48 = vmul.f32 %v3622_v43, %v3606_v9 }
 0x31d   : > { %v1072_v52 = vmul.f32 %v3624_v45, %v3604_v5 }
 0x31e   : > { %v3626_v46 = vpop.eup %3625 }
 0x31f   : > { %v1071_v51 = vmul.f32 %v3626_v46, %v3610_v15  ;;  %v1079_v57 = vpack.c.bf16 %v1073_v47, %v1072_v52  ;;  %v1284_v15 = vsel %vm859_vm1, %v1274_v58, 0 }
 0x320   : > { %v1201_v53 = vpop.permute.xlu0 %1200 }
 0x321   : > { %3503 = vmatprep.subr.msk.bf16.mxu0 %vm859_vm1, %v1201_v53  ;;  %v1211_v54 = vsel %vm859_vm1, %v1201_v53, 0  ;;  %v1078_v55 = vpack.c.bf16 %v1071_v51, %v1070_v48 }
 0x322   : > { %3360 = vmatpush3.bf16.xpose.msra.mxu0 %v1211_v54 }
 0x323   : > { %3347 = vmatprep.mubr.msk.bf16.mxu1 %vm593_vm0, %v1078_v55  ;;  %3504 = vmatprep.subr.msk.bf16.mxu0 %vm859_vm1, %v1203_v56 }
 0x324   : > { %3348 = vmatmul.mubr.msk.bf16.vlgmr.msra.gmra.mrb[16].mxu1 %vm593_vm0, %v1079_v57  ;;  %v1197_v1 = vpop.permute.xlu0 %1196 }
 0x325   : > { %3352 = vmatpush3.bf16.msra.mxu1 %v3988_v20 }
 0x326   : > { %3353 = vmatprep.subr.bf16.mxu1 %v3985_v19 }
 0x328   : > { %v1268_v14 = vpop.permute.xlu0 %1267 }
 0x329   : > { %3354 = vmatpush3.bf16.msra.mxu1 %v3985_v19 }
 0x32a   : > { %3505 = vmatprep.subr.msk.bf16.mxu1 %vm859_vm1, %v1274_v58  ;;  %3362 = vmatpush3.bf16.xpose.msra.mxu0 %v1214_v59 }
 0x34c   : > { %v1061_v62 = vpop.xlane.xlu1 %1060 }
 0x34d   : > { %3627 = vrcp.f32 %v1061_v62 }
 0x34e   : > { %3629 = vrcp.f32 %v1052_v44 }
 0x34f   : > { %3631 = vrcp.f32 %v1058_v41 }
 0x350   : > { %v1055_v63 = vpop.xlane.xlu1 %1054 }
 0x351   : > { %3633 = vrcp.f32 %v1055_v63 }
 0x354   : > { %v1195_v0 = vpop.permute.xlu1 %1194 }
 0x355   : > { %3363 = vmatprep.mubr.msk.bf16.mxu0 %vm859_vm1, %v1195_v0 }
 0x356   : > { %3364 = vmatmul.mubr.msk.bf16.vlgmr.msra.gmra.mrb[16].mxu0 %vm859_vm1, %v1197_v1 }
 0x357   : > { %v3628_v2 = vpop.eup %3627 }
 0x358   : > { %v3630_v3 = vpop.eup %3629  ;;  %v1077_v6 = vmul.f32 %v3628_v2, %v3616_v29  ;;  %v1276_v16 = vpop.permute.xlu1 %1275 }
 0x359   : > { %v3632_v4 = vpop.eup %3631  ;;  %v1074_v7 = vmul.f32 %v3630_v3, %v4012_v21  ;;  %v1287_v18 = vsel %vm859_vm1, %v1276_v16, 0 }
 0x35a   : > { %v1076_v9 = vmul.f32 %v3632_v4, %v4008_v17 }
 0x35b   : > { %v3634_v5 = vpop.eup %3633 }
 0x35c   : > { %v1075_v8 = vmul.f32 %v3634_v5, %v3618_v31  ;;  %v1081_v12 = vpack.c.bf16 %v1077_v6, %v1076_v9  ;;  %v1270_v21 = vpop.permute.xlu1 %1269 }
 0x35e   : > { %v1080_v11 = vpack.c.bf16 %v1075_v8, %v1074_v7 }
 0x360   : > { %3355 = vmatprep.mubr.msk.bf16.mxu1 %vm593_vm0, %v1080_v11 }
 0x361   : > { %3356 = vmatmul.mubr.msk.bf16.vlgmr.msra.gmra.mrb[20].mxu1 %vm593_vm0, %v1081_v12 }
 0x362   : > { %3368 = vmatpush3.bf16.xpose.msra.mxu1 %v1284_v15  ;;  %3371 = vmatprep.mubr.msk.bf16.mxu1 %vm859_vm1, %v1268_v14 }
 0x363   : > { %3506 = vmatprep.subr.msk.bf16.mxu1 %vm859_vm1, %v1276_v16 }
 0x36a   : > { %3370 = vmatpush3.bf16.xpose.msra.mxu1 %v1287_v18 }
 0x371   : > { %3372 = vmatmul.mubr.msk.bf16.vlgmr.msra.gmra.mrb[24].mxu1 %vm859_vm1, %v1270_v21 }
 0x3f7   : > { %v4056_v17 = vpop.f32.mrb[16].mxu1 }
 0x3f8   : > { %v4058_v22 = vpop.f32.mrb[17].mxu1 }
 0x3f9   : > { %v4060_v23 = vpop.f32.mrb[18].mxu1 }
 0x3fa   : > { %v4062_v24 = vpop.f32.mrb[19].mxu1 }
 0x429   : > { %v3365_v25 = vpop.f32.mrb[16].mxu0 }
 0x42a   : > { %v1250_v26 = vpop.f32.mrb[17].mxu0  ;;  %v1340_v30 = vmul.f32 0.35355338, %v3365_v25 }
 0x42b   : > { %v1338_v27 = vmul.f32 0.35355338, %v1250_v26  ;;  %v3366_v28 = vpop.f32.mrb[18].mxu0 }
 0x42c   : > { %v1253_v29 = vpop.f32.mrb[19].mxu0  ;;  %v1341_v36 = vmul.f32 0.35355338, %v3366_v28  ;;  %v1352_v38 = vsel %vm593_vm0, %v1340_v30, -inf }
 0x42d   : > { %v1339_v31 = vmul.f32 0.35355338, %v1253_v29  ;;  %v1346_v33 = vsel %vm593_vm0, %v1338_v27, -inf }
 0x42e   : > { %1347 = vmax.xlane.f32.xlu0 %v1346_v33  ;;  %v1355_v42 = vsel %vm593_vm0, %v1341_v36, -inf }
 0x42f   : > { %v1349_v34 = vsel %vm593_vm0, %v1339_v31, -inf }
 0x430   : > { %1350 = vmax.xlane.f32.xlu1 %v1349_v34 }
 0x432   : > { %1353 = vmax.xlane.f32.xlu0 %v1352_v38 }
 0x434   : > { %v4067_v39 = vpop.f32.mrb[20].mxu1 }
 0x435   : > { %v4069_v41 = vpop.f32.mrb[21].mxu1 }
 0x436   : > { %v4072_v43 = vpop.f32.mrb[22].mxu1  ;;  %1356 = vmax.xlane.f32.xlu0 %v1355_v42 }
 0x437   : > { %v4074_v44 = vpop.f32.mrb[23].mxu1 }
 0x444   : > { %v3373_v45 = vpop.f32.mrb[24].mxu1 }
 0x445   : > { %v1323_v46 = vpop.f32.mrb[25].mxu1  ;;  %v1344_v52 = vmul.f32 0.35355338, %v3373_v45 }
 0x446   : > { %v1342_v47 = vmul.f32 0.35355338, %v1323_v46  ;;  %v3374_v48 = vpop.f32.mrb[26].mxu1 }
 0x447   : > { %v1326_v51 = vpop.f32.mrb[27].mxu1  ;;  %v1345_v55 = vmul.f32 0.35355338, %v3374_v48  ;;  %v1364_v57 = vsel %vm593_vm0, %v1344_v52, -inf }
 0x448   : > { %v1343_v53 = vmul.f32 0.35355338, %v1326_v51  ;;  %v1358_v54 = vsel %vm593_vm0, %v1342_v47, -inf }
 0x449   : > { %1359 = vmax.xlane.f32.xlu0 %v1358_v54  ;;  %v1367_v58 = vsel %vm593_vm0, %v1345_v55, -inf }
 0x44a   : > { %v1361_v56 = vsel %vm593_vm0, %v1343_v53, -inf }
 0x44b   : > { %1362 = vmax.xlane.f32.xlu1 %v1361_v56 }
 0x44d   : > { %1365 = vmax.xlane.f32.xlu0 %v1364_v57 }
 0x44f   : > { %1368 = vmax.xlane.f32.xlu1 %v1367_v58 }
 0x4bb   : > { %v1348_v59 = vpop.xlane.xlu0 %1347 }
 0x4bc   : > { %v1370_v62 = vsub.f32 %v1338_v27, %v1348_v59 }
 0x4bd   : > { %v1351_v63 = vpop.xlane.xlu1 %1350 }
 0x4be   : > { %v1378_v0 = vmul.f32 1.442695, %v1370_v62  ;;  %v1371_v1 = vsub.f32 %v1339_v31, %v1351_v63 }
 0x4bf   : > { %v1354_v2 = vpop.xlane.xlu0 %1353 }
 0x4c0   : > { %3635 = vpow2.f32 %v1378_v0  ;;  %v1380_v3 = vmul.f32 1.442695, %v1371_v1  ;;  %v1372_v4 = vsub.f32 %v1340_v30, %v1354_v2 }
 0x4c2   : > { %3637 = vpow2.f32 %v1380_v3  ;;  %v1382_v5 = vmul.f32 1.442695, %v1372_v4 }
 0x4c3   : > { %v1357_v6 = vpop.xlane.xlu0 %1356 }
 0x4c4   : > { %3639 = vpow2.f32 %v1382_v5  ;;  %v1373_v7 = vsub.f32 %v1341_v36, %v1357_v6 }
 0x4c6   : > { %v1384_v8 = vmul.f32 1.442695, %v1373_v7 }
 0x4c8   : > { %3641 = vpow2.f32 %v1384_v8 }
 0x4ca   : > { %v4080_v9 = vpop.eup %3635 }
 0x4cb   : > { %v1394_v11 = vsel %vm593_vm0, %v4080_v9, 0.0 }
 0x4cc   : > { %v4084_v12 = vpop.eup %3637  ;;  %1395 = vadd.xlane.f32.xlu0 %v1394_v11 }
 0x4cd   : > { %v1397_v14 = vsel %vm593_vm0, %v4084_v12, 0.0 }
 0x4ce   : > { %v4088_v15 = vpop.eup %3639  ;;  %1398 = vadd.xlane.f32.xlu1 %v1397_v14 }
 0x4cf   : > { %v1400_v16 = vsel %vm593_vm0, %v4088_v15, 0.0 }
 0x4d0   : > { %1401 = vadd.xlane.f32.xlu0 %v1400_v16 }
 0x4d2   : > { %v4092_v18 = vpop.eup %3641 }
 0x4d3   : > { %v1403_v21 = vsel %vm593_vm0, %v4092_v18, 0.0 }
 0x4d4   : > { %1404 = vadd.xlane.f32.xlu1 %v1403_v21 }
 0x4d6   : > { %v1360_v25 = vpop.xlane.xlu0 %1359 }
 0x4d7   : > { %v1374_v29 = vsub.f32 %v1342_v47, %v1360_v25 }
 0x4d8   : > { %v1363_v28 = vpop.xlane.xlu1 %1362 }
 0x4d9   : > { %v1386_v31 = vmul.f32 1.442695, %v1374_v29  ;;  %v1375_v36 = vsub.f32 %v1343_v53, %v1363_v28 }
 0x4da   : > { %v1366_v26 = vpop.xlane.xlu0 %1365 }
 0x4db   : > { %v1376_v27 = vsub.f32 %v1344_v52, %v1366_v26  ;;  %v1388_v45 = vmul.f32 1.442695, %v1375_v36 }
 0x4dc   : > { %v1369_v33 = vpop.xlane.xlu1 %1368 }
 0x4dd   : > { %v1390_v30 = vmul.f32 1.442695, %v1376_v27  ;;  %v1377_v34 = vsub.f32 %v1345_v55, %v1369_v33 }
 0x4df   : > { %3643 = vpow2.f32 %v1390_v30  ;;  %v1392_v38 = vmul.f32 1.442695, %v1377_v34 }
 0x4e0   : > { %3645 = vpow2.f32 %v1386_v31 }
 0x4e1   : > { %3647 = vpow2.f32 %v1392_v38 }
 0x4e2   : > { %3649 = vpow2.f32 %v1388_v45 }
 0x4e5   : > { %1442 = vrot.lane.b32.xlu1 %v3980_v10, %s3779_s27 }
 0x4e6   : > { %1440 = vrot.lane.b32.xlu0 %v3982_v13, %s3779_s27 }
 0x4e9   : > { %1503 = vrot.lane.b32.xlu1 %v3988_v20, %s3779_s27  ;;  %v4108_v42 = vpop.eup %3643 }
 0x4ea   : > { %1568 = vrot.lane.b32.xlu0 %v3951_v50, %s3780_s0  ;;  %v1412_v46 = vsel %vm593_vm0, %v4108_v42, 0.0  ;;  %v4112_v48 = vpop.eup %3645 }
 0x4eb   : > { %v1406_v47 = vsel %vm593_vm0, %v4112_v48, 0.0  ;;  %v4116_v51 = vpop.eup %3647 }
 0x4ec   : > { %v1415_v52 = vsel %vm593_vm0, %v4116_v51, 0.0  ;;  %v4120_v53 = vpop.eup %3649 }
 0x4ed   : > { %1505 = vrot.lane.b32.xlu1 %v3985_v19, %s3779_s27  ;;  %v1409_v54 = vsel %vm593_vm0, %v4120_v53, 0.0 }
 0x4f1   : > { %1570 = vrot.lane.b32.xlu1 %v3949_v49, %s3780_s0 }
 0x509   : > { %1413 = vadd.xlane.f32.xlu0 %v1412_v46 }
 0x50d   : > { %1407 = vadd.xlane.f32.xlu0 %v1406_v47 }
 0x515   : > { %1416 = vadd.xlane.f32.xlu1 %v1415_v52 }
 0x519   : > { %1410 = vadd.xlane.f32.xlu1 %v1409_v54 }
 0x523   : > { %1637 = vrot.lane.b32.xlu0 %v3961_v61, %s3780_s0 }
 0x527   : > { %1566 = vrot.lane.b32.xlu0 %v3938_v37, %s3780_s0 }
 0x52a   : > { %1564 = vrot.lane.b32.xlu1 %v3945_v40, %s3780_s0 }
 0x52b   : > { %1633 = vrot.lane.b32.xlu0 %v3936_v35, %s3780_s0 }
 0x52e   : > { %1639 = vrot.lane.b32.xlu1 %v3959_v60, %s3780_s0 }
 0x532   : > { %1635 = vrot.lane.b32.xlu1 %v3934_v32, %s3780_s0 }
 0x559   : > { %v1396_v55 = vpop.xlane.xlu0 %1395 }
 0x55a   : > { %3651 = vrcp.f32 %v1396_v55 }
 0x55b   : > { %v1399_v56 = vpop.xlane.xlu1 %1398 }
 0x55c   : > { %3653 = vrcp.f32 %v1399_v56 }
 0x55d   : > { %v1402_v57 = vpop.xlane.xlu0 %1401 }
 0x55e   : > { %3655 = vrcp.f32 %v1402_v57 }
 0x561   : > { %v1405_v58 = vpop.xlane.xlu1 %1404  ;;  %v1441_v59 = vpop.permute.xlu0 %1440 }
 0x562   : > { %3657 = vrcp.f32 %v1405_v58  ;;  %3375 = vmatprep.subr.bf16.mxu0 %v1441_v59 }
 0x563   : > { %3376 = vmatpush3.bf16.msra.mxu0 %v1441_v59 }
 0x564   : > { %v3652_v62 = vpop.eup %3651 }
 0x565   : > { %v1443_v63 = vpop.permute.xlu1 %1442  ;;  %v1569_v1 = vpop.permute.xlu0 %1568  ;;  %v1426_v2 = vmul.f32 %v3652_v62, %v4080_v9 }
 0x566   : > { %v3654_v0 = vpop.eup %3653  ;;  %3377 = vmatprep.subr.bf16.mxu0 %v1443_v63 }
 0x567   : > { %3378 = vmatpush3.bf16.msra.mxu0 %v1443_v63  ;;  %v1427_v3 = vmul.f32 %v3654_v0, %v4084_v12  ;;  %v1579_v12 = vsel %vm859_vm1, %v1569_v1, 0 }
 0x568   : > { %3507 = vmatprep.subr.msk.bf16.mxu0 %vm859_vm1, %v1569_v1  ;;  %v3656_v6 = vpop.eup %3655 }
 0x569   : > { %v1504_v4 = vpop.permute.xlu1 %1503  ;;  %v1434_v5 = vpack.c.bf16 %v1427_v3, %v1426_v2  ;;  %v1428_v8 = vmul.f32 %v3656_v6, %v4088_v15 }
 0x56a   : > { %3383 = vmatprep.subr.bf16.mxu1 %v1504_v4 }
 0x56b   : > { %3379 = vmatprep.mubr.msk.bf16.mxu0 %vm593_vm0, %v1434_v5  ;;  %3384 = vmatpush3.bf16.msra.mxu1 %v1504_v4 }
 0x56c   : > { %v3658_v7 = vpop.eup %3657 }
 0x56d   : > { %v1429_v11 = vmul.f32 %v3658_v7, %v4092_v18  ;;  %v1506_v14 = vpop.permute.xlu1 %1505 }
 0x56e   : > { %3385 = vmatprep.subr.bf16.mxu1 %v1506_v14 }
 0x56f   : > { %3386 = vmatpush3.bf16.msra.mxu1 %v1506_v14  ;;  %v1435_v9 = vpack.c.bf16 %v1429_v11, %v1428_v8 }
 0x571   : > { %v1571_v16 = vpop.permute.xlu1 %1570  ;;  %3380 = vmatmul.mubr.msk.bf16.vlgmr.msra.gmra.mrb[20].mxu0 %vm593_vm0, %v1435_v9 }
 0x572   : > { %3392 = vmatpush3.bf16.xpose.msra.mxu0 %v1579_v12  ;;  %v1582_v21 = vsel %vm859_vm1, %v1571_v16, 0 }
 0x573   : > { %3508 = vmatprep.subr.msk.bf16.mxu0 %vm859_vm1, %v1571_v16 }
 0x57a   : > { %3394 = vmatpush3.bf16.xpose.msra.mxu0 %v1582_v21 }
 0x596   : > { %v1414_v25 = vpop.xlane.xlu0 %1413 }
 0x59a   : > { %v1408_v26 = vpop.xlane.xlu0 %1407 }
 0x59e   : > { %v1638_v15 = vpop.permute.xlu0 %1637 }
 0x59f   : > { %3509 = vmatprep.subr.msk.bf16.mxu1 %vm859_vm1, %v1638_v15  ;;  %v1648_v55 = vsel %vm859_vm1, %v1638_v15, 0 }
 0x5a2   : > { %v1417_v18 = vpop.xlane.xlu1 %1416  ;;  %v1567_v29 = vpop.permute.xlu0 %1566 }
 0x5a3   : > { %3659 = vrcp.f32 %v1417_v18 }
 0x5a4   : > { %3661 = vrcp.f32 %v1408_v26 }
 0x5a5   : > { %3663 = vrcp.f32 %v1414_v25 }
 0x5a6   : > { %v1411_v27 = vpop.xlane.xlu1 %1410  ;;  %v1634_v54 = vpop.permute.xlu0 %1633 }
 0x5a7   : > { %3665 = vrcp.f32 %v1411_v27 }
 0x5aa   : > { %v1565_v28 = vpop.permute.xlu1 %1564 }
 0x5ab   : > { %3395 = vmatprep.mubr.msk.bf16.mxu0 %vm859_vm1, %v1565_v28 }
 0x5ac   : > { %3396 = vmatmul.mubr.msk.bf16.vlgmr.msra.gmra.mrb[24].mxu0 %vm859_vm1, %v1567_v29 }
 0x5ad   : > { %v3660_v30 = vpop.eup %3659 }
 0x5ae   : > { %v3662_v31 = vpop.eup %3661  ;;  %v1433_v36 = vmul.f32 %v3660_v30, %v4116_v51  ;;  %v1640_v56 = vpop.permute.xlu1 %1639 }
 0x5af   : > { %v3664_v33 = vpop.eup %3663  ;;  %v1430_v38 = vmul.f32 %v3662_v31, %v4112_v48  ;;  %v1651_v48 = vsel %vm859_vm1, %v1640_v56, 0 }
 0x5b0   : > { %v1432_v46 = vmul.f32 %v3664_v33, %v4108_v42 }
 0x5b1   : > { %v3666_v34 = vpop.eup %3665 }
 0x5b2   : > { %v1431_v45 = vmul.f32 %v3666_v34, %v4120_v53  ;;  %v1437_v52 = vpack.c.bf16 %v1433_v36, %v1432_v46  ;;  %v1636_v51 = vpop.permute.xlu1 %1635 }
 0x5b4   : > { %v1436_v47 = vpack.c.bf16 %v1431_v45, %v1430_v38 }
 0x5b6   : > { %3387 = vmatprep.mubr.msk.bf16.mxu1 %vm593_vm0, %v1436_v47 }
 0x5b7   : > { %3388 = vmatmul.mubr.msk.bf16.vlgmr.msra.gmra.mrb[28].mxu1 %vm593_vm0, %v1437_v52 }
 0x5b8   : > { %3400 = vmatpush3.bf16.xpose.msra.mxu1 %v1648_v55  ;;  %3403 = vmatprep.mubr.msk.bf16.mxu1 %vm859_vm1, %v1634_v54 }
 0x5b9   : > { %3510 = vmatprep.subr.msk.bf16.mxu1 %vm859_vm1, %v1640_v56 }
 0x5c0   : > { %3402 = vmatpush3.bf16.xpose.msra.mxu1 %v1651_v48 }
 0x5c7   : > { %3404 = vmatmul.mubr.msk.bf16.vlgmr.msra.gmra.mrb[32].mxu1 %vm859_vm1, %v1636_v51 }
 0x644   : > { %v4160_v42 = vpop.f32.mrb[20].mxu0 }
 0x645   : > { %v4162_v53 = vpop.f32.mrb[21].mxu0 }
 0x646   : > { %v4164_v57 = vpop.f32.mrb[22].mxu0 }
 0x647   : > { %v3534_v58 = vpack.i.bf16 %v4164_v57, %v4160_v42  ;;  %v4168_v59 = vpop.f32.mrb[23].mxu0 }
 0x648   : > { %v3529_v62 = vpack.i.bf16 %v4168_v59, %v4162_v53 }
 0x67f   : > { %v3397_v63 = vpop.f32.mrb[24].mxu0 }
 0x680   : > { %v1618_v0 = vpop.f32.mrb[25].mxu0  ;;  %v1704_v4 = vmul.f32 0.35355338, %v3397_v63 }
 0x681   : > { %v1702_v1 = vmul.f32 0.35355338, %v1618_v0  ;;  %v3398_v2 = vpop.f32.mrb[26].mxu0 }
 0x682   : > { %v1621_v3 = vpop.f32.mrb[27].mxu0  ;;  %v1705_v8 = vmul.f32 0.35355338, %v3398_v2  ;;  %v1716_v11 = vsel %vm593_vm0, %v1704_v4, -inf }
 0x683   : > { %v1703_v5 = vmul.f32 0.35355338, %v1621_v3  ;;  %v1710_v6 = vsel %vm593_vm0, %v1702_v1, -inf }
 0x684   : > { %1711 = vmax.xlane.f32.xlu0 %v1710_v6  ;;  %v1719_v16 = vsel %vm593_vm0, %v1705_v8, -inf }
 0x685   : > { %v1713_v7 = vsel %vm593_vm0, %v1703_v5, -inf }
 0x686   : > { %1714 = vmax.xlane.f32.xlu1 %v1713_v7 }
 0x688   : > { %1717 = vmax.xlane.f32.xlu0 %v1716_v11 }
 0x68a   : > { %v4175_v14 = vpop.f32.mrb[28].mxu1 }
 0x68b   : > { %v4177_v9 = vpop.f32.mrb[29].mxu1 }
 0x68c   : > { %v4180_v12 = vpop.f32.mrb[30].mxu1  ;;  %1720 = vmax.xlane.f32.xlu0 %v1719_v16 }
 0x68d   : > { %v3564_v21 = vpack.i.bf16 %v4180_v12, %v4175_v14  ;;  %v4184_v25 = vpop.f32.mrb[31].mxu1 }
 0x68e   : > { %v3559_v26 = vpack.i.bf16 %v4184_v25, %v4177_v9 }
 0x69a   : > { %v3405_v15 = vpop.f32.mrb[32].mxu1 }
 0x69b   : > { %v1687_v18 = vpop.f32.mrb[33].mxu1  ;;  %v1708_v30 = vmul.f32 0.35355338, %v3405_v15 }
 0x69c   : > { %v1706_v27 = vmul.f32 0.35355338, %v1687_v18  ;;  %v3406_v28 = vpop.f32.mrb[34].mxu1 }
 0x69d   : > { %v1690_v29 = vpop.f32.mrb[35].mxu1  ;;  %v1709_v34 = vmul.f32 0.35355338, %v3406_v28  ;;  %v1728_v38 = vsel %vm593_vm0, %v1708_v30, -inf }
 0x69e   : > { %v1707_v31 = vmul.f32 0.35355338, %v1690_v29  ;;  %v1722_v33 = vsel %vm593_vm0, %v1706_v27, -inf }
 0x69f   : > { %1723 = vmax.xlane.f32.xlu0 %v1722_v33  ;;  %v1731_v45 = vsel %vm593_vm0, %v1709_v34, -inf }
 0x6a0   : > { %v1725_v36 = vsel %vm593_vm0, %v1707_v31, -inf }
 0x6a1   : > { %1726 = vmax.xlane.f32.xlu1 %v1725_v36 }
 0x6a3   : > { %1729 = vmax.xlane.f32.xlu0 %v1728_v38 }
 0x6a5   : > { %1732 = vmax.xlane.f32.xlu1 %v1731_v45 }
 0x711   : > { %v1712_v46 = vpop.xlane.xlu0 %1711 }
 0x712   : > { %v1734_v47 = vsub.f32 %v1702_v1, %v1712_v46 }
 0x713   : > { %v1715_v52 = vpop.xlane.xlu1 %1714 }
 0x714   : > { %v1742_v54 = vmul.f32 1.442695, %v1734_v47  ;;  %v1735_v55 = vsub.f32 %v1703_v5, %v1715_v52 }
 0x715   : > { %v1718_v56 = vpop.xlane.xlu0 %1717 }
 0x716   : > { %3667 = vpow2.f32 %v1742_v54  ;;  %v1744_v48 = vmul.f32 1.442695, %v1735_v55  ;;  %v1736_v51 = vsub.f32 %v1704_v4, %v1718_v56 }
 0x718   : > { %3669 = vpow2.f32 %v1744_v48  ;;  %v1746_v63 = vmul.f32 1.442695, %v1736_v51 }
 0x719   : > { %v1721_v0 = vpop.xlane.xlu0 %1720 }
 0x71a   : > { %3671 = vpow2.f32 %v1746_v63  ;;  %v1737_v2 = vsub.f32 %v1705_v8, %v1721_v0 }
 0x71c   : > { %v1748_v3 = vmul.f32 1.442695, %v1737_v2 }
 0x71e   : > { %3673 = vpow2.f32 %v1748_v3 }
 0x720   : > { %v4192_v6 = vpop.eup %3667 }
 0x721   : > { %v1758_v7 = vsel %vm593_vm0, %v4192_v6, 0.0 }
 0x722   : > { %v4196_v1 = vpop.eup %3669  ;;  %1759 = vadd.xlane.f32.xlu0 %v1758_v7 }
 0x723   : > { %v1761_v5 = vsel %vm593_vm0, %v4196_v1, 0.0 }
 0x724   : > { %v4200_v11 = vpop.eup %3671  ;;  %1762 = vadd.xlane.f32.xlu1 %v1761_v5 }
 0x725   : > { %v1764_v4 = vsel %vm593_vm0, %v4200_v11, 0.0 }
 0x726   : > { %1765 = vadd.xlane.f32.xlu0 %v1764_v4 }
 0x728   : > { %v4204_v8 = vpop.eup %3673 }
 0x729   : > { %v1767_v16 = vsel %vm593_vm0, %v4204_v8, 0.0 }
 0x72a   : > { %1768 = vadd.xlane.f32.xlu1 %v1767_v16 }
 0x72c   : > { %v1724_v15 = vpop.xlane.xlu0 %1723 }
 0x72d   : > { %v1738_v33 = vsub.f32 %v1706_v27, %v1724_v15 }
 0x72e   : > { %v1727_v29 = vpop.xlane.xlu1 %1726 }
 0x72f   : > { %v1750_v38 = vmul.f32 1.442695, %v1738_v33  ;;  %v1739_v47 = vsub.f32 %v1707_v31, %v1727_v29 }
 0x730   : > { %v1730_v18 = vpop.xlane.xlu0 %1729 }
 0x731   : > { %v1740_v28 = vsub.f32 %v1708_v30, %v1730_v18 }
 0x732   : > { %v1733_v45 = vpop.xlane.xlu1 %1732 }
 0x733   : > { %v1754_v36 = vmul.f32 1.442695, %v1740_v28  ;;  %v1741_v46 = vsub.f32 %v1709_v34, %v1733_v45 }
 0x735   : > { %3675 = vpow2.f32 %v1754_v36  ;;  %v1756_v52 = vmul.f32 1.442695, %v1741_v46 }
 0x736   : > { %3677 = vpow2.f32 %v1750_v38 }
 0x737   : > { %3679 = vpow2.f32 %v1756_v52 }
 0x73b   : > { %1804 = vrot.lane.b32.xlu1 %v3980_v10, %s3780_s0 }
 0x73c   : > { %1802 = vrot.lane.b32.xlu0 %v3982_v13, %s3780_s0 }
 0x73f   : > { %1863 = vrot.lane.b32.xlu1 %v3988_v20, %s3780_s0  ;;  %v4220_v54 = vpop.eup %3675 }
 0x740   : > { %1928 = vrot.lane.b32.xlu0 %v3951_v50, %s3781_s30  ;;  %v1752_v50 = vmul.f32 1.442695, %v1739_v47  ;;  %v1776_v55 = vsel %vm593_vm0, %v4220_v54, 0.0  ;;  %v4224_v56 = vpop.eup %3677 }
 0x741   : > { %v4228_v27 = vpop.eup %3679 }
 0x742   : > { %3681 = vpow2.f32 %v1752_v50  ;;  %v1779_v30 = vsel %vm593_vm0, %v4228_v27, 0.0 }
 0x743   : > { %1865 = vrot.lane.b32.xlu1 %v3985_v19, %s3780_s0 }
 0x747   : > { %1930 = vrot.lane.b32.xlu1 %v3949_v49, %s3781_s30  ;;  %v1770_v49 = vsel %vm593_vm0, %v4224_v56, 0.0 }
 0x74c   : > { %v4232_v31 = vpop.eup %3681 }
 0x74d   : > { %v1773_v34 = vsel %vm593_vm0, %v4232_v31, 0.0 }
 0x75f   : > { %1777 = vadd.xlane.f32.xlu0 %v1776_v55 }
 0x763   : > { %1771 = vadd.xlane.f32.xlu0 %v1770_v49 }
 0x76b   : > { %1780 = vadd.xlane.f32.xlu1 %v1779_v30 }
 0x76f   : > { %1774 = vadd.xlane.f32.xlu1 %v1773_v34 }
 0x779   : > { %1997 = vrot.lane.b32.xlu0 %v3961_v61, %s3781_s30 }
 0x77d   : > { %1926 = vrot.lane.b32.xlu0 %v3938_v37, %s3781_s30 }
 0x780   : > { %1924 = vrot.lane.b32.xlu1 %v3945_v40, %s3781_s30 }
 0x781   : > { %1993 = vrot.lane.b32.xlu0 %v3936_v35, %s3781_s30 }
 0x784   : > { %1999 = vrot.lane.b32.xlu1 %v3959_v60, %s3781_s30 }
 0x788   : > { %1995 = vrot.lane.b32.xlu1 %v3934_v32, %s3781_s30 }
 0x7af   : > { %v1760_v48 = vpop.xlane.xlu0 %1759 }
 0x7b0   : > { %3683 = vrcp.f32 %v1760_v48 }
 0x7b1   : > { %v1763_v51 = vpop.xlane.xlu1 %1762 }
 0x7b2   : > { %3685 = vrcp.f32 %v1763_v51 }
 0x7b3   : > { %v1766_v61 = vpop.xlane.xlu0 %1765 }
 0x7b4   : > { %3687 = vrcp.f32 %v1766_v61 }
 0x7b7   : > { %v1769_v63 = vpop.xlane.xlu1 %1768  ;;  %v1803_v37 = vpop.permute.xlu0 %1802 }
 0x7b8   : > { %3689 = vrcp.f32 %v1769_v63  ;;  %3407 = vmatprep.subr.bf16.mxu0 %v1803_v37 }
 0x7b9   : > { %3408 = vmatpush3.bf16.msra.mxu0 %v1803_v37 }
 0x7ba   : > { %v3684_v40 = vpop.eup %3683 }
 0x7bb   : > { %v1805_v0 = vpop.permute.xlu1 %1804  ;;  %v1929_v2 = vpop.permute.xlu0 %1928  ;;  %v1790_v60 = vmul.f32 %v3684_v40, %v4192_v6 }
 0x7bc   : > { %v3686_v35 = vpop.eup %3685  ;;  %3409 = vmatprep.subr.bf16.mxu0 %v1805_v0 }
 0x7bd   : > { %3410 = vmatpush3.bf16.msra.mxu0 %v1805_v0  ;;  %v1791_v32 = vmul.f32 %v3686_v35, %v4196_v1  ;;  %v1939_v1 = vsel %vm859_vm1, %v1929_v2, 0 }
 0x7be   : > { %3511 = vmatprep.subr.msk.bf16.mxu0 %vm859_vm1, %v1929_v2  ;;  %v3688_v5 = vpop.eup %3687 }
 0x7bf   : > { %v1864_v3 = vpop.permute.xlu1 %1863  ;;  %v1798_v7 = vpack.c.bf16 %v1791_v32, %v1790_v60  ;;  %v1792_v16 = vmul.f32 %v3688_v5, %v4200_v11 }
 0x7c0   : > { %3415 = vmatprep.subr.bf16.mxu1 %v1864_v3 }
 0x7c1   : > { %3411 = vmatprep.mubr.msk.bf16.mxu0 %vm593_vm0, %v1798_v7  ;;  %3416 = vmatpush3.bf16.msra.mxu1 %v1864_v3 }
 0x7c2   : > { %v3690_v4 = vpop.eup %3689 }
 0x7c3   : > { %v1793_v15 = vmul.f32 %v3690_v4, %v4204_v8  ;;  %v1866_v18 = vpop.permute.xlu1 %1865 }
 0x7c4   : > { %3417 = vmatprep.subr.bf16.mxu1 %v1866_v18 }
 0x7c5   : > { %3418 = vmatpush3.bf16.msra.mxu1 %v1866_v18  ;;  %v1799_v6 = vpack.c.bf16 %v1793_v15, %v1792_v16 }
 0x7c7   : > { %v1931_v28 = vpop.permute.xlu1 %1930  ;;  %3412 = vmatmul.mubr.msk.bf16.vlgmr.msra.gmra.mrb[28].mxu0 %vm593_vm0, %v1799_v6 }
 0x7c8   : > { %3424 = vmatpush3.bf16.xpose.msra.mxu0 %v1939_v1  ;;  %v1942_v29 = vsel %vm859_vm1, %v1931_v28, 0 }
 0x7c9   : > { %3512 = vmatprep.subr.msk.bf16.mxu0 %vm859_vm1, %v1931_v28 }
 0x7d0   : > { %3426 = vmatpush3.bf16.xpose.msra.mxu0 %v1942_v29 }
 0x7ec   : > { %v1778_v33 = vpop.xlane.xlu0 %1777 }
 0x7f0   : > { %v1772_v36 = vpop.xlane.xlu0 %1771 }
 0x7f4   : > { %v1998_v11 = vpop.permute.xlu0 %1997 }
 0x7f5   : > { %3513 = vmatprep.subr.msk.bf16.mxu1 %vm859_vm1, %v1998_v11  ;;  %v2008_v63 = vsel %vm859_vm1, %v1998_v11, 0 }
 0x7f8   : > { %v1781_v8 = vpop.xlane.xlu1 %1780  ;;  %v1927_v46 = vpop.permute.xlu0 %1926 }
 0x7f9   : > { %3691 = vrcp.f32 %v1781_v8 }
 0x7fa   : > { %3693 = vrcp.f32 %v1772_v36 }
 0x7fb   : > { %3695 = vrcp.f32 %v1778_v33 }
 0x7fc   : > { %v1775_v38 = vpop.xlane.xlu1 %1774  ;;  %v1994_v37 = vpop.permute.xlu0 %1993 }
 0x7fd   : > { %3697 = vrcp.f32 %v1775_v38 }
 0x800   : > { %v1925_v45 = vpop.permute.xlu1 %1924 }
 0x801   : > { %3427 = vmatprep.mubr.msk.bf16.mxu0 %vm859_vm1, %v1925_v45 }
 0x802   : > { %3428 = vmatmul.mubr.msk.bf16.vlgmr.msra.gmra.mrb[32].mxu0 %vm859_vm1, %v1927_v46 }
 0x803   : > { %v3692_v47 = vpop.eup %3691 }
 0x804   : > { %v3694_v52 = vpop.eup %3693  ;;  %v1797_v49 = vmul.f32 %v3692_v47, %v4228_v27  ;;  %v2000_v40 = vpop.permute.xlu1 %1999 }
 0x805   : > { %v3696_v50 = vpop.eup %3695  ;;  %v1794_v30 = vmul.f32 %v3694_v52, %v4224_v56  ;;  %v2011_v56 = vsel %vm859_vm1, %v2000_v40, 0 }
 0x806   : > { %v1796_v48 = vmul.f32 %v3696_v50, %v4220_v54 }
 0x807   : > { %v3698_v55 = vpop.eup %3697 }
 0x808   : > { %v1795_v34 = vmul.f32 %v3698_v55, %v4232_v31  ;;  %v1801_v61 = vpack.c.bf16 %v1797_v49, %v1796_v48  ;;  %v1996_v27 = vpop.permute.xlu1 %1995 }
 0x80a   : > { %v1800_v51 = vpack.c.bf16 %v1795_v34, %v1794_v30 }
 0x80c   : > { %3419 = vmatprep.mubr.msk.bf16.mxu1 %vm593_vm0, %v1800_v51 }
 0x80d   : > { %3420 = vmatmul.mubr.msk.bf16.vlgmr.msra.gmra.mrb[36].mxu1 %vm593_vm0, %v1801_v61 }
 0x80e   : > { %3432 = vmatpush3.bf16.xpose.msra.mxu1 %v2008_v63  ;;  %3435 = vmatprep.mubr.msk.bf16.mxu1 %vm859_vm1, %v1994_v37 }
 0x80f   : > { %3514 = vmatprep.subr.msk.bf16.mxu1 %vm859_vm1, %v2000_v40 }
 0x816   : > { %3434 = vmatpush3.bf16.xpose.msra.mxu1 %v2011_v56 }
 0x81d   : > { %3436 = vmatmul.mubr.msk.bf16.vlgmr.msra.gmra.mrb[40].mxu1 %vm859_vm1, %v1996_v27 }
 0x89a   : > { %v4272_v54 = vpop.f32.mrb[28].mxu0 }
 0x89b   : > { %v4274_v31 = vpop.f32.mrb[29].mxu0 }
 0x89c   : > { %v4276_v0 = vpop.f32.mrb[30].mxu0 }
 0x89d   : > { %v3544_v35 = vpack.i.bf16 %v4276_v0, %v4272_v54  ;;  %v4280_v2 = vpop.f32.mrb[31].mxu0 }
 0x89e   : > { %v3539_v60 = vpack.i.bf16 %v4280_v2, %v4274_v31 }
 0x8d5   : > { %v3429_v32 = vpop.f32.mrb[32].mxu0 }
 0x8d6   : > { %v1978_v3 = vpop.f32.mrb[33].mxu0  ;;  %v2064_v16 = vmul.f32 0.35355338, %v3429_v32 }
 0x8d7   : > { %v2062_v7 = vmul.f32 0.35355338, %v1978_v3  ;;  %v3430_v5 = vpop.f32.mrb[34].mxu0 }
 0x8d8   : > { %v1981_v4 = vpop.f32.mrb[35].mxu0  ;;  %v2065_v1 = vmul.f32 0.35355338, %v3430_v5  ;;  %v2076_v28 = vsel %vm593_vm0, %v2064_v16, -inf }
 0x8d9   : > { %v2063_v15 = vmul.f32 0.35355338, %v1981_v4  ;;  %v2070_v18 = vsel %vm593_vm0, %v2062_v7, -inf }
 0x8da   : > { %2071 = vmax.xlane.f32.xlu0 %v2070_v18  ;;  %v2079_v36 = vsel %vm593_vm0, %v2065_v1, -inf }
 0x8db   : > { %v2073_v6 = vsel %vm593_vm0, %v2063_v15, -inf }
 0x8dc   : > { %2074 = vmax.xlane.f32.xlu1 %v2073_v6 }
 0x8de   : > { %2077 = vmax.xlane.f32.xlu0 %v2076_v28 }
 0x8e0   : > { %v4287_v29 = vpop.f32.mrb[36].mxu1 }
 0x8e1   : > { %v4289_v33 = vpop.f32.mrb[37].mxu1 }
 0x8e2   : > { %v4292_v11 = vpop.f32.mrb[38].mxu1  ;;  %2080 = vmax.xlane.f32.xlu0 %v2079_v36 }
 0x8e3   : > { %v3574_v8 = vpack.i.bf16 %v4292_v11, %v4287_v29  ;;  %v4296_v38 = vpop.f32.mrb[39].mxu1 }
 0x8e4   : > { %v3569_v45 = vpack.i.bf16 %v4296_v38, %v4289_v33 }
 0x8f0   : > { %v3437_v46 = vpop.f32.mrb[40].mxu1 }
 0x8f1   : > { %v2047_v47 = vpop.f32.mrb[41].mxu1  ;;  %v2068_v49 = vmul.f32 0.35355338, %v3437_v46 }
 0x8f2   : > { %v2066_v52 = vmul.f32 0.35355338, %v2047_v47  ;;  %v3438_v50 = vpop.f32.mrb[42].mxu1 }
 0x8f3   : > { %v2050_v55 = vpop.f32.mrb[43].mxu1  ;;  %v2069_v48 = vmul.f32 0.35355338, %v3438_v50  ;;  %v2088_v61 = vsel %vm593_vm0, %v2068_v49, -inf }
 0x8f4   : > { %v2067_v30 = vmul.f32 0.35355338, %v2050_v55  ;;  %v2082_v34 = vsel %vm593_vm0, %v2066_v52, -inf }
 0x8f5   : > { %2083 = vmax.xlane.f32.xlu0 %v2082_v34  ;;  %v2091_v63 = vsel %vm593_vm0, %v2069_v48, -inf }
 0x8f6   : > { %v2085_v51 = vsel %vm593_vm0, %v2067_v30, -inf }
 0x8f7   : > { %2086 = vmax.xlane.f32.xlu1 %v2085_v51 }
 0x8f9   : > { %2089 = vmax.xlane.f32.xlu0 %v2088_v61 }
 0x8fb   : > { %2092 = vmax.xlane.f32.xlu1 %v2091_v63 }
 0x967   : > { %v2072_v37 = vpop.xlane.xlu0 %2071 }
 0x968   : > { %v2094_v40 = vsub.f32 %v2062_v7, %v2072_v37 }
 0x969   : > { %v2075_v56 = vpop.xlane.xlu1 %2074 }
 0x96a   : > { %v2102_v27 = vmul.f32 1.442695, %v2094_v40  ;;  %v2095_v32 = vsub.f32 %v2063_v15, %v2075_v56 }
 0x96b   : > { %v2078_v3 = vpop.xlane.xlu0 %2077 }
 0x96c   : > { %3699 = vpow2.f32 %v2102_v27  ;;  %v2104_v5 = vmul.f32 1.442695, %v2095_v32  ;;  %v2096_v4 = vsub.f32 %v2064_v16, %v2078_v3 }
 0x96e   : > { %3701 = vpow2.f32 %v2104_v5  ;;  %v2106_v18 = vmul.f32 1.442695, %v2096_v4 }
 0x96f   : > { %v2081_v6 = vpop.xlane.xlu0 %2080 }
 0x970   : > { %3703 = vpow2.f32 %v2106_v18  ;;  %v2097_v28 = vsub.f32 %v2065_v1, %v2081_v6 }
 0x972   : > { %v2108_v36 = vmul.f32 1.442695, %v2097_v28 }
 0x974   : > { %3705 = vpow2.f32 %v2108_v36 }
 0x976   : > { %v3700_v46 = vpop.eup %3699 }
 0x977   : > { %v2118_v47 = vsel %vm593_vm0, %v3700_v46, 0.0 }
 0x978   : > { %v3702_v50 = vpop.eup %3701  ;;  %2119 = vadd.xlane.f32.xlu0 %v2118_v47 }
 0x979   : > { %v2121_v7 = vsel %vm593_vm0, %v3702_v50, 0.0 }
 0x97a   : > { %v4306_v55 = vpop.eup %3703  ;;  %2122 = vadd.xlane.f32.xlu1 %v2121_v7 }
 0x97b   : > { %v2124_v16 = vsel %vm593_vm0, %v4306_v55, 0.0 }
 0x97c   : > { %2125 = vadd.xlane.f32.xlu0 %v2124_v16 }
 0x97e   : > { %v4310_v15 = vpop.eup %3705 }
 0x97f   : > { %v2127_v1 = vsel %vm593_vm0, %v4310_v15, 0.0 }
 0x980   : > { %2128 = vadd.xlane.f32.xlu1 %v2127_v1 }
 0x982   : > { %v2084_v34 = vpop.xlane.xlu0 %2083 }
 0x983   : > { %v2098_v51 = vsub.f32 %v2066_v52, %v2084_v34 }
 0x984   : > { %v2087_v52 = vpop.xlane.xlu1 %2086 }
 0x985   : > { %v2110_v37 = vmul.f32 1.442695, %v2098_v51  ;;  %v2099_v4 = vsub.f32 %v2067_v30, %v2087_v52 }
 0x986   : > { %v2090_v61 = vpop.xlane.xlu0 %2089 }
 0x987   : > { %v2100_v63 = vsub.f32 %v2068_v49, %v2090_v61  ;;  %v2112_v18 = vmul.f32 1.442695, %v2099_v4 }
 0x988   : > { %v2093_v3 = vpop.xlane.xlu1 %2092 }
 0x989   : > { %v2114_v40 = vmul.f32 1.442695, %v2100_v63  ;;  %v2101_v5 = vsub.f32 %v2069_v48, %v2093_v3  ;;  %v3596_v3 = vld [vmem:[%s4636_s7 + $0x8] sm:$0xff]  }
 0x98b   : > { %3707 = vpow2.f32 %v2114_v40 }
 0x98c   : > { %3709 = vpow2.f32 %v2110_v37 }
 0x991   : > { %2164 = vrot.lane.b32.xlu1 %v3980_v10, %s3781_s30  ;;  %v2116_v10 = vmul.f32 1.442695, %v2101_v5 }
 0x993   : > { %3711 = vpow2.f32 %v2116_v10 }
 0x994   : > { %3713 = vpow2.f32 %v2112_v18 }
 0x995   : > { %v4316_v56 = vpop.eup %3707  ;;  %2223 = vrot.lane.b32.xlu1 %v3988_v20, %s3781_s30 }
 0x996   : > { %v2136_v27 = vsel %vm593_vm0, %v4316_v56, 0.0  ;;  %v4322_v32 = vpop.eup %3709 }
 0x997   : > { %2137 = vadd.xlane.f32.xlu0 %v2136_v27  ;;  %v2130_v49 = vsel %vm593_vm0, %v4322_v32, 0.0 }
 0x99b   : > { %2131 = vadd.xlane.f32.xlu0 %v2130_v49  ;;  %v3595_v49 = vld [vmem:[%s4636_s7] sm:$0xff]  }
 0x99d   : > { %v3712_v20 = vpop.eup %3711 }
 0x99e   : > { %v2139_v6 = vsel %vm593_vm0, %v3712_v20, 0.0  ;;  %v3714_v28 = vpop.eup %3713 }
 0x99f   : > { %v2133_v30 = vsel %vm593_vm0, %v3714_v28, 0.0 }
 0x9b1   : > { %2162 = vrot.lane.b32.xlu0 %v3982_v13, %s3781_s30 }
 0x9b5   : > { %3530 = vrot.lane.b32.xlu0 %v3529_v62, %s3782_s18 }
 0x9b9   : > { %3540 = vrot.lane.b32.xlu0 %v3539_v60, %s3783_s19  ;;  %2140 = vadd.xlane.f32.xlu1 %v2139_v6 }
 0x9bd   : > { %2134 = vadd.xlane.f32.xlu1 %v2133_v30 }
 0x9ce   : > { %2225 = vrot.lane.b32.xlu1 %v3985_v19, %s3781_s30 }
 0x9d2   : > { %3535 = vrot.lane.b32.xlu1 %v3534_v58, %s3782_s18 }
 0x9d6   : > { %3545 = vrot.lane.b32.xlu1 %v3544_v35, %s3783_s19 }
 0xa05   : > { %v2120_v13 = vpop.xlane.xlu0 %2119 }
 0xa06   : > { %3715 = vrcp.f32 %v2120_v13 }
 0xa07   : > { %v2123_v53 = vpop.xlane.xlu1 %2122 }
 0xa08   : > { %3717 = vrcp.f32 %v2123_v53 }
 0xa09   : > { %v2126_v42 = vpop.xlane.xlu0 %2125 }
 0xa0d   : > { %v2129_v59 = vpop.xlane.xlu1 %2128 }
 0xa0e   : > { %3719 = vrcp.f32 %v2129_v59 }
 0xa0f   : > { %3721 = vrcp.f32 %v2126_v42 }
 0xa10   : > { %v3716_v62 = vpop.eup %3715 }
 0xa11   : > { %v2165_v31 = vpop.permute.xlu1 %2164  ;;  %v2150_v60 = vmul.f32 %v3716_v62, %v3700_v46 }
 0xa12   : > { %v3718_v2 = vpop.eup %3717 }
 0xa13   : > { %v2151_v19 = vmul.f32 %v3718_v2, %v3702_v50 }
 0xa15   : > { %v2224_v48 = vpop.permute.xlu1 %2223  ;;  %v2158_v36 = vpack.c.bf16 %v2151_v19, %v2150_v60 }
 0xa16   : > { %3447 = vmatprep.subr.bf16.mxu1 %v2224_v48 }
 0xa17   : > { %3443 = vmatprep.mubr.msk.bf16.mxu0 %vm593_vm0, %v2158_v36  ;;  %3448 = vmatpush3.bf16.msra.mxu1 %v2224_v48 }
 0xa18   : > { %v3720_v54 = vpop.eup %3719 }
 0xa19   : > { %v3722_v35 = vpop.eup %3721  ;;  %v2153_v47 = vmul.f32 %v3720_v54, %v4310_v15 }
 0xa1a   : > { %v2152_v46 = vmul.f32 %v3722_v35, %v4306_v55 }
 0xa1c   : > { %v2159_v50 = vpack.c.bf16 %v2153_v47, %v2152_v46 }
 0xa24   : > { %v2138_v57 = vpop.xlane.xlu0 %2137 }
 0xa28   : > { %v2132_v58 = vpop.xlane.xlu0 %2131 }
 0xa2c   : > { %v2163_v0 = vpop.permute.xlu0 %2162 }
 0xa2d   : > { %3439 = vmatprep.subr.bf16.mxu0 %v2163_v0 }
 0xa2e   : > { %3440 = vmatpush3.bf16.msra.mxu0 %v2163_v0 }
 0xa2f   : > { %3441 = vmatprep.subr.bf16.mxu0 %v2165_v31 }
 0xa30   : > { %v3531_v25 = vpop.permute.xlu0 %3530 }
 0xa31   : > { %v3533_v30 = vunpack.i.h.bf16 %v3531_v25  ;;  %v3532_v13 = vunpack.i.l.bf16 %v3531_v25 }
 0xa32   : > { %3442 = vmatpush3.bf16.msra.mxu0 %v2165_v31 }
 0xa33   : > { %3455 = vmatprep.subr.bf16.mxu0 %v3595_v49  ;;  %v2380_v62 = vsel %vm859_vm1, %v4058_v22, %v3532_v13 }
 0xa34   : > { %v3541_v29 = vpop.permute.xlu0 %3540 }
 0xa35   : > { %3444 = vmatmul.mubr.msk.bf16.vlgmr.msra.gmra.mrb[36].mxu0 %vm593_vm0, %v2159_v50  ;;  %v3543_v33 = vunpack.i.h.bf16 %v3541_v29  ;;  %v3542_v38 = vunpack.i.l.bf16 %v3541_v29 }
 0xa36   : > { %3456 = vmatpush3.bf16.msra.mxu0 %v3595_v49 }
 0xa37   : > { %3457 = vmatprep.subr.bf16.mxu0 %v3596_v3  ;;  %v2389_v22 = vsel %vm2388_vm2, %v2380_v62, %v3542_v38  ;;  %v3765_v62 = vld [vmem:[%s3903_s26 + $0x8] sm:$0xff] }
 0xa3a   : > { %3458 = vmatpush3.bf16.msra.mxu0 %v3596_v3 }
 0xa46   : > { %v2141_v7 = vpop.xlane.xlu1 %2140 }
 0xa47   : > { %3723 = vrcp.f32 %v2141_v7 }
 0xa48   : > { %3725 = vrcp.f32 %v2132_v58 }
 0xa49   : > { %3727 = vrcp.f32 %v2138_v57 }
 0xa4a   : > { %v2135_v16 = vpop.xlane.xlu1 %2134 }
 0xa4b   : > { %3729 = vrcp.f32 %v2135_v16 }
 0xa4e   : > { %v2226_v1 = vpop.permute.xlu1 %2225 }
 0xa4f   : > { %3449 = vmatprep.subr.bf16.mxu1 %v2226_v1 }
 0xa50   : > { %3450 = vmatpush3.bf16.msra.mxu1 %v2226_v1 }
 0xa51   : > { %v3724_v34 = vpop.eup %3723 }
 0xa52   : > { %v3726_v51 = vpop.eup %3725  ;;  %v2157_v63 = vmul.f32 %v3724_v34, %v3712_v20  ;;  %v3536_v9 = vpop.permute.xlu1 %3535 }
 0xa53   : > { %v3728_v61 = vpop.eup %3727  ;;  %v2154_v55 = vmul.f32 %v3726_v51, %v4322_v32  ;;  %v3538_v11 = vunpack.i.h.bf16 %v3536_v9 }
 0xa54   : > { %v2156_v40 = vmul.f32 %v3728_v61, %v4316_v56 }
 0xa55   : > { %v3730_v15 = vpop.eup %3729  ;;  %v2383_v2 = vsel %vm859_vm1, %v4060_v23, %v3538_v11 }
 0xa56   : > { %v2155_v37 = vmul.f32 %v3730_v15, %v3714_v28  ;;  %v2161_v52 = vpack.c.bf16 %v2157_v63, %v2156_v40 }
 0xa58   : > { %v2160_v27 = vpack.c.bf16 %v2155_v37, %v2154_v55 }
 0xa5a   : > { %3451 = vmatprep.mubr.msk.bf16.mxu1 %vm593_vm0, %v2160_v27 }
 0xa5b   : > { %3452 = vmatmul.mubr.msk.bf16.vlgmr.msra.gmra.mrb[44].mxu1 %vm593_vm0, %v2161_v52 }
 0xb08   : > { %v3445_v32 = vpop.f32.mrb[36].mxu0 }
 0xb09   : > { %v2208_v56 = vpop.f32.mrb[37].mxu0 }
 0xb0a   : > { %v3446_v5 = vpop.f32.mrb[38].mxu0 }
 0xb0b   : > { %v3554_v4 = vpack.i.bf16 %v3446_v5, %v3445_v32  ;;  %v2211_v10 = vpop.f32.mrb[39].mxu0 }
 0xb0c   : > { %v3549_v18 = vpack.i.bf16 %v2211_v10, %v2208_v56 }
 0xb0d   : > { %3555 = vrot.lane.b32.xlu1 %v3554_v4, %s3784_s25 }
 0xb0e   : > { %3550 = vrot.lane.b32.xlu0 %v3549_v18, %s3784_s25 }
 0xb11   : > { %3565 = vrot.lane.b32.xlu1 %v3564_v21, %s3782_s18 }
 0xb12   : > { %3560 = vrot.lane.b32.xlu0 %v3559_v26, %s3782_s18  ;;  %v3546_v26 = vpop.permute.xlu1 %3545 }
 0xb13   : > { %v3548_v53 = vunpack.i.h.bf16 %v3546_v26  ;;  %v3547_v59 = vunpack.i.l.bf16 %v3546_v26 }
 0xb15   : > { %3575 = vrot.lane.b32.xlu1 %v3574_v8, %s3783_s19  ;;  %v3537_v8 = vunpack.i.l.bf16 %v3536_v9  ;;  %v2392_v57 = vsel %vm2388_vm2, %v2383_v2, %v3548_v53  ;;  %v3158_v9 = vld [vmem:[%s4637_s8] ss:$0 sm:$0xff] }
 0xb16   : > { %3570 = vrot.lane.b32.xlu0 %v3569_v45, %s3783_s19  ;;  %v2381_v45 = vsel %vm859_vm1, %v4062_v24, %v3533_v30 }
 0xb17   : > { %v2382_v60 = vsel %vm859_vm1, %v4056_v17, %v3537_v8  ;;  %v2390_v54 = vsel %vm2388_vm2, %v2381_v45, %v3543_v33  ;;  %v3763_v8 = vld [vmem:[%s3903_s26] sm:$0xff]  ;;  %v3764_v33 = vld [vmem:[%s3903_s26 + $0x10] sm:$0xff] }
 0xb18   : > { %v2391_v42 = vsel %vm2388_vm2, %v2382_v60, %v3547_v59 }
 0xb2e   : > { %v3453_v20 = vpop.f32.mrb[44].mxu1 }
 0xb2f   : > { %v2269_v6 = vpop.f32.mrb[45].mxu1 }
 0xb30   : > { %v3454_v28 = vpop.f32.mrb[46].mxu1 }
 0xb31   : > { %v3584_v14 = vpack.i.bf16 %v3454_v28, %v3453_v20  ;;  %v2272_v12 = vpop.f32.mrb[47].mxu1 }
 0xb32   : > { %v3579_v21 = vpack.i.bf16 %v2272_v12, %v2269_v6 }
 0xb33   : > { %3585 = vrot.lane.b32.xlu1 %v3584_v14, %s3784_s25 }
 0xb34   : > { %3580 = vrot.lane.b32.xlu0 %v3579_v21, %s3784_s25 }
 0xb7f   : > { %v3556_v31 = vpop.permute.xlu1 %3555 }
 0xb80   : > { %v3558_v19 = vunpack.i.h.bf16 %v3556_v31  ;;  %v3557_v48 = vunpack.i.l.bf16 %v3556_v31  ;;  %v3551_v36 = vpop.permute.xlu0 %3550 }
 0xb81   : > { %v3553_v24 = vunpack.i.h.bf16 %v3551_v36  ;;  %v3552_v58 = vunpack.i.l.bf16 %v3551_v36 }
 0xb82   : > { %v2401_v0 = vsel %vm2397_vm3, %v2392_v57, %v3558_v19  ;;  %v2400_v23 = vsel %vm2397_vm3, %v2391_v42, %v3557_v48  ;;  %v3766_v19 = vld [vmem:[%s3903_s26 + $0x18] sm:$0xff] }
 0xb83   : > { %v2407_v35 = vpack.c.bf16 %v2401_v0, %v2400_v23  ;;  %v2398_v17 = vsel %vm2397_vm3, %v2389_v22, %v3552_v58  ;;  %v2399_v47 = vsel %vm2397_vm3, %v2390_v54, %v3553_v24  ;;  %v3566_v50 = vpop.permute.xlu1 %3565  ;;  %v3767_v23 = vld [vmem:[%s3903_s26 + $0x20] sm:$0xff] }
 0xb84   : > { %v2406_v46 = vpack.c.bf16 %v2399_v47, %v2398_v17  ;;  %v3561_v7 = vpop.permute.xlu0 %3560  ;;  %v3568_v1 = vunpack.i.h.bf16 %v3566_v50  ;;  %v3567_v34 = vunpack.i.l.bf16 %v3566_v50 }
 0xb85   : > { %v3563_v61 = vunpack.i.h.bf16 %v3561_v7  ;;  %v3562_v15 = vunpack.i.l.bf16 %v3561_v7  ;;  %v3769_v7 = vld [vmem:[%s3903_s26 + $0x28] sm:$0xff] }
 0xb86   : > { %3459 = vmatprep.mubr.msk.bf16.mxu0 %vm593_vm0, %v2406_v46  ;;  %v2387_v27 = vsel %vm859_vm1, %v4072_v43, %v3568_v1  ;;  %v2386_v52 = vsel %vm859_vm1, %v4067_v39, %v3567_v34  ;;  %v3768_v46 = vld [vmem:[%s3903_s26 + $0x30] sm:$0xff]  ;;  %v3770_v34 = vld [vmem:[%s3903_s26 + $0x38] sm:$0xff] }
 0xb87   : > { %3460 = vmatmul.mubr.msk.bf16.vlgmr.msra.gmra.mrb[40].mxu0 %vm593_vm0, %v2407_v35  ;;  %v3576_v16 = vpop.permute.xlu1 %3575  ;;  %v2385_v3 = vsel %vm859_vm1, %v4074_v44, %v3563_v61  ;;  %v2384_v32 = vsel %vm859_vm1, %v4069_v41, %v3562_v15 }
 0xb88   : > { %v3571_v51 = vpop.permute.xlu0 %3570  ;;  %v3578_v63 = vunpack.i.h.bf16 %v3576_v16  ;;  %v3577_v55 = vunpack.i.l.bf16 %v3576_v16 }
 0xb89   : > { %v3573_v37 = vunpack.i.h.bf16 %v3571_v51  ;;  %v3572_v40 = vunpack.i.l.bf16 %v3571_v51 }
 0xb8a   : > { %v2395_v10 = vsel %vm2388_vm2, %v2386_v52, %v3577_v55  ;;  %v2396_v18 = vsel %vm2388_vm2, %v2387_v27, %v3578_v63 }
 0xb8b   : > { %v2393_v43 = vsel %vm2388_vm2, %v2384_v32, %v3572_v40  ;;  %v2394_v39 = vsel %vm2388_vm2, %v2385_v3, %v3573_v37 }
 0xba5   : > { %v3586_v49 = vpop.permute.xlu1 %3585 }
 0xba6   : > { %v3588_v56 = vunpack.i.h.bf16 %v3586_v49  ;;  %v3587_v5 = vunpack.i.l.bf16 %v3586_v49  ;;  %v3581_v4 = vpop.permute.xlu0 %3580 }
 0xba7   : > { %v3583_v20 = vunpack.i.h.bf16 %v3581_v4  ;;  %v3582_v6 = vunpack.i.l.bf16 %v3581_v4 }
 0xba8   : > { %v2404_v28 = vsel %vm2397_vm3, %v2395_v10, %v3587_v5  ;;  %v2405_v44 = vsel %vm2397_vm3, %v2396_v18, %v3588_v56 }
 0xba9   : > { %v2409_v14 = vpack.c.bf16 %v2405_v44, %v2404_v28  ;;  %v2402_v41 = vsel %vm2397_vm3, %v2393_v43, %v3582_v6  ;;  %v2403_v12 = vsel %vm2397_vm3, %v2394_v39, %v3583_v20 }
 0xbaa   : > { %v2408_v21 = vpack.c.bf16 %v2403_v12, %v2402_v41 }
 0xbac   : > { %3463 = vmatprep.mubr.msk.bf16.mxu0 %vm593_vm0, %v2408_v21 }
 0xbad   : > { %3464 = vmatmul.mubr.msk.bf16.gmra.mrb[44].mxu0 %vm593_vm0, %v2409_v14 }
 0xc5a   : > { %v3461_v25 = vpop.f32.mrb[40].mxu0 }
 0xc5b   : > { %v2479_v26 = vpop.f32.mrb[41].mxu0  ;;  %v2488_v30 = vadd.f32 %v3461_v25, %v3158_v9 }
 0xc5c   : > { %v2480_v13 = vadd.f32 %v3158_v9, %v2479_v26  ;;  %v3462_v29 = vpop.f32.mrb[42].mxu0 }
 0xc5d   : > { %v2482_v11 = vpop.f32.mrb[43].mxu0  ;;  %v2512_v38 = vadd.f32 %v3764_v33, %v2488_v30  ;;  %v2491_v45 = vadd.f32 %v3462_v29, %v3158_v9 }
 0xc5e   : > { %v2510_v53 = vadd.f32 %v3763_v8, %v2480_v13  ;;  %v2483_v59 = vadd.f32 %v3158_v9, %v2482_v11  ;;  %v3597_v11 = vld [vmem:[%s4638_s9] sm:$0xff]  }
 0xc5f   : > { %v2513_v48 = vadd.f32 %v3766_v19, %v2491_v45  ;;  %v2526_v36 = vsel %vm593_vm0, %v2512_v38, 0.0  ;;  %3467 = vmatprep.subr.bf16.mxu1 %v3597_v11 }
 0xc60   : > { %v2511_v31 = vadd.f32 %v3765_v62, %v2483_v59  ;;  %v2520_v2 = vsel %vm593_vm0, %v2510_v53, 0.0  ;;  %3468 = vmatpush3.bf16.msra.mxu1 %v3597_v11 }
 0xc61   : > { %2521 = vadd.xlane.f32.xlu0 %v2520_v2  ;;  %v2529_v42 = vsel %vm593_vm0, %v2513_v48, 0.0  ;;  %v3598_v2 = vld [vmem:[%s4638_s9 + $0x8] sm:$0xff]  }
 0xc62   : > { %v2523_v60 = vsel %vm593_vm0, %v2511_v31, 0.0  ;;  %3469 = vmatprep.subr.bf16.mxu1 %v3598_v2 }
 0xc63   : > { %2524 = vadd.xlane.f32.xlu1 %v2523_v60 }
 0xc64   : > { %3470 = vmatpush3.bf16.msra.mxu1 %v3598_v2 }
 0xc65   : > { %2527 = vadd.xlane.f32.xlu0 %v2526_v36  ;;  %v3599_v36 = vld [vmem:[%s4640_s11] sm:$0xff]  }
 0xc66   : > { %3479 = vmatprep.subr.bf16.mxu0 %v3599_v36 }
 0xc67   : > { %3480 = vmatpush3.bf16.msra.mxu0 %v3599_v36 }
 0xc69   : > { %2530 = vadd.xlane.f32.xlu0 %v2529_v42  ;;  %v3600_v42 = vld [vmem:[%s4640_s11 + $0x8] sm:$0xff]  }
 0xc6a   : > { %3481 = vmatprep.subr.bf16.mxu0 %v3600_v42 }
 0xc6b   : > { %3482 = vmatpush3.bf16.msra.mxu0 %v3600_v42  ;;  %v3602_v42 = vld [vmem:[%s4640_s11 + $0x18] sm:$0xff]  }
 0xc80   : > { %v3465_v57 = vpop.f32.mrb[44].mxu0 }
 0xc81   : > { %v2495_v24 = vpop.f32.mrb[45].mxu0  ;;  %v2504_v58 = vadd.f32 %v3465_v57, %v3158_v9 }
 0xc82   : > { %v2496_v22 = vadd.f32 %v3158_v9, %v2495_v24  ;;  %v3466_v54 = vpop.f32.mrb[46].mxu0 }
 0xc83   : > { %v2498_v0 = vpop.f32.mrb[47].mxu0  ;;  %v2507_v17 = vadd.f32 %v3466_v54, %v3158_v9  ;;  %v2516_v50 = vadd.f32 %v3768_v46, %v2504_v58 }
 0xc84   : > { %v2514_v35 = vadd.f32 %v3767_v23, %v2496_v22  ;;  %v2499_v47 = vadd.f32 %v3158_v9, %v2498_v0 }
 0xc85   : > { %v2517_v51 = vadd.f32 %v3770_v34, %v2507_v17  ;;  %v2538_v15 = vsel %vm593_vm0, %v2516_v50, 0.0 }
 0xc86   : > { %v2515_v16 = vadd.f32 %v3769_v7, %v2499_v47  ;;  %v2532_v1 = vsel %vm593_vm0, %v2514_v35, 0.0 }
 0xc87   : > { %2533 = vadd.xlane.f32.xlu0 %v2532_v1  ;;  %v2541_v63 = vsel %vm593_vm0, %v2517_v51, 0.0 }
 0xc88   : > { %v2535_v61 = vsel %vm593_vm0, %v2515_v16, 0.0 }
 0xc89   : > { %2536 = vadd.xlane.f32.xlu1 %v2535_v61 }
 0xc8b   : > { %2539 = vadd.xlane.f32.xlu0 %v2538_v15 }
 0xc8d   : > { %2542 = vadd.xlane.f32.xlu1 %v2541_v63  ;;  %v3166_v63 = vld [vmem:[%s4643_s14] ss:$0 sm:$0xff] }
 0xcee   : > { %v2522_v55 = vpop.xlane.xlu0 %2521 }
 0xcef   : > { %v2545_v37 = vmul.f32 0.03125, %v2522_v55 }
 0xcf0   : > { %v2525_v40 = vpop.xlane.xlu1 %2524 }
 0xcf1   : > { %v4433_v27 = vsub.f32 %v2510_v53, %v2545_v37  ;;  %v2546_v52 = vmul.f32 0.03125, %v2525_v40 }
 0xcf2   : > { %v2528_v49 = vpop.xlane.xlu0 %2527 }
 0xcf3   : > { %v4435_v3 = vsub.f32 %v2511_v31, %v2546_v52  ;;  %v2547_v32 = vmul.f32 0.03125, %v2528_v49  ;;  %v2561_v56 = vmul.f32 %v4433_v27, %v4433_v27 }
 0xcf5   : > { %v4439_v5 = vsub.f32 %v2512_v38, %v2547_v32  ;;  %v2569_v4 = vsel %vm593_vm0, %v2561_v56, 0.0  ;;  %v2562_v10 = vmul.f32 %v4435_v3, %v4435_v3 }
 0xcf6   : > { %2570 = vadd.xlane.f32.xlu0 %v2569_v4  ;;  %v2531_v18 = vpop.xlane.xlu0 %2530 }
 0xcf7   : > { %v2548_v20 = vmul.f32 0.03125, %v2531_v18  ;;  %v2572_v6 = vsel %vm593_vm0, %v2562_v10, 0.0  ;;  %v2563_v43 = vmul.f32 %v4439_v5, %v4439_v5 }
 0xcf8   : > { %2573 = vadd.xlane.f32.xlu1 %v2572_v6 }
 0xcf9   : > { %v4447_v39 = vsub.f32 %v2513_v48, %v2548_v20  ;;  %v2575_v28 = vsel %vm593_vm0, %v2563_v43, 0.0 }
 0xcfa   : > { %2576 = vadd.xlane.f32.xlu0 %v2575_v28 }
 0xcfb   : > { %v2564_v44 = vmul.f32 %v4447_v39, %v4447_v39 }
 0xcfd   : > { %v2578_v14 = vsel %vm593_vm0, %v2564_v44, 0.0 }
 0xcfe   : > { %2579 = vadd.xlane.f32.xlu1 %v2578_v14 }
 0xd14   : > { %v2534_v41 = vpop.xlane.xlu0 %2533 }
 0xd15   : > { %v2549_v12 = vmul.f32 0.03125, %v2534_v41 }
 0xd16   : > { %v2537_v21 = vpop.xlane.xlu1 %2536 }
 0xd17   : > { %v4453_v9 = vsub.f32 %v2514_v35, %v2549_v12  ;;  %v2550_v25 = vmul.f32 0.03125, %v2537_v21 }
 0xd18   : > { %v2540_v26 = vpop.xlane.xlu0 %2539 }
 0xd19   : > { %v4455_v30 = vsub.f32 %v2515_v16, %v2550_v25  ;;  %v2551_v13 = vmul.f32 0.03125, %v2540_v26  ;;  %v2565_v29 = vmul.f32 %v4453_v9, %v4453_v9  ;;  %v3165_v16 = vld [vmem:[%s4642_s13] ss:$0 sm:$0xff] }
 0xd1a   : > { %v2543_v8 = vpop.xlane.xlu1 %2542 }
 0xd1b   : > { %v4462_v53 = vsub.f32 %v2516_v50, %v2551_v13  ;;  %v2552_v59 = vmul.f32 0.03125, %v2543_v8  ;;  %v2581_v33 = vsel %vm593_vm0, %v2565_v29, 0.0  ;;  %v2566_v38 = vmul.f32 %v4455_v30, %v4455_v30 }
 0xd1c   : > { %2582 = vadd.xlane.f32.xlu0 %v2581_v33 }
 0xd1d   : > { %v4467_v45 = vsub.f32 %v2517_v51, %v2552_v59  ;;  %v2584_v62 = vsel %vm593_vm0, %v2566_v38, 0.0  ;;  %v2567_v31 = vmul.f32 %v4462_v53, %v4462_v53 }
 0xd1e   : > { %2585 = vadd.xlane.f32.xlu1 %v2584_v62 }
 0xd1f   : > { %v2587_v60 = vsel %vm593_vm0, %v2567_v31, 0.0  ;;  %v2568_v19 = vmul.f32 %v4467_v45, %v4467_v45 }
 0xd20   : > { %2588 = vadd.xlane.f32.xlu0 %v2587_v60 }
 0xd21   : > { %v2590_v48 = vsel %vm593_vm0, %v2568_v19, 0.0 }
 0xd22   : > { %2591 = vadd.xlane.f32.xlu1 %v2590_v48 }
 0xd83   : > { %v2571_v57 = vpop.xlane.xlu0 %2570 }
 0xd84   : > { %v2593_v24 = vmul.f32 0.03125, %v2571_v57  ;;  %v3167_v57 = vld [vmem:[%s4639_s10] ss:$0 sm:$0xff] }
 0xd85   : > { %v2574_v58 = vpop.xlane.xlu1 %2573 }
 0xd86   : > { %v2601_v22 = vadd.f32 1e-05, %v2593_v24  ;;  %v2594_v54 = vmul.f32 0.03125, %v2574_v58 }
 0xd87   : > { %v2577_v0 = vpop.xlane.xlu0 %2576 }
 0xd88   : > { %3731 = vrsqrt.f32 %v2601_v22  ;;  %v2602_v23 = vadd.f32 1e-05, %v2594_v54  ;;  %v2595_v35 = vmul.f32 0.03125, %v2577_v0 }
 0xd8a   : > { %3733 = vrsqrt.f32 %v2602_v23  ;;  %v2603_v17 = vadd.f32 1e-05, %v2595_v35 }
 0xd8b   : > { %v2580_v47 = vpop.xlane.xlu1 %2579 }
 0xd8c   : > { %3735 = vrsqrt.f32 %v2603_v17  ;;  %v2596_v46 = vmul.f32 0.03125, %v2580_v47 }
 0xd8e   : > { %v2604_v50 = vadd.f32 1e-05, %v2596_v46 }
 0xd90   : > { %3737 = vrsqrt.f32 %v2604_v50 }
 0xd92   : > { %v3732_v7 = vpop.eup %3731 }
 0xd93   : > { %v2617_v1 = vmul.f32 %v3732_v7, %v4433_v27 }
 0xd94   : > { %v3734_v34 = vpop.eup %3733 }
 0xd95   : > { %v2618_v51 = vmul.f32 %v3734_v34, %v4435_v3  ;;  %v2631_v61 = vmul.f32 %v3165_v16, %v2617_v1 }
 0xd96   : > { %v3736_v15 = vpop.eup %3735 }
 0xd97   : > { %v2619_v55 = vmul.f32 %v3736_v15, %v4439_v5  ;;  %v2632_v37 = vmul.f32 %v3165_v16, %v2618_v51  ;;  %v4494_v40 = vadd.f32 %v3166_v63, %v2631_v61 }
 0xd99   : > { %v4496_v52 = vadd.f32 %v3166_v63, %v2632_v37  ;;  %v2633_v32 = vmul.f32 %v3165_v16, %v2619_v55 }
 0xd9a   : > { %v3738_v49 = vpop.eup %3737 }
 0xd9b   : > { %v2620_v27 = vmul.f32 %v3738_v49, %v4447_v39  ;;  %v2653_v3 = vpack.c.bf16 %v4496_v52, %v4494_v40  ;;  %v4502_v4 = vadd.f32 %v3166_v63, %v2633_v32 }
 0xd9d   : > { %v2634_v56 = vmul.f32 %v3165_v16, %v2620_v27  ;;  %3471 = vmatprep.mubr.msk.bf16.mxu1 %vm593_vm0, %v2653_v3 }
 0xd9f   : > { %v4504_v10 = vadd.f32 %v3166_v63, %v2634_v56 }
 0xda1   : > { %v2654_v5 = vpack.c.bf16 %v4504_v10, %v4502_v4 }
 0xda3   : > { %3472 = vmatmul.mubr.msk.bf16.vlgmr.msra.gmra.mrb[48].mxu1 %vm593_vm0, %v2654_v5 }
 0xda9   : > { %v2583_v18 = vpop.xlane.xlu0 %2582 }
 0xdaa   : > { %v2597_v20 = vmul.f32 0.03125, %v2583_v18 }
 0xdab   : > { %v2586_v6 = vpop.xlane.xlu1 %2585 }
 0xdac   : > { %v2605_v43 = vadd.f32 1e-05, %v2597_v20  ;;  %v2598_v39 = vmul.f32 0.03125, %v2586_v6  ;;  %v3174_v20 = vld [vmem:[%s4641_s12] ss:$0 sm:$0xff] }
 0xdad   : > { %v2589_v28 = vpop.xlane.xlu0 %2588 }
 0xdae   : > { %3739 = vrsqrt.f32 %v2605_v43  ;;  %v2606_v44 = vadd.f32 1e-05, %v2598_v39  ;;  %v2599_v14 = vmul.f32 0.03125, %v2589_v28 }
 0xdaf   : > { %v2592_v41 = vpop.xlane.xlu1 %2591 }
 0xdb0   : > { %3741 = vrsqrt.f32 %v2606_v44  ;;  %v2607_v12 = vadd.f32 1e-05, %v2599_v14  ;;  %v2600_v21 = vmul.f32 0.03125, %v2592_v41 }
 0xdb2   : > { %3743 = vrsqrt.f32 %v2607_v12  ;;  %v2608_v25 = vadd.f32 1e-05, %v2600_v21 }
 0xdb4   : > { %3745 = vrsqrt.f32 %v2608_v25 }
 0xdb8   : > { %v3740_v26 = vpop.eup %3739 }
 0xdb9   : > { %v2621_v13 = vmul.f32 %v3740_v26, %v4453_v9 }
 0xdba   : > { %v3742_v29 = vpop.eup %3741 }
 0xdbb   : > { %v2622_v11 = vmul.f32 %v3742_v29, %v4455_v30  ;;  %v2635_v8 = vmul.f32 %v3165_v16, %v2621_v13 }
 0xdbc   : > { %v3744_v59 = vpop.eup %3743 }
 0xdbd   : > { %v2623_v33 = vmul.f32 %v3744_v59, %v4462_v53  ;;  %v2636_v38 = vmul.f32 %v3165_v16, %v2622_v11  ;;  %v4513_v2 = vadd.f32 %v3166_v63, %v2635_v8 }
 0xdbe   : > { %v3746_v62 = vpop.eup %3745 }
 0xdbf   : > { %v2624_v31 = vmul.f32 %v3746_v62, %v4467_v45  ;;  %v4515_v60 = vadd.f32 %v3166_v63, %v2636_v38  ;;  %v2637_v19 = vmul.f32 %v3165_v16, %v2623_v33  ;;  %v3601_v45 = vld [vmem:[%s4640_s11 + $0x10] sm:$0xff]  }
 0xdc0   : > { %3483 = vmatprep.subr.bf16.mxu0 %v3601_v45 }
 0xdc1   : > { %v2655_v48 = vpack.c.bf16 %v4515_v60, %v4513_v2  ;;  %v2638_v9 = vmul.f32 %v3165_v16, %v2624_v31  ;;  %v4520_v30 = vadd.f32 %v3166_v63, %v2637_v19  ;;  %3484 = vmatpush3.bf16.msra.mxu0 %v3601_v45 }
 0xdc2   : > { %3485 = vmatprep.subr.bf16.mxu0 %v3602_v42 }
 0xdc3   : > { %3475 = vmatprep.mubr.msk.bf16.mxu1 %vm593_vm0, %v2655_v48  ;;  %v4522_v36 = vadd.f32 %v3166_v63, %v2638_v9 }
 0xdc5   : > { %v2656_v53 = vpack.c.bf16 %v4522_v36, %v4520_v30  ;;  %3486 = vmatpush3.bf16.msra.mxu0 %v3602_v42 }
 0xdc7   : > { %3476 = vmatmul.mubr.msk.bf16.gmra.mrb[52].mxu1 %vm593_vm0, %v2656_v53 }
 0xe76   : > { %v3473_v24 = vpop.f32.mrb[48].mxu1 }
 0xe77   : > { %v2735_v58 = vadd.f32 %v3473_v24, %v3167_v57  ;;  %v2726_v22 = vpop.f32.mrb[49].mxu1 }
 0xe78   : > { %v2727_v54 = vadd.f32 %v3167_v57, %v2726_v22  ;;  %v3474_v0 = vpop.f32.mrb[50].mxu1 }
 0xe79   : > { %v2738_v23 = vadd.f32 %v3474_v0, %v3167_v57  ;;  %v2729_v35 = vpop.f32.mrb[51].mxu1  ;;  %v2759_v47 = vmax.f32 %v2735_v58, 0.0 }
 0xe7a   : > { %v2730_v17 = vadd.f32 %v3167_v57, %v2729_v35  ;;  %v2757_v50 = vmax.f32 %v2727_v54, 0.0 }
 0xe7b   : > { %v2760_v46 = vmax.f32 %v2738_v23, 0.0 }
 0xe7c   : > { %v2758_v7 = vmax.f32 %v2730_v17, 0.0 }
 0xe7d   : > { %v2766_v16 = vpack.c.bf16 %v2760_v46, %v2759_v47 }
 0xe7e   : > { %v2765_v1 = vpack.c.bf16 %v2758_v7, %v2757_v50 }
 0xe80   : > { %3487 = vmatprep.mubr.msk.bf16.mxu0 %vm2808_vm4, %v2765_v1 }
 0xe81   : > { %3488 = vmatmul.mubr.msk.bf16.vlgmr.msra.gmra.mrb[48].mxu0 %vm2808_vm4, %v2766_v16 }
 0xe9a   : > { %v3477_v34 = vpop.f32.mrb[52].mxu1 }
 0xe9b   : > { %v2751_v51 = vadd.f32 %v3477_v34, %v3167_v57  ;;  %v2742_v61 = vpop.f32.mrb[53].mxu1 }
 0xe9c   : > { %v2743_v15 = vadd.f32 %v3167_v57, %v2742_v61  ;;  %v3478_v63 = vpop.f32.mrb[54].mxu1 }
 0xe9d   : > { %v2754_v55 = vadd.f32 %v3478_v63, %v3167_v57  ;;  %v2745_v37 = vpop.f32.mrb[55].mxu1  ;;  %v2763_v32 = vmax.f32 %v2751_v51, 0.0 }
 0xe9e   : > { %v2746_v49 = vadd.f32 %v3167_v57, %v2745_v37  ;;  %v2761_v3 = vmax.f32 %v2743_v15, 0.0 }
 0xe9f   : > { %v2764_v27 = vmax.f32 %v2754_v55, 0.0 }
 0xea0   : > { %v2762_v56 = vmax.f32 %v2746_v49, 0.0 }
 0xea1   : > { %v2768_v5 = vpack.c.bf16 %v2764_v27, %v2763_v32 }
 0xea2   : > { %v2767_v18 = vpack.c.bf16 %v2762_v56, %v2761_v3 }
 0xea4   : > { %3491 = vmatprep.mubr.msk.bf16.mxu0 %vm2808_vm4, %v2767_v18 }
 0xea5   : > { %3492 = vmatmul.mubr.msk.bf16.gmra.mrb[52].mxu0 %vm2808_vm4, %v2768_v5 }
 0xf54   : > { %v3489_v6 = vpop.f32.mrb[48].mxu0 }
 0xf55   : > { %v2864_v43 = vadd.f32 %v3489_v6, %v3174_v20  ;;  %v2855_v39 = vpop.f32.mrb[49].mxu0 }
 0xf56   : > { %v2856_v28 = vadd.f32 %v3174_v20, %v2855_v39  ;;  %v3490_v44 = vpop.f32.mrb[50].mxu0 }
 0xf57   : > { %v2888_v14 = vadd.f32 %v2864_v43, %v4502_v4  ;;  %v2867_v41 = vadd.f32 %v3490_v44, %v3174_v20  ;;  %v2858_v12 = vpop.f32.mrb[51].mxu0 }
 0xf58   : > { %v2859_v21 = vadd.f32 %v3174_v20, %v2858_v12  ;;  %v2886_v25 = vadd.f32 %v2856_v28, %v4494_v40 }
 0xf59   : > { %v2889_v26 = vadd.f32 %v2867_v41, %v4504_v10  ;;  %v2902_v13 = vsel %vm593_vm0, %v2888_v14, 0.0 }
 0xf5a   : > { %2903 = vadd.xlane.f32.xlu0 %v2902_v13  ;;  %v2887_v29 = vadd.f32 %v2859_v21, %v4496_v52  ;;  %v2896_v8 = vsel %vm593_vm0, %v2886_v25, 0.0 }
 0xf5b   : > { %v2905_v11 = vsel %vm593_vm0, %v2889_v26, 0.0 }
 0xf5c   : > { %2906 = vadd.xlane.f32.xlu1 %v2905_v11  ;;  %v2899_v4 = vsel %vm593_vm0, %v2887_v29, 0.0 }
 0xf5e   : > { %2897 = vadd.xlane.f32.xlu0 %v2896_v8 }
 0xf60   : > { %2900 = vadd.xlane.f32.xlu1 %v2899_v4 }
 0xf78   : > { %v3493_v59 = vpop.f32.mrb[52].mxu0 }
 0xf79   : > { %v2871_v33 = vpop.f32.mrb[53].mxu0  ;;  %v2880_v38 = vadd.f32 %v3493_v59, %v3174_v20 }
 0xf7a   : > { %v2872_v40 = vadd.f32 %v3174_v20, %v2871_v33  ;;  %v3494_v62 = vpop.f32.mrb[54].mxu0 }
 0xf7b   : > { %v2874_v10 = vpop.f32.mrb[55].mxu0  ;;  %v2883_v19 = vadd.f32 %v3494_v62, %v3174_v20  ;;  %v2892_v52 = vadd.f32 %v2880_v38, %v4520_v30 }
 0xf7c   : > { %v2890_v31 = vadd.f32 %v2872_v40, %v4513_v2  ;;  %v2875_v48 = vadd.f32 %v3174_v20, %v2874_v10  ;;  %v3183_v10 = vld [vmem:[%s4644_s15] ss:$0 sm:$0xff] }
 0xf7d   : > { %v2893_v45 = vadd.f32 %v2883_v19, %v4522_v36  ;;  %v2914_v57 = vsel %vm593_vm0, %v2892_v52, 0.0 }
 0xf7e   : > { %v2891_v9 = vadd.f32 %v2875_v48, %v4515_v60  ;;  %v2908_v53 = vsel %vm593_vm0, %v2890_v31, 0.0  ;;  %v3184_v48 = vld [vmem:[%s4645_s16] ss:$0 sm:$0xff] }
 0xf7f   : > { %2909 = vadd.xlane.f32.xlu0 %v2908_v53  ;;  %v2917_v24 = vsel %vm593_vm0, %v2893_v45, 0.0 }
 0xf80   : > { %v2911_v42 = vsel %vm593_vm0, %v2891_v9, 0.0 }
 0xf81   : > { %2912 = vadd.xlane.f32.xlu1 %v2911_v42 }
 0xf83   : > { %2915 = vadd.xlane.f32.xlu0 %v2914_v57 }
 0xf85   : > { %2918 = vadd.xlane.f32.xlu1 %v2917_v24 }
 0xfe7   : > { %v2904_v2 = vpop.xlane.xlu0 %2903 }
 0xfe8   : > { %v2922_v22 = vmul.f32 0.03125, %v2904_v2 }
 0xfe9   : > { %v2907_v58 = vpop.xlane.xlu1 %2906 }
 0xfea   : > { %v2923_v54 = vmul.f32 0.03125, %v2907_v58  ;;  %v4559_v23 = vsub.f32 %v2888_v14, %v2922_v22 }
 0xfeb   : > { %v2898_v30 = vpop.xlane.xlu0 %2897 }
 0xfec   : > { %v2920_v60 = vmul.f32 0.03125, %v2898_v30  ;;  %v4561_v17 = vsub.f32 %v2889_v26, %v2923_v54  ;;  %v2938_v16 = vmul.f32 %v4559_v23, %v4559_v23 }
 0xfed   : > { %v2901_v0 = vpop.xlane.xlu1 %2900 }
 0xfee   : > { %v2928_v35 = vsub.f32 %v2886_v25, %v2920_v60  ;;  %v2921_v36 = vmul.f32 0.03125, %v2901_v0  ;;  %v2939_v34 = vmul.f32 %v4561_v17, %v4561_v17  ;;  %v2950_v51 = vsel %vm593_vm0, %v2938_v16, 0.0 }
 0xff0   : > { %v2929_v47 = vsub.f32 %v2887_v29, %v2921_v36  ;;  %v2936_v46 = vmul.f32 %v2928_v35, %v2928_v35  ;;  %v2953_v61 = vsel %vm593_vm0, %v2939_v34, 0.0 }
 0xff2   : > { %v2944_v50 = vsel %vm593_vm0, %v2936_v46, 0.0  ;;  %v2937_v7 = vmul.f32 %v2929_v47, %v2929_v47 }
 0xff3   : > { %2945 = vadd.xlane.f32.xlu0 %v2944_v50 }
 0xff4   : > { %v2947_v1 = vsel %vm593_vm0, %v2937_v7, 0.0 }
 0xff5   : > { %2948 = vadd.xlane.f32.xlu1 %v2947_v1 }
 0xff7   : > { %2951 = vadd.xlane.f32.xlu0 %v2950_v51 }
 0xff9   : > { %2954 = vadd.xlane.f32.xlu1 %v2953_v61 }
0x100c   : > { %v2910_v15 = vpop.xlane.xlu0 %2909 }
0x100d   : > { %v2924_v63 = vmul.f32 0.03125, %v2910_v15 }
0x100e   : > { %v2913_v55 = vpop.xlane.xlu1 %2912 }
0x100f   : > { %v4571_v37 = vsub.f32 %v2890_v31, %v2924_v63  ;;  %v2925_v49 = vmul.f32 0.03125, %v2913_v55 }
0x1010   : > { %v2916_v32 = vpop.xlane.xlu0 %2915 }
0x1011   : > { %v4573_v27 = vsub.f32 %v2891_v9, %v2925_v49  ;;  %v2926_v3 = vmul.f32 0.03125, %v2916_v32  ;;  %v2940_v56 = vmul.f32 %v4571_v37, %v4571_v37 }
0x1012   : > { %v2919_v5 = vpop.xlane.xlu1 %2918 }
0x1013   : > { %v4577_v18 = vsub.f32 %v2892_v52, %v2926_v3  ;;  %v2927_v20 = vmul.f32 0.03125, %v2919_v5  ;;  %v2956_v6 = vsel %vm593_vm0, %v2940_v56, 0.0  ;;  %v2941_v43 = vmul.f32 %v4573_v27, %v4573_v27 }
0x1014   : > { %2957 = vadd.xlane.f32.xlu0 %v2956_v6 }
0x1015   : > { %v4582_v39 = vsub.f32 %v2893_v45, %v2927_v20  ;;  %v2959_v28 = vsel %vm593_vm0, %v2941_v43, 0.0  ;;  %v2942_v44 = vmul.f32 %v4577_v18, %v4577_v18 }
0x1016   : > { %2960 = vadd.xlane.f32.xlu1 %v2959_v28 }
0x1017   : > { %v2962_v14 = vsel %vm593_vm0, %v2942_v44, 0.0  ;;  %v2943_v41 = vmul.f32 %v4582_v39, %v4582_v39 }
0x1018   : > { %2963 = vadd.xlane.f32.xlu0 %v2962_v14 }
0x1019   : > { %v2965_v12 = vsel %vm593_vm0, %v2943_v41, 0.0 }
0x101a   : > { %2966 = vadd.xlane.f32.xlu1 %v2965_v12 }
0x1080   : > { %v2946_v21 = vpop.xlane.xlu0 %2945 }
0x1081   : > { %v2968_v25 = vmul.f32 0.03125, %v2946_v21 }
0x1082   : > { %v2949_v26 = vpop.xlane.xlu1 %2948 }
0x1083   : > { %v2976_v13 = vadd.f32 1e-05, %v2968_v25  ;;  %v2969_v29 = vmul.f32 0.03125, %v2949_v26 }
0x1084   : > { %v2952_v11 = vpop.xlane.xlu0 %2951 }
0x1085   : > { %3747 = vrsqrt.f32 %v2976_v13  ;;  %v2977_v8 = vadd.f32 1e-05, %v2969_v29  ;;  %v2970_v4 = vmul.f32 0.03125, %v2952_v11 }
0x1086   : > { %v2955_v59 = vpop.xlane.xlu1 %2954 }
0x1087   : > { %3749 = vrsqrt.f32 %v2977_v8  ;;  %v2978_v33 = vadd.f32 1e-05, %v2970_v4  ;;  %v2971_v38 = vmul.f32 0.03125, %v2955_v59 }
0x1089   : > { %3751 = vrsqrt.f32 %v2978_v33  ;;  %v2979_v40 = vadd.f32 1e-05, %v2971_v38 }
0x108b   : > { %3753 = vrsqrt.f32 %v2979_v40 }
0x108f   : > { %v3748_v62 = vpop.eup %3747 }
0x1090   : > { %v2992_v31 = vmul.f32 %v3748_v62, %v2928_v35 }
0x1091   : > { %v3750_v19 = vpop.eup %3749 }
0x1092   : > { %v3006_v52 = vmul.f32 %v3183_v10, %v2992_v31  ;;  %v2993_v9 = vmul.f32 %v3750_v19, %v2929_v47 }
0x1093   : > { %v3752_v53 = vpop.eup %3751 }
0x1094   : > { %v3020_v45 = vadd.f32 %v3184_v48, %v3006_v52  ;;  %v3007_v42 = vmul.f32 %v3183_v10, %v2993_v9  ;;  %v2994_v57 = vmul.f32 %v3752_v53, %v4559_v23 }
0x1095   : > { %v3754_v24 = vpop.eup %3753 }
0x1096   : > { %3028 = vst.msk [vmem:[%s4602_s1] sm:$0xff] %vm593_vm0, %v3020_v45  ;;  %v3021_v2 = vadd.f32 %v3184_v48, %v3007_v42  ;;  %v3008_v58 = vmul.f32 %v3183_v10, %v2994_v57  ;;  %v2995_v22 = vmul.f32 %v3754_v24, %v4561_v17 }
0x1098   : > { %3029 = vst.msk [vmem:[%s4602_s1 + $0x8] sm:$0xff] %vm593_vm0, %v3021_v2  ;;  %v3022_v30 = vadd.f32 %v3184_v48, %v3008_v58  ;;  %v3009_v54 = vmul.f32 %v3183_v10, %v2995_v22 }
0x109a   : > { %3030 = vst.msk [vmem:[%s4602_s1 + $0x10] sm:$0xff] %vm593_vm0, %v3022_v30  ;;  %v3023_v60 = vadd.f32 %v3184_v48, %v3009_v54 }
0x109c   : > { %3031 = vst.msk [vmem:[%s4602_s1 + $0x18] sm:$0xff] %vm593_vm0, %v3023_v60 }
0x10a1   : > { %v2958_v0 = vpop.xlane.xlu0 %2957 }
0x10a2   : > { %v2972_v35 = vmul.f32 0.03125, %v2958_v0 }
0x10a3   : > { %v2961_v36 = vpop.xlane.xlu1 %2960 }
0x10a4   : > { %v2980_v23 = vadd.f32 1e-05, %v2972_v35  ;;  %v2973_v47 = vmul.f32 0.03125, %v2961_v36 }
0x10a5   : > { %v2964_v46 = vpop.xlane.xlu0 %2963 }
0x10a6   : > { %3755 = vrsqrt.f32 %v2980_v23  ;;  %v2981_v50 = vadd.f32 1e-05, %v2973_v47  ;;  %v2974_v7 = vmul.f32 0.03125, %v2964_v46 }
0x10a7   : > { %v2967_v16 = vpop.xlane.xlu1 %2966 }
0x10a8   : > { %3757 = vrsqrt.f32 %v2981_v50  ;;  %v2982_v17 = vadd.f32 1e-05, %v2974_v7  ;;  %v2975_v1 = vmul.f32 0.03125, %v2967_v16 }
0x10aa   : > { %3759 = vrsqrt.f32 %v2982_v17  ;;  %v2983_v34 = vadd.f32 1e-05, %v2975_v1 }
0x10ac   : > { %3761 = vrsqrt.f32 %v2983_v34 }
0x10b0   : > { %v3756_v51 = vpop.eup %3755 }
0x10b1   : > { %v2996_v61 = vmul.f32 %v3756_v51, %v4571_v37 }
0x10b2   : > { %v3758_v15 = vpop.eup %3757 }
0x10b3   : > { %v3010_v63 = vmul.f32 %v3183_v10, %v2996_v61  ;;  %v2997_v55 = vmul.f32 %v3758_v15, %v4573_v27 }
0x10b4   : > { %v3760_v49 = vpop.eup %3759 }
0x10b5   : > { %v3024_v32 = vadd.f32 %v3184_v48, %v3010_v63  ;;  %v3011_v3 = vmul.f32 %v3183_v10, %v2997_v55  ;;  %v2998_v56 = vmul.f32 %v3760_v49, %v4577_v18 }
0x10b6   : > { %v3762_v5 = vpop.eup %3761 }
0x10b7   : > { %3032 = vst.msk [vmem:[%s4602_s1 + $0x20] sm:$0xff] %vm593_vm0, %v3024_v32  ;;  %v3025_v20 = vadd.f32 %v3184_v48, %v3011_v3  ;;  %v3012_v6 = vmul.f32 %v3183_v10, %v2998_v56  ;;  %v2999_v43 = vmul.f32 %v3762_v5, %v4582_v39 }
0x10b9   : > { %3033 = vst.msk [vmem:[%s4602_s1 + $0x28] sm:$0xff] %vm593_vm0, %v3025_v20  ;;  %v3026_v37 = vadd.f32 %v3184_v48, %v3012_v6  ;;  %v3013_v28 = vmul.f32 %v3183_v10, %v2999_v43 }
0x10bb   : > { %3034 = vst.msk [vmem:[%s4602_s1 + $0x30] sm:$0xff] %vm593_vm0, %v3026_v37  ;;  %v3027_v44 = vadd.f32 %v3184_v48, %v3013_v28 }
0x10bd   : > { %3035 = vst.msk [vmem:[%s4602_s1 + $0x38] sm:$0xff] %vm593_vm0, %v3027_v44 }
0x10be PF: > { %s27_s24 = sadd.s32 1, %s3777_s24  }
0x10bf   : > { %p24_p4 = scmp.ge.s32.totalorder %s27_s24, 4  }
0x10c1   :  { %26 = sbr.rel (!%p24_p4) target bundleno = 3 (0x3), region = 118 }

// kernel: mgfn_forward.5
= control target key start
LH: loop header
LB: loop body
LE: loop exit
PB: predicated region body
PF: predicated region fallthrough
CT: control target
= control target key end

     0   :  { %s11668_s24 = smov 0   ;;  %s14601_s0 = inlined_call_operand.vmem [shape: f32[32,4,32], index: 0, kind: input, shape index: {}]   ;;  %s14602_s1 = inlined_call_operand.vmem [shape: bf16[32,32], index: 1, kind: input, shape index: {}]   ;;  %s14603_s2 = inlined_call_operand.vmem [shape: f32[1,32], index: 2, kind: input, shape index: {}]   ;;  %s14604_s3 = inlined_call_operand.vmem [shape: bf16[32,32], index: 3, kind: input, shape index: {}]   ;;  %s14605_s4 = inlined_call_operand.vmem [shape: f32[1,32], index: 4, kind: input, shape index: {}]   ;;  %s14606_s5 = inlined_call_operand.vmem [shape: bf16[32,32], index: 5, kind: input, shape index: {}]   ;;  %s14607_s6 = inlined_call_operand.vmem [shape: f32[1,32], index: 6, kind: input, shape index: {}]   ;;  %s14608_s7 = inlined_call_operand.vmem [shape: bf16[32,32], index: 7, kind: input, shape index: {}]   ;;  %s14609_s8 = inlined_call_operand.vmem [shape: f32[1,32], index: 8, kind: input, shape index: {}]   ;;  %s14610_s9 = inlined_call_operand.vmem [shape: bf16[32,64], index: 9, kind: input, shape index: {}]   ;;  %s14611_s10 = inlined_call_operand.vmem [shape: f32[1,64], index: 10, kind: input, shape index: {}]   ;;  %s14612_s11 = inlined_call_operand.vmem [shape: bf16[64,32], index: 11, kind: input, shape index: {}]   ;;  %s14613_s12 = inlined_call_operand.vmem [shape: f32[1,32], index: 12, kind: input, shape index: {}]   ;;  %s14614_s13 = inlined_call_operand.vmem [shape: f32[1,32], index: 13, kind: input, shape index: {}]   ;;  %s14615_s14 = inlined_call_operand.vmem [shape: f32[1,32], index: 14, kind: input, shape index: {}]   ;;  %s14616_s15 = inlined_call_operand.vmem [shape: f32[1,32], index: 15, kind: input, shape index: {}]   ;;  %s14617_s16 = inlined_call_operand.vmem [shape: f32[1,32], index: 16, kind: input, shape index: {}]   ;;  %s14618_s17 = inlined_call_operand.vmem [shape: f32[32,4,32], index: 17, kind: output, shape index: {}]  }
   0x1   :  { %14670 = sst [smem:[#allocation56_spill]] %s14601_s0 }
   0x2   :  { %14671 = sst [smem:[#allocation57_spill]] %s14602_s1 }
   0x3 LB: > { %s9887_s25 = sadd.s32 4294967295, %s11566_s24   ;;  %p9891_p0 = scmp.ge.s32.totalorder %s11566_s24, 1  ;;  %s11566_s24 = sphi %s11668_s24, %s27_s24  }
   0x4   : > { %p488_p1 = scmp.lt.s32.totalorder %s11566_s24, 3 }
   0x6   : > { %p489_p2 = pnand %p9891_p0, %p488_p1 }
   0x8   : > { %492 = sbr.rel (%p489_p2) target bundleno = 4523 (0x11ab), region = 88 }
   0xf   : > { %s14672_s28 = sld [smem:[#allocation57_spill]]  ;;  %s9892_s29 = sshll.u32 %s9887_s25, 4  ;;  %v11240_v2 = vld [vmem:[%s14604_s3] sm:$0xff]   ;;  %vm628_vm0 = vcmask 261120   ;;  %v11241_v16 = vld [vmem:[%s14604_s3 + $0x8] sm:$0xff]   ;;  %v14620_v34 = vmov 0.0  }
  0x10   : > { %p541_p3 = scmp.lt.s32.totalorder %s9892_s29, 31  ;;  %s14673_s22 = sld [smem:[#allocation56_spill]]  ;;  %v11246_v32 = vld [vmem:[%s14606_s5] sm:$0xff]   ;;  %v11247_v33 = vld [vmem:[%s14606_s5 + $0x8] sm:$0xff]   ;;  %vm11569_vm1 = vmmov 0   ;;  %vm1002_vm2 = vcmask 64512  }
  0x11   : > { %v11749_v43 = vld [vmem:[%s14605_s4] ss:$0 sm:$0xff]  ;;  %vm1952_vm3 = vcmask 1041408   ;;  %vm1755_vm4 = vcmask 27648   ;;  %s11570_s27 = smov 120   ;;  %vm1948_vm5 = vcmask 31744  }
  0x12   : > { %s14827_s29 = smov (!%p541_p3, %s9892_s29), 31  ;;  %v11758_v51 = vld [vmem:[%s14603_s2] ss:$0 sm:$0xff]  ;;  %s11571_s0 = smov 112   ;;  %vm8270_vm6 = vcmask 130048   ;;  %vm8287_vm7 = vcmask 195584  }
  0x13   : > { %s9893_s1 = sshll.u32 %s14827_s29, 2  ;;  %s11572_s30 = smov 104   ;;  %vm9182_vm8 = vcmask 523264   ;;  %vm9814_vm9 = vcmask 257024  }
  0x14   : > { %s11573_s18 = smov 8   ;;  %s11574_s19 = smov 16  }
  0x15   : > { %v11234_v0 = vld [vmem:[%s14672_s28] sm:$0xff]   ;;  %v11235_v1 = vld [vmem:[%s14672_s28 + $0x8] sm:$0xff]   ;;  %s11575_s20 = smov 24  }
  0x16   : > { %11212 = vmatprep.subr.bf16.mxu1 %v11234_v0  ;;  %10368 = vmatprep.subr.bf16.mxu0 %v11234_v0  ;;  %s11693_s23 = scalar_lea.vmem %s14673_s22, %s9893_s1 }
  0x17   : > { %11214 = vmatpush3.bf16.msra.mxu1 %v11234_v0  ;;  %10369 = vmatpush3.bf16.msra.mxu0 %v11234_v0  ;;  %v561_v3 = vld [vmem:[%s11693_s23 + $0x20] sm:$0xf]  ;;  %v562_v4 = vld [vmem:[%s11693_s23 + $0x24] sm:$0xf]  ;;  %v563_v5 = vld [vmem:[%s11693_s23 + $0x28] sm:$0xf] }
  0x18   : > { %11213 = vmatprep.subr.bf16.mxu1 %v11235_v1  ;;  %10370 = vmatprep.subr.bf16.mxu0 %v11235_v1  ;;  %v564_v6 = vld [vmem:[%s11693_s23 + $0x2c] sm:$0xf]  ;;  %v589_v7 = vcombine.low %v561_v3, %v562_v4  ;;  %v565_v8 = vld [vmem:[%s11693_s23 + $0x30] sm:$0xf]  ;;  %v566_v9 = vld [vmem:[%s11693_s23 + $0x34] sm:$0xf] }
  0x19   : > { %v590_v10 = vcombine.low %v563_v5, %v564_v6  ;;  %v567_v11 = vld [vmem:[%s11693_s23 + $0x38] sm:$0xf]  ;;  %v568_v12 = vld [vmem:[%s11693_s23 + $0x3c] sm:$0xf]  ;;  %v591_v13 = vcombine.low %v565_v8, %v566_v9  ;;  %v553_v14 = vld [vmem:[%s11693_s23] sm:$0xf] }
  0x1a   : > { %v592_v15 = vcombine.low %v567_v11, %v568_v12  ;;  %v554_v17 = vld [vmem:[%s11693_s23 + $0x4] sm:$0xf]  ;;  %v555_v18 = vld [vmem:[%s11693_s23 + $0x8] sm:$0xf]  ;;  %v556_v19 = vld [vmem:[%s11693_s23 + $0xc] sm:$0xf] }
  0x1b   : > { %11215 = vmatpush3.bf16.msra.mxu1 %v11235_v1  ;;  %10371 = vmatpush3.bf16.msra.mxu0 %v11235_v1  ;;  %v603_v20 = vpack.c.bf16 %v590_v10, %v589_v7  ;;  %v585_v21 = vcombine.low %v553_v14, %v554_v17  ;;  %v586_v22 = vcombine.low %v555_v18, %v556_v19  ;;  %v557_v23 = vld [vmem:[%s11693_s23 + $0x10] sm:$0xf]  ;;  %v558_v24 = vld [vmem:[%s11693_s23 + $0x14] sm:$0xf]  ;;  %v559_v25 = vld [vmem:[%s11693_s23 + $0x18] sm:$0xf] }
  0x1c   : > { %10380 = vmatprep.subr.bf16.mxu1 %v11240_v2  ;;  %v604_v26 = vpack.c.bf16 %v592_v15, %v591_v13  ;;  %v560_v27 = vld [vmem:[%s11693_s23 + $0x1c] sm:$0xf]  ;;  %v587_v28 = vcombine.low %v557_v23, %v558_v24  ;;  %10392 = vmatprep.subr.bf16.mxu0 %v11246_v32 }
  0x1d   : > { %10376 = vmatprep.mubr.msk.bf16.mxu1 %vm628_vm0, %v603_v20  ;;  %v601_v29 = vpack.c.bf16 %v586_v22, %v585_v21  ;;  %v588_v30 = vcombine.low %v559_v25, %v560_v27 }
  0x1e   : > { %10377 = vmatmul.mubr.msk.bf16.vlgmr.msra.gmra.mrb[0].mxu1 %vm628_vm0, %v604_v26 }
  0x1f   : > { %10381 = vmatpush3.bf16.msra.mxu1 %v11240_v2  ;;  %10384 = vmatprep.mubr.msk.bf16.mxu1 %vm628_vm0, %v601_v29  ;;  %v602_v31 = vpack.c.bf16 %v588_v30, %v587_v28 }
  0x20   : > { %10382 = vmatprep.subr.bf16.mxu1 %v11241_v16  ;;  %10372 = vmatprep.mubr.msk.bf16.mxu0 %vm628_vm0, %v601_v29 }
  0x21   : > { %10373 = vmatmul.mubr.msk.bf16.vlgmr.msra.gmra.mrb[0].mxu0 %vm628_vm0, %v602_v31 }
  0x22   : > { %10396 = vmatprep.mubr.msk.bf16.mxu0 %vm628_vm0, %v601_v29  ;;  %10393 = vmatpush3.bf16.msra.mxu0 %v11246_v32 }
  0x23   : > { %10383 = vmatpush3.bf16.msra.mxu1 %v11241_v16  ;;  %10394 = vmatprep.subr.bf16.mxu0 %v11247_v33 }
  0x24   : > { %10404 = vmatprep.subr.bf16.mxu1 %v14620_v34 }
  0x26   : > { %10385 = vmatmul.mubr.msk.bf16.vlgmr.msra.gmra.mrb[4].mxu1 %vm628_vm0, %v602_v31  ;;  %10395 = vmatpush3.bf16.msra.mxu0 %v11247_v33 }
  0x27   : > { %10388 = vmatprep.mubr.msk.bf16.mxu1 %vm628_vm0, %v603_v20  ;;  %10416 = vmatprep.subr.bf16.mxu0 %v14620_v34 }
  0x29   : > { %10397 = vmatmul.mubr.msk.bf16.vlgmr.msra.gmra.mrb[4].mxu0 %vm628_vm0, %v602_v31 }
  0x2a   : > { %10400 = vmatprep.mubr.msk.bf16.mxu0 %vm628_vm0, %v603_v20 }
  0x2e   : > { %10389 = vmatmul.mubr.msk.bf16.gmra.mrb[8].mxu1 %vm628_vm0, %v604_v26 }
  0x2f   : > { %10406 = vmatprep.mubr.msk.bf16.mxu1 %vm11569_vm1, %v14620_v34 }
  0x31   : > { %10401 = vmatmul.mubr.msk.bf16.gmra.mrb[8].mxu0 %vm628_vm0, %v604_v26 }
  0x32   : > { %10418 = vmatprep.mubr.msk.bf16.mxu0 %vm11569_vm1, %v14620_v34 }
  0xf1   : > { %v11738_v35 = vpop.f32.mrb[0].mxu1 }
  0xf2   : > { %v11740_v36 = vpop.f32.mrb[1].mxu1 }
  0xf3   : > { %v11742_v37 = vpop.f32.mrb[2].mxu1  ;;  %v692_v28 = vadd.f32 %v11758_v51, %v11740_v36 }
  0xf4   : > { %v11744_v38 = vpop.f32.mrb[3].mxu1  ;;  %v10374_v39 = vpop.f32.mrb[0].mxu0 }
  0xf5   : > { %v675_v40 = vpop.f32.mrb[1].mxu0  ;;  %v684_v9 = vadd.f32 %v10374_v39, %v11758_v51  ;;  %v11854_v33 = vpack.c.bf16 %v692_v28, %v692_v28 }
  0xf6   : > { %v10375_v41 = vpop.f32.mrb[2].mxu0  ;;  %v676_v55 = vadd.f32 %v11758_v51, %v675_v40 }
  0xf7   : > { %v678_v42 = vpop.f32.mrb[3].mxu0  ;;  %v11805_v13 = vpack.c.bf16 %v684_v9, %v684_v9  ;;  %v687_v18 = vadd.f32 %v10375_v41, %v11758_v51  ;;  %v892_v27 = vcombine.high %v684_v9, %v684_v9 }
  0xf8   : > { %v11773_v61 = vpack.c.bf16 %v676_v55, %v676_v55  ;;  %v679_v62 = vadd.f32 %v11758_v51, %v678_v42  ;;  %v890_v6 = vcombine.high %v676_v55, %v676_v55  ;;  %v700_v55 = vadd.f32 %v11738_v35, %v11758_v51 }
  0xf9   : > { %v10386_v44 = vpop.f32.mrb[4].mxu1  ;;  %v11829_v22 = vpack.c.bf16 %v687_v18, %v687_v18  ;;  %v11852_v31 = vpack.c.bf16 %v892_v27, %v892_v27  ;;  %v893_v40 = vcombine.high %v687_v18, %v687_v18 }
  0xfa   : > { %v763_v45 = vpop.f32.mrb[5].mxu1  ;;  %v772_v56 = vadd.f32 %v10386_v44, %v11749_v43  ;;  %v11781_v3 = vpack.c.bf16 %v679_v62, %v679_v62  ;;  %v11803_v11 = vpack.c.bf16 %v890_v6, %v890_v6  ;;  %v891_v16 = vcombine.high %v679_v62, %v679_v62 }
  0xfb   : > { %v764_v46 = vadd.f32 %v11749_v43, %v763_v45  ;;  %v10387_v47 = vpop.f32.mrb[6].mxu1  ;;  %v695_v44 = vadd.f32 %v11758_v51, %v11744_v38  ;;  %v11876_v45 = vpack.c.bf16 %v893_v40, %v893_v40  ;;  %v894_v38 = vcombine.high %v692_v28, %v692_v28 }
  0xfc   : > { %v766_v48 = vpop.f32.mrb[7].mxu1  ;;  %v11779_v1 = vpack.c.bf16 %v772_v56, %v772_v56  ;;  %v775_v5 = vadd.f32 %v10387_v47, %v11749_v43  ;;  %v932_v12 = vcombine.high %v772_v56, %v772_v56  ;;  %v11827_v21 = vpack.c.bf16 %v891_v16, %v891_v16  ;;  %v9910_v16 = vld [vmem:[%s14607_s6] ss:$0 sm:$0xff] }
  0xfd   : > { %v11752_v49 = vpack.c.bf16 %v764_v46, %v764_v46  ;;  %v767_v50 = vadd.f32 %v11749_v43, %v766_v48  ;;  %v930_v52 = vcombine.high %v764_v46, %v764_v46  ;;  %v11882_v48 = vpack.c.bf16 %v695_v44, %v695_v44 }
  0xfe   : > { %v1191_v7 = vsel %vm1002_vm2, %v11779_v1, 0  ;;  %v11801_v10 = vpack.c.bf16 %v775_v5, %v775_v5  ;;  %v11822_v19 = vpack.c.bf16 %v932_v12, %v932_v12  ;;  %v933_v23 = vcombine.high %v775_v5, %v775_v5 }
  0xff   : > { %v11760_v53 = vpack.c.bf16 %v767_v50, %v767_v50  ;;  %v1007_v54 = vsel %vm1002_vm2, %v11752_v49, 0  ;;  %v11771_v60 = vpack.c.bf16 %v930_v52, %v930_v52  ;;  %v931_v2 = vcombine.high %v767_v50, %v767_v50 }
 0x100   : > { %10405 = vmatpush3.bf16.xpose.msra.mxu1 %v1007_v54  ;;  %v1283_v17 = vsel %vm1002_vm2, %v11801_v10, 0  ;;  %v1237_v24 = vsel %vm1002_vm2, %v11822_v19, 0  ;;  %v11847_v29 = vpack.c.bf16 %v933_v23, %v933_v23  ;;  %v895_v35 = vcombine.high %v695_v44, %v695_v44 }
 0x101   : > { %v1099_v57 = vsel %vm1002_vm2, %v11760_v53, 0  ;;  %10410 = vmatprep.subr.bf16.mxu1 %v14620_v34  ;;  %v11769_v58 = vpop.f32.mrb[8].mxu1  ;;  %v1053_v4 = vsel %vm1002_vm2, %v11771_v60, 0  ;;  %v11797_v8 = vpack.c.bf16 %v931_v2, %v931_v2 }
 0x102   : > { %10417 = vmatpush3.bf16.xpose.msra.mxu0 %v1099_v57  ;;  %v779_v59 = vpop.f32.mrb[9].mxu1  ;;  %v1329_v39 = vsel %vm1002_vm2, %v11847_v29, 0  ;;  %v788_v41 = vadd.f32 %v11769_v58, %v11749_v43  ;;  %v11906_v58 = vpack.c.bf16 %v700_v55, %v700_v55 }
 0x103   : > { %10428 = vmatprep.subr.bf16.mxu0 %v14620_v34  ;;  %v11777_v63 = vpop.f32.mrb[10].mxu1  ;;  %v1145_v14 = vsel %vm1002_vm2, %v11797_v8, 0  ;;  %v780_v15 = vadd.f32 %v11749_v43, %v779_v59 }
 0x104   : > { %v782_v0 = vpop.f32.mrb[11].mxu1  ;;  %v11878_v46 = vpack.c.bf16 %v788_v41, %v788_v41  ;;  %v791_v52 = vadd.f32 %v11777_v63, %v11749_v43  ;;  %14677 = vst [vmem:[#allocation5_spill] sm:$0xff] %v11906_v58  ;;  %v936_v59 = vcombine.high %v788_v41, %v788_v41 }
 0x105   : > { %v11824_v20 = vpack.c.bf16 %v780_v15, %v780_v15  ;;  %v783_v26 = vadd.f32 %v11749_v43, %v782_v0  ;;  %v934_v32 = vcombine.high %v780_v15, %v780_v15  ;;  %v11902_v43 = vpack.c.bf16 %v894_v38, %v894_v38 }
 0x106   : > { %14674 = vst [vmem:[#allocation2_spill] sm:$0xff] %v11878_v46  ;;  %v1559_v54 = vsel %vm1002_vm2, %v11878_v46, 0  ;;  %v11904_v57 = vpack.c.bf16 %v791_v52, %v791_v52  ;;  %v703_v0 = vadd.f32 %v11742_v37, %v11758_v51  ;;  %v11923_v2 = vpack.c.bf16 %v936_v59, %v936_v59 }
 0x107   : > { %10407 = vmatmul.mubr.msk.bf16.vlgmr.msra.gmra.mrb[12].mxu1 %vm1002_vm2, %v11773_v61  ;;  %v1375_v25 = vsel %vm1002_vm2, %v11824_v20, 0  ;;  %v11849_v30 = vpack.c.bf16 %v783_v26, %v783_v26  ;;  %v11866_v42 = vpack.c.bf16 %v934_v32, %v934_v32  ;;  %v935_v50 = vcombine.high %v783_v26, %v783_v26 }
 0x108   : > { %10411 = vmatpush3.bf16.xpose.msra.mxu1 %v1053_v4  ;;  %10412 = vmatprep.mubr.msk.bf16.mxu1 %vm11569_vm1, %v14620_v34  ;;  %14676 = vst [vmem:[#allocation4_spill] sm:$0xff] %v11904_v57  ;;  %v1651_v63 = vsel %vm1002_vm2, %v11904_v57, 0  ;;  %14678 = vst [vmem:[#allocation6_spill] sm:$0xff] %v11923_v2  ;;  %v11926_v4 = vpack.c.bf16 %v895_v35, %v895_v35  ;;  %v11928_v5 = vpack.c.bf16 %v703_v0, %v703_v0 }
 0x109   : > { %10419 = vmatmul.mubr.msk.bf16.vlgmr.msra.gmra.mrb[12].mxu0 %vm1002_vm2, %v11781_v3  ;;  %10422 = vmatprep.subr.bf16.mxu1 %v14620_v34  ;;  %v1467_v36 = vsel %vm1002_vm2, %v11849_v30, 0  ;;  %v1421_v47 = vsel %vm1002_vm2, %v11866_v42, 0  ;;  %v11899_v56 = vpack.c.bf16 %v935_v50, %v935_v50  ;;  %v937_v6 = vcombine.high %v791_v52, %v791_v52 }
 0x10a   : > { %10429 = vmatpush3.bf16.xpose.msra.mxu0 %v1191_v7  ;;  %10430 = vmatprep.mubr.msk.bf16.mxu0 %vm11569_vm1, %v14620_v34  ;;  %14679 = vst [vmem:[#allocation7_spill] sm:$0xff] %v11926_v4  ;;  %14680 = vst [vmem:[#allocation8_spill] sm:$0xff] %v11928_v5  ;;  %v1605_v7 = vsel %vm1002_vm2, %v11923_v2, 0  ;;  %v896_v37 = vcombine.high %v700_v55, %v700_v55 }
 0x10b   : > { %10440 = vmatprep.subr.bf16.mxu0 %v14620_v34  ;;  %14675 = vst [vmem:[#allocation3_spill] sm:$0xff] %v11899_v56  ;;  %v1513_v62 = vsel %vm1002_vm2, %v11899_v56, 0  ;;  %v11941_v51 = vpack.c.bf16 %v937_v6, %v937_v6 }
 0x10c   : > { %v11943_v9 = vpack.c.bf16 %v896_v37, %v896_v37 }
 0x10d   : > { %14681 = vst [vmem:[#allocation9_spill] sm:$0xff] %v11941_v51  ;;  %v1697_v12 = vsel %vm1002_vm2, %v11941_v51, 0 }
 0x10e   : > { %14682 = vst [vmem:[#allocation10_spill] sm:$0xff] %v11943_v9 }
 0x10f   : > { %10413 = vmatmul.mubr.msk.bf16.vlgmr.msra.gmra.mrb[16].mxu1 %vm1002_vm2, %v11803_v11 }
 0x110   : > { %10423 = vmatpush3.bf16.xpose.msra.mxu1 %v1145_v14  ;;  %10424 = vmatprep.mubr.msk.bf16.mxu1 %vm11569_vm1, %v14620_v34  ;;  %v897_v14 = vcombine.high %v703_v0, %v703_v0 }
 0x111   : > { %10431 = vmatmul.mubr.msk.bf16.vlgmr.msra.gmra.mrb[16].mxu0 %vm1002_vm2, %v11805_v13  ;;  %10434 = vmatprep.subr.bf16.mxu1 %v14620_v34 }
 0x112   : > { %10441 = vmatpush3.bf16.xpose.msra.mxu0 %v1283_v17  ;;  %10442 = vmatprep.mubr.msk.bf16.mxu0 %vm11569_vm1, %v14620_v34  ;;  %v11952_v15 = vpack.c.bf16 %v897_v14, %v897_v14  ;;  %v10398_v17 = vpop.f32.mrb[4].mxu0 }
 0x113   : > { %10452 = vmatprep.subr.bf16.mxu0 %v14620_v34  ;;  %v11961_v18 = vadd.f32 %v10398_v17, %v9910_v16  ;;  %v851_v23 = vpop.f32.mrb[5].mxu0 }
 0x114   : > { %14683 = vst [vmem:[#allocation11_spill] sm:$0xff] %v11952_v15  ;;  %v852_v50 = vadd.f32 %v9910_v16, %v851_v23 }
 0x116   : > { %v970_v38 = vcombine.high %v852_v50, %v852_v50  ;;  %v11975_v52 = vpack.c.bf16 %v852_v50, %v852_v50 }
 0x117   : > { %10425 = vmatmul.mubr.msk.bf16.vlgmr.msra.gmra.mrb[20].mxu1 %vm1002_vm2, %v11827_v21 }
 0x118   : > { %10435 = vmatpush3.bf16.xpose.msra.mxu1 %v1237_v24  ;;  %10436 = vmatprep.mubr.msk.bf16.mxu1 %vm11569_vm1, %v14620_v34  ;;  %v10399_v24 = vpop.f32.mrb[6].mxu0  ;;  %14684 = vst [vmem:[#allocation12_spill] sm:$0xff] %v11975_v52  ;;  %v1954_v55 = vsel %vm1952_vm3, %v11975_v52, 0 }
 0x119   : > { %10443 = vmatmul.mubr.msk.bf16.vlgmr.msra.gmra.mrb[20].mxu0 %vm1002_vm2, %v11829_v22  ;;  %10446 = vmatprep.subr.bf16.mxu1 %v14620_v34  ;;  %v854_v26 = vpop.f32.mrb[7].mxu0 }
 0x11a   : > { %10453 = vmatpush3.bf16.xpose.msra.mxu0 %v1375_v25  ;;  %10454 = vmatprep.mubr.msk.bf16.mxu0 %vm11569_vm1, %v14620_v34  ;;  %v11963_v25 = vadd.f32 %v10399_v24, %v9910_v16  ;;  %v11965_v27 = vadd.f32 %v9910_v16, %v854_v26  ;;  %v10402_v28 = vpop.f32.mrb[8].mxu0 }
 0x11b   : > { %10464 = vmatprep.subr.bf16.mxu0 %v14620_v34  ;;  %v11967_v32 = vadd.f32 %v10402_v28, %v9910_v16 }
 0x11f   : > { %10437 = vmatmul.mubr.msk.bf16.vlgmr.msra.gmra.mrb[24].mxu1 %vm1002_vm2, %v11852_v31 }
 0x120   : > { %10447 = vmatpush3.bf16.xpose.msra.mxu1 %v1329_v39  ;;  %10448 = vmatprep.mubr.msk.bf16.mxu1 %vm11569_vm1, %v14620_v34  ;;  %v867_v39 = vpop.f32.mrb[9].mxu0 }
 0x121   : > { %10455 = vmatmul.mubr.msk.bf16.vlgmr.msra.gmra.mrb[24].mxu0 %vm1002_vm2, %v11854_v33  ;;  %10458 = vmatprep.subr.bf16.mxu1 %v14620_v34  ;;  %v10403_v40 = vpop.f32.mrb[10].mxu0 }
 0x122   : > { %10465 = vmatpush3.bf16.xpose.msra.mxu0 %v1467_v36  ;;  %10466 = vmatprep.mubr.msk.bf16.mxu0 %vm11569_vm1, %v14620_v34  ;;  %v11969_v36 = vadd.f32 %v9910_v16, %v867_v39  ;;  %v11971_v41 = vadd.f32 %v10403_v40, %v9910_v16  ;;  %v870_v44 = vpop.f32.mrb[11].mxu0 }
 0x123   : > { %10476 = vmatprep.subr.bf16.mxu0 %v14620_v34 }
 0x127   : > { %10449 = vmatmul.mubr.msk.bf16.vlgmr.msra.gmra.mrb[28].mxu1 %vm1002_vm2, %v11876_v45 }
 0x128   : > { %10459 = vmatpush3.bf16.xpose.msra.mxu1 %v1421_v47  ;;  %10460 = vmatprep.mubr.msk.bf16.mxu1 %vm11569_vm1, %v14620_v34  ;;  %v11973_v47 = vadd.f32 %v9910_v16, %v870_v44 }
 0x129   : > { %10467 = vmatmul.mubr.msk.bf16.vlgmr.msra.gmra.mrb[28].mxu0 %vm1002_vm2, %v11882_v48  ;;  %10470 = vmatprep.subr.bf16.mxu1 %v14620_v34 }
 0x12a   : > { %10477 = vmatpush3.bf16.xpose.msra.mxu0 %v1559_v54  ;;  %10478 = vmatprep.mubr.msk.bf16.mxu0 %vm11569_vm1, %v14620_v34  ;;  %v11977_v54 = vpack.c.bf16 %v970_v38, %v970_v38 }
 0x12b   : > { %10488 = vmatprep.subr.bf16.mxu0 %v14620_v34 }
 0x12c   : > { %14685 = vst [vmem:[#allocation13_spill] sm:$0xff] %v11977_v54  ;;  %v2000_v59 = vsel %vm1952_vm3, %v11977_v54, 0 }
 0x12f   : > { %10461 = vmatmul.mubr.msk.bf16.vlgmr.msra.gmra.mrb[32].mxu1 %vm1002_vm2, %v11902_v43 }
 0x130   : > { %10471 = vmatpush3.bf16.xpose.msra.mxu1 %v1513_v62  ;;  %10472 = vmatprep.mubr.msk.bf16.mxu1 %vm11569_vm1, %v14620_v34 }
 0x131   : > { %10479 = vmatmul.mubr.msk.bf16.vlgmr.msra.gmra.mrb[32].mxu0 %vm1002_vm2, %v11906_v58  ;;  %10482 = vmatprep.subr.bf16.mxu1 %v14620_v34 }
 0x132   : > { %10489 = vmatpush3.bf16.xpose.msra.mxu0 %v1651_v63  ;;  %10490 = vmatprep.mubr.msk.bf16.mxu0 %vm11569_vm1, %v14620_v34 }
 0x133   : > { %10500 = vmatprep.subr.bf16.mxu0 %v14620_v34 }
 0x137   : > { %10473 = vmatmul.mubr.msk.bf16.vlgmr.msra.gmra.mrb[36].mxu1 %vm1002_vm2, %v11926_v4 }
 0x138   : > { %10483 = vmatpush3.bf16.xpose.msra.mxu1 %v1605_v7  ;;  %10484 = vmatprep.mubr.msk.bf16.mxu1 %vm11569_vm1, %v14620_v34 }
 0x139   : > { %10491 = vmatmul.mubr.msk.bf16.vlgmr.msra.gmra.mrb[36].mxu0 %vm1002_vm2, %v11928_v5  ;;  %10494 = vmatprep.subr.bf16.mxu1 %v14620_v34 }
 0x13a   : > { %10502 = vmatprep.mubr.msk.bf16.mxu0 %vm11569_vm1, %v14620_v34  ;;  %10501 = vmatpush3.bf16.msra.mxu0 %v1954_v55 }
 0x13b   : > { %10512 = vmatprep.subr.bf16.mxu0 %v14620_v34 }
 0x13f   : > { %10485 = vmatmul.mubr.msk.bf16.vlgmr.msra.gmra.mrb[40].mxu1 %vm1002_vm2, %v11943_v9 }
 0x140   : > { %10495 = vmatpush3.bf16.xpose.msra.mxu1 %v1697_v12  ;;  %10496 = vmatprep.mubr.msk.bf16.mxu1 %vm11569_vm1, %v14620_v34 }
 0x141   : > { %10506 = vmatprep.subr.bf16.mxu1 %v14620_v34 }
 0x147   : > { %10497 = vmatmul.mubr.msk.bf16.vlgmr.msra.gmra.mrb[44].mxu1 %vm1002_vm2, %v11952_v15 }
 0x148   : > { %10508 = vmatprep.mubr.msk.bf16.mxu1 %vm11569_vm1, %v14620_v34  ;;  %10507 = vmatpush3.bf16.msra.mxu1 %v2000_v59 }
 0x149   : > { %10518 = vmatprep.subr.bf16.mxu1 %v14620_v34 }
 0x1da   : > { %v1043_v62 = vpop.f32.mrb[12].mxu1 }
 0x1db   : > { %v11985_v35 = vmul.f32 0.35355338, %v1043_v62  ;;  %v10408_v63 = vpop.f32.mrb[13].mxu1 }
 0x1dc   : > { %v1135_v0 = vpop.f32.mrb[12].mxu0  ;;  %v1046_v6 = vpop.f32.mrb[14].mxu1 }
 0x1dd   : > { %v1756_v7 = vsel %vm1755_vm4, %v11985_v35, -inf  ;;  %v11989_v37 = vmul.f32 0.35355338, %v1135_v0  ;;  %v10420_v12 = vpop.f32.mrb[13].mxu0  ;;  %v10409_v14 = vpop.f32.mrb[15].mxu1 }
 0x1de   : > { %1757 = vmax.xlane.f32.xlu0 %v1756_v7  ;;  %v1138_v16 = vpop.f32.mrb[14].mxu0 }
 0x1df   : > { %v1762_v17 = vsel %vm1755_vm4, %v11989_v37, -inf  ;;  %v10421_v23 = vpop.f32.mrb[15].mxu0 }
 0x1e0   : > { %1763 = vmax.xlane.f32.xlu1 %v1762_v17 }
 0x1e2   : > { %v1089_v24 = vpop.f32.mrb[16].mxu1 }
 0x1e3   : > { %v10414_v26 = vpop.f32.mrb[17].mxu1  ;;  %v11993_v28 = vmul.f32 0.35355338, %v1089_v24 }
 0x1e4   : > { %v1092_v39 = vpop.f32.mrb[18].mxu1  ;;  %v1227_v40 = vpop.f32.mrb[16].mxu0 }
 0x1e5   : > { %v10415_v44 = vpop.f32.mrb[19].mxu1  ;;  %v10432_v50 = vpop.f32.mrb[17].mxu0  ;;  %v1759_v38 = vsel %vm1755_vm4, %v11993_v28, -inf  ;;  %v11997_v55 = vmul.f32 0.35355338, %v1227_v40 }
 0x1e6   : > { %v1230_v59 = vpop.f32.mrb[18].mxu0  ;;  %1760 = vmax.xlane.f32.xlu0 %v1759_v38 }
 0x1e7   : > { %v10433_v62 = vpop.f32.mrb[19].mxu0  ;;  %v1768_v63 = vsel %vm1755_vm4, %v11997_v55, -inf }
 0x1ea   : > { %1769 = vmax.xlane.f32.xlu0 %v1768_v63  ;;  %v1181_v0 = vpop.f32.mrb[20].mxu1 }
 0x1eb   : > { %v10426_v6 = vpop.f32.mrb[21].mxu1  ;;  %v12001_v7 = vmul.f32 0.35355338, %v1181_v0 }
 0x1ec   : > { %v1184_v12 = vpop.f32.mrb[22].mxu1  ;;  %v1319_v14 = vpop.f32.mrb[20].mxu0 }
 0x1ed   : > { %v10427_v16 = vpop.f32.mrb[23].mxu1  ;;  %v10444_v17 = vpop.f32.mrb[21].mxu0  ;;  %v1765_v23 = vsel %vm1755_vm4, %v12001_v7, -inf  ;;  %v12005_v24 = vmul.f32 0.35355338, %v1319_v14 }
 0x1ee   : > { %v1322_v26 = vpop.f32.mrb[22].mxu0  ;;  %1766 = vmax.xlane.f32.xlu1 %v1765_v23 }
 0x1ef   : > { %v10445_v39 = vpop.f32.mrb[23].mxu0  ;;  %v1774_v40 = vsel %vm1755_vm4, %v12005_v24, -inf }
 0x1f0   : > { %1775 = vmax.xlane.f32.xlu0 %v1774_v40 }
 0x1f2   : > { %v1273_v44 = vpop.f32.mrb[24].mxu1 }
 0x1f3   : > { %v12009_v50 = vmul.f32 0.35355338, %v1273_v44  ;;  %v10438_v38 = vpop.f32.mrb[25].mxu1 }
 0x1f4   : > { %v1276_v59 = vpop.f32.mrb[26].mxu1  ;;  %v1411_v62 = vpop.f32.mrb[24].mxu0 }
 0x1f5   : > { %v12011_v63 = vmul.f32 0.35355338, %v1411_v62  ;;  %v10439_v0 = vpop.f32.mrb[27].mxu1  ;;  %v10456_v6 = vpop.f32.mrb[25].mxu0  ;;  %v1771_v12 = vsel %vm1755_vm4, %v12009_v50, -inf }
 0x1f6   : > { %v1414_v14 = vpop.f32.mrb[26].mxu0  ;;  %1772 = vmax.xlane.f32.xlu1 %v1771_v12 }
 0x1f7   : > { %v10457_v16 = vpop.f32.mrb[27].mxu0  ;;  %v1780_v17 = vsel %vm1755_vm4, %v12011_v63, -inf }
 0x1f8   : > { %1781 = vmax.xlane.f32.xlu0 %v1780_v17 }
 0x1fa   : > { %v1365_v23 = vpop.f32.mrb[28].mxu1 }
 0x1fb   : > { %v12017_v26 = vmul.f32 0.35355338, %v1365_v23  ;;  %v10450_v39 = vpop.f32.mrb[29].mxu1 }
 0x1fc   : > { %v1368_v40 = vpop.f32.mrb[30].mxu1  ;;  %v1503_v44 = vpop.f32.mrb[28].mxu0 }
 0x1fd   : > { %v12019_v38 = vmul.f32 0.35355338, %v1503_v44  ;;  %v10451_v59 = vpop.f32.mrb[31].mxu1  ;;  %v10468_v62 = vpop.f32.mrb[29].mxu0  ;;  %v1777_v0 = vsel %vm1755_vm4, %v12017_v26, -inf }
 0x1fe   : > { %v1506_v6 = vpop.f32.mrb[30].mxu0  ;;  %1778 = vmax.xlane.f32.xlu1 %v1777_v0 }
 0x1ff   : > { %v10469_v12 = vpop.f32.mrb[31].mxu0  ;;  %v1786_v14 = vsel %vm1755_vm4, %v12019_v38, -inf }
 0x200   : > { %1787 = vmax.xlane.f32.xlu0 %v1786_v14 }
 0x202   : > { %v1457_v16 = vpop.f32.mrb[32].mxu1 }
 0x203   : > { %v12025_v17 = vmul.f32 0.35355338, %v1457_v16  ;;  %v10462_v23 = vpop.f32.mrb[33].mxu1 }
 0x204   : > { %v1460_v39 = vpop.f32.mrb[34].mxu1  ;;  %v1595_v40 = vpop.f32.mrb[32].mxu0 }
 0x205   : > { %v12027_v44 = vmul.f32 0.35355338, %v1595_v40  ;;  %v10463_v59 = vpop.f32.mrb[35].mxu1  ;;  %v10480_v62 = vpop.f32.mrb[33].mxu0  ;;  %v1783_v34 = vsel %vm1755_vm4, %v12025_v17, -inf }
 0x206   : > { %v1598_v6 = vpop.f32.mrb[34].mxu0  ;;  %1784 = vmax.xlane.f32.xlu1 %v1783_v34 }
 0x207   : > { %v10481_v0 = vpop.f32.mrb[35].mxu0  ;;  %v1792_v12 = vsel %vm1755_vm4, %v12027_v44, -inf }
 0x208   : > { %1793 = vmax.xlane.f32.xlu0 %v1792_v12 }
 0x20a   : > { %v1549_v14 = vpop.f32.mrb[36].mxu1 }
 0x20b   : > { %v12033_v16 = vmul.f32 0.35355338, %v1549_v14  ;;  %v10474_v23 = vpop.f32.mrb[37].mxu1 }
 0x20c   : > { %v1552_v39 = vpop.f32.mrb[38].mxu1  ;;  %v1687_v54 = vpop.f32.mrb[36].mxu0 }
 0x20d   : > { %v12035_v40 = vmul.f32 0.35355338, %v1687_v54  ;;  %v10475_v59 = vpop.f32.mrb[39].mxu1  ;;  %v10492_v62 = vpop.f32.mrb[37].mxu0  ;;  %v1789_v15 = vsel %vm1755_vm4, %v12033_v16, -inf }
 0x20e   : > { %v1690_v6 = vpop.f32.mrb[38].mxu0  ;;  %1790 = vmax.xlane.f32.xlu1 %v1789_v15 }
 0x20f   : > { %v10493_v34 = vpop.f32.mrb[39].mxu0  ;;  %v1798_v0 = vsel %vm1755_vm4, %v12035_v40, -inf }
 0x210   : > { %1799 = vmax.xlane.f32.xlu0 %v1798_v0 }
 0x212   : > { %v1641_v12 = vpop.f32.mrb[40].mxu1 }
 0x213   : > { %v12041_v14 = vmul.f32 0.35355338, %v1641_v12  ;;  %v10486_v23 = vpop.f32.mrb[41].mxu1 }
 0x214   : > { %v1644_v39 = vpop.f32.mrb[42].mxu1 }
 0x215   : > { %v10487_v51 = vpop.f32.mrb[43].mxu1  ;;  %v1795_v54 = vsel %vm1755_vm4, %v12041_v14, -inf }
 0x216   : > { %1796 = vmax.xlane.f32.xlu1 %v1795_v54 }
 0x21a   : > { %v1733_v59 = vpop.f32.mrb[44].mxu1 }
 0x21b   : > { %v12045_v62 = vmul.f32 0.35355338, %v1733_v59  ;;  %v10498_v6 = vpop.f32.mrb[45].mxu1 }
 0x21c   : > { %v1736_v15 = vpop.f32.mrb[46].mxu1 }
 0x21d   : > { %v10499_v34 = vpop.f32.mrb[47].mxu1  ;;  %v1801_v9 = vsel %vm1755_vm4, %v12045_v62, -inf }
 0x21e   : > { %1802 = vmax.xlane.f32.xlu1 %v1801_v9 }
 0x26b   : > { %v1758_v0 = vpop.xlane.xlu0 %1757 }
 0x26c   : > { %v1804_v12 = vsub.f32 %v11985_v35, %v1758_v0 }
 0x26d   : > { %v1764_v23 = vpop.xlane.xlu1 %1763 }
 0x26e   : > { %v1820_v39 = vmul.f32 1.442695, %v1804_v12  ;;  %v1806_v51 = vsub.f32 %v11989_v37, %v1764_v23 }
 0x270   : > { %11256 = vpow2.f32 %v1820_v39  ;;  %v1824_v2 = vmul.f32 1.442695, %v1806_v51 }
 0x272   : > { %11258 = vpow2.f32 %v1824_v2 }
 0x273   : > { %v1761_v54 = vpop.xlane.xlu0 %1760 }
 0x274   : > { %v1805_v59 = vsub.f32 %v11993_v28, %v1761_v54 }
 0x276   : > { %v1822_v6 = vmul.f32 1.442695, %v1805_v59 }
 0x277   : > { %v1770_v15 = vpop.xlane.xlu0 %1769 }
 0x278   : > { %11260 = vpow2.f32 %v1822_v6  ;;  %v1808_v34 = vsub.f32 %v11997_v55, %v1770_v15 }
 0x27a   : > { %v12053_v4 = vpop.eup %11256  ;;  %v1828_v9 = vmul.f32 1.442695, %v1808_v34 }
 0x27b   : > { %v1767_v56 = vpop.xlane.xlu1 %1766  ;;  %v1852_v35 = vsel %vm1755_vm4, %v12053_v4, 0.0 }
 0x27c   : > { %v12057_v0 = vpop.eup %11258  ;;  %11262 = vpow2.f32 %v1828_v9  ;;  %v1807_v2 = vsub.f32 %v12001_v7, %v1767_v56  ;;  %1853 = vadd.xlane.f32.xlu0 %v1852_v35 }
 0x27d   : > { %v1776_v37 = vpop.xlane.xlu0 %1775  ;;  %v1858_v55 = vsel %vm1755_vm4, %v12057_v0, 0.0 }
 0x27e   : > { %v1826_v28 = vmul.f32 1.442695, %v1807_v2  ;;  %v1810_v12 = vsub.f32 %v12005_v24, %v1776_v37 }
 0x280   : > { %11264 = vpow2.f32 %v1826_v28  ;;  %v1832_v23 = vmul.f32 1.442695, %v1810_v12  ;;  %1859 = vadd.xlane.f32.xlu0 %v1858_v55 }
 0x282   : > { %v12063_v39 = vpop.eup %11260  ;;  %11266 = vpow2.f32 %v1832_v23 }
 0x283   : > { %v1773_v51 = vpop.xlane.xlu1 %1772  ;;  %v1855_v54 = vsel %vm1755_vm4, %v12063_v39, 0.0 }
 0x284   : > { %v1809_v56 = vsub.f32 %v12009_v50, %v1773_v51  ;;  %1856 = vadd.xlane.f32.xlu1 %v1855_v54 }
 0x285   : > { %v1782_v7 = vpop.xlane.xlu0 %1781 }
 0x286   : > { %v12068_v59 = vpop.eup %11262  ;;  %v1830_v24 = vmul.f32 1.442695, %v1809_v56  ;;  %v1812_v6 = vsub.f32 %v12011_v63, %v1782_v7 }
 0x287   : > { %v1864_v15 = vsel %vm1755_vm4, %v12068_v59, 0.0 }
 0x288   : > { %11268 = vpow2.f32 %v1830_v24  ;;  %v1836_v34 = vmul.f32 1.442695, %v1812_v6  ;;  %1865 = vadd.xlane.f32.xlu0 %v1864_v15 }
 0x28a   : > { %v12073_v9 = vpop.eup %11264  ;;  %11270 = vpow2.f32 %v1836_v34 }
 0x28b   : > { %v1779_v35 = vpop.xlane.xlu1 %1778  ;;  %v1861_v50 = vsel %vm1755_vm4, %v12073_v9, 0.0 }
 0x28c   : > { %v12077_v2 = vpop.eup %11266  ;;  %v1811_v37 = vsub.f32 %v12017_v26, %v1779_v35  ;;  %1862 = vadd.xlane.f32.xlu1 %v1861_v50 }
 0x28d   : > { %v1788_v28 = vpop.xlane.xlu0 %1787  ;;  %v1870_v63 = vsel %vm1755_vm4, %v12077_v2, 0.0 }
 0x28e   : > { %v1834_v12 = vmul.f32 1.442695, %v1811_v37  ;;  %v1814_v55 = vsub.f32 %v12019_v38, %v1788_v28  ;;  %1871 = vadd.xlane.f32.xlu0 %v1870_v63 }
 0x290   : > { %11272 = vpow2.f32 %v1834_v12  ;;  %v1840_v23 = vmul.f32 1.442695, %v1814_v55 }
 0x292   : > { %v12083_v51 = vpop.eup %11268  ;;  %11274 = vpow2.f32 %v1840_v23 }
 0x293   : > { %v1785_v54 = vpop.xlane.xlu1 %1784  ;;  %v1867_v56 = vsel %vm1755_vm4, %v12083_v51, 0.0 }
 0x294   : > { %v12087_v7 = vpop.eup %11270  ;;  %v1813_v26 = vsub.f32 %v12025_v17, %v1785_v54  ;;  %1868 = vadd.xlane.f32.xlu1 %v1867_v56 }
 0x295   : > { %v1794_v24 = vpop.xlane.xlu0 %1793  ;;  %v1876_v6 = vsel %vm1755_vm4, %v12087_v7, 0.0 }
 0x296   : > { %v1838_v38 = vmul.f32 1.442695, %v1813_v26  ;;  %v1816_v15 = vsub.f32 %v12027_v44, %v1794_v24  ;;  %1877 = vadd.xlane.f32.xlu0 %v1876_v6 }
 0x298   : > { %11276 = vpow2.f32 %v1838_v38  ;;  %v1844_v34 = vmul.f32 1.442695, %v1816_v15 }
 0x29a   : > { %v12093_v35 = vpop.eup %11272  ;;  %11278 = vpow2.f32 %v1844_v34 }
 0x29b   : > { %v1791_v50 = vpop.xlane.xlu1 %1790  ;;  %v1873_v37 = vsel %vm1755_vm4, %v12093_v35, 0.0 }
 0x29c   : > { %v12097_v28 = vpop.eup %11274  ;;  %v1815_v17 = vsub.f32 %v12033_v16, %v1791_v50  ;;  %1874 = vadd.xlane.f32.xlu1 %v1873_v37 }
 0x29d   : > { %v1800_v63 = vpop.xlane.xlu0 %1799  ;;  %v1882_v12 = vsel %vm1755_vm4, %v12097_v28, 0.0 }
 0x29e   : > { %v1842_v44 = vmul.f32 1.442695, %v1815_v17  ;;  %v1818_v55 = vsub.f32 %v12035_v40, %v1800_v63  ;;  %1883 = vadd.xlane.f32.xlu0 %v1882_v12  ;;  %v12163_v12 = vpack.c.bf16 %v11965_v27, %v11965_v27 }
 0x2a0   : > { %11280 = vpow2.f32 %v1842_v44  ;;  %v1848_v23 = vmul.f32 1.442695, %v1818_v55  ;;  %14686 = vst [vmem:[#allocation14_spill] sm:$0xff] %v12163_v12  ;;  %v12169_v55 = vpack.c.bf16 %v11961_v18, %v11961_v18 }
 0x2a2   : > { %v12103_v54 = vpop.eup %11276  ;;  %11282 = vpow2.f32 %v1848_v23  ;;  %14687 = vst [vmem:[#allocation15_spill] sm:$0xff] %v12169_v55  ;;  %v12175_v23 = vpack.c.bf16 %v11963_v25, %v11963_v25 }
 0x2a3   : > { %v1879_v56 = vsel %vm1755_vm4, %v12103_v54, 0.0  ;;  %v1797_v15 = vpop.xlane.xlu1 %1796 }
 0x2a4   : > { %v12107_v26 = vpop.eup %11278  ;;  %1880 = vadd.xlane.f32.xlu1 %v1879_v56  ;;  %v1817_v34 = vsub.f32 %v12041_v14, %v1797_v15  ;;  %14688 = vst [vmem:[#allocation16_spill] sm:$0xff] %v12175_v23 }
 0x2a5   : > { %v1888_v16 = vsel %vm1755_vm4, %v12107_v26, 0.0 }
 0x2a6   : > { %1889 = vadd.xlane.f32.xlu0 %v1888_v16  ;;  %v1846_v50 = vmul.f32 1.442695, %v1817_v34  ;;  %v12181_v16 = vpack.c.bf16 %v11969_v36, %v11969_v36 }
 0x2a8   : > { %11284 = vpow2.f32 %v1846_v50  ;;  %14689 = vst [vmem:[#allocation17_spill] sm:$0xff] %v12181_v16 }
 0x2aa   : > { %v12111_v24 = vpop.eup %11280 }
 0x2ab   : > { %v1885_v40 = vsel %vm1755_vm4, %v12111_v24, 0.0  ;;  %v1803_v17 = vpop.xlane.xlu1 %1802 }
 0x2ac   : > { %v12115_v6 = vpop.eup %11282  ;;  %1886 = vadd.xlane.f32.xlu1 %v1885_v40  ;;  %v1819_v63 = vsub.f32 %v12045_v62, %v1803_v17 }
 0x2ad   : > { %v1894_v38 = vsel %vm1755_vm4, %v12115_v6, 0.0 }
 0x2ae   : > { %1895 = vadd.xlane.f32.xlu0 %v1894_v38  ;;  %v1850_v44 = vmul.f32 1.442695, %v1819_v63 }
 0x2b0   : > { %11286 = vpow2.f32 %v1850_v44  ;;  %v971_v44 = vcombine.high %v11965_v27, %v11965_v27 }
 0x2b2   : > { %v12136_v37 = vpop.eup %11284 }
 0x2b3   : > { %v1891_v14 = vsel %vm1755_vm4, %v12136_v37, 0.0 }
 0x2ba   : > { %v12185_v38 = vpop.eup %11286 }
 0x2bb   : > { %v1897_v50 = vsel %vm1755_vm4, %v12185_v38, 0.0 }
 0x2bd   : > { %2742 = vrot.lane.b32.xlu1 %v11771_v60, %s11570_s27 }
 0x2c4   : > { %2690 = vrot.lane.b32.xlu0 %v11752_v49, %s11570_s27 }
 0x2c8   : > { %2794 = vrot.lane.b32.xlu0 %v11760_v53, %s11570_s27 }
 0x2cc   : > { %2791 = vrot.lane.b32.xlu0 %v11781_v3, %s11570_s27 }
 0x2d0   : > { %2898 = vrot.lane.b32.xlu0 %v11779_v1, %s11570_s27 }
 0x2d4   : > { %2895 = vrot.lane.b32.xlu0 %v11805_v13, %s11570_s27 }
 0x2d8   : > { %3002 = vrot.lane.b32.xlu0 %v11801_v10, %s11570_s27 }
 0x2dc   : > { %2999 = vrot.lane.b32.xlu0 %v11829_v22, %s11570_s27 }
 0x2e0   : > { %3106 = vrot.lane.b32.xlu0 %v11824_v20, %s11570_s27 }
 0x2e1   : > { %1892 = vadd.xlane.f32.xlu1 %v1891_v14 }
 0x2e4   : > { %3103 = vrot.lane.b32.xlu0 %v11854_v33, %s11570_s27 }
 0x2e8   : > { %3210 = vrot.lane.b32.xlu0 %v11849_v30, %s11570_s27 }
 0x2ec   : > { %3207 = vrot.lane.b32.xlu0 %v11882_v48, %s11570_s27 }
 0x2f0   : > { %3314 = vrot.lane.b32.xlu0 %v11878_v46, %s11570_s27 }
 0x2f2   : > { %2687 = vrot.lane.b32.xlu1 %v11773_v61, %s11570_s27 }
 0x2f4   : > { %3311 = vrot.lane.b32.xlu0 %v11906_v58, %s11570_s27 }
 0x2f8   : > { %3418 = vrot.lane.b32.xlu0 %v11904_v57, %s11570_s27 }
 0x2fc   : > { %3415 = vrot.lane.b32.xlu0 %v11928_v5, %s11570_s27 }
 0x300   : > { %3727 = vrot.lane.b32.xlu0 %v11975_v52, %s11570_s27 }
 0x304   : > { %3825 = vrot.lane.b32.xlu0 %v12163_v12, %s11570_s27 }
 0x308   : > { %3923 = vrot.lane.b32.xlu0 %v12169_v55, %s11570_s27 }
 0x309   : > { %v1854_v62 = vpop.xlane.xlu0 %1853 }
 0x30a   : > { %11288 = vrcp.f32 %v1854_v62  ;;  %v2046_v62 = vsel %vm1952_vm3, %v12163_v12, 0 }
 0x30c   : > { %4021 = vrot.lane.b32.xlu0 %v12175_v23, %s11570_s27 }
 0x30d   : > { %v1860_v56 = vpop.xlane.xlu0 %1859 }
 0x30e   : > { %11290 = vrcp.f32 %v1860_v56 }
 0x310   : > { %4119 = vrot.lane.b32.xlu0 %v12181_v16, %s11570_s27 }
 0x311   : > { %v1857_v40 = vpop.xlane.xlu1 %1856 }
 0x312   : > { %11292 = vrcp.f32 %v1857_v40  ;;  %v14690_v40 = vmov 0.0  }
 0x314   : > { %v11289_v15 = vpop.eup %11288 }
 0x315   : > { %v1866_v34 = vpop.xlane.xlu0 %1865  ;;  %v1916_v14 = vmul.f32 %v11289_v15, %v12053_v4 }
 0x316   : > { %11294 = vrcp.f32 %v1866_v34  ;;  %1898 = vadd.xlane.f32.xlu1 %v1897_v50  ;;  %v12199_v50 = vpack.c.bf16 %v971_v44, %v971_v44 }
 0x317   : > { %v1932_v17 = vpack.c.bf16 %v1916_v14, %v1916_v14 }
 0x318   : > { %v11291_v63 = vpop.eup %11290  ;;  %14691 = vst [vmem:[#allocation18_spill] sm:$0xff] %v12199_v50 }
 0x319   : > { %10503 = vmatmul.mubr.msk.bf16.vlgmr.msra.gmra.mrb[40].mxu0 %vm1948_vm5, %v1932_v17  ;;  %v1863_v56 = vpop.xlane.xlu1 %1862  ;;  %v1918_v15 = vmul.f32 %v11291_v63, %v12057_v0  ;;  %v2138_v0 = vsel %vm1952_vm3, %v12169_v55, 0 }
 0x31a   : > { %10513 = vmatpush3.bf16.msra.mxu0 %v2046_v62  ;;  %11296 = vrcp.f32 %v1863_v56  ;;  %10514 = vmatprep.mubr.msk.bf16.mxu0 %vm11569_vm1, %v14690_v40  ;;  %v972_v62 = vcombine.high %v11961_v18, %v11961_v18  ;;  %v2092_v56 = vsel %vm1952_vm3, %v12199_v50, 0 }
 0x31b   : > { %v1872_v4 = vpop.xlane.xlu0 %1871  ;;  %10524 = vmatprep.subr.bf16.mxu0 %v14690_v40  ;;  %v1934_v17 = vpack.c.bf16 %v1918_v15, %v1918_v15 }
 0x31c   : > { %v11293_v34 = vpop.eup %11292  ;;  %11298 = vrcp.f32 %v1872_v4  ;;  %v12217_v4 = vpack.c.bf16 %v972_v62, %v972_v62 }
 0x31d   : > { %v1917_v27 = vmul.f32 %v11293_v34, %v12063_v39 }
 0x31e   : > { %14692 = vst [vmem:[#allocation19_spill] sm:$0xff] %v12217_v4 }
 0x31f   : > { %v1933_v14 = vpack.c.bf16 %v1917_v27, %v1917_v27 }
 0x320   : > { %v11295_v12 = vpop.eup %11294 }
 0x321   : > { %10509 = vmatmul.mubr.msk.bf16.vlgmr.msra.gmra.mrb[48].mxu1 %vm1948_vm5, %v1933_v14  ;;  %10515 = vmatmul.mubr.msk.bf16.vlgmr.msra.gmra.mrb[44].mxu0 %vm1948_vm5, %v1934_v17  ;;  %v1869_v63 = vpop.xlane.xlu1 %1868  ;;  %v1920_v18 = vmul.f32 %v11295_v12, %v12068_v59  ;;  %v973_v17 = vcombine.high %v11963_v25, %v11963_v25  ;;  %v2184_v59 = vsel %vm1952_vm3, %v12217_v4, 0 }
 0x322   : > { %10519 = vmatpush3.bf16.msra.mxu1 %v2092_v56  ;;  %10525 = vmatpush3.bf16.msra.mxu0 %v2138_v0  ;;  %11300 = vrcp.f32 %v1869_v63 }
 0x323   : > { %v1878_v39 = vpop.xlane.xlu0 %1877  ;;  %10520 = vmatprep.mubr.msk.bf16.mxu1 %vm11569_vm1, %v14690_v40  ;;  %10526 = vmatprep.mubr.msk.bf16.mxu0 %vm11569_vm1, %v14690_v40  ;;  %v1936_v27 = vpack.c.bf16 %v1920_v18, %v1920_v18  ;;  %v12238_v0 = vpack.c.bf16 %v973_v17, %v973_v17 }
 0x324   : > { %v11297_v44 = vpop.eup %11296  ;;  %10530 = vmatprep.subr.bf16.mxu1 %v14690_v40  ;;  %10536 = vmatprep.subr.bf16.mxu0 %v14690_v40  ;;  %11302 = vrcp.f32 %v1878_v39 }
 0x325   : > { %v1919_v15 = vmul.f32 %v11297_v44, %v12073_v9  ;;  %v2230_v9 = vsel %vm1952_vm3, %v12175_v23, 0  ;;  %14693 = vst [vmem:[#allocation20_spill] sm:$0xff] %v12238_v0 }
 0x326   : > { %v11299_v14 = vpop.eup %11298 }
 0x327   : > { %2739 = vrot.lane.b32.xlu1 %v11803_v11, %s11570_s27  ;;  %v1935_v34 = vpack.c.bf16 %v1919_v15, %v1919_v15  ;;  %v1922_v25 = vmul.f32 %v11299_v14, %v12077_v2  ;;  %v974_v2 = vcombine.high %v11969_v36, %v11969_v36  ;;  %v2276_v15 = vsel %vm1952_vm3, %v12238_v0, 0 }
 0x329   : > { %10521 = vmatmul.mubr.msk.bf16.vlgmr.msra.gmra.mrb[52].mxu1 %vm1948_vm5, %v1935_v34  ;;  %10527 = vmatmul.mubr.msk.bf16.vlgmr.msra.gmra.mrb[48].mxu0 %vm1948_vm5, %v1936_v27  ;;  %v1875_v12 = vpop.xlane.xlu1 %1874  ;;  %v1938_v18 = vpack.c.bf16 %v1922_v25, %v1922_v25  ;;  %v12260_v17 = vpack.c.bf16 %v974_v2, %v974_v2  ;;  %v975_v25 = vcombine.high %v11973_v47, %v11973_v47 }
 0x32a   : > { %10531 = vmatpush3.bf16.msra.mxu1 %v2184_v59  ;;  %10537 = vmatpush3.bf16.msra.mxu0 %v2230_v9  ;;  %11304 = vrcp.f32 %v1875_v12  ;;  %v12264_v59 = vpack.c.bf16 %v11973_v47, %v11973_v47 }
 0x32b   : > { %v1884_v62 = vpop.xlane.xlu0 %1883  ;;  %2846 = vrot.lane.b32.xlu1 %v11797_v8, %s11570_s27  ;;  %10532 = vmatprep.mubr.msk.bf16.mxu1 %vm11569_vm1, %v14690_v40  ;;  %14694 = vst [vmem:[#allocation21_spill] sm:$0xff] %v12260_v17  ;;  %v12290_v2 = vpack.c.bf16 %v975_v25, %v975_v25 }
 0x32c   : > { %v11301_v56 = vpop.eup %11300  ;;  %10538 = vmatprep.mubr.msk.bf16.mxu0 %vm11569_vm1, %v14690_v40  ;;  %10542 = vmatprep.subr.bf16.mxu1 %v14690_v40  ;;  %11306 = vrcp.f32 %v1884_v62  ;;  %14695 = vst [vmem:[#allocation22_spill] sm:$0xff] %v12264_v59 }
 0x32d   : > { %10548 = vmatprep.subr.bf16.mxu0 %v14690_v40  ;;  %v1921_v63 = vmul.f32 %v11301_v56, %v12083_v51  ;;  %v2322_v51 = vsel %vm1952_vm3, %v12181_v16, 0  ;;  %v2368_v56 = vsel %vm1952_vm3, %v12260_v17, 0  ;;  %14697 = vst [vmem:[#allocation24_spill] sm:$0xff] %v12290_v2 }
 0x32e   : > { %v11303_v44 = vpop.eup %11302 }
 0x32f   : > { %2843 = vrot.lane.b32.xlu1 %v11827_v21, %s11570_s27  ;;  %v1937_v39 = vpack.c.bf16 %v1921_v63, %v1921_v63  ;;  %v1924_v36 = vmul.f32 %v11303_v44, %v12087_v7  ;;  %v12288_v44 = vpack.c.bf16 %v11967_v32, %v11967_v32 }
 0x331   : > { %10533 = vmatmul.mubr.msk.bf16.vlgmr.msra.gmra.mrb[56].mxu1 %vm1948_vm5, %v1937_v39  ;;  %10539 = vmatmul.mubr.msk.bf16.vlgmr.msra.gmra.mrb[52].mxu0 %vm1948_vm5, %v1938_v18  ;;  %v1881_v34 = vpop.xlane.xlu1 %1880  ;;  %v1940_v12 = vpack.c.bf16 %v1924_v36, %v1924_v36  ;;  %14696 = vst [vmem:[#allocation23_spill] sm:$0xff] %v12288_v44  ;;  %v2460_v36 = vsel %vm1952_vm3, %v12290_v2, 0 }
 0x332   : > { %10543 = vmatpush3.bf16.msra.mxu1 %v2276_v15  ;;  %10549 = vmatpush3.bf16.msra.mxu0 %v2322_v51  ;;  %11308 = vrcp.f32 %v1881_v34 }
 0x333   : > { %v1890_v27 = vpop.xlane.xlu0 %1889  ;;  %2950 = vrot.lane.b32.xlu1 %v11822_v19, %s11570_s27  ;;  %10544 = vmatprep.mubr.msk.bf16.mxu1 %vm11569_vm1, %v14690_v40 }
 0x334   : > { %v11305_v14 = vpop.eup %11304  ;;  %10550 = vmatprep.mubr.msk.bf16.mxu0 %vm11569_vm1, %v14690_v40  ;;  %10554 = vmatprep.subr.bf16.mxu1 %v14690_v40  ;;  %11310 = vrcp.f32 %v1890_v27  ;;  %v976_v27 = vcombine.high %v11967_v32, %v11967_v32 }
 0x335   : > { %10560 = vmatprep.subr.bf16.mxu0 %v14690_v40  ;;  %v1923_v9 = vmul.f32 %v11305_v14, %v12093_v35  ;;  %v2414_v35 = vsel %vm1952_vm3, %v12264_v59, 0 }
 0x336   : > { %v11307_v62 = vpop.eup %11306 }
 0x337   : > { %2947 = vrot.lane.b32.xlu1 %v11852_v31, %s11570_s27  ;;  %v1939_v7 = vpack.c.bf16 %v1923_v9, %v1923_v9  ;;  %v1926_v47 = vmul.f32 %v11307_v62, %v12097_v28  ;;  %v12312_v9 = vpack.c.bf16 %v976_v27, %v976_v27  ;;  %v14703_v27 = vld [vmem:[#allocation9_spill] sm:$0xff] }
 0x339   : > { %10545 = vmatmul.mubr.msk.bf16.vlgmr.msra.gmra.mrb[60].mxu1 %vm1948_vm5, %v1939_v7  ;;  %10551 = vmatmul.mubr.msk.bf16.vlgmr.msra.gmra.mrb[56].mxu0 %vm1948_vm5, %v1940_v12  ;;  %v1887_v63 = vpop.xlane.xlu1 %1886  ;;  %v1942_v51 = vpack.c.bf16 %v1926_v47, %v1926_v47  ;;  %14698 = vst [vmem:[#allocation25_spill] sm:$0xff] %v12312_v9  ;;  %v12316_v7 = vpack.c.bf16 %v11971_v41, %v11971_v41  ;;  %v14700_v47 = vld [vmem:[#allocation7_spill] sm:$0xff] }
 0x33a   : > { %10555 = vmatpush3.bf16.msra.mxu1 %v2368_v56  ;;  %10561 = vmatpush3.bf16.msra.mxu0 %v2414_v35  ;;  %11312 = vrcp.f32 %v1887_v63  ;;  %v2552_v56 = vsel %vm1952_vm3, %v12312_v9, 0 }
 0x33b   : > { %v1896_v39 = vpop.xlane.xlu0 %1895  ;;  %3054 = vrot.lane.b32.xlu1 %v11847_v29, %s11570_s27  ;;  %10556 = vmatprep.mubr.msk.bf16.mxu1 %vm11569_vm1, %v14690_v40  ;;  %v2598_v35 = vsel %vm1952_vm3, %v12316_v7, 0 }
 0x33c   : > { %v11309_v18 = vpop.eup %11308  ;;  %10562 = vmatprep.mubr.msk.bf16.mxu0 %vm11569_vm1, %v14690_v40  ;;  %10566 = vmatprep.subr.bf16.mxu1 %v14690_v40  ;;  %11314 = vrcp.f32 %v1896_v39 }
 0x33d   : > { %10572 = vmatprep.subr.bf16.mxu0 %v14690_v40  ;;  %v1925_v15 = vmul.f32 %v11309_v18, %v12103_v54  ;;  %v2506_v54 = vsel %vm1952_vm3, %v12288_v44, 0 }
 0x33e   : > { %v11311_v34 = vpop.eup %11310 }
 0x33f   : > { %3051 = vrot.lane.b32.xlu1 %v11876_v45, %s11570_s27  ;;  %v1941_v28 = vpack.c.bf16 %v1925_v15, %v1925_v15  ;;  %v1928_v32 = vmul.f32 %v11311_v34, %v12107_v26  ;;  %v2691_v39 = vpop.permute.xlu0 %2690 }
 0x340   : > { %v2696_v15 = vsel %vm1002_vm2, %v2691_v39, 0 }
 0x341   : > { %10557 = vmatmul.mubr.msk.bf16.vlgmr.msra.gmra.mrb[64].mxu1 %vm1948_vm5, %v1941_v28  ;;  %10563 = vmatmul.mubr.msk.bf16.vlgmr.msra.gmra.mrb[60].mxu0 %vm1948_vm5, %v1942_v51  ;;  %v1944_v62 = vpack.c.bf16 %v1928_v32, %v1928_v32  ;;  %v14702_v51 = vld [vmem:[#allocation10_spill] sm:$0xff]  ;;  %v14705_v32 = vld [vmem:[#allocation13_spill] sm:$0xff] }
 0x342   : > { %10567 = vmatpush3.bf16.msra.mxu1 %v2460_v36  ;;  %10573 = vmatpush3.bf16.msra.mxu0 %v2506_v54  ;;  %v14704_v36 = vld [vmem:[#allocation11_spill] sm:$0xff] }
 0x343   : > { %3158 = vrot.lane.b32.xlu1 %v11866_v42, %s11570_s27  ;;  %10568 = vmatprep.mubr.msk.bf16.mxu1 %vm11569_vm1, %v14690_v40  ;;  %v2795_v28 = vpop.permute.xlu0 %2794 }
 0x344   : > { %v11313_v14 = vpop.eup %11312  ;;  %10574 = vmatprep.mubr.msk.bf16.mxu0 %vm11569_vm1, %v14690_v40  ;;  %10578 = vmatprep.subr.bf16.mxu1 %v14690_v40 }
 0x345   : > { %10584 = vmatprep.subr.bf16.mxu0 %v14690_v40  ;;  %v1927_v12 = vmul.f32 %v11313_v14, %v12111_v24  ;;  %v14699_v24 = vld [vmem:[#allocation3_spill] sm:$0xff] }
 0x346   : > { %v11315_v25 = vpop.eup %11314 }
 0x347   : > { %3155 = vrot.lane.b32.xlu1 %v11902_v43, %s11570_s27  ;;  %v1943_v26 = vpack.c.bf16 %v1927_v12, %v1927_v12  ;;  %v1930_v63 = vmul.f32 %v11315_v25, %v12115_v6  ;;  %v14701_v6 = vld [vmem:[#allocation6_spill] sm:$0xff]  ;;  %v2792_v34 = vpop.permute.xlu0 %2791  ;;  %v12356_v12 = vpop.permute.xlu1 %2742 }
 0x349   : > { %10569 = vmatmul.mubr.msk.bf16.vlgmr.msra.gmra.mrb[68].mxu1 %vm1948_vm5, %v1943_v26  ;;  %10575 = vmatmul.mubr.msk.bf16.vlgmr.msra.gmra.mrb[64].mxu0 %vm1948_vm5, %v1944_v62  ;;  %v1946_v18 = vpack.c.bf16 %v1930_v63, %v1930_v63  ;;  %v977_v63 = vcombine.high %v11971_v41, %v11971_v41 }
 0x34a   : > { %10579 = vmatpush3.bf16.msra.mxu1 %v2552_v56  ;;  %10585 = vmatpush3.bf16.msra.mxu0 %v2598_v35  ;;  %v2800_v35 = vsel %vm1002_vm2, %v2795_v28, 0 }
 0x34b   : > { %3262 = vrot.lane.b32.xlu1 %v14699_v24, %s11570_s27  ;;  %10586 = vmatprep.mubr.msk.bf16.mxu0 %vm11569_vm1, %v14690_v40  ;;  %v2899_v54 = vpop.permute.xlu0 %2898 }
 0x34c   : > { %10596 = vmatprep.subr.bf16.mxu0 %v14690_v40  ;;  %10580 = vmatprep.mubr.msk.bf16.mxu1 %vm11569_vm1, %v14690_v40 }
 0x34d   : > { %10590 = vmatprep.subr.bf16.mxu1 %v14690_v40 }
 0x34f   : > { %3259 = vrot.lane.b32.xlu1 %v14700_v47, %s11570_s27  ;;  %v2896_v14 = vpop.permute.xlu0 %2895 }
 0x351   : > { %10587 = vmatmul.mubr.msk.bf16.vlgmr.msra.gmra.mrb[68].mxu0 %vm1948_vm5, %v1946_v18 }
 0x352   : > { %10598 = vmatprep.mubr.msk.bf16.mxu0 %vm11569_vm1, %v14690_v40 }
 0x353   : > { %10597 = vmatpush3.bf16.xpose.msra.mxu0 %v2696_v15  ;;  %3366 = vrot.lane.b32.xlu1 %v14701_v6, %s11570_s27  ;;  %v3003_v26 = vpop.permute.xlu0 %3002  ;;  %v12373_v15 = vpack.c.bf16 %v977_v63, %v977_v63 }
 0x354   : > { %10608 = vmatprep.subr.bf16.mxu0 %v14690_v40 }
 0x357   : > { %3363 = vrot.lane.b32.xlu1 %v14702_v51, %s11570_s27  ;;  %v3000_v25 = vpop.permute.xlu0 %2999 }
 0x35b   : > { %3470 = vrot.lane.b32.xlu1 %v14703_v27, %s11570_s27  ;;  %v3107_v39 = vpop.permute.xlu0 %3106 }
 0x35c   : > { %v3112_v63 = vsel %vm1002_vm2, %v3107_v39, 0 }
 0x35f   : > { %3467 = vrot.lane.b32.xlu1 %v14704_v36, %s11570_s27  ;;  %v3104_v41 = vpop.permute.xlu0 %3103 }
 0x363   : > { %3776 = vrot.lane.b32.xlu1 %v14705_v32, %s11570_s27 }
 0x367   : > { %3874 = vrot.lane.b32.xlu1 %v12199_v50, %s11570_s27 }
 0x36b   : > { %3972 = vrot.lane.b32.xlu1 %v12217_v4, %s11570_s27 }
 0x36e   : > { %v1893_v62 = vpop.xlane.xlu1 %1892 }
 0x36f   : > { %11316 = vrcp.f32 %v1893_v62  ;;  %4070 = vrot.lane.b32.xlu1 %v12238_v0, %s11570_s27  ;;  %v2904_v62 = vsel %vm1002_vm2, %v2899_v54, 0  ;;  %v3211_v54 = vpop.permute.xlu0 %3210 }
 0x372   : > { %v2688_v56 = vpop.permute.xlu1 %2687 }
 0x373   : > { %4168 = vrot.lane.b32.xlu1 %v12260_v17, %s11570_s27  ;;  %10599 = vmatmul.mubr.msk.bf16.vlgmr.msra.gmra.mrb[72].mxu0 %vm1002_vm2, %v2688_v56 }
 0x374   : > { %10609 = vmatpush3.bf16.xpose.msra.mxu0 %v2800_v35  ;;  %10610 = vmatprep.mubr.msk.bf16.mxu0 %vm11569_vm1, %v14690_v40  ;;  %v3208_v35 = vpop.permute.xlu0 %3207 }
 0x375   : > { %10620 = vmatprep.subr.bf16.mxu0 %v14690_v40 }
 0x377   : > { %4217 = vrot.lane.b32.xlu1 %v12264_v59, %s11570_s27 }
 0x379   : > { %v11317_v18 = vpop.eup %11316 }
 0x37a   : > { %v1929_v28 = vmul.f32 %v11317_v18, %v12136_v37  ;;  %v2644_v37 = vsel %vm1952_vm3, %v12373_v15, 0 }
 0x37b   : > { %4266 = vrot.lane.b32.xlu1 %v12290_v2, %s11570_s27  ;;  %10611 = vmatmul.mubr.msk.bf16.vlgmr.msra.gmra.mrb[76].mxu0 %vm1002_vm2, %v2792_v34  ;;  %v3008_v34 = vsel %vm1002_vm2, %v3003_v26, 0  ;;  %v3315_v26 = vpop.permute.xlu0 %3314 }
 0x37c   : > { %10621 = vmatpush3.bf16.xpose.msra.mxu0 %v2904_v62  ;;  %v1945_v56 = vpack.c.bf16 %v1929_v28, %v1929_v28  ;;  %10622 = vmatprep.mubr.msk.bf16.mxu0 %vm11569_vm1, %v14690_v40 }
 0x37d   : > { %10632 = vmatprep.subr.bf16.mxu0 %v14690_v40 }
 0x37e   : > { %10581 = vmatmul.mubr.msk.bf16.vlgmr.msra.gmra.mrb[72].mxu1 %vm1948_vm5, %v1945_v56 }
 0x37f   : > { %10591 = vmatpush3.bf16.msra.mxu1 %v2644_v37  ;;  %10592 = vmatprep.mubr.msk.bf16.mxu1 %vm11569_vm1, %v14690_v40  ;;  %v3312_v39 = vpop.permute.xlu0 %3311 }
 0x380   : > { %10602 = vmatprep.subr.bf16.mxu1 %v14690_v40 }
 0x383   : > { %10623 = vmatmul.mubr.msk.bf16.vlgmr.msra.gmra.mrb[80].mxu0 %vm1002_vm2, %v2896_v14  ;;  %v3216_v14 = vsel %vm1002_vm2, %v3211_v54, 0  ;;  %v3419_v18 = vpop.permute.xlu0 %3418 }
 0x384   : > { %10633 = vmatpush3.bf16.xpose.msra.mxu0 %v3008_v34  ;;  %10634 = vmatprep.mubr.msk.bf16.mxu0 %vm11569_vm1, %v14690_v40  ;;  %v3424_v62 = vsel %vm1002_vm2, %v3419_v18, 0 }
 0x385   : > { %10644 = vmatprep.subr.bf16.mxu0 %v14690_v40 }
 0x387   : > { %v3416_v28 = vpop.permute.xlu0 %3415 }
 0x38b   : > { %10635 = vmatmul.mubr.msk.bf16.vlgmr.msra.gmra.mrb[84].mxu0 %vm1002_vm2, %v3000_v25  ;;  %v3320_v25 = vsel %vm1002_vm2, %v3315_v26, 0  ;;  %v3728_v37 = vpop.permute.xlu0 %3727 }
 0x38c   : > { %10645 = vmatpush3.bf16.xpose.msra.mxu0 %v3112_v63  ;;  %10646 = vmatprep.mubr.msk.bf16.mxu0 %vm11569_vm1, %v14690_v40  ;;  %v3733_v34 = vsel %vm1952_vm3, %v3728_v37, 0 }
 0x38d   : > { %10656 = vmatprep.subr.bf16.mxu0 %v14690_v40 }
 0x38f   : > { %v12556_v57 = vpop.permute.xlu0 %3825 }
 0x393   : > { %10647 = vmatmul.mubr.msk.bf16.vlgmr.msra.gmra.mrb[88].mxu0 %vm1002_vm2, %v3104_v41 }
 0x394   : > { %10657 = vmatpush3.bf16.xpose.msra.mxu0 %v3216_v14  ;;  %10658 = vmatprep.mubr.msk.bf16.mxu0 %vm11569_vm1, %v14690_v40 }
 0x395   : > { %10668 = vmatprep.subr.bf16.mxu0 %v14690_v40 }
 0x39b   : > { %10659 = vmatmul.mubr.msk.bf16.vlgmr.msra.gmra.mrb[92].mxu0 %vm1002_vm2, %v3208_v35 }
 0x39c   : > { %10669 = vmatpush3.bf16.xpose.msra.mxu0 %v3320_v25  ;;  %10670 = vmatprep.mubr.msk.bf16.mxu0 %vm11569_vm1, %v14690_v40 }
 0x39d   : > { %10680 = vmatprep.subr.bf16.mxu0 %v14690_v40 }
 0x3a3   : > { %10671 = vmatmul.mubr.msk.bf16.vlgmr.msra.gmra.mrb[96].mxu0 %vm1002_vm2, %v3312_v39  ;;  %v1899_v56 = vpop.xlane.xlu1 %1898  ;;  %v2748_v39 = vsel %vm1002_vm2, %v12356_v12, 0 }
 0x3a4   : > { %10681 = vmatpush3.bf16.xpose.msra.mxu0 %v3424_v62  ;;  %11318 = vrcp.f32 %v1899_v56  ;;  %10682 = vmatprep.mubr.msk.bf16.mxu0 %vm11569_vm1, %v14690_v40 }
 0x3a5   : > { %10692 = vmatprep.subr.bf16.mxu0 %v14690_v40 }
 0x3a7   : > { %v2740_v41 = vpop.permute.xlu1 %2739 }
 0x3ab   : > { %10683 = vmatmul.mubr.msk.bf16.vlgmr.msra.gmra.mrb[100].mxu0 %vm1002_vm2, %v3416_v28  ;;  %v2847_v54 = vpop.permute.xlu1 %2846 }
 0x3ac   : > { %10693 = vmatpush3.bf16.msra.mxu0 %v3733_v34  ;;  %10694 = vmatprep.mubr.msk.bf16.mxu0 %vm11569_vm1, %v14690_v40  ;;  %v2852_v28 = vsel %vm1002_vm2, %v2847_v54, 0 }
 0x3ad   : > { %10704 = vmatprep.subr.bf16.mxu0 %v14690_v40 }
 0x3ae   : > { %v11319_v35 = vpop.eup %11318 }
 0x3af   : > { %v2844_v63 = vpop.permute.xlu1 %2843  ;;  %v1931_v26 = vmul.f32 %v11319_v35, %v12185_v38 }
 0x3b1   : > { %v1947_v14 = vpack.c.bf16 %v1931_v26, %v1931_v26 }
 0x3b3   : > { %10593 = vmatmul.mubr.msk.bf16.vlgmr.msra.gmra.mrb[76].mxu1 %vm1948_vm5, %v1947_v14  ;;  %v2951_v25 = vpop.permute.xlu1 %2950 }
 0x3b4   : > { %10603 = vmatpush3.bf16.xpose.msra.mxu1 %v2748_v39  ;;  %10604 = vmatprep.mubr.msk.bf16.mxu1 %vm11569_vm1, %v14690_v40  ;;  %v2956_v12 = vsel %vm1002_vm2, %v2951_v25, 0 }
 0x3b5   : > { %10614 = vmatprep.subr.bf16.mxu1 %v14690_v40 }
 0x3b7   : > { %v2948_v18 = vpop.permute.xlu1 %2947 }
 0x3bb   : > { %10605 = vmatmul.mubr.msk.bf16.vlgmr.msra.gmra.mrb[80].mxu1 %vm1002_vm2, %v2740_v41  ;;  %v3055_v62 = vpop.permute.xlu1 %3054 }
 0x3bc   : > { %10615 = vmatpush3.bf16.xpose.msra.mxu1 %v2852_v28  ;;  %10616 = vmatprep.mubr.msk.bf16.mxu1 %vm11569_vm1, %v14690_v40  ;;  %v3060_v37 = vsel %vm1002_vm2, %v3055_v62, 0 }
 0x3bd   : > { %10626 = vmatprep.subr.bf16.mxu1 %v14690_v40 }
 0x3bf   : > { %v3052_v38 = vpop.permute.xlu1 %3051 }
 0x3c3   : > { %10617 = vmatmul.mubr.msk.bf16.vlgmr.msra.gmra.mrb[84].mxu1 %vm1002_vm2, %v2844_v63  ;;  %v3159_v56 = vpop.permute.xlu1 %3158 }
 0x3c4   : > { %10627 = vmatpush3.bf16.xpose.msra.mxu1 %v2956_v12  ;;  %10628 = vmatprep.mubr.msk.bf16.mxu1 %vm11569_vm1, %v14690_v40  ;;  %v3164_v35 = vsel %vm1002_vm2, %v3159_v56, 0 }
 0x3c5   : > { %10638 = vmatprep.subr.bf16.mxu1 %v14690_v40 }
 0x3c7   : > { %v3156_v41 = vpop.permute.xlu1 %3155 }
 0x3cb   : > { %10629 = vmatmul.mubr.msk.bf16.vlgmr.msra.gmra.mrb[88].mxu1 %vm1002_vm2, %v2948_v18  ;;  %v3263_v34 = vpop.permute.xlu1 %3262 }
 0x3cc   : > { %10639 = vmatpush3.bf16.xpose.msra.mxu1 %v3060_v37  ;;  %10640 = vmatprep.mubr.msk.bf16.mxu1 %vm11569_vm1, %v14690_v40  ;;  %v3268_v26 = vsel %vm1002_vm2, %v3263_v34, 0 }
 0x3cd   : > { %10650 = vmatprep.subr.bf16.mxu1 %v14690_v40 }
 0x3cf   : > { %v3260_v54 = vpop.permute.xlu1 %3259 }
 0x3d3   : > { %10641 = vmatmul.mubr.msk.bf16.vlgmr.msra.gmra.mrb[92].mxu1 %vm1002_vm2, %v3052_v38  ;;  %v3367_v63 = vpop.permute.xlu1 %3366 }
 0x3d4   : > { %10651 = vmatpush3.bf16.xpose.msra.mxu1 %v3164_v35  ;;  %10652 = vmatprep.mubr.msk.bf16.mxu1 %vm11569_vm1, %v14690_v40  ;;  %v3372_v39 = vsel %vm1002_vm2, %v3367_v63, 0 }
 0x3d5   : > { %10662 = vmatprep.subr.bf16.mxu1 %v14690_v40 }
 0x3d7   : > { %v3364_v14 = vpop.permute.xlu1 %3363 }
 0x3db   : > { %10653 = vmatmul.mubr.msk.bf16.vlgmr.msra.gmra.mrb[96].mxu1 %vm1002_vm2, %v3156_v41  ;;  %v3471_v25 = vpop.permute.xlu1 %3470 }
 0x3dc   : > { %10663 = vmatpush3.bf16.xpose.msra.mxu1 %v3268_v26  ;;  %10664 = vmatprep.mubr.msk.bf16.mxu1 %vm11569_vm1, %v14690_v40  ;;  %v3476_v28 = vsel %vm1002_vm2, %v3471_v25, 0 }
 0x3dd   : > { %10674 = vmatprep.subr.bf16.mxu1 %v14690_v40 }
 0x3df   : > { %v3468_v18 = vpop.permute.xlu1 %3467 }
 0x3e3   : > { %10665 = vmatmul.mubr.msk.bf16.vlgmr.msra.gmra.mrb[100].mxu1 %vm1002_vm2, %v3260_v54  ;;  %v3777_v41 = vpop.permute.xlu1 %3776 }
 0x3e4   : > { %10675 = vmatpush3.bf16.xpose.msra.mxu1 %v3372_v39  ;;  %10676 = vmatprep.mubr.msk.bf16.mxu1 %vm11569_vm1, %v14690_v40  ;;  %v3782_v37 = vsel %vm1952_vm3, %v3777_v41, 0 }
 0x3e5   : > { %10686 = vmatprep.subr.bf16.mxu1 %v14690_v40 }
 0x3eb   : > { %10677 = vmatmul.mubr.msk.bf16.vlgmr.msra.gmra.mrb[104].mxu1 %vm1002_vm2, %v3364_v14 }
 0x3ec   : > { %10687 = vmatpush3.bf16.xpose.msra.mxu1 %v3476_v28  ;;  %v12458_v62 = vpop.f32.mrb[40].mxu0  ;;  %10688 = vmatprep.mubr.msk.bf16.mxu1 %vm11569_vm1, %v14690_v40 }
 0x3ed   : > { %14706 = vst [vmem:[#allocation3_spill] sm:$0xff] %v12458_v62  ;;  %v10504_v38 = vpop.f32.mrb[41].mxu0  ;;  %10698 = vmatprep.subr.bf16.mxu1 %v14690_v40 }
 0x3ee   : > { %v1993_v12 = vpop.f32.mrb[42].mxu0 }
 0x3ef   : > { %v10505_v56 = vpop.f32.mrb[43].mxu0 }
 0x3f3   : > { %10689 = vmatmul.mubr.msk.bf16.vlgmr.msra.gmra.mrb[108].mxu1 %vm1002_vm2, %v3468_v18 }
 0x3f4   : > { %10699 = vmatpush3.bf16.msra.mxu1 %v3782_v37  ;;  %v12465_v34 = vpop.f32.mrb[48].mxu1  ;;  %v12467_v54 = vpop.f32.mrb[44].mxu0  ;;  %10700 = vmatprep.mubr.msk.bf16.mxu1 %vm11569_vm1, %v14690_v40 }
 0x3f5   : > { %14707 = vst [vmem:[#allocation7_spill] sm:$0xff] %v12465_v34  ;;  %14708 = vst [vmem:[#allocation6_spill] sm:$0xff] %v12467_v54  ;;  %v10510_v35 = vpop.f32.mrb[49].mxu1  ;;  %v10516_v63 = vpop.f32.mrb[45].mxu0  ;;  %10710 = vmatprep.subr.bf16.mxu1 %v14690_v40 }
 0x3f6   : > { %v2039_v26 = vpop.f32.mrb[50].mxu1  ;;  %v2085_v14 = vpop.f32.mrb[46].mxu0 }
 0x3f7   : > { %v10517_v39 = vpop.f32.mrb[47].mxu0  ;;  %v10511_v25 = vpop.f32.mrb[51].mxu1 }
 0x3fc   : > { %v12472_v28 = vpop.f32.mrb[52].mxu1  ;;  %v12474_v38 = vpop.f32.mrb[48].mxu0 }
 0x3fd   : > { %14709 = vst [vmem:[#allocation10_spill] sm:$0xff] %v12472_v28  ;;  %14710 = vst [vmem:[#allocation9_spill] sm:$0xff] %v12474_v38  ;;  %v10522_v18 = vpop.f32.mrb[53].mxu1  ;;  %v10528_v12 = vpop.f32.mrb[49].mxu0 }
 0x3fe   : > { %v2131_v56 = vpop.f32.mrb[54].mxu1  ;;  %v2177_v41 = vpop.f32.mrb[50].mxu0 }
 0x3ff   : > { %v10523_v37 = vpop.f32.mrb[55].mxu1  ;;  %v10529_v54 = vpop.f32.mrb[51].mxu0 }
 0x404   : > { %v12476_v62 = vpop.f32.mrb[56].mxu1  ;;  %v12478_v35 = vpop.f32.mrb[52].mxu0 }
 0x405   : > { %14711 = vst [vmem:[#allocation11_spill] sm:$0xff] %v12476_v62  ;;  %14712 = vst [vmem:[#allocation26_spill] sm:$0xff] %v12478_v35  ;;  %v10534_v63 = vpop.f32.mrb[57].mxu1  ;;  %v10540_v34 = vpop.f32.mrb[53].mxu0 }
 0x406   : > { %v2223_v26 = vpop.f32.mrb[58].mxu1  ;;  %v2269_v14 = vpop.f32.mrb[54].mxu0 }
 0x407   : > { %v10535_v39 = vpop.f32.mrb[59].mxu1  ;;  %v10541_v25 = vpop.f32.mrb[55].mxu0 }
 0x40c   : > { %v12480_v16 = vpop.f32.mrb[60].mxu1  ;;  %v12482_v28 = vpop.f32.mrb[56].mxu0 }
 0x40d   : > { %14713 = vst [vmem:[#allocation27_spill] sm:$0xff] %v12480_v16  ;;  %14714 = vst [vmem:[#allocation28_spill] sm:$0xff] %v12482_v28  ;;  %v10546_v18 = vpop.f32.mrb[61].mxu1  ;;  %v10552_v12 = vpop.f32.mrb[57].mxu0 }
 0x40e   : > { %v2315_v56 = vpop.f32.mrb[62].mxu1  ;;  %v2361_v41 = vpop.f32.mrb[58].mxu0 }
 0x40f   : > { %v10547_v37 = vpop.f32.mrb[63].mxu1  ;;  %v10553_v54 = vpop.f32.mrb[59].mxu0 }
 0x414   : > { %v12484_v38 = vpop.f32.mrb[64].mxu1  ;;  %v12486_v62 = vpop.f32.mrb[60].mxu0 }
 0x415   : > { %14715 = vst [vmem:[#allocation29_spill] sm:$0xff] %v12484_v38  ;;  %14716 = vst [vmem:[#allocation30_spill] sm:$0xff] %v12486_v62  ;;  %v10558_v63 = vpop.f32.mrb[65].mxu1  ;;  %v10564_v34 = vpop.f32.mrb[61].mxu0 }
 0x416   : > { %v2407_v26 = vpop.f32.mrb[66].mxu1  ;;  %v2453_v14 = vpop.f32.mrb[62].mxu0 }
 0x417   : > { %v10559_v39 = vpop.f32.mrb[67].mxu1  ;;  %v10565_v25 = vpop.f32.mrb[63].mxu0 }
 0x41c   : > { %v12488_v35 = vpop.f32.mrb[68].mxu1  ;;  %v12490_v16 = vpop.f32.mrb[64].mxu0 }
 0x41d   : > { %14717 = vst [vmem:[#allocation31_spill] sm:$0xff] %v12488_v35  ;;  %14718 = vst [vmem:[#allocation32_spill] sm:$0xff] %v12490_v16  ;;  %v10570_v18 = vpop.f32.mrb[69].mxu1  ;;  %v10576_v12 = vpop.f32.mrb[65].mxu0 }
 0x41e   : > { %v2499_v56 = vpop.f32.mrb[70].mxu1  ;;  %v2545_v41 = vpop.f32.mrb[66].mxu0 }
 0x41f   : > { %v10571_v37 = vpop.f32.mrb[71].mxu1  ;;  %v10577_v54 = vpop.f32.mrb[67].mxu0 }
 0x424   : > { %v12492_v28 = vpop.f32.mrb[68].mxu0 }
 0x425   : > { %14719 = vst [vmem:[#allocation33_spill] sm:$0xff] %v12492_v28  ;;  %v10588_v38 = vpop.f32.mrb[69].mxu0 }
 0x426   : > { %v2637_v62 = vpop.f32.mrb[70].mxu0 }
 0x427   : > { %v10589_v63 = vpop.f32.mrb[71].mxu0 }
 0x446   : > { %v2732_v34 = vpop.f32.mrb[72].mxu0 }
 0x447   : > { %v12494_v26 = vmul.f32 0.35355338, %v2732_v34  ;;  %v10600_v14 = vpop.f32.mrb[73].mxu0 }
 0x448   : > { %v2735_v39 = vpop.f32.mrb[74].mxu0 }
 0x449   : > { %v10601_v25 = vpop.f32.mrb[75].mxu0  ;;  %v3534_v35 = vsel %vm1755_vm4, %v12494_v26, -inf }
 0x44a   : > { %3535 = vmax.xlane.f32.xlu0 %v3534_v35 }
 0x44e   : > { %v2836_v18 = vpop.f32.mrb[76].mxu0 }
 0x44f   : > { %v12498_v12 = vmul.f32 0.35355338, %v2836_v18  ;;  %v10612_v56 = vpop.f32.mrb[77].mxu0 }
 0x450   : > { %v2839_v41 = vpop.f32.mrb[78].mxu0 }
 0x451   : > { %v12500_v37 = vpop.f32.mrb[72].mxu1  ;;  %v10613_v38 = vpop.f32.mrb[79].mxu0  ;;  %v3540_v62 = vsel %vm1755_vm4, %v12498_v12, -inf }
 0x452   : > { %14720 = vst [vmem:[#allocation34_spill] sm:$0xff] %v12500_v37  ;;  %3541 = vmax.xlane.f32.xlu0 %v3540_v62  ;;  %v10582_v54 = vpop.f32.mrb[73].mxu1 }
 0x453   : > { %v2591_v63 = vpop.f32.mrb[74].mxu1 }
 0x454   : > { %v10583_v34 = vpop.f32.mrb[75].mxu1 }
 0x456   : > { %v2940_v14 = vpop.f32.mrb[80].mxu0 }
 0x457   : > { %v10624_v39 = vpop.f32.mrb[81].mxu0 }
 0x458   : > { %v2943_v25 = vpop.f32.mrb[82].mxu0 }
 0x459   : > { %v10625_v28 = vpop.f32.mrb[83].mxu0 }
 0x45e   : > { %v3044_v35 = vpop.f32.mrb[84].mxu0 }
 0x45f   : > { %v10636_v16 = vpop.f32.mrb[85].mxu0 }
 0x460   : > { %v3047_v18 = vpop.f32.mrb[86].mxu0 }
 0x461   : > { %v10637_v23 = vpop.f32.mrb[87].mxu0 }
 0x466   : > { %v3148_v56 = vpop.f32.mrb[88].mxu0 }
 0x467   : > { %v10648_v41 = vpop.f32.mrb[89].mxu0 }
 0x468   : > { %v3151_v55 = vpop.f32.mrb[90].mxu0 }
 0x469   : > { %v10649_v37 = vpop.f32.mrb[91].mxu0 }
 0x46e   : > { %v3252_v38 = vpop.f32.mrb[92].mxu0 }
 0x46f   : > { %v10660_v2 = vpop.f32.mrb[93].mxu0 }
 0x470   : > { %v3255_v59 = vpop.f32.mrb[94].mxu0 }
 0x471   : > { %v10661_v52 = vpop.f32.mrb[95].mxu0 }
 0x476   : > { %v3356_v62 = vpop.f32.mrb[96].mxu0 }
 0x477   : > { %v10672_v54 = vpop.f32.mrb[97].mxu0 }
 0x478   : > { %v3359_v63 = vpop.f32.mrb[98].mxu0 }
 0x479   : > { %v10673_v34 = vpop.f32.mrb[99].mxu0 }
 0x47e   : > { %v3460_v17 = vpop.f32.mrb[100].mxu0 }
 0x47f   : > { %v10684_v39 = vpop.f32.mrb[101].mxu0 }
 0x480   : > { %v3463_v25 = vpop.f32.mrb[102].mxu0 }
 0x481   : > { %v10685_v28 = vpop.f32.mrb[103].mxu0  ;;  %v12512_v25 = vmul.f32 0.35355338, %v2940_v14 }
 0x486   : > { %v12504_v5 = vpop.f32.mrb[76].mxu1 }
 0x487   : > { %14721 = vst [vmem:[#allocation35_spill] sm:$0xff] %v12504_v5  ;;  %v10594_v16 = vpop.f32.mrb[77].mxu1 }
 0x488   : > { %v2683_v23 = vpop.f32.mrb[78].mxu1 }
 0x489   : > { %v10595_v18 = vpop.f32.mrb[79].mxu1  ;;  %v12516_v23 = vmul.f32 0.35355338, %v3044_v35  ;;  %v12528_v35 = vmul.f32 0.35355338, %v3252_v38 }
 0x48a   : > { %v3546_v18 = vsel %vm1755_vm4, %v12512_v25, -inf  ;;  %v12540_v38 = vmul.f32 0.35355338, %v3460_v17 }
 0x48e   : > { %v2784_v41 = vpop.f32.mrb[80].mxu1 }
 0x48f   : > { %v12506_v55 = vmul.f32 0.35355338, %v2784_v41  ;;  %v10606_v37 = vpop.f32.mrb[81].mxu1 }
 0x490   : > { %v2787_v2 = vpop.f32.mrb[82].mxu1 }
 0x491   : > { %v10607_v59 = vpop.f32.mrb[83].mxu1  ;;  %v3537_v52 = vsel %vm1755_vm4, %v12506_v55, -inf }
 0x492   : > { %3538 = vmax.xlane.f32.xlu1 %v3537_v52  ;;  %v12522_v52 = vmul.f32 0.35355338, %v3148_v56 }
 0x496   : > { %v2888_v54 = vpop.f32.mrb[84].mxu1 }
 0x497   : > { %v12510_v63 = vmul.f32 0.35355338, %v2888_v54  ;;  %v10618_v34 = vpop.f32.mrb[85].mxu1  ;;  %v3552_v54 = vsel %vm1755_vm4, %v12516_v23, -inf }
 0x498   : > { %v2891_v39 = vpop.f32.mrb[86].mxu1 }
 0x499   : > { %v10619_v28 = vpop.f32.mrb[87].mxu1  ;;  %v3543_v16 = vsel %vm1755_vm4, %v12510_v63, -inf  ;;  %v3558_v39 = vsel %vm1755_vm4, %v12522_v52, -inf }
 0x49a   : > { %3544 = vmax.xlane.f32.xlu0 %v3543_v16 }
 0x49e   : > { %3547 = vmax.xlane.f32.xlu0 %v3546_v18  ;;  %v2992_v41 = vpop.f32.mrb[88].mxu1 }
 0x49f   : > { %v12520_v37 = vmul.f32 0.35355338, %v2992_v41  ;;  %v10630_v2 = vpop.f32.mrb[89].mxu1  ;;  %v12534_v41 = vmul.f32 0.35355338, %v3356_v62 }
 0x4a0   : > { %v2995_v59 = vpop.f32.mrb[90].mxu1 }
 0x4a1   : > { %v10631_v14 = vpop.f32.mrb[91].mxu1  ;;  %v3549_v34 = vsel %vm1755_vm4, %v12520_v37, -inf  ;;  %v3564_v59 = vsel %vm1755_vm4, %v12528_v35, -inf }
 0x4a2   : > { %3553 = vmax.xlane.f32.xlu0 %v3552_v54  ;;  %3550 = vmax.xlane.f32.xlu1 %v3549_v34  ;;  %v3570_v54 = vsel %vm1755_vm4, %v12534_v41, -inf }
 0x4a6   : > { %3559 = vmax.xlane.f32.xlu0 %v3558_v39  ;;  %v3096_v28 = vpop.f32.mrb[92].mxu1 }
 0x4a7   : > { %v12532_v16 = vmul.f32 0.35355338, %v3096_v28  ;;  %v10642_v56 = vpop.f32.mrb[93].mxu1 }
 0x4a8   : > { %v3099_v18 = vpop.f32.mrb[94].mxu1 }
 0x4a9   : > { %v10643_v2 = vpop.f32.mrb[95].mxu1  ;;  %v3555_v14 = vsel %vm1755_vm4, %v12532_v16, -inf  ;;  %v3576_v18 = vsel %vm1755_vm4, %v12540_v38, -inf }
 0x4aa   : > { %3565 = vmax.xlane.f32.xlu0 %v3564_v59  ;;  %3556 = vmax.xlane.f32.xlu1 %v3555_v14 }
 0x4ae   : > { %3571 = vmax.xlane.f32.xlu0 %v3570_v54  ;;  %v3200_v34 = vpop.f32.mrb[96].mxu1 }
 0x4af   : > { %v12544_v39 = vmul.f32 0.35355338, %v3200_v34  ;;  %v10654_v62 = vpop.f32.mrb[97].mxu1 }
 0x4b0   : > { %v3203_v28 = vpop.f32.mrb[98].mxu1 }
 0x4b1   : > { %v10655_v56 = vpop.f32.mrb[99].mxu1  ;;  %v3561_v2 = vsel %vm1755_vm4, %v12544_v39, -inf }
 0x4b2   : > { %3577 = vmax.xlane.f32.xlu0 %v3576_v18  ;;  %3562 = vmax.xlane.f32.xlu1 %v3561_v2 }
 0x4b6   : > { %v3304_v17 = vpop.f32.mrb[100].mxu1 }
 0x4b7   : > { %v12550_v59 = vmul.f32 0.35355338, %v3304_v17  ;;  %v10666_v14 = vpop.f32.mrb[101].mxu1  ;;  %v12560_v17 = vpop.permute.xlu0 %3923 }
 0x4b8   : > { %v3307_v5 = vpop.f32.mrb[102].mxu1 }
 0x4b9   : > { %v10667_v54 = vpop.f32.mrb[103].mxu1  ;;  %v3567_v34 = vsel %vm1755_vm4, %v12550_v59, -inf }
 0x4ba   : > { %3568 = vmax.xlane.f32.xlu1 %v3567_v34 }
 0x4bb   : > { %v12564_v34 = vpop.permute.xlu0 %4021 }
 0x4bc   : > { %14722 = vst [vmem:[#allocation36_spill] sm:$0xff] %v12564_v34 }
 0x4be   : > { %v3408_v62 = vpop.f32.mrb[104].mxu1 }
 0x4bf   : > { %v12554_v28 = vmul.f32 0.35355338, %v3408_v62  ;;  %v10678_v56 = vpop.f32.mrb[105].mxu1  ;;  %v12566_v62 = vpop.permute.xlu0 %4119 }
 0x4c0   : > { %v3411_v0 = vpop.f32.mrb[106].mxu1  ;;  %14723 = vst [vmem:[#allocation37_spill] sm:$0xff] %v12566_v62 }
 0x4c1   : > { %v10679_v4 = vpop.f32.mrb[107].mxu1  ;;  %v3573_v18 = vsel %vm1755_vm4, %v12554_v28, -inf }
 0x4c2   : > { %3574 = vmax.xlane.f32.xlu1 %v3573_v18 }
 0x4c6   : > { %v3512_v2 = vpop.f32.mrb[108].mxu1 }
 0x4c7   : > { %v10690_v5 = vpop.f32.mrb[109].mxu1 }
 0x4c8   : > { %4315 = vrot.lane.b32.xlu0 %v12288_v44, %s11570_s27  ;;  %v3515_v14 = vpop.f32.mrb[110].mxu1 }
 0x4c9   : > { %v10691_v54 = vpop.f32.mrb[111].mxu1 }
 0x4d3   : > { %4364 = vrot.lane.b32.xlu1 %v12312_v9, %s11570_s27 }
 0x4d7   : > { %v3536_v4 = vpop.xlane.xlu0 %3535 }
 0x4d8   : > { %v3582_v0 = vsub.f32 %v12494_v26, %v3536_v4  ;;  %v12580_v26 = vmul.f32 0.35355338, %v3512_v2 }
 0x4da   : > { %v3598_v56 = vmul.f32 1.442695, %v3582_v0  ;;  %v3579_v4 = vsel %vm1755_vm4, %v12580_v26, -inf }
 0x4dc   : > { %11320 = vpow2.f32 %v3598_v56 }
 0x4df   : > { %v3542_v18 = vpop.xlane.xlu0 %3541 }
 0x4e0   : > { %v3584_v5 = vsub.f32 %v12498_v12, %v3542_v18  ;;  %v12584_v12 = vpop.permute.xlu1 %3874 }
 0x4e2   : > { %v3602_v58 = vmul.f32 1.442695, %v3584_v5 }
 0x4e4   : > { %11322 = vpow2.f32 %v3602_v58  ;;  %v12586_v58 = vpop.permute.xlu1 %3972 }
 0x4e6   : > { %v12572_v44 = vpop.eup %11320 }
 0x4e7   : > { %v3630_v14 = vsel %vm1755_vm4, %v12572_v44, 0.0 }
 0x4e8   : > { %3631 = vadd.xlane.f32.xlu0 %v3630_v14  ;;  %v12588_v0 = vpop.permute.xlu1 %4070 }
 0x4e9   : > { %14724 = vst [vmem:[#allocation38_spill] sm:$0xff] %v12588_v0 }
 0x4ec   : > { %v12590_v56 = vpop.permute.xlu1 %4168 }
 0x4ed   : > { %14725 = vst [vmem:[#allocation39_spill] sm:$0xff] %v12590_v56 }
 0x4ee   : > { %v12576_v54 = vpop.eup %11322 }
 0x4ef   : > { %v3636_v9 = vsel %vm1755_vm4, %v12576_v54, 0.0 }
 0x4f0   : > { %3637 = vadd.xlane.f32.xlu0 %v3636_v9  ;;  %v12592_v18 = vpop.permute.xlu1 %4217 }
 0x4f1   : > { %14726 = vst [vmem:[#allocation40_spill] sm:$0xff] %v12592_v18 }
 0x4f4   : > { %v12594_v5 = vpop.permute.xlu1 %4266 }
 0x4f5   : > { %14727 = vst [vmem:[#allocation41_spill] sm:$0xff] %v12594_v5 }
 0x4f7   : > { %3580 = vmax.xlane.f32.xlu1 %v3579_v4 }
 0x51f   : > { %v3539_v14 = vpop.xlane.xlu1 %3538 }
 0x520   : > { %v3583_v9 = vsub.f32 %v12506_v55, %v3539_v14 }
 0x522   : > { %v3600_v2 = vmul.f32 1.442695, %v3583_v9 }
 0x524   : > { %11324 = vpow2.f32 %v3600_v2 }
 0x527   : > { %v3545_v62 = vpop.xlane.xlu0 %3544 }
 0x528   : > { %v3585_v4 = vsub.f32 %v12510_v63, %v3545_v62 }
 0x52a   : > { %v3604_v50 = vmul.f32 1.442695, %v3585_v4 }
 0x52b   : > { %v3548_v46 = vpop.xlane.xlu0 %3547 }
 0x52c   : > { %11326 = vpow2.f32 %v3604_v50  ;;  %v3586_v32 = vsub.f32 %v12512_v25, %v3548_v46 }
 0x52e   : > { %v12599_v0 = vpop.eup %11324  ;;  %v3606_v56 = vmul.f32 1.442695, %v3586_v32 }
 0x52f   : > { %v3554_v34 = vpop.xlane.xlu0 %3553  ;;  %v3551_v18 = vpop.xlane.xlu1 %3550  ;;  %v3633_v5 = vsel %vm1755_vm4, %v12599_v0, 0.0 }
 0x530   : > { %11328 = vpow2.f32 %v3606_v56  ;;  %v3588_v55 = vsub.f32 %v12516_v23, %v3554_v34  ;;  %v3587_v14 = vsub.f32 %v12520_v37, %v3551_v18  ;;  %3634 = vadd.xlane.f32.xlu1 %v3633_v5 }
 0x532   : > { %v3610_v63 = vmul.f32 1.442695, %v3588_v55  ;;  %v3608_v62 = vmul.f32 1.442695, %v3587_v14 }
 0x533   : > { %v3560_v9 = vpop.xlane.xlu0 %3559 }
 0x534   : > { %11330 = vpow2.f32 %v3610_v63  ;;  %v3590_v50 = vsub.f32 %v12522_v52, %v3560_v9 }
 0x535   : > { %11332 = vpow2.f32 %v3608_v62 }
 0x536   : > { %v12605_v46 = vpop.eup %11326  ;;  %v3614_v34 = vmul.f32 1.442695, %v3590_v50 }
 0x537   : > { %v3566_v32 = vpop.xlane.xlu0 %3565  ;;  %v3557_v25 = vpop.xlane.xlu1 %3556  ;;  %v3639_v2 = vsel %vm1755_vm4, %v12605_v46, 0.0 }
 0x538   : > { %v3589_v56 = vsub.f32 %v12532_v16, %v3557_v25  ;;  %3640 = vadd.xlane.f32.xlu1 %v3639_v2  ;;  %v3592_v18 = vsub.f32 %v12528_v35, %v3566_v32 }
 0x53a   : > { %v12611_v23 = vpop.eup %11328  ;;  %v3612_v37 = vmul.f32 1.442695, %v3589_v56  ;;  %v3618_v14 = vmul.f32 1.442695, %v3592_v18 }
 0x53b   : > { %v3642_v5 = vsel %vm1755_vm4, %v12611_v23, 0.0  ;;  %v3572_v4 = vpop.xlane.xlu0 %3571 }
 0x53c   : > { %3643 = vadd.xlane.f32.xlu0 %v3642_v5  ;;  %11334 = vpow2.f32 %v3612_v37  ;;  %v3594_v16 = vsub.f32 %v12534_v41, %v3572_v4 }
 0x53d   : > { %11336 = vpow2.f32 %v3614_v34 }
 0x53e   : > { %v12616_v52 = vpop.eup %11330  ;;  %11338 = vpow2.f32 %v3618_v14  ;;  %v3622_v32 = vmul.f32 1.442695, %v3594_v16 }
 0x53f   : > { %v12618_v55 = vpop.eup %11332  ;;  %v3563_v63 = vpop.xlane.xlu1 %3562  ;;  %v3648_v62 = vsel %vm1755_vm4, %v12616_v52, 0.0 }
 0x540   : > { %v3591_v35 = vsub.f32 %v12544_v39, %v3563_v63  ;;  %3649 = vadd.xlane.f32.xlu0 %v3648_v62  ;;  %v3645_v9 = vsel %vm1755_vm4, %v12618_v55, 0.0 }
 0x541   : > { %3646 = vadd.xlane.f32.xlu1 %v3645_v9 }
 0x542   : > { %v3616_v50 = vmul.f32 1.442695, %v3591_v35 }
 0x544   : > { %11340 = vpow2.f32 %v3616_v50 }
 0x545   : > { %11342 = vpow2.f32 %v3622_v32 }
 0x546   : > { %v12626_v25 = vpop.eup %11334 }
 0x547   : > { %v3569_v2 = vpop.xlane.xlu1 %3568  ;;  %v3651_v56 = vsel %vm1755_vm4, %v12626_v25, 0.0  ;;  %v12631_v37 = vpop.eup %11336 }
 0x548   : > { %v3593_v41 = vsub.f32 %v12550_v59, %v3569_v2  ;;  %3652 = vadd.xlane.f32.xlu1 %v3651_v56  ;;  %v3654_v34 = vsel %vm1755_vm4, %v12631_v37, 0.0  ;;  %v12635_v18 = vpop.eup %11338  ;;  %v3578_v2 = vpop.xlane.xlu0 %3577 }
 0x549   : > { %v3660_v16 = vsel %vm1755_vm4, %v12635_v18, 0.0  ;;  %v3596_v56 = vsub.f32 %v12540_v38, %v3578_v2 }
 0x54a   : > { %v3620_v39 = vmul.f32 1.442695, %v3593_v41 }
 0x54c   : > { %11344 = vpow2.f32 %v3620_v39  ;;  %3655 = vadd.xlane.f32.xlu1 %v3654_v34  ;;  %v12658_v41 = vpop.permute.xlu0 %4315  ;;  %v3626_v34 = vmul.f32 1.442695, %v3596_v56 }
 0x54e   : > { %v12637_v5 = vpop.eup %11340 }
 0x54f   : > { %v3575_v4 = vpop.xlane.xlu1 %3574  ;;  %v3657_v59 = vsel %vm1755_vm4, %v12637_v5, 0.0  ;;  %v12644_v63 = vpop.eup %11342 }
 0x550   : > { %v3595_v14 = vsub.f32 %v12554_v28, %v3575_v4  ;;  %3658 = vadd.xlane.f32.xlu0 %v3657_v59  ;;  %3661 = vadd.xlane.f32.xlu1 %v3660_v16  ;;  %v3666_v35 = vsel %vm1755_vm4, %v12644_v63, 0.0 }
 0x552   : > { %v3624_v62 = vmul.f32 1.442695, %v3595_v14 }
 0x553   : > { %v12663_v59 = vpop.permute.xlu1 %4364 }
 0x554   : > { %11346 = vpow2.f32 %v3624_v62  ;;  %3667 = vadd.xlane.f32.xlu1 %v3666_v35 }
 0x556   : > { %v12648_v9 = vpop.eup %11344 }
 0x557   : > { %v3663_v28 = vsel %vm1755_vm4, %v12648_v9, 0.0 }
 0x558   : > { %3664 = vadd.xlane.f32.xlu0 %v3663_v28  ;;  %v3831_v28 = vsel %vm1952_vm3, %v12556_v57, 0 }
 0x55e   : > { %v12652_v50 = vpop.eup %11346 }
 0x55f   : > { %v3669_v32 = vsel %vm1755_vm4, %v12652_v50, 0.0 }
 0x560   : > { %3670 = vadd.xlane.f32.xlu0 %v3669_v32 }
 0x565   : > { %4462 = vrot.lane.b32.xlu1 %v12373_v15, %s11570_s27 }
 0x575   : > { %v3632_v39 = vpop.xlane.xlu0 %3631 }
 0x576   : > { %11348 = vrcp.f32 %v3632_v39  ;;  %4413 = vrot.lane.b32.xlu0 %v12316_v7, %s11570_s27  ;;  %v3929_v39 = vsel %vm1952_vm3, %v12560_v17, 0 }
 0x577   : > { %11350 = vpow2.f32 %v3626_v34 }
 0x57d   : > { %v3638_v4 = vpop.xlane.xlu0 %3637 }
 0x57e   : > { %11352 = vrcp.f32 %v3638_v4 }
 0x580   : > { %v11349_v14 = vpop.eup %11348 }
 0x581   : > { %v3694_v16 = vmul.f32 %v11349_v14, %v12572_v44  ;;  %v12670_v32 = vpop.eup %11350 }
 0x582   : > { %v3672_v44 = vsel %vm1755_vm4, %v12670_v32, 0.0 }
 0x583   : > { %v3710_v62 = vpack.c.bf16 %v3694_v16, %v3694_v16 }
 0x584   : > { %v3581_v35 = vpop.xlane.xlu1 %3580 }
 0x585   : > { %v3597_v38 = vsub.f32 %v12580_v26, %v3581_v35  ;;  %10695 = vmatmul.mubr.msk.bf16.vlgmr.msra.gmra.mrb[104].mxu0 %vm1948_vm5, %v3710_v62 }
 0x586   : > { %10705 = vmatpush3.bf16.msra.mxu0 %v3831_v28  ;;  %10706 = vmatprep.mubr.msk.bf16.mxu0 %vm11569_vm1, %v14690_v40  ;;  %v3880_v28 = vsel %vm1952_vm3, %v12584_v12, 0 }
 0x587   : > { %v3628_v2 = vmul.f32 1.442695, %v3597_v38  ;;  %10716 = vmatprep.subr.bf16.mxu0 %v14690_v40 }
 0x588   : > { %v11353_v56 = vpop.eup %11352 }
 0x589   : > { %11354 = vpow2.f32 %v3628_v2  ;;  %v3696_v57 = vmul.f32 %v11353_v56, %v12576_v54  ;;  %3673 = vadd.xlane.f32.xlu1 %v3672_v44 }
 0x58b   : > { %v3712_v26 = vpack.c.bf16 %v3696_v57, %v3696_v57  ;;  %v3978_v57 = vsel %vm1952_vm3, %v12586_v58, 0 }
 0x58d   : > { %10707 = vmatmul.mubr.msk.bf16.vlgmr.msra.gmra.mrb[108].mxu0 %vm1948_vm5, %v3712_v26 }
 0x58e   : > { %10717 = vmatpush3.bf16.msra.mxu0 %v3929_v39  ;;  %10718 = vmatprep.mubr.msk.bf16.mxu0 %vm11569_vm1, %v14690_v40 }
 0x58f   : > { %10728 = vmatprep.subr.bf16.mxu0 %v14690_v40 }
 0x593   : > { %v12684_v34 = vpop.eup %11354 }
 0x594   : > { %v3675_v4 = vsel %vm1755_vm4, %v12684_v34, 0.0 }
 0x595   : > { %3676 = vadd.xlane.f32.xlu0 %v3675_v4 }
 0x59a   : > { %4562 = vrot.lane.b32.xlu1 %v11771_v60, %s11571_s0 }
 0x59e   : > { %4560 = vrot.lane.b32.xlu1 %v11803_v11, %s11571_s0 }
 0x5a2   : > { %4662 = vrot.lane.b32.xlu1 %v11797_v8, %s11571_s0 }
 0x5a6   : > { %4660 = vrot.lane.b32.xlu1 %v11827_v21, %s11571_s0 }
 0x5aa   : > { %4762 = vrot.lane.b32.xlu1 %v11822_v19, %s11571_s0 }
 0x5ab   : > { %4512 = vrot.lane.b32.xlu0 %v11752_v49, %s11571_s0 }
 0x5ae   : > { %4760 = vrot.lane.b32.xlu1 %v11852_v31, %s11571_s0 }
 0x5af   : > { %4510 = vrot.lane.b32.xlu0 %v11773_v61, %s11571_s0 }
 0x5b2   : > { %4862 = vrot.lane.b32.xlu1 %v11847_v29, %s11571_s0 }
 0x5b3   : > { %4612 = vrot.lane.b32.xlu0 %v11760_v53, %s11571_s0 }
 0x5b6   : > { %4860 = vrot.lane.b32.xlu1 %v11876_v45, %s11571_s0 }
 0x5b7   : > { %4610 = vrot.lane.b32.xlu0 %v11781_v3, %s11571_s0 }
 0x5ba   : > { %4962 = vrot.lane.b32.xlu1 %v11866_v42, %s11571_s0 }
 0x5bb   : > { %4712 = vrot.lane.b32.xlu0 %v11779_v1, %s11571_s0 }
 0x5bd   : > { %v3635_v17 = vpop.xlane.xlu1 %3634 }
 0x5be   : > { %11356 = vrcp.f32 %v3635_v17  ;;  %4960 = vrot.lane.b32.xlu1 %v11902_v43, %s11571_s0  ;;  %v14728_v17 = vld [vmem:[#allocation36_spill] sm:$0xff] }
 0x5bf   : > { %4710 = vrot.lane.b32.xlu0 %v11805_v13, %s11571_s0 }
 0x5c2   : > { %5062 = vrot.lane.b32.xlu1 %v14699_v24, %s11571_s0 }
 0x5c3   : > { %4812 = vrot.lane.b32.xlu0 %v11801_v10, %s11571_s0 }
 0x5c5   : > { %v3641_v54 = vpop.xlane.xlu1 %3640 }
 0x5c6   : > { %11358 = vrcp.f32 %v3641_v54  ;;  %5060 = vrot.lane.b32.xlu1 %v14700_v47, %s11571_s0 }
 0x5c7   : > { %4810 = vrot.lane.b32.xlu0 %v11829_v22, %s11571_s0 }
 0x5c8   : > { %v11357_v14 = vpop.eup %11356 }
 0x5c9   : > { %v3644_v16 = vpop.xlane.xlu0 %3643  ;;  %v3695_v62 = vmul.f32 %v11357_v14, %v12599_v0 }
 0x5ca   : > { %11360 = vrcp.f32 %v3644_v16  ;;  %5162 = vrot.lane.b32.xlu1 %v14701_v6, %s11571_s0  ;;  %v14729_v16 = vld [vmem:[#allocation13_spill] sm:$0xff] }
 0x5cb   : > { %4912 = vrot.lane.b32.xlu0 %v11824_v20, %s11571_s0  ;;  %v3711_v35 = vpack.c.bf16 %v3695_v62, %v3695_v62  ;;  %v14730_v62 = vld [vmem:[#allocation2_spill] sm:$0xff] }
 0x5cd   : > { %v3650_v38 = vpop.xlane.xlu0 %3649  ;;  %10701 = vmatmul.mubr.msk.bf16.vlgmr.msra.gmra.mrb[112].mxu1 %vm1948_vm5, %v3711_v35 }
 0x5ce   : > { %11362 = vrcp.f32 %v3650_v38  ;;  %10711 = vmatpush3.bf16.msra.mxu1 %v3880_v28  ;;  %v3647_v2 = vpop.xlane.xlu1 %3646  ;;  %10712 = vmatprep.mubr.msk.bf16.mxu1 %vm11569_vm1, %v14690_v40  ;;  %v14731_v38 = vld [vmem:[#allocation38_spill] sm:$0xff] }
 0x5cf   : > { %11364 = vrcp.f32 %v3647_v2  ;;  %5160 = vrot.lane.b32.xlu1 %v14702_v51, %s11571_s0  ;;  %4910 = vrot.lane.b32.xlu0 %v11854_v33, %s11571_s0  ;;  %v4076_v2 = vsel %vm1952_vm3, %v14731_v38, 0  ;;  %v14739_v38 = vld [vmem:[#allocation8_spill] sm:$0xff] }
 0x5d0   : > { %v11359_v0 = vpop.eup %11358  ;;  %10722 = vmatprep.subr.bf16.mxu1 %v14690_v40 }
 0x5d1   : > { %v3697_v12 = vmul.f32 %v11359_v0, %v12605_v46 }
 0x5d3   : > { %5262 = vrot.lane.b32.xlu1 %v14703_v27, %s11571_s0  ;;  %5012 = vrot.lane.b32.xlu0 %v11849_v30, %s11571_s0  ;;  %v3713_v56 = vpack.c.bf16 %v3697_v12, %v3697_v12  ;;  %v14732_v12 = vld [vmem:[#allocation18_spill] sm:$0xff] }
 0x5d4   : > { %v11361_v44 = vpop.eup %11360 }
 0x5d5   : > { %10713 = vmatmul.mubr.msk.bf16.vlgmr.msra.gmra.mrb[116].mxu1 %vm1948_vm5, %v3713_v56  ;;  %v3698_v26 = vmul.f32 %v11361_v44, %v12611_v23  ;;  %v3653_v39 = vpop.xlane.xlu1 %3652  ;;  %v4027_v23 = vsel %vm1952_vm3, %v14728_v17, 0  ;;  %v14733_v44 = vld [vmem:[#allocation5_spill] sm:$0xff] }
 0x5d6   : > { %10723 = vmatpush3.bf16.msra.mxu1 %v3978_v57  ;;  %10724 = vmatprep.mubr.msk.bf16.mxu1 %vm11569_vm1, %v14690_v40  ;;  %11366 = vrcp.f32 %v3653_v39  ;;  %v14734_v57 = vld [vmem:[#allocation37_spill] sm:$0xff] }
 0x5d7   : > { %5260 = vrot.lane.b32.xlu1 %v14704_v36, %s11571_s0  ;;  %5010 = vrot.lane.b32.xlu0 %v11882_v48, %s11571_s0  ;;  %v3714_v46 = vpack.c.bf16 %v3698_v26, %v3698_v26  ;;  %v4125_v26 = vsel %vm1952_vm3, %v14734_v57, 0  ;;  %v14741_v57 = vld [vmem:[#allocation21_spill] sm:$0xff] }
 0x5d8   : > { %v11363_v4 = vpop.eup %11362  ;;  %10734 = vmatprep.subr.bf16.mxu1 %v14690_v40 }
 0x5d9   : > { %v11365_v58 = vpop.eup %11364  ;;  %10719 = vmatmul.mubr.msk.bf16.vlgmr.msra.gmra.mrb[112].mxu0 %vm1948_vm5, %v3714_v46  ;;  %v3656_v54 = vpop.xlane.xlu1 %3655  ;;  %v3700_v35 = vmul.f32 %v11363_v4, %v12616_v52  ;;  %v14735_v46 = vld [vmem:[#allocation19_spill] sm:$0xff] }
 0x5da   : > { %10729 = vmatpush3.bf16.msra.mxu0 %v4027_v23  ;;  %v3699_v14 = vmul.f32 %v11365_v58, %v12618_v55  ;;  %10730 = vmatprep.mubr.msk.bf16.mxu0 %vm11569_vm1, %v14690_v40  ;;  %11368 = vrcp.f32 %v3656_v54  ;;  %v14736_v58 = vld [vmem:[#allocation4_spill] sm:$0xff] }
 0x5db   : > { %5566 = vrot.lane.b32.xlu1 %v14729_v16, %s11571_s0  ;;  %5112 = vrot.lane.b32.xlu0 %v14730_v62, %s11571_s0  ;;  %v3716_v56 = vpack.c.bf16 %v3700_v35, %v3700_v35 }
 0x5dc   : > { %v3715_v28 = vpack.c.bf16 %v3699_v14, %v3699_v14  ;;  %10740 = vmatprep.subr.bf16.mxu0 %v14690_v40  ;;  %v14737_v14 = vld [vmem:[#allocation39_spill] sm:$0xff] }
 0x5dd   : > { %v3659_v0 = vpop.xlane.xlu0 %3658  ;;  %v3662_v55 = vpop.xlane.xlu1 %3661  ;;  %v4174_v35 = vsel %vm1952_vm3, %v14737_v14, 0 }
 0x5de   : > { %10725 = vmatmul.mubr.msk.bf16.vlgmr.msra.gmra.mrb[120].mxu1 %vm1948_vm5, %v3715_v28  ;;  %11370 = vrcp.f32 %v3659_v0  ;;  %v14738_v28 = vld [vmem:[#allocation20_spill] sm:$0xff] }
 0x5df   : > { %10735 = vmatpush3.bf16.msra.mxu1 %v4076_v2  ;;  %5662 = vrot.lane.b32.xlu1 %v14732_v12, %s11571_s0  ;;  %11372 = vrcp.f32 %v3662_v55 }
 0x5e0   : > { %5110 = vrot.lane.b32.xlu0 %v14733_v44, %s11571_s0  ;;  %10736 = vmatprep.mubr.msk.bf16.mxu1 %vm11569_vm1, %v14690_v40  ;;  %v11367_v52 = vpop.eup %11366 }
 0x5e1   : > { %10731 = vmatmul.mubr.msk.bf16.vlgmr.msra.gmra.mrb[116].mxu0 %vm1948_vm5, %v3716_v56  ;;  %10746 = vmatprep.subr.bf16.mxu1 %v14690_v40  ;;  %v3701_v39 = vmul.f32 %v11367_v52, %v12626_v25  ;;  %v3668_v4 = vpop.xlane.xlu1 %3667  ;;  %v14740_v56 = vld [vmem:[#allocation40_spill] sm:$0xff] }
 0x5e2   : > { %10741 = vmatpush3.bf16.msra.mxu0 %v4125_v26  ;;  %10742 = vmatprep.mubr.msk.bf16.mxu0 %vm11569_vm1, %v14690_v40  ;;  %v4223_v52 = vsel %vm1952_vm3, %v14740_v56, 0  ;;  %v14742_v26 = vld [vmem:[#allocation12_spill] sm:$0xff] }
 0x5e3   : > { %5758 = vrot.lane.b32.xlu1 %v14735_v46, %s11571_s0  ;;  %10752 = vmatprep.subr.bf16.mxu0 %v14690_v40  ;;  %v3717_v17 = vpack.c.bf16 %v3701_v39, %v3701_v39 }
 0x5e4   : > { %5212 = vrot.lane.b32.xlu0 %v14736_v58, %s11571_s0  ;;  %v11369_v23 = vpop.eup %11368 }
 0x5e5   : > { %v3665_v54 = vpop.xlane.xlu0 %3664  ;;  %v3702_v25 = vmul.f32 %v11369_v23, %v12631_v37  ;;  %v14743_v23 = vld [vmem:[#allocation41_spill] sm:$0xff] }
 0x5e6   : > { %11374 = vrcp.f32 %v3665_v54  ;;  %10737 = vmatmul.mubr.msk.bf16.vlgmr.msra.gmra.mrb[124].mxu1 %vm1948_vm5, %v3717_v17  ;;  %v4272_v54 = vsel %vm1952_vm3, %v14743_v23, 0 }
 0x5e7   : > { %11376 = vrcp.f32 %v3668_v4  ;;  %10747 = vmatpush3.bf16.msra.mxu1 %v4174_v35  ;;  %5854 = vrot.lane.b32.xlu1 %v14738_v28, %s11571_s0  ;;  %v3718_v2 = vpack.c.bf16 %v3702_v25, %v3702_v25  ;;  %v14745_v35 = vld [vmem:[#allocation14_spill] sm:$0xff] }
 0x5e8   : > { %5210 = vrot.lane.b32.xlu0 %v14739_v38, %s11571_s0  ;;  %10748 = vmatprep.mubr.msk.bf16.mxu1 %vm11569_vm1, %v14690_v40  ;;  %v11371_v0 = vpop.eup %11370 }
 0x5e9   : > { %10758 = vmatprep.subr.bf16.mxu1 %v14690_v40  ;;  %v11373_v55 = vpop.eup %11372  ;;  %10743 = vmatmul.mubr.msk.bf16.vlgmr.msra.gmra.mrb[120].mxu0 %vm1948_vm5, %v3718_v2  ;;  %v3703_v37 = vmul.f32 %v11371_v0, %v12637_v5  ;;  %v14744_v5 = vld [vmem:[#allocation22_spill] sm:$0xff]  ;;  %v4321_v0 = vsel %vm1952_vm3, %v12658_v41, 0 }
 0x5ea   : > { %10753 = vmatpush3.bf16.msra.mxu0 %v4223_v52  ;;  %10754 = vmatprep.mubr.msk.bf16.mxu0 %vm11569_vm1, %v14690_v40  ;;  %v3704_v4 = vmul.f32 %v11373_v55, %v12635_v18  ;;  %v14746_v55 = vld [vmem:[#allocation24_spill] sm:$0xff]  ;;  %v14747_v52 = vld [vmem:[#allocation15_spill] sm:$0xff] }
 0x5eb   : > { %5950 = vrot.lane.b32.xlu1 %v14741_v57, %s11571_s0  ;;  %v3719_v39 = vpack.c.bf16 %v3703_v37, %v3703_v37  ;;  %10764 = vmatprep.subr.bf16.mxu0 %v14690_v40 }
 0x5ec   : > { %5518 = vrot.lane.b32.xlu0 %v14742_v26, %s11571_s0  ;;  %v3720_v25 = vpack.c.bf16 %v3704_v4, %v3704_v4  ;;  %v14748_v4 = vld [vmem:[#allocation16_spill] sm:$0xff] }
 0x5ed   : > { %v3671_v17 = vpop.xlane.xlu0 %3670 }
 0x5ee   : > { %11378 = vrcp.f32 %v3671_v17  ;;  %10749 = vmatmul.mubr.msk.bf16.vlgmr.msra.gmra.mrb[128].mxu1 %vm1948_vm5, %v3719_v39 }
 0x5ef   : > { %10759 = vmatpush3.bf16.msra.mxu1 %v4272_v54  ;;  %5998 = vrot.lane.b32.xlu1 %v14744_v5, %s11571_s0 }
 0x5f0   : > { %v11375_v14 = vpop.eup %11374  ;;  %5614 = vrot.lane.b32.xlu0 %v14745_v35, %s11571_s0  ;;  %10760 = vmatprep.mubr.msk.bf16.mxu1 %vm11569_vm1, %v14690_v40 }
 0x5f1   : > { %v11377_v18 = vpop.eup %11376  ;;  %10770 = vmatprep.subr.bf16.mxu1 %v14690_v40  ;;  %v3705_v2 = vmul.f32 %v11375_v14, %v12648_v9  ;;  %10755 = vmatmul.mubr.msk.bf16.vlgmr.msra.gmra.mrb[124].mxu0 %vm1948_vm5, %v3720_v25  ;;  %v4370_v9 = vsel %vm1952_vm3, %v12663_v59, 0  ;;  %v4414_v41 = vpop.permute.xlu0 %4413  ;;  %v14749_v14 = vld [vmem:[#allocation17_spill] sm:$0xff] }
 0x5f2   : > { %10765 = vmatpush3.bf16.msra.mxu0 %v4321_v0  ;;  %10766 = vmatprep.mubr.msk.bf16.mxu0 %vm11569_vm1, %v14690_v40  ;;  %v3706_v37 = vmul.f32 %v11377_v18, %v12644_v63  ;;  %v4419_v23 = vsel %vm1952_vm3, %v4414_v41, 0  ;;  %v4463_v59 = vpop.permute.xlu1 %4462 }
 0x5f3   : > { %6046 = vrot.lane.b32.xlu1 %v14746_v55, %s11571_s0  ;;  %v3721_v56 = vpack.c.bf16 %v3705_v2, %v3705_v2  ;;  %10776 = vmatprep.subr.bf16.mxu0 %v14690_v40  ;;  %v4468_v25 = vsel %vm1952_vm3, %v4463_v59, 0 }
 0x5f4   : > { %5710 = vrot.lane.b32.xlu0 %v14747_v52, %s11571_s0  ;;  %v3722_v17 = vpack.c.bf16 %v3706_v37, %v3706_v37 }
 0x5f6   : > { %10761 = vmatmul.mubr.msk.bf16.vlgmr.msra.gmra.mrb[132].mxu1 %vm1948_vm5, %v3721_v56 }
 0x5f7   : > { %10771 = vmatpush3.bf16.msra.mxu1 %v4370_v9  ;;  %10772 = vmatprep.mubr.msk.bf16.mxu1 %vm11569_vm1, %v14690_v40 }
 0x5f8   : > { %v11379_v39 = vpop.eup %11378  ;;  %5806 = vrot.lane.b32.xlu0 %v14748_v4, %s11571_s0  ;;  %10782 = vmatprep.subr.bf16.mxu1 %v14690_v40 }
 0x5f9   : > { %v3707_v63 = vmul.f32 %v11379_v39, %v12652_v50  ;;  %10767 = vmatmul.mubr.msk.bf16.vlgmr.msra.gmra.mrb[128].mxu0 %vm1948_vm5, %v3722_v17 }
 0x5fa   : > { %10777 = vmatpush3.bf16.msra.mxu0 %v4419_v23  ;;  %10778 = vmatprep.mubr.msk.bf16.mxu0 %vm11569_vm1, %v14690_v40 }
 0x5fb   : > { %v3723_v54 = vpack.c.bf16 %v3707_v63, %v3707_v63  ;;  %10788 = vmatprep.subr.bf16.mxu0 %v14690_v40 }
 0x5fc   : > { %5902 = vrot.lane.b32.xlu0 %v14749_v14, %s11571_s0 }
 0x5fe   : > { %10773 = vmatmul.mubr.msk.bf16.vlgmr.msra.gmra.mrb[136].mxu1 %vm1948_vm5, %v3723_v54 }
 0x5ff   : > { %10783 = vmatpush3.bf16.msra.mxu1 %v4468_v25  ;;  %10784 = vmatprep.mubr.msk.bf16.mxu1 %vm11569_vm1, %v14690_v40 }
 0x600   : > { %10794 = vmatprep.subr.bf16.mxu1 %v14690_v40 }
 0x616   : > { %v3674_v50 = vpop.xlane.xlu1 %3673 }
 0x617   : > { %11380 = vrcp.f32 %v3674_v50 }
 0x61a   : > { %v4563_v18 = vpop.permute.xlu1 %4562 }
 0x61e   : > { %v4561_v2 = vpop.permute.xlu1 %4560 }
 0x621   : > { %v11381_v0 = vpop.eup %11380 }
 0x622   : > { %v3677_v56 = vpop.xlane.xlu0 %3676  ;;  %v4663_v37 = vpop.permute.xlu1 %4662  ;;  %v3708_v9 = vmul.f32 %v11381_v0, %v12670_v32 }
 0x623   : > { %11382 = vrcp.f32 %v3677_v56 }
 0x624   : > { %v3724_v41 = vpack.c.bf16 %v3708_v9, %v3708_v9  ;;  %v4568_v9 = vsel %vm1002_vm2, %v4563_v18, 0 }
 0x626   : > { %v4513_v39 = vpop.permute.xlu0 %4512  ;;  %10779 = vmatmul.mubr.msk.bf16.vlgmr.msra.gmra.mrb[132].mxu0 %vm1948_vm5, %v3724_v41  ;;  %v4661_v63 = vpop.permute.xlu1 %4660 }
 0x627   : > { %v4518_v17 = vsel %vm1002_vm2, %v4513_v39, 0  ;;  %10790 = vmatprep.mubr.msk.bf16.mxu0 %vm11569_vm1, %v14690_v40 }
 0x628   : > { %10789 = vmatpush3.bf16.xpose.msra.mxu0 %v4518_v17 }
 0x629   : > { %10800 = vmatprep.subr.bf16.mxu0 %v14690_v40 }
 0x62a   : > { %v4511_v23 = vpop.permute.xlu0 %4510  ;;  %v4763_v59 = vpop.permute.xlu1 %4762 }
 0x62d   : > { %v11383_v54 = vpop.eup %11382 }
 0x62e   : > { %v4613_v25 = vpop.permute.xlu0 %4612  ;;  %v3709_v50 = vmul.f32 %v11383_v54, %v12684_v34  ;;  %v4761_v0 = vpop.permute.xlu1 %4760 }
 0x62f   : > { %v4618_v32 = vsel %vm1002_vm2, %v4613_v25, 0  ;;  %10791 = vmatmul.mubr.msk.bf16.vlgmr.msra.gmra.mrb[136].mxu0 %vm1002_vm2, %v4511_v23  ;;  %v4668_v23 = vsel %vm1002_vm2, %v4663_v37, 0 }
 0x630   : > { %10801 = vmatpush3.bf16.xpose.msra.mxu0 %v4618_v32  ;;  %v3725_v56 = vpack.c.bf16 %v3709_v50, %v3709_v50  ;;  %10802 = vmatprep.mubr.msk.bf16.mxu0 %vm11569_vm1, %v14690_v40 }
 0x631   : > { %10812 = vmatprep.subr.bf16.mxu0 %v14690_v40 }
 0x632   : > { %v4611_v41 = vpop.permute.xlu0 %4610  ;;  %10785 = vmatmul.mubr.msk.bf16.vlgmr.msra.gmra.mrb[140].mxu1 %vm1948_vm5, %v3725_v56  ;;  %v4863_v39 = vpop.permute.xlu1 %4862 }
 0x633   : > { %10795 = vmatpush3.bf16.xpose.msra.mxu1 %v4568_v9  ;;  %10796 = vmatprep.mubr.msk.bf16.mxu1 %vm11569_vm1, %v14690_v40 }
 0x634   : > { %10806 = vmatprep.subr.bf16.mxu1 %v14690_v40 }
 0x636   : > { %v4713_v34 = vpop.permute.xlu0 %4712  ;;  %v4861_v18 = vpop.permute.xlu1 %4860 }
 0x637   : > { %v4718_v17 = vsel %vm1002_vm2, %v4713_v34, 0  ;;  %10803 = vmatmul.mubr.msk.bf16.vlgmr.msra.gmra.mrb[140].mxu0 %vm1002_vm2, %v4611_v41 }
 0x638   : > { %10813 = vmatpush3.bf16.xpose.msra.mxu0 %v4718_v17  ;;  %10814 = vmatprep.mubr.msk.bf16.mxu0 %vm11569_vm1, %v14690_v40 }
 0x639   : > { %10824 = vmatprep.subr.bf16.mxu0 %v14690_v40 }
 0x63a   : > { %v4711_v54 = vpop.permute.xlu0 %4710  ;;  %10797 = vmatmul.mubr.msk.bf16.vlgmr.msra.gmra.mrb[144].mxu1 %vm1002_vm2, %v4561_v2  ;;  %v4963_v50 = vpop.permute.xlu1 %4962  ;;  %v4768_v2 = vsel %vm1002_vm2, %v4763_v59, 0 }
 0x63b   : > { %10807 = vmatpush3.bf16.xpose.msra.mxu1 %v4668_v23  ;;  %10808 = vmatprep.mubr.msk.bf16.mxu1 %vm11569_vm1, %v14690_v40 }
 0x63c   : > { %10818 = vmatprep.subr.bf16.mxu1 %v14690_v40 }
 0x63e   : > { %v4813_v25 = vpop.permute.xlu0 %4812  ;;  %v4961_v56 = vpop.permute.xlu1 %4960 }
 0x63f   : > { %v4818_v32 = vsel %vm1002_vm2, %v4813_v25, 0  ;;  %10815 = vmatmul.mubr.msk.bf16.vlgmr.msra.gmra.mrb[144].mxu0 %vm1002_vm2, %v4711_v54 }
 0x640   : > { %10825 = vmatpush3.bf16.xpose.msra.mxu0 %v4818_v32  ;;  %10826 = vmatprep.mubr.msk.bf16.mxu0 %vm11569_vm1, %v14690_v40 }
 0x641   : > { %10836 = vmatprep.subr.bf16.mxu0 %v14690_v40 }
 0x642   : > { %v4811_v37 = vpop.permute.xlu0 %4810  ;;  %10809 = vmatmul.mubr.msk.bf16.vlgmr.msra.gmra.mrb[148].mxu1 %vm1002_vm2, %v4661_v63  ;;  %v4868_v63 = vsel %vm1002_vm2, %v4863_v39, 0  ;;  %v5063_v34 = vpop.permute.xlu1 %5062 }
 0x643   : > { %10819 = vmatpush3.bf16.xpose.msra.mxu1 %v4768_v2  ;;  %10820 = vmatprep.mubr.msk.bf16.mxu1 %vm11569_vm1, %v14690_v40 }
 0x644   : > { %10830 = vmatprep.subr.bf16.mxu1 %v14690_v40 }
 0x646   : > { %v4913_v9 = vpop.permute.xlu0 %4912  ;;  %v5061_v39 = vpop.permute.xlu1 %5060 }
 0x647   : > { %v4918_v41 = vsel %vm1002_vm2, %v4913_v9, 0  ;;  %10827 = vmatmul.mubr.msk.bf16.vlgmr.msra.gmra.mrb[148].mxu0 %vm1002_vm2, %v4811_v37 }
 0x648   : > { %10837 = vmatpush3.bf16.xpose.msra.mxu0 %v4918_v41  ;;  %10838 = vmatprep.mubr.msk.bf16.mxu0 %vm11569_vm1, %v14690_v40 }
 0x649   : > { %10848 = vmatprep.subr.bf16.mxu0 %v14690_v40 }
 0x64a   : > { %v4911_v59 = vpop.permute.xlu0 %4910  ;;  %10821 = vmatmul.mubr.msk.bf16.vlgmr.msra.gmra.mrb[152].mxu1 %vm1002_vm2, %v4761_v0  ;;  %v4968_v0 = vsel %vm1002_vm2, %v4963_v50, 0  ;;  %v5163_v32 = vpop.permute.xlu1 %5162 }
 0x64b   : > { %10831 = vmatpush3.bf16.xpose.msra.mxu1 %v4868_v63  ;;  %10832 = vmatprep.mubr.msk.bf16.mxu1 %vm11569_vm1, %v14690_v40 }
 0x64c   : > { %10842 = vmatprep.subr.bf16.mxu1 %v14690_v40 }
 0x64e   : > { %v5013_v17 = vpop.permute.xlu0 %5012 }
 0x64f   : > { %v5018_v23 = vsel %vm1002_vm2, %v5013_v17, 0  ;;  %10839 = vmatmul.mubr.msk.bf16.vlgmr.msra.gmra.mrb[152].mxu0 %vm1002_vm2, %v4911_v59  ;;  %v5161_v59 = vpop.permute.xlu1 %5160 }
 0x650   : > { %10849 = vmatpush3.bf16.xpose.msra.mxu0 %v5018_v23  ;;  %10850 = vmatprep.mubr.msk.bf16.mxu0 %vm11569_vm1, %v14690_v40 }
 0x651   : > { %10860 = vmatprep.subr.bf16.mxu0 %v14690_v40 }
 0x652   : > { %v5011_v54 = vpop.permute.xlu0 %5010  ;;  %10833 = vmatmul.mubr.msk.bf16.vlgmr.msra.gmra.mrb[156].mxu1 %vm1002_vm2, %v4861_v18  ;;  %v5068_v18 = vsel %vm1002_vm2, %v5063_v34, 0  ;;  %v5168_v34 = vsel %vm1002_vm2, %v5163_v32, 0 }
 0x653   : > { %10843 = vmatpush3.bf16.xpose.msra.mxu1 %v4968_v0  ;;  %10844 = vmatprep.mubr.msk.bf16.mxu1 %vm11569_vm1, %v14690_v40 }
 0x654   : > { %10854 = vmatprep.subr.bf16.mxu1 %v14690_v40 }
 0x656   : > { %v5113_v25 = vpop.permute.xlu0 %5112 }
 0x657   : > { %v5118_v2 = vsel %vm1002_vm2, %v5113_v25, 0  ;;  %10851 = vmatmul.mubr.msk.bf16.vlgmr.msra.gmra.mrb[156].mxu0 %vm1002_vm2, %v5011_v54 }
 0x658   : > { %v12917_v37 = vpop.f32.mrb[104].mxu0  ;;  %10861 = vmatpush3.bf16.xpose.msra.mxu0 %v5118_v2  ;;  %10862 = vmatprep.mubr.msk.bf16.mxu0 %vm11569_vm1, %v14690_v40  ;;  %v5263_v2 = vpop.permute.xlu1 %5262 }
 0x659   : > { %14750 = vst [vmem:[#allocation36_spill] sm:$0xff] %v12917_v37  ;;  %v10696_v50 = vpop.f32.mrb[105].mxu0  ;;  %10872 = vmatprep.subr.bf16.mxu0 %v14690_v40 }
 0x65a   : > { %v3772_v9 = vpop.f32.mrb[106].mxu0  ;;  %v5111_v41 = vpop.permute.xlu0 %5110  ;;  %10845 = vmatmul.mubr.msk.bf16.vlgmr.msra.gmra.mrb[160].mxu1 %vm1002_vm2, %v4961_v56 }
 0x65b   : > { %10855 = vmatpush3.bf16.xpose.msra.mxu1 %v5068_v18  ;;  %v10697_v63 = vpop.f32.mrb[107].mxu0  ;;  %10856 = vmatprep.mubr.msk.bf16.mxu1 %vm11569_vm1, %v14690_v40 }
 0x65c   : > { %10866 = vmatprep.subr.bf16.mxu1 %v14690_v40  ;;  %v5261_v32 = vpop.permute.xlu1 %5260 }
 0x65e   : > { %v5213_v17 = vpop.permute.xlu0 %5212 }
 0x65f   : > { %v5218_v23 = vsel %vm1002_vm2, %v5213_v17, 0  ;;  %10863 = vmatmul.mubr.msk.bf16.vlgmr.msra.gmra.mrb[160].mxu0 %vm1002_vm2, %v5111_v41 }
 0x660   : > { %v12929_v0 = vpop.f32.mrb[108].mxu0  ;;  %10873 = vmatpush3.bf16.xpose.msra.mxu0 %v5218_v23  ;;  %10874 = vmatprep.mubr.msk.bf16.mxu0 %vm11569_vm1, %v14690_v40  ;;  %v5567_v41 = vpop.permute.xlu1 %5566 }
 0x661   : > { %14751 = vst [vmem:[#allocation38_spill] sm:$0xff] %v12929_v0  ;;  %v10708_v56 = vpop.f32.mrb[109].mxu0  ;;  %10884 = vmatprep.subr.bf16.mxu0 %v14690_v40  ;;  %v5572_v63 = vsel %vm1952_vm3, %v5567_v41, 0 }
 0x662   : > { %v3870_v54 = vpop.f32.mrb[110].mxu0  ;;  %v5211_v25 = vpop.permute.xlu0 %5210  ;;  %10857 = vmatmul.mubr.msk.bf16.vlgmr.msra.gmra.mrb[164].mxu1 %vm1002_vm2, %v5061_v39  ;;  %v5268_v39 = vsel %vm1002_vm2, %v5263_v2, 0 }
 0x663   : > { %10867 = vmatpush3.bf16.xpose.msra.mxu1 %v5168_v34  ;;  %v10709_v50 = vpop.f32.mrb[111].mxu0  ;;  %10868 = vmatprep.mubr.msk.bf16.mxu1 %vm11569_vm1, %v14690_v40 }
 0x664   : > { %10878 = vmatprep.subr.bf16.mxu1 %v14690_v40 }
 0x666   : > { %v5519_v18 = vpop.permute.xlu0 %5518 }
 0x667   : > { %v5524_v9 = vsel %vm1952_vm3, %v5519_v18, 0  ;;  %10875 = vmatmul.mubr.msk.bf16.vlgmr.msra.gmra.mrb[164].mxu0 %vm1002_vm2, %v5211_v25 }
 0x668   : > { %10885 = vmatpush3.bf16.msra.mxu0 %v5524_v9  ;;  %10886 = vmatprep.mubr.msk.bf16.mxu0 %vm11569_vm1, %v14690_v40 }
 0x669   : > { %10896 = vmatprep.subr.bf16.mxu0 %v14690_v40 }
 0x66a   : > { %10869 = vmatmul.mubr.msk.bf16.vlgmr.msra.gmra.mrb[168].mxu1 %vm1002_vm2, %v5161_v59 }
 0x66b   : > { %10879 = vmatpush3.bf16.xpose.msra.mxu1 %v5268_v39  ;;  %10880 = vmatprep.mubr.msk.bf16.mxu1 %vm11569_vm1, %v14690_v40 }
 0x66c   : > { %10890 = vmatprep.subr.bf16.mxu1 %v14690_v40 }
 0x672   : > { %10881 = vmatmul.mubr.msk.bf16.vlgmr.msra.gmra.mrb[172].mxu1 %vm1002_vm2, %v5261_v32 }
 0x673   : > { %10891 = vmatpush3.bf16.msra.mxu1 %v5572_v63  ;;  %10892 = vmatprep.mubr.msk.bf16.mxu1 %vm11569_vm1, %v14690_v40 }
 0x674   : > { %10902 = vmatprep.subr.bf16.mxu1 %v14690_v40 }
 0x6a0   : > { %v12954_v17 = vpop.f32.mrb[112].mxu1 }
 0x6a1   : > { %14752 = vst [vmem:[#allocation37_spill] sm:$0xff] %v12954_v17  ;;  %v10702_v59 = vpop.f32.mrb[113].mxu1 }
 0x6a2   : > { %v3821_v23 = vpop.f32.mrb[114].mxu1 }
 0x6a3   : > { %v10703_v56 = vpop.f32.mrb[115].mxu1 }
 0x6a8   : > { %v12956_v34 = vpop.f32.mrb[116].mxu1 }
 0x6a9   : > { %14753 = vst [vmem:[#allocation39_spill] sm:$0xff] %v12956_v34  ;;  %v10714_v54 = vpop.f32.mrb[117].mxu1 }
 0x6aa   : > { %v3919_v25 = vpop.f32.mrb[118].mxu1 }
 0x6ab   : > { %v10715_v2 = vpop.f32.mrb[119].mxu1 }
 0x6ac   : > { %v12958_v50 = vpop.f32.mrb[112].mxu0 }
 0x6ad   : > { %14754 = vst [vmem:[#allocation40_spill] sm:$0xff] %v12958_v50  ;;  %v10720_v18 = vpop.f32.mrb[113].mxu0 }
 0x6ae   : > { %v3968_v9 = vpop.f32.mrb[114].mxu0 }
 0x6af   : > { %v10721_v32 = vpop.f32.mrb[115].mxu0 }
 0x6b1   : > { %v12960_v39 = vpop.f32.mrb[120].mxu1 }
 0x6b2   : > { %14755 = vst [vmem:[#allocation41_spill] sm:$0xff] %v12960_v39  ;;  %v10726_v41 = vpop.f32.mrb[121].mxu1 }
 0x6b3   : > { %v4017_v63 = vpop.f32.mrb[122].mxu1 }
 0x6b4   : > { %v10727_v0 = vpop.f32.mrb[123].mxu1  ;;  %v12962_v37 = vpop.f32.mrb[116].mxu0 }
 0x6b5   : > { %14756 = vst [vmem:[#allocation42_spill] sm:$0xff] %v12962_v37  ;;  %v10732_v59 = vpop.f32.mrb[117].mxu0 }
 0x6b6   : > { %v4066_v23 = vpop.f32.mrb[118].mxu0 }
 0x6b7   : > { %v10733_v56 = vpop.f32.mrb[119].mxu0 }
 0x6b9   : > { %v12964_v17 = vpop.f32.mrb[124].mxu1 }
 0x6ba   : > { %14757 = vst [vmem:[#allocation43_spill] sm:$0xff] %v12964_v17  ;;  %v10738_v54 = vpop.f32.mrb[125].mxu1 }
 0x6bb   : > { %v4115_v25 = vpop.f32.mrb[126].mxu1 }
 0x6bc   : > { %v10739_v2 = vpop.f32.mrb[127].mxu1  ;;  %v12966_v34 = vpop.f32.mrb[120].mxu0 }
 0x6bd   : > { %14758 = vst [vmem:[#allocation44_spill] sm:$0xff] %v12966_v34  ;;  %v10744_v18 = vpop.f32.mrb[121].mxu0 }
 0x6be   : > { %v4164_v9 = vpop.f32.mrb[122].mxu0 }
 0x6bf   : > { %v10745_v32 = vpop.f32.mrb[123].mxu0 }
 0x6c1   : > { %v12968_v50 = vpop.f32.mrb[128].mxu1 }
 0x6c2   : > { %14759 = vst [vmem:[#allocation45_spill] sm:$0xff] %v12968_v50  ;;  %v10750_v41 = vpop.f32.mrb[129].mxu1 }
 0x6c3   : > { %v4213_v63 = vpop.f32.mrb[130].mxu1 }
 0x6c4   : > { %v10751_v0 = vpop.f32.mrb[131].mxu1  ;;  %v12970_v39 = vpop.f32.mrb[124].mxu0 }
 0x6c5   : > { %14760 = vst [vmem:[#allocation46_spill] sm:$0xff] %v12970_v39  ;;  %v10756_v59 = vpop.f32.mrb[125].mxu0 }
 0x6c6   : > { %v4262_v23 = vpop.f32.mrb[126].mxu0 }
 0x6c7   : > { %v10757_v56 = vpop.f32.mrb[127].mxu0 }
 0x6c9   : > { %v12972_v37 = vpop.f32.mrb[132].mxu1 }
 0x6ca   : > { %14761 = vst [vmem:[#allocation47_spill] sm:$0xff] %v12972_v37  ;;  %v10762_v54 = vpop.f32.mrb[133].mxu1 }
 0x6cb   : > { %v4311_v25 = vpop.f32.mrb[134].mxu1 }
 0x6cc   : > { %v10763_v2 = vpop.f32.mrb[135].mxu1  ;;  %v12974_v17 = vpop.f32.mrb[128].mxu0 }
 0x6cd   : > { %14762 = vst [vmem:[#allocation48_spill] sm:$0xff] %v12974_v17  ;;  %v10768_v18 = vpop.f32.mrb[129].mxu0 }
 0x6ce   : > { %v4360_v9 = vpop.f32.mrb[130].mxu0 }
 0x6cf   : > { %v10769_v32 = vpop.f32.mrb[131].mxu0 }
 0x6d1   : > { %v12976_v34 = vpop.f32.mrb[136].mxu1 }
 0x6d2   : > { %14763 = vst [vmem:[#allocation49_spill] sm:$0xff] %v12976_v34  ;;  %v10774_v41 = vpop.f32.mrb[137].mxu1 }
 0x6d3   : > { %v4409_v63 = vpop.f32.mrb[138].mxu1 }
 0x6d4   : > { %v10775_v0 = vpop.f32.mrb[139].mxu1 }
 0x6f9   : > { %v12978_v50 = vpop.f32.mrb[132].mxu0 }
 0x6fa   : > { %14764 = vst [vmem:[#allocation50_spill] sm:$0xff] %v12978_v50  ;;  %v10780_v59 = vpop.f32.mrb[133].mxu0 }
 0x6fb   : > { %v4458_v23 = vpop.f32.mrb[134].mxu0 }
 0x6fc   : > { %v10781_v56 = vpop.f32.mrb[135].mxu0 }
 0x702   : > { %v4554_v39 = vpop.f32.mrb[136].mxu0 }
 0x703   : > { %v12980_v37 = vmul.f32 0.35355338, %v4554_v39  ;;  %v10792_v54 = vpop.f32.mrb[137].mxu0 }
 0x704   : > { %v4557_v25 = vpop.f32.mrb[138].mxu0 }
 0x705   : > { %v12982_v2 = vpop.f32.mrb[140].mxu1  ;;  %v10793_v18 = vpop.f32.mrb[139].mxu0  ;;  %v5326_v9 = vsel %vm1755_vm4, %v12980_v37, -inf }
 0x706   : > { %14765 = vst [vmem:[#allocation51_spill] sm:$0xff] %v12982_v2  ;;  %5327 = vmax.xlane.f32.xlu0 %v5326_v9  ;;  %v10786_v32 = vpop.f32.mrb[141].mxu1 }
 0x707   : > { %v4507_v41 = vpop.f32.mrb[142].mxu1 }
 0x708   : > { %v10787_v63 = vpop.f32.mrb[143].mxu1 }
 0x70a   : > { %v4654_v0 = vpop.f32.mrb[140].mxu0 }
 0x70b   : > { %v12986_v50 = vmul.f32 0.35355338, %v4654_v0  ;;  %v10804_v59 = vpop.f32.mrb[141].mxu0 }
 0x70c   : > { %v4657_v23 = vpop.f32.mrb[142].mxu0 }
 0x70d   : > { %v4604_v56 = vpop.f32.mrb[144].mxu1  ;;  %v10805_v39 = vpop.f32.mrb[143].mxu0  ;;  %v5332_v54 = vsel %vm1755_vm4, %v12986_v50, -inf }
 0x70e   : > { %v12990_v25 = vmul.f32 0.35355338, %v4604_v56  ;;  %5333 = vmax.xlane.f32.xlu0 %v5332_v54  ;;  %v10798_v18 = vpop.f32.mrb[145].mxu1 }
 0x70f   : > { %v4607_v17 = vpop.f32.mrb[146].mxu1 }
 0x710   : > { %v10799_v2 = vpop.f32.mrb[147].mxu1  ;;  %v5329_v9 = vsel %vm1755_vm4, %v12990_v25, -inf }
 0x711   : > { %5330 = vmax.xlane.f32.xlu1 %v5329_v9 }
 0x712   : > { %v4754_v32 = vpop.f32.mrb[144].mxu0 }
 0x713   : > { %v10816_v41 = vpop.f32.mrb[145].mxu0  ;;  %v12996_v55 = vmul.f32 0.35355338, %v4754_v32 }
 0x714   : > { %v4757_v63 = vpop.f32.mrb[146].mxu0 }
 0x715   : > { %v4704_v0 = vpop.f32.mrb[148].mxu1  ;;  %v10817_v59 = vpop.f32.mrb[147].mxu0  ;;  %v5338_v41 = vsel %vm1755_vm4, %v12996_v55, -inf }
 0x716   : > { %v12994_v23 = vmul.f32 0.35355338, %v4704_v0  ;;  %v10810_v39 = vpop.f32.mrb[149].mxu1 }
 0x717   : > { %v4707_v34 = vpop.f32.mrb[150].mxu1 }
 0x718   : > { %v10811_v56 = vpop.f32.mrb[151].mxu1  ;;  %v5335_v17 = vsel %vm1755_vm4, %v12994_v23, -inf }
 0x719   : > { %5336 = vmax.xlane.f32.xlu0 %v5335_v17 }
 0x71a   : > { %v4854_v2 = vpop.f32.mrb[148].mxu0 }
 0x71b   : > { %v10828_v54 = vpop.f32.mrb[149].mxu0  ;;  %v13000_v18 = vmul.f32 0.35355338, %v4854_v2 }
 0x71c   : > { %v4857_v9 = vpop.f32.mrb[150].mxu0 }
 0x71d   : > { %v10829_v63 = vpop.f32.mrb[151].mxu0  ;;  %5339 = vmax.xlane.f32.xlu0 %v5338_v41  ;;  %v4804_v0 = vpop.f32.mrb[152].mxu1  ;;  %v5344_v56 = vsel %vm1755_vm4, %v13000_v18, -inf }
 0x71e   : > { %v13004_v59 = vmul.f32 0.35355338, %v4804_v0  ;;  %v10822_v34 = vpop.f32.mrb[153].mxu1 }
 0x71f   : > { %v4807_v32 = vpop.f32.mrb[154].mxu1 }
 0x720   : > { %v10823_v39 = vpop.f32.mrb[155].mxu1  ;;  %v5341_v17 = vsel %vm1755_vm4, %v13004_v59, -inf }
 0x721   : > { %5345 = vmax.xlane.f32.xlu0 %v5344_v56  ;;  %5342 = vmax.xlane.f32.xlu1 %v5341_v17 }
 0x722   : > { %v4954_v2 = vpop.f32.mrb[152].mxu0 }
 0x723   : > { %v13010_v54 = vmul.f32 0.35355338, %v4954_v2  ;;  %v10840_v9 = vpop.f32.mrb[153].mxu0 }
 0x724   : > { %v4957_v63 = vpop.f32.mrb[154].mxu0 }
 0x725   : > { %v4904_v41 = vpop.f32.mrb[156].mxu1  ;;  %v10841_v5 = vpop.f32.mrb[155].mxu0  ;;  %v5350_v0 = vsel %vm1755_vm4, %v13010_v54, -inf }
 0x726   : > { %v13014_v34 = vmul.f32 0.35355338, %v4904_v41  ;;  %5351 = vmax.xlane.f32.xlu0 %v5350_v0  ;;  %v10834_v32 = vpop.f32.mrb[157].mxu1 }
 0x727   : > { %v4907_v39 = vpop.f32.mrb[158].mxu1 }
 0x728   : > { %v10835_v14 = vpop.f32.mrb[159].mxu1  ;;  %v5347_v56 = vsel %vm1755_vm4, %v13014_v34, -inf }
 0x729   : > { %5348 = vmax.xlane.f32.xlu1 %v5347_v56 }
 0x72a   : > { %v5054_v17 = vpop.f32.mrb[156].mxu0 }
 0x72b   : > { %v13018_v2 = vmul.f32 0.35355338, %v5054_v17  ;;  %v10852_v9 = vpop.f32.mrb[157].mxu0 }
 0x72c   : > { %v5057_v63 = vpop.f32.mrb[158].mxu0 }
 0x72d   : > { %v5004_v57 = vpop.f32.mrb[160].mxu1  ;;  %v10853_v5 = vpop.f32.mrb[159].mxu0  ;;  %v5356_v4 = vsel %vm1755_vm4, %v13018_v2, -inf }
 0x72e   : > { %v13022_v41 = vmul.f32 0.35355338, %v5004_v57  ;;  %5357 = vmax.xlane.f32.xlu0 %v5356_v4  ;;  %v10846_v0 = vpop.f32.mrb[161].mxu1 }
 0x72f   : > { %v5007_v32 = vpop.f32.mrb[162].mxu1 }
 0x730   : > { %v10847_v14 = vpop.f32.mrb[163].mxu1  ;;  %v5353_v39 = vsel %vm1755_vm4, %v13022_v41, -inf }
 0x731   : > { %5354 = vmax.xlane.f32.xlu1 %v5353_v39 }
 0x732   : > { %v5154_v56 = vpop.f32.mrb[160].mxu0 }
 0x733   : > { %v13026_v17 = vmul.f32 0.35355338, %v5154_v56  ;;  %v10864_v9 = vpop.f32.mrb[161].mxu0 }
 0x734   : > { %v5157_v63 = vpop.f32.mrb[162].mxu0 }
 0x735   : > { %v5104_v52 = vpop.f32.mrb[164].mxu1  ;;  %v10865_v5 = vpop.f32.mrb[163].mxu0  ;;  %v5362_v35 = vsel %vm1755_vm4, %v13026_v17, -inf }
 0x736   : > { %v13030_v57 = vmul.f32 0.35355338, %v5104_v52  ;;  %5363 = vmax.xlane.f32.xlu0 %v5362_v35  ;;  %v10858_v4 = vpop.f32.mrb[165].mxu1 }
 0x737   : > { %v5107_v0 = vpop.f32.mrb[166].mxu1 }
 0x738   : > { %v10859_v32 = vpop.f32.mrb[167].mxu1  ;;  %v5359_v14 = vsel %vm1755_vm4, %v13030_v57, -inf }
 0x739   : > { %5360 = vmax.xlane.f32.xlu1 %v5359_v14 }
 0x73a   : > { %v5254_v39 = vpop.f32.mrb[164].mxu0 }
 0x73b   : > { %v13034_v56 = vmul.f32 0.35355338, %v5254_v39  ;;  %v10876_v9 = vpop.f32.mrb[165].mxu0 }
 0x73c   : > { %v5257_v63 = vpop.f32.mrb[166].mxu0 }
 0x73d   : > { %v5204_v26 = vpop.f32.mrb[168].mxu1  ;;  %v10877_v5 = vpop.f32.mrb[167].mxu0  ;;  %v5368_v38 = vsel %vm1755_vm4, %v13034_v56, -inf  ;;  %v14766_v63 = vld [vmem:[#allocation25_spill] sm:$0xff] }
 0x73e   : > { %v13038_v52 = vmul.f32 0.35355338, %v5204_v26  ;;  %5369 = vmax.xlane.f32.xlu0 %v5368_v38  ;;  %v10870_v35 = vpop.f32.mrb[169].mxu1  ;;  %v14767_v5 = vld [vmem:[#allocation23_spill] sm:$0xff] }
 0x73f   : > { %v5207_v4 = vpop.f32.mrb[170].mxu1  ;;  %v13050_v35 = vpop.permute.xlu1 %5662 }
 0x740   : > { %v10871_v0 = vpop.f32.mrb[171].mxu1  ;;  %v5365_v32 = vsel %vm1755_vm4, %v13038_v52, -inf  ;;  %v13052_v4 = vpop.permute.xlu0 %5614 }
 0x741   : > { %5366 = vmax.xlane.f32.xlu1 %v5365_v32 }
 0x743   : > { %v13054_v0 = vpop.permute.xlu1 %5758 }
 0x745   : > { %v5304_v14 = vpop.f32.mrb[172].mxu1 }
 0x746   : > { %v10882_v39 = vpop.f32.mrb[173].mxu1  ;;  %v13046_v26 = vmul.f32 0.35355338, %v5304_v14 }
 0x747   : > { %v5307_v28 = vpop.f32.mrb[174].mxu1  ;;  %v13058_v32 = vpop.permute.xlu1 %5854 }
 0x748   : > { %v10883_v9 = vpop.f32.mrb[175].mxu1  ;;  %v5371_v38 = vsel %vm1755_vm4, %v13046_v26, -inf  ;;  %v13056_v28 = vpop.permute.xlu0 %5710  ;;  %14768 = vst [vmem:[#allocation52_spill] sm:$0xff] %v13058_v32 }
 0x74b   : > { %v13062_v9 = vpop.permute.xlu1 %5950 }
 0x74c   : > { %v13060_v39 = vpop.permute.xlu0 %5806  ;;  %14770 = vst [vmem:[#allocation54_spill] sm:$0xff] %v13062_v9 }
 0x74d   : > { %14769 = vst [vmem:[#allocation53_spill] sm:$0xff] %v13060_v39 }
 0x750   : > { %v13064_v14 = vpop.permute.xlu0 %5902 }
 0x752   : > { %6142 = vrot.lane.b32.xlu1 %v14766_v63, %s11571_s0  ;;  %v13066_v63 = vpop.permute.xlu1 %5998 }
 0x753   : > { %14771 = vst [vmem:[#allocation55_spill] sm:$0xff] %v13066_v63 }
 0x754   : > { %6094 = vrot.lane.b32.xlu0 %v14767_v5, %s11571_s0 }
 0x756   : > { %v13069_v46 = vpop.permute.xlu1 %6046 }
 0x776   : > { %5372 = vmax.xlane.f32.xlu1 %v5371_v38 }
 0x793   : > { %v5328_v5 = vpop.xlane.xlu0 %5327 }
 0x794   : > { %v5374_v38 = vsub.f32 %v12980_v37, %v5328_v5 }
 0x796   : > { %v5390_v58 = vmul.f32 1.442695, %v5374_v38 }
 0x798   : > { %11384 = vpow2.f32 %v5390_v58 }
 0x79b   : > { %v5334_v44 = vpop.xlane.xlu0 %5333 }
 0x79c   : > { %v5376_v12 = vsub.f32 %v12986_v50, %v5334_v44 }
 0x79e   : > { %v5394_v62 = vmul.f32 1.442695, %v5376_v12  ;;  %v5331_v32 = vpop.xlane.xlu1 %5330 }
 0x79f   : > { %v5375_v16 = vsub.f32 %v12990_v25, %v5331_v32 }
 0x7a0   : > { %11386 = vpow2.f32 %v5394_v62 }
 0x7a1   : > { %v5392_v9 = vmul.f32 1.442695, %v5375_v16 }
 0x7a2   : > { %v13073_v39 = vpop.eup %11384 }
 0x7a3   : > { %11388 = vpow2.f32 %v5392_v9  ;;  %v5422_v63 = vsel %vm1755_vm4, %v13073_v39, 0.0 }
 0x7a4   : > { %5423 = vadd.xlane.f32.xlu0 %v5422_v63 }
 0x7a6   : > { %v5337_v37 = vpop.xlane.xlu0 %5336 }
 0x7a7   : > { %v5377_v58 = vsub.f32 %v12994_v23, %v5337_v37 }
 0x7a9   : > { %v5396_v5 = vmul.f32 1.442695, %v5377_v58 }
 0x7aa   : > { %v13078_v38 = vpop.eup %11386  ;;  %v5340_v44 = vpop.xlane.xlu0 %5339 }
 0x7ab   : > { %11390 = vpow2.f32 %v5396_v5  ;;  %v5378_v12 = vsub.f32 %v12996_v55, %v5340_v44  ;;  %v5428_v16 = vsel %vm1755_vm4, %v13078_v38, 0.0 }
 0x7ac   : > { %5429 = vadd.xlane.f32.xlu0 %v5428_v16 }
 0x7ad   : > { %v13083_v62 = vpop.eup %11388  ;;  %v5398_v50 = vmul.f32 1.442695, %v5378_v12 }
 0x7ae   : > { %v5346_v25 = vpop.xlane.xlu0 %5345  ;;  %v5343_v32 = vpop.xlane.xlu1 %5342  ;;  %v5425_v63 = vsel %vm1755_vm4, %v13083_v62, 0.0 }
 0x7af   : > { %11392 = vpow2.f32 %v5398_v50  ;;  %v5380_v23 = vsub.f32 %v13000_v18, %v5346_v25  ;;  %v5379_v9 = vsub.f32 %v13004_v59, %v5343_v32  ;;  %5426 = vadd.xlane.f32.xlu1 %v5425_v63 }
 0x7b1   : > { %v5402_v37 = vmul.f32 1.442695, %v5380_v23  ;;  %v5400_v55 = vmul.f32 1.442695, %v5379_v9 }
 0x7b3   : > { %11394 = vpow2.f32 %v5402_v37  ;;  %v5352_v58 = vpop.xlane.xlu0 %5351 }
 0x7b4   : > { %11396 = vpow2.f32 %v5400_v55  ;;  %v5382_v44 = vsub.f32 %v13010_v54, %v5352_v58 }
 0x7b5   : > { %v13089_v5 = vpop.eup %11390 }
 0x7b6   : > { %v5349_v12 = vpop.xlane.xlu1 %5348  ;;  %v5431_v16 = vsel %vm1755_vm4, %v13089_v5, 0.0  ;;  %v5406_v59 = vmul.f32 1.442695, %v5382_v44 }
 0x7b7   : > { %v5381_v50 = vsub.f32 %v13014_v34, %v5349_v12  ;;  %5432 = vadd.xlane.f32.xlu1 %v5431_v16 }
 0x7b9   : > { %v13095_v18 = vpop.eup %11392  ;;  %v5404_v25 = vmul.f32 1.442695, %v5381_v50 }
 0x7ba   : > { %v5434_v32 = vsel %vm1755_vm4, %v13095_v18, 0.0 }
 0x7bb   : > { %11398 = vpow2.f32 %v5404_v25  ;;  %5435 = vadd.xlane.f32.xlu0 %v5434_v32  ;;  %v5358_v63 = vpop.xlane.xlu0 %5357 }
 0x7bc   : > { %v5384_v23 = vsub.f32 %v13018_v2, %v5358_v63  ;;  %11400 = vpow2.f32 %v5406_v59 }
 0x7bd   : > { %v13100_v54 = vpop.eup %11394 }
 0x7be   : > { %v13102_v9 = vpop.eup %11396  ;;  %v5410_v37 = vmul.f32 1.442695, %v5384_v23  ;;  %v5355_v34 = vpop.xlane.xlu1 %5354  ;;  %v5440_v55 = vsel %vm1755_vm4, %v13100_v54, 0.0 }
 0x7bf   : > { %v5383_v58 = vsub.f32 %v13022_v41, %v5355_v34  ;;  %5441 = vadd.xlane.f32.xlu0 %v5440_v55  ;;  %v5437_v44 = vsel %vm1755_vm4, %v13102_v9, 0.0 }
 0x7c0   : > { %5438 = vadd.xlane.f32.xlu1 %v5437_v44  ;;  %11402 = vpow2.f32 %v5410_v37 }
 0x7c1   : > { %v5408_v12 = vmul.f32 1.442695, %v5383_v58 }
 0x7c3   : > { %11404 = vpow2.f32 %v5408_v12  ;;  %v5364_v2 = vpop.xlane.xlu0 %5363 }
 0x7c4   : > { %v5386_v16 = vsub.f32 %v13026_v17, %v5364_v2 }
 0x7c5   : > { %v13110_v50 = vpop.eup %11398 }
 0x7c6   : > { %v5414_v59 = vmul.f32 1.442695, %v5386_v16  ;;  %v5361_v25 = vpop.xlane.xlu1 %5360  ;;  %v5443_v32 = vsel %vm1755_vm4, %v13110_v50, 0.0  ;;  %v13114_v63 = vpop.eup %11400 }
 0x7c7   : > { %v5385_v41 = vsub.f32 %v13030_v57, %v5361_v25  ;;  %5444 = vadd.xlane.f32.xlu1 %v5443_v32  ;;  %v5446_v37 = vsel %vm1755_vm4, %v13114_v63, 0.0 }
 0x7c8   : > { %11406 = vpow2.f32 %v5414_v59 }
 0x7c9   : > { %v5412_v23 = vmul.f32 1.442695, %v5385_v41 }
 0x7ca   : > { %v13119_v34 = vpop.eup %11402 }
 0x7cb   : > { %11408 = vpow2.f32 %v5412_v23  ;;  %5447 = vadd.xlane.f32.xlu1 %v5446_v37  ;;  %v5452_v44 = vsel %vm1755_vm4, %v13119_v34, 0.0  ;;  %v5370_v41 = vpop.xlane.xlu0 %5369 }
 0x7cc   : > { %v5388_v23 = vsub.f32 %v13034_v56, %v5370_v41 }
 0x7cd   : > { %v13121_v17 = vpop.eup %11404 }
 0x7ce   : > { %v5367_v55 = vpop.xlane.xlu1 %5366  ;;  %v5449_v58 = vsel %vm1755_vm4, %v13121_v17, 0.0  ;;  %v5418_v37 = vmul.f32 1.442695, %v5388_v23  ;;  %v14775_v23 = vld [vmem:[#allocation52_spill] sm:$0xff] }
 0x7cf   : > { %v5387_v57 = vsub.f32 %v13038_v52, %v5367_v55  ;;  %5450 = vadd.xlane.f32.xlu0 %v5449_v58  ;;  %5453 = vadd.xlane.f32.xlu1 %v5452_v44 }
 0x7d1   : > { %v5416_v12 = vmul.f32 1.442695, %v5387_v57 }
 0x7d2   : > { %v13128_v2 = vpop.eup %11406  ;;  %v13145_v55 = vpop.permute.xlu1 %6142 }
 0x7d3   : > { %11410 = vpow2.f32 %v5416_v12  ;;  %v5458_v16 = vsel %vm1755_vm4, %v13128_v2, 0.0 }
 0x7d4   : > { %5459 = vadd.xlane.f32.xlu1 %v5458_v16  ;;  %11412 = vpow2.f32 %v5418_v37  ;;  %v5860_v37 = vsel %vm1952_vm3, %v14775_v23, 0 }
 0x7d5   : > { %v13132_v59 = vpop.eup %11408 }
 0x7d6   : > { %v5455_v25 = vsel %vm1755_vm4, %v13132_v59, 0.0 }
 0x7d7   : > { %5456 = vadd.xlane.f32.xlu0 %v5455_v25 }
 0x7dd   : > { %v13136_v32 = vpop.eup %11410 }
 0x7de   : > { %v5461_v52 = vsel %vm1755_vm4, %v13136_v32, 0.0  ;;  %v13148_v57 = vpop.eup %11412 }
 0x7df   : > { %5462 = vadd.xlane.f32.xlu0 %v5461_v52  ;;  %v5464_v16 = vsel %vm1755_vm4, %v13148_v57, 0.0 }
 0x7e5   : > { %6238 = vrot.lane.b32.xlu1 %v12373_v15, %s11571_s0 }
 0x7f5   : > { %6190 = vrot.lane.b32.xlu0 %v12316_v7, %s11571_s0 }
 0x803   : > { %v5373_v58 = vpop.xlane.xlu1 %5372 }
 0x804   : > { %v5389_v44 = vsub.f32 %v13046_v26, %v5373_v58  ;;  %v13168_v26 = vpop.permute.xlu0 %6094 }
 0x806   : > { %v5420_v12 = vmul.f32 1.442695, %v5389_v44 }
 0x808   : > { %11414 = vpow2.f32 %v5420_v12  ;;  %v5908_v12 = vsel %vm1952_vm3, %v13064_v14, 0  ;;  %v14779_v14 = vld [vmem:[#allocation4_spill] sm:$0xff] }
 0x809   : > { %5465 = vadd.xlane.f32.xlu1 %v5464_v16 }
 0x812   : > { %v13152_v25 = vpop.eup %11414 }
 0x813   : > { %v5467_v56 = vsel %vm1755_vm4, %v13152_v25, 0.0 }
 0x814   : > { %5468 = vadd.xlane.f32.xlu0 %v5467_v56 }
 0x81a   : > { %6338 = vrot.lane.b32.xlu1 %v11771_v60, %s11572_s30 }
 0x81e   : > { %6336 = vrot.lane.b32.xlu1 %v11803_v11, %s11572_s30 }
 0x822   : > { %6438 = vrot.lane.b32.xlu1 %v11797_v8, %s11572_s30 }
 0x826   : > { %6436 = vrot.lane.b32.xlu1 %v11827_v21, %s11572_s30 }
 0x82a   : > { %6538 = vrot.lane.b32.xlu1 %v11822_v19, %s11572_s30  ;;  %6288 = vrot.lane.b32.xlu0 %v11752_v49, %s11572_s30 }
 0x82e   : > { %6536 = vrot.lane.b32.xlu1 %v11852_v31, %s11572_s30  ;;  %6286 = vrot.lane.b32.xlu0 %v11773_v61, %s11572_s30 }
 0x831   : > { %v5424_v60 = vpop.xlane.xlu0 %5423 }
 0x832   : > { %11416 = vrcp.f32 %v5424_v60  ;;  %6638 = vrot.lane.b32.xlu1 %v11847_v29, %s11572_s30  ;;  %6388 = vrot.lane.b32.xlu0 %v11760_v53, %s11572_s30  ;;  %v14778_v60 = vld [vmem:[#allocation19_spill] sm:$0xff] }
 0x836   : > { %6636 = vrot.lane.b32.xlu1 %v11876_v45, %s11572_s30  ;;  %6386 = vrot.lane.b32.xlu0 %v11781_v3, %s11572_s30  ;;  %v5620_v3 = vsel %vm1952_vm3, %v13052_v4, 0  ;;  %v5764_v4 = vsel %vm1952_vm3, %v13054_v0, 0  ;;  %v14772_v0 = vld [vmem:[#allocation53_spill] sm:$0xff] }
 0x839   : > { %v5430_v49 = vpop.xlane.xlu0 %5429 }
 0x83a   : > { %11418 = vrcp.f32 %v5430_v49  ;;  %6738 = vrot.lane.b32.xlu1 %v11866_v42, %s11572_s30  ;;  %6488 = vrot.lane.b32.xlu0 %v11779_v1, %s11572_s30  ;;  %v5716_v42 = vsel %vm1952_vm3, %v13056_v28, 0 }
 0x83c   : > { %v11417_v61 = vpop.eup %11416  ;;  %v5427_v8 = vpop.xlane.xlu1 %5426 }
 0x83d   : > { %11420 = vrcp.f32 %v5427_v8  ;;  %v5486_v11 = vmul.f32 %v11417_v61, %v13073_v39  ;;  %v5812_v39 = vsel %vm1952_vm3, %v14772_v0, 0 }
 0x83e   : > { %6736 = vrot.lane.b32.xlu1 %v11902_v43, %s11572_s30  ;;  %6486 = vrot.lane.b32.xlu0 %v11805_v13, %s11572_s30 }
 0x83f   : > { %v5502_v53 = vpack.c.bf16 %v5486_v11, %v5486_v11 }
 0x841   : > { %10887 = vmatmul.mubr.msk.bf16.vlgmr.msra.gmra.mrb[168].mxu0 %vm1948_vm5, %v5502_v53 }
 0x842   : > { %10897 = vmatpush3.bf16.msra.mxu0 %v5620_v3  ;;  %6838 = vrot.lane.b32.xlu1 %v14699_v24, %s11572_s30  ;;  %v14781_v3 = vld [vmem:[#allocation20_spill] sm:$0xff] }
 0x843   : > { %6588 = vrot.lane.b32.xlu0 %v11801_v10, %s11572_s30  ;;  %10898 = vmatprep.mubr.msk.bf16.mxu0 %vm11569_vm1, %v14690_v40 }
 0x844   : > { %v11419_v1 = vpop.eup %11418  ;;  %v5433_v19 = vpop.xlane.xlu1 %5432  ;;  %10908 = vmatprep.subr.bf16.mxu0 %v14690_v40 }
 0x845   : > { %11422 = vrcp.f32 %v5433_v19  ;;  %v5488_v13 = vmul.f32 %v11419_v1, %v13078_v38 }
 0x846   : > { %6836 = vrot.lane.b32.xlu1 %v14700_v47, %s11572_s30 }
 0x847   : > { %v11421_v21 = vpop.eup %11420  ;;  %6586 = vrot.lane.b32.xlu0 %v11829_v22, %s11572_s30  ;;  %v5504_v29 = vpack.c.bf16 %v5488_v13, %v5488_v13  ;;  %v5668_v22 = vsel %vm1952_vm3, %v13050_v35, 0  ;;  %v14782_v13 = vld [vmem:[#allocation8_spill] sm:$0xff] }
 0x848   : > { %v5436_v31 = vpop.xlane.xlu0 %5435  ;;  %v5487_v10 = vmul.f32 %v11421_v21, %v13083_v62 }
 0x849   : > { %11424 = vrcp.f32 %v5436_v31  ;;  %10899 = vmatmul.mubr.msk.bf16.vlgmr.msra.gmra.mrb[172].mxu0 %vm1948_vm5, %v5504_v29 }
 0x84a   : > { %10909 = vmatpush3.bf16.msra.mxu0 %v5716_v42  ;;  %6938 = vrot.lane.b32.xlu1 %v14701_v6, %s11572_s30  ;;  %v5503_v45 = vpack.c.bf16 %v5487_v10, %v5487_v10 }
 0x84b   : > { %6688 = vrot.lane.b32.xlu0 %v11824_v20, %s11572_s30  ;;  %10910 = vmatprep.mubr.msk.bf16.mxu0 %vm11569_vm1, %v14690_v40 }
 0x84c   : > { %v5442_v43 = vpop.xlane.xlu0 %5441  ;;  %10893 = vmatmul.mubr.msk.bf16.vlgmr.msra.gmra.mrb[176].mxu1 %vm1948_vm5, %v5503_v45  ;;  %10920 = vmatprep.subr.bf16.mxu0 %v14690_v40  ;;  %v14784_v45 = vld [vmem:[#allocation12_spill] sm:$0xff] }
 0x84d   : > { %11426 = vrcp.f32 %v5442_v43  ;;  %10903 = vmatpush3.bf16.msra.mxu1 %v5668_v22  ;;  %v5439_v24 = vpop.xlane.xlu1 %5438  ;;  %10904 = vmatprep.mubr.msk.bf16.mxu1 %vm11569_vm1, %v14690_v40  ;;  %v6052_v43 = vsel %vm1952_vm3, %v13069_v46, 0 }
 0x84e   : > { %11428 = vrcp.f32 %v5439_v24  ;;  %6936 = vrot.lane.b32.xlu1 %v14702_v51, %s11572_s30  ;;  %10914 = vmatprep.subr.bf16.mxu1 %v14690_v40 }
 0x84f   : > { %v11423_v20 = vpop.eup %11422  ;;  %6686 = vrot.lane.b32.xlu0 %v11854_v33, %s11572_s30 }
 0x850   : > { %v5489_v47 = vmul.f32 %v11423_v20, %v13089_v5  ;;  %v14774_v5 = vld [vmem:[#allocation2_spill] sm:$0xff] }
 0x852   : > { %7038 = vrot.lane.b32.xlu1 %v14703_v27, %s11572_s30  ;;  %v5505_v6 = vpack.c.bf16 %v5489_v47, %v5489_v47  ;;  %v14785_v47 = vld [vmem:[#allocation14_spill] sm:$0xff] }
 0x853   : > { %v11425_v35 = vpop.eup %11424  ;;  %6788 = vrot.lane.b32.xlu0 %v11849_v30, %s11572_s30 }
 0x854   : > { %10905 = vmatmul.mubr.msk.bf16.vlgmr.msra.gmra.mrb[180].mxu1 %vm1948_vm5, %v5505_v6  ;;  %v5445_v51 = vpop.xlane.xlu1 %5444  ;;  %v5490_v28 = vmul.f32 %v11425_v35, %v13095_v18 }
 0x855   : > { %10915 = vmatpush3.bf16.msra.mxu1 %v5764_v4  ;;  %11430 = vrcp.f32 %v5445_v51  ;;  %10916 = vmatprep.mubr.msk.bf16.mxu1 %vm11569_vm1, %v14690_v40  ;;  %v14786_v4 = vld [vmem:[#allocation15_spill] sm:$0xff]  ;;  %v6148_v51 = vsel %vm1952_vm3, %v13145_v55, 0 }
 0x856   : > { %7036 = vrot.lane.b32.xlu1 %v14704_v36, %s11572_s30  ;;  %v5506_v33 = vpack.c.bf16 %v5490_v28, %v5490_v28  ;;  %10926 = vmatprep.subr.bf16.mxu1 %v14690_v40  ;;  %v14773_v36 = vld [vmem:[#allocation13_spill] sm:$0xff] }
 0x857   : > { %v11427_v30 = vpop.eup %11426  ;;  %6786 = vrot.lane.b32.xlu0 %v11882_v48, %s11572_s30 }
 0x858   : > { %v11429_v27 = vpop.eup %11428  ;;  %10911 = vmatmul.mubr.msk.bf16.vlgmr.msra.gmra.mrb[176].mxu0 %vm1948_vm5, %v5506_v33  ;;  %v5448_v38 = vpop.xlane.xlu1 %5447  ;;  %v5492_v48 = vmul.f32 %v11427_v30, %v13100_v54  ;;  %v14777_v54 = vld [vmem:[#allocation5_spill] sm:$0xff]  ;;  %v14787_v33 = vld [vmem:[#allocation16_spill] sm:$0xff] }
 0x859   : > { %10921 = vmatpush3.bf16.msra.mxu0 %v5812_v39  ;;  %11432 = vrcp.f32 %v5448_v38  ;;  %v5491_v62 = vmul.f32 %v11429_v27, %v13102_v9  ;;  %10922 = vmatprep.mubr.msk.bf16.mxu0 %vm11569_vm1, %v14690_v40  ;;  %v14776_v9 = vld [vmem:[#allocation18_spill] sm:$0xff] }
 0x85a   : > { %7342 = vrot.lane.b32.xlu1 %v14773_v36, %s11572_s30  ;;  %10932 = vmatprep.subr.bf16.mxu0 %v14690_v40  ;;  %v5508_v58 = vpack.c.bf16 %v5492_v48, %v5492_v48 }
 0x85b   : > { %6888 = vrot.lane.b32.xlu0 %v14774_v5, %s11572_s30  ;;  %v5507_v18 = vpack.c.bf16 %v5491_v62, %v5491_v62 }
 0x85c   : > { %v5451_v52 = vpop.xlane.xlu0 %5450  ;;  %v5454_v41 = vpop.xlane.xlu1 %5453 }
 0x85d   : > { %11434 = vrcp.f32 %v5451_v52  ;;  %10917 = vmatmul.mubr.msk.bf16.vlgmr.msra.gmra.mrb[184].mxu1 %vm1948_vm5, %v5507_v18 }
 0x85e   : > { %10927 = vmatpush3.bf16.msra.mxu1 %v5860_v37  ;;  %11436 = vrcp.f32 %v5454_v41  ;;  %7438 = vrot.lane.b32.xlu1 %v14776_v9, %s11572_s30 }
 0x85f   : > { %v11431_v44 = vpop.eup %11430  ;;  %6886 = vrot.lane.b32.xlu0 %v14777_v54, %s11572_s30  ;;  %10928 = vmatprep.mubr.msk.bf16.mxu1 %vm11569_vm1, %v14690_v40 }
 0x860   : > { %10923 = vmatmul.mubr.msk.bf16.vlgmr.msra.gmra.mrb[180].mxu0 %vm1948_vm5, %v5508_v58  ;;  %10938 = vmatprep.subr.bf16.mxu1 %v14690_v40  ;;  %v5493_v16 = vmul.f32 %v11431_v44, %v13110_v50  ;;  %v14780_v50 = vld [vmem:[#allocation54_spill] sm:$0xff] }
 0x861   : > { %10933 = vmatpush3.bf16.msra.mxu0 %v5908_v12  ;;  %v5460_v56 = vpop.xlane.xlu1 %5459  ;;  %10934 = vmatprep.mubr.msk.bf16.mxu0 %vm11569_vm1, %v14690_v40  ;;  %v5956_v53 = vsel %vm1952_vm3, %v14780_v50, 0 }
 0x862   : > { %7534 = vrot.lane.b32.xlu1 %v14778_v60, %s11572_s30  ;;  %v5509_v49 = vpack.c.bf16 %v5493_v16, %v5493_v16  ;;  %10944 = vmatprep.subr.bf16.mxu0 %v14690_v40  ;;  %11438 = vrcp.f32 %v5460_v56 }
 0x863   : > { %v11433_v61 = vpop.eup %11432  ;;  %6988 = vrot.lane.b32.xlu0 %v14779_v14, %s11572_s30 }
 0x864   : > { %v5457_v8 = vpop.xlane.xlu0 %5456  ;;  %v5494_v11 = vmul.f32 %v11433_v61, %v13114_v63  ;;  %v14783_v63 = vld [vmem:[#allocation55_spill] sm:$0xff] }
 0x865   : > { %11440 = vrcp.f32 %v5457_v8  ;;  %10929 = vmatmul.mubr.msk.bf16.vlgmr.msra.gmra.mrb[188].mxu1 %vm1948_vm5, %v5509_v49  ;;  %v6004_v29 = vsel %vm1952_vm3, %v14783_v63, 0  ;;  %v6239_v30 = vpop.permute.xlu1 %6238 }
 0x866   : > { %10939 = vmatpush3.bf16.msra.mxu1 %v5956_v53  ;;  %7630 = vrot.lane.b32.xlu1 %v14781_v3, %s11572_s30  ;;  %v5510_v1 = vpack.c.bf16 %v5494_v11, %v5494_v11  ;;  %v6244_v0 = vsel %vm1952_vm3, %v6239_v30, 0 }
 0x867   : > { %v11435_v19 = vpop.eup %11434  ;;  %6986 = vrot.lane.b32.xlu0 %v14782_v13, %s11572_s30  ;;  %10940 = vmatprep.mubr.msk.bf16.mxu1 %vm11569_vm1, %v14690_v40 }
 0x868   : > { %v11437_v21 = vpop.eup %11436  ;;  %10935 = vmatmul.mubr.msk.bf16.vlgmr.msra.gmra.mrb[184].mxu0 %vm1948_vm5, %v5510_v1  ;;  %10950 = vmatprep.subr.bf16.mxu1 %v14690_v40  ;;  %v5495_v31 = vmul.f32 %v11435_v19, %v13121_v17 }
 0x869   : > { %10945 = vmatpush3.bf16.msra.mxu0 %v6004_v29  ;;  %10946 = vmatprep.mubr.msk.bf16.mxu0 %vm11569_vm1, %v14690_v40  ;;  %v5496_v42 = vmul.f32 %v11437_v21, %v13119_v34  ;;  %v6100_v34 = vsel %vm1952_vm3, %v13168_v26, 0 }
 0x86a   : > { %v5511_v10 = vpack.c.bf16 %v5495_v31, %v5495_v31  ;;  %10956 = vmatprep.subr.bf16.mxu0 %v14690_v40 }
 0x86b   : > { %7294 = vrot.lane.b32.xlu0 %v14784_v45, %s11572_s30  ;;  %v5512_v24 = vpack.c.bf16 %v5496_v42, %v5496_v42 }
 0x86c   : > { %v5463_v22 = vpop.xlane.xlu0 %5462  ;;  %v11439_v17 = vpop.eup %11438 }
 0x86d   : > { %11442 = vrcp.f32 %v5463_v22  ;;  %10941 = vmatmul.mubr.msk.bf16.vlgmr.msra.gmra.mrb[192].mxu1 %vm1948_vm5, %v5511_v10  ;;  %v5498_v35 = vmul.f32 %v11439_v17, %v13128_v2 }
 0x86e   : > { %10951 = vmatpush3.bf16.msra.mxu1 %v6052_v43  ;;  %10952 = vmatprep.mubr.msk.bf16.mxu1 %vm11569_vm1, %v14690_v40 }
 0x86f   : > { %v11441_v20 = vpop.eup %11440  ;;  %7390 = vrot.lane.b32.xlu0 %v14785_v47, %s11572_s30  ;;  %10962 = vmatprep.subr.bf16.mxu1 %v14690_v40 }
 0x870   : > { %10947 = vmatmul.mubr.msk.bf16.vlgmr.msra.gmra.mrb[188].mxu0 %vm1948_vm5, %v5512_v24  ;;  %v5497_v46 = vmul.f32 %v11441_v20, %v13132_v59  ;;  %v6191_v26 = vpop.permute.xlu0 %6190  ;;  %v5514_v59 = vpack.c.bf16 %v5498_v35, %v5498_v35 }
 0x871   : > { %10957 = vmatpush3.bf16.msra.mxu0 %v6100_v34  ;;  %10958 = vmatprep.mubr.msk.bf16.mxu0 %vm11569_vm1, %v14690_v40  ;;  %v6196_v2 = vsel %vm1952_vm3, %v6191_v26, 0 }
 0x872   : > { %v5513_v6 = vpack.c.bf16 %v5497_v46, %v5497_v46  ;;  %10968 = vmatprep.subr.bf16.mxu0 %v14690_v40 }
 0x873   : > { %7486 = vrot.lane.b32.xlu0 %v14786_v4, %s11572_s30 }
 0x875   : > { %10953 = vmatmul.mubr.msk.bf16.vlgmr.msra.gmra.mrb[196].mxu1 %vm1948_vm5, %v5513_v6 }
 0x876   : > { %10963 = vmatpush3.bf16.msra.mxu1 %v6148_v51  ;;  %10964 = vmatprep.mubr.msk.bf16.mxu1 %vm11569_vm1, %v14690_v40 }
 0x877   : > { %v11443_v28 = vpop.eup %11442  ;;  %7582 = vrot.lane.b32.xlu0 %v14787_v33, %s11572_s30  ;;  %10974 = vmatprep.subr.bf16.mxu1 %v14690_v40 }
 0x878   : > { %10959 = vmatmul.mubr.msk.bf16.vlgmr.msra.gmra.mrb[192].mxu0 %vm1948_vm5, %v5514_v59  ;;  %v5499_v55 = vmul.f32 %v11443_v28, %v13136_v32 }
 0x879   : > { %10969 = vmatpush3.bf16.msra.mxu0 %v6196_v2  ;;  %10970 = vmatprep.mubr.msk.bf16.mxu0 %vm11569_vm1, %v14690_v40 }
 0x87a   : > { %v5515_v27 = vpack.c.bf16 %v5499_v55, %v5499_v55  ;;  %10980 = vmatprep.subr.bf16.mxu0 %v14690_v40 }
 0x87d   : > { %10965 = vmatmul.mubr.msk.bf16.vlgmr.msra.gmra.mrb[200].mxu1 %vm1948_vm5, %v5515_v27 }
 0x87e   : > { %10975 = vmatpush3.bf16.msra.mxu1 %v6244_v0  ;;  %10976 = vmatprep.mubr.msk.bf16.mxu1 %vm11569_vm1, %v14690_v40 }
 0x87f   : > { %10986 = vmatprep.subr.bf16.mxu1 %v14690_v40 }
 0x896   : > { %v5466_v39 = vpop.xlane.xlu1 %5465 }
 0x897   : > { %11444 = vrcp.f32 %v5466_v39 }
 0x89a   : > { %v6339_v32 = vpop.permute.xlu1 %6338 }
 0x89b   : > { %v6344_v56 = vsel %vm1002_vm2, %v6339_v32, 0 }
 0x89e   : > { %v6337_v38 = vpop.permute.xlu1 %6336 }
 0x8a1   : > { %v11445_v62 = vpop.eup %11444  ;;  %v5469_v36 = vpop.xlane.xlu0 %5468 }
 0x8a2   : > { %11446 = vrcp.f32 %v5469_v36  ;;  %v6439_v48 = vpop.permute.xlu1 %6438  ;;  %v5500_v5 = vmul.f32 %v11445_v62, %v13148_v57 }
 0x8a3   : > { %v6444_v8 = vsel %vm1002_vm2, %v6439_v48, 0 }
 0x8a4   : > { %v5516_v18 = vpack.c.bf16 %v5500_v5, %v5500_v5 }
 0x8a5   : > { %v6289_v52 = vpop.permute.xlu0 %6288 }
 0x8a6   : > { %v6294_v41 = vsel %vm1002_vm2, %v6289_v52, 0  ;;  %10971 = vmatmul.mubr.msk.bf16.vlgmr.msra.gmra.mrb[196].mxu0 %vm1948_vm5, %v5516_v18  ;;  %v6437_v23 = vpop.permute.xlu1 %6436 }
 0x8a7   : > { %10981 = vmatpush3.bf16.xpose.msra.mxu0 %v6294_v41  ;;  %10982 = vmatprep.mubr.msk.bf16.mxu0 %vm11569_vm1, %v14690_v40 }
 0x8a8   : > { %10992 = vmatprep.subr.bf16.mxu0 %v14690_v40 }
 0x8a9   : > { %v6287_v37 = vpop.permute.xlu0 %6286 }
 0x8aa   : > { %v6539_v9 = vpop.permute.xlu1 %6538 }
 0x8ab   : > { %v6544_v1 = vsel %vm1002_vm2, %v6539_v9, 0 }
 0x8ac   : > { %v11447_v58 = vpop.eup %11446 }
 0x8ad   : > { %v6389_v44 = vpop.permute.xlu0 %6388  ;;  %v5501_v54 = vmul.f32 %v11447_v58, %v13152_v25 }
 0x8ae   : > { %v6394_v57 = vsel %vm1002_vm2, %v6389_v44, 0  ;;  %10983 = vmatmul.mubr.msk.bf16.vlgmr.msra.gmra.mrb[200].mxu0 %vm1002_vm2, %v6287_v37  ;;  %v6537_v12 = vpop.permute.xlu1 %6536 }
 0x8af   : > { %10993 = vmatpush3.bf16.xpose.msra.mxu0 %v6394_v57  ;;  %v5517_v16 = vpack.c.bf16 %v5501_v54, %v5501_v54  ;;  %10994 = vmatprep.mubr.msk.bf16.mxu0 %vm11569_vm1, %v14690_v40 }
 0x8b0   : > { %11004 = vmatprep.subr.bf16.mxu0 %v14690_v40 }
 0x8b1   : > { %v6387_v60 = vpop.permute.xlu0 %6386  ;;  %10977 = vmatmul.mubr.msk.bf16.vlgmr.msra.gmra.mrb[204].mxu1 %vm1948_vm5, %v5517_v16 }
 0x8b2   : > { %10987 = vmatpush3.bf16.xpose.msra.mxu1 %v6344_v56  ;;  %v6639_v49 = vpop.permute.xlu1 %6638  ;;  %10988 = vmatprep.mubr.msk.bf16.mxu1 %vm11569_vm1, %v14690_v40 }
 0x8b3   : > { %10998 = vmatprep.subr.bf16.mxu1 %v14690_v40  ;;  %v6644_v29 = vsel %vm1002_vm2, %v6639_v49, 0 }
 0x8b5   : > { %v6489_v25 = vpop.permute.xlu0 %6488 }
 0x8b6   : > { %v6494_v61 = vsel %vm1002_vm2, %v6489_v25, 0  ;;  %10995 = vmatmul.mubr.msk.bf16.vlgmr.msra.gmra.mrb[204].mxu0 %vm1002_vm2, %v6387_v60  ;;  %v6637_v14 = vpop.permute.xlu1 %6636 }
 0x8b7   : > { %11005 = vmatpush3.bf16.xpose.msra.mxu0 %v6494_v61  ;;  %11006 = vmatprep.mubr.msk.bf16.mxu0 %vm11569_vm1, %v14690_v40 }
 0x8b8   : > { %11016 = vmatprep.subr.bf16.mxu0 %v14690_v40 }
 0x8b9   : > { %v6487_v11 = vpop.permute.xlu0 %6486  ;;  %10989 = vmatmul.mubr.msk.bf16.vlgmr.msra.gmra.mrb[208].mxu1 %vm1002_vm2, %v6337_v38 }
 0x8ba   : > { %10999 = vmatpush3.bf16.xpose.msra.mxu1 %v6444_v8  ;;  %11000 = vmatprep.mubr.msk.bf16.mxu1 %vm11569_vm1, %v14690_v40  ;;  %v6739_v53 = vpop.permute.xlu1 %6738 }
 0x8bb   : > { %11010 = vmatprep.subr.bf16.mxu1 %v14690_v40  ;;  %v6744_v43 = vsel %vm1002_vm2, %v6739_v53, 0 }
 0x8bd   : > { %v6589_v50 = vpop.permute.xlu0 %6588 }
 0x8be   : > { %v6594_v3 = vsel %vm1002_vm2, %v6589_v50, 0  ;;  %11007 = vmatmul.mubr.msk.bf16.vlgmr.msra.gmra.mrb[208].mxu0 %vm1002_vm2, %v6487_v11  ;;  %v6737_v13 = vpop.permute.xlu1 %6736 }
 0x8bf   : > { %11017 = vmatpush3.bf16.xpose.msra.mxu0 %v6594_v3  ;;  %11018 = vmatprep.mubr.msk.bf16.mxu0 %vm11569_vm1, %v14690_v40 }
 0x8c0   : > { %11028 = vmatprep.subr.bf16.mxu0 %v14690_v40 }
 0x8c1   : > { %v6587_v19 = vpop.permute.xlu0 %6586  ;;  %11001 = vmatmul.mubr.msk.bf16.vlgmr.msra.gmra.mrb[212].mxu1 %vm1002_vm2, %v6437_v23 }
 0x8c2   : > { %11011 = vmatpush3.bf16.xpose.msra.mxu1 %v6544_v1  ;;  %11012 = vmatprep.mubr.msk.bf16.mxu1 %vm11569_vm1, %v14690_v40  ;;  %v6839_v10 = vpop.permute.xlu1 %6838 }
 0x8c3   : > { %11022 = vmatprep.subr.bf16.mxu1 %v14690_v40  ;;  %v6844_v34 = vsel %vm1002_vm2, %v6839_v10, 0 }
 0x8c5   : > { %v6689_v21 = vpop.permute.xlu0 %6688 }
 0x8c6   : > { %v6694_v63 = vsel %vm1002_vm2, %v6689_v21, 0  ;;  %11019 = vmatmul.mubr.msk.bf16.vlgmr.msra.gmra.mrb[212].mxu0 %vm1002_vm2, %v6587_v19  ;;  %v6837_v22 = vpop.permute.xlu1 %6836 }
 0x8c7   : > { %11029 = vmatpush3.bf16.xpose.msra.mxu0 %v6694_v63  ;;  %11030 = vmatprep.mubr.msk.bf16.mxu0 %vm11569_vm1, %v14690_v40 }
 0x8c8   : > { %11040 = vmatprep.subr.bf16.mxu0 %v14690_v40 }
 0x8c9   : > { %v6687_v31 = vpop.permute.xlu0 %6686  ;;  %11013 = vmatmul.mubr.msk.bf16.vlgmr.msra.gmra.mrb[216].mxu1 %vm1002_vm2, %v6537_v12 }
 0x8ca   : > { %11023 = vmatpush3.bf16.xpose.msra.mxu1 %v6644_v29  ;;  %11024 = vmatprep.mubr.msk.bf16.mxu1 %vm11569_vm1, %v14690_v40  ;;  %v6939_v20 = vpop.permute.xlu1 %6938 }
 0x8cb   : > { %11034 = vmatprep.subr.bf16.mxu1 %v14690_v40  ;;  %v6944_v51 = vsel %vm1002_vm2, %v6939_v20, 0 }
 0x8cd   : > { %v6789_v42 = vpop.permute.xlu0 %6788 }
 0x8ce   : > { %v6794_v45 = vsel %vm1002_vm2, %v6789_v42, 0  ;;  %11031 = vmatmul.mubr.msk.bf16.vlgmr.msra.gmra.mrb[216].mxu0 %vm1002_vm2, %v6687_v31  ;;  %v6937_v6 = vpop.permute.xlu1 %6936 }
 0x8cf   : > { %11041 = vmatpush3.bf16.xpose.msra.mxu0 %v6794_v45  ;;  %11042 = vmatprep.mubr.msk.bf16.mxu0 %vm11569_vm1, %v14690_v40 }
 0x8d0   : > { %11052 = vmatprep.subr.bf16.mxu0 %v14690_v40 }
 0x8d1   : > { %v6787_v17 = vpop.permute.xlu0 %6786  ;;  %11025 = vmatmul.mubr.msk.bf16.vlgmr.msra.gmra.mrb[220].mxu1 %vm1002_vm2, %v6637_v14 }
 0x8d2   : > { %11035 = vmatpush3.bf16.xpose.msra.mxu1 %v6744_v43  ;;  %11036 = vmatprep.mubr.msk.bf16.mxu1 %vm11569_vm1, %v14690_v40  ;;  %v7039_v59 = vpop.permute.xlu1 %7038 }
 0x8d3   : > { %11046 = vmatprep.subr.bf16.mxu1 %v14690_v40  ;;  %v7044_v55 = vsel %vm1002_vm2, %v7039_v59, 0 }
 0x8d5   : > { %v6889_v24 = vpop.permute.xlu0 %6888 }
 0x8d6   : > { %v6894_v47 = vsel %vm1002_vm2, %v6889_v24, 0  ;;  %11043 = vmatmul.mubr.msk.bf16.vlgmr.msra.gmra.mrb[220].mxu0 %vm1002_vm2, %v6787_v17  ;;  %v7037_v2 = vpop.permute.xlu1 %7036 }
 0x8d7   : > { %11053 = vmatpush3.bf16.xpose.msra.mxu0 %v6894_v47  ;;  %11054 = vmatprep.mubr.msk.bf16.mxu0 %vm11569_vm1, %v14690_v40 }
 0x8d8   : > { %11064 = vmatprep.subr.bf16.mxu0 %v14690_v40 }
 0x8d9   : > { %v6887_v46 = vpop.permute.xlu0 %6886  ;;  %11037 = vmatmul.mubr.msk.bf16.vlgmr.msra.gmra.mrb[224].mxu1 %vm1002_vm2, %v6737_v13 }
 0x8da   : > { %11047 = vmatpush3.bf16.xpose.msra.mxu1 %v6844_v34  ;;  %11048 = vmatprep.mubr.msk.bf16.mxu1 %vm11569_vm1, %v14690_v40  ;;  %v7343_v30 = vpop.permute.xlu1 %7342 }
 0x8db   : > { %11058 = vmatprep.subr.bf16.mxu1 %v14690_v40  ;;  %v7348_v27 = vsel %vm1952_vm3, %v7343_v30, 0 }
 0x8dd   : > { %v6989_v35 = vpop.permute.xlu0 %6988 }
 0x8de   : > { %v6994_v4 = vsel %vm1002_vm2, %v6989_v35, 0  ;;  %11055 = vmatmul.mubr.msk.bf16.vlgmr.msra.gmra.mrb[224].mxu0 %vm1002_vm2, %v6887_v46 }
 0x8df   : > { %11065 = vmatpush3.bf16.xpose.msra.mxu0 %v6994_v4  ;;  %11066 = vmatprep.mubr.msk.bf16.mxu0 %vm11569_vm1, %v14690_v40 }
 0x8e0   : > { %11076 = vmatprep.subr.bf16.mxu0 %v14690_v40 }
 0x8e1   : > { %v6987_v26 = vpop.permute.xlu0 %6986  ;;  %11049 = vmatmul.mubr.msk.bf16.vlgmr.msra.gmra.mrb[228].mxu1 %vm1002_vm2, %v6837_v22 }
 0x8e2   : > { %11059 = vmatpush3.bf16.xpose.msra.mxu1 %v6944_v51  ;;  %11060 = vmatprep.mubr.msk.bf16.mxu1 %vm11569_vm1, %v14690_v40 }
 0x8e3   : > { %11070 = vmatprep.subr.bf16.mxu1 %v14690_v40 }
 0x8e5   : > { %v7295_v28 = vpop.permute.xlu0 %7294 }
 0x8e6   : > { %v7300_v33 = vsel %vm1952_vm3, %v7295_v28, 0  ;;  %11067 = vmatmul.mubr.msk.bf16.vlgmr.msra.gmra.mrb[228].mxu0 %vm1002_vm2, %v6987_v26 }
 0x8e7   : > { %11077 = vmatpush3.bf16.msra.mxu0 %v7300_v33  ;;  %11078 = vmatprep.mubr.msk.bf16.mxu0 %vm11569_vm1, %v14690_v40 }
 0x8e8   : > { %11088 = vmatprep.subr.bf16.mxu0 %v14690_v40 }
 0x8e9   : > { %11061 = vmatmul.mubr.msk.bf16.vlgmr.msra.gmra.mrb[232].mxu1 %vm1002_vm2, %v6937_v6 }
 0x8ea   : > { %11071 = vmatpush3.bf16.xpose.msra.mxu1 %v7044_v55  ;;  %11072 = vmatprep.mubr.msk.bf16.mxu1 %vm11569_vm1, %v14690_v40 }
 0x8eb   : > { %11082 = vmatprep.subr.bf16.mxu1 %v14690_v40 }
 0x8f1   : > { %11073 = vmatmul.mubr.msk.bf16.vlgmr.msra.gmra.mrb[236].mxu1 %vm1002_vm2, %v7037_v2 }
 0x8f2   : > { %11083 = vmatpush3.bf16.msra.mxu1 %v7348_v27  ;;  %11084 = vmatprep.mubr.msk.bf16.mxu1 %vm11569_vm1, %v14690_v40 }
 0x8f3   : > { %11094 = vmatprep.subr.bf16.mxu1 %v14690_v40 }
 0x914   : > { %v13426_v0 = vpop.f32.mrb[168].mxu0 }
 0x915   : > { %v10888_v39 = vpop.f32.mrb[169].mxu0 }
 0x916   : > { %v5563_v32 = vpop.f32.mrb[170].mxu0 }
 0x917   : > { %v10889_v38 = vpop.f32.mrb[171].mxu0 }
 0x91c   : > { %v13428_v62 = vpop.f32.mrb[172].mxu0 }
 0x91d   : > { %v10900_v36 = vpop.f32.mrb[173].mxu0 }
 0x91e   : > { %v5659_v48 = vpop.f32.mrb[174].mxu0 }
 0x91f   : > { %v13430_v5 = vpop.f32.mrb[176].mxu1  ;;  %v10901_v18 = vpop.f32.mrb[175].mxu0 }
 0x920   : > { %v10894_v52 = vpop.f32.mrb[177].mxu1 }
 0x921   : > { %v5611_v41 = vpop.f32.mrb[178].mxu1 }
 0x922   : > { %v10895_v23 = vpop.f32.mrb[179].mxu1 }
 0x927   : > { %v13432_v37 = vpop.f32.mrb[180].mxu1 }
 0x928   : > { %v10906_v9 = vpop.f32.mrb[181].mxu1 }
 0x929   : > { %v5707_v58 = vpop.f32.mrb[182].mxu1 }
 0x92a   : > { %v10907_v44 = vpop.f32.mrb[183].mxu1 }
 0x92b   : > { %v13434_v54 = vpop.f32.mrb[176].mxu0 }
 0x92c   : > { %v10912_v57 = vpop.f32.mrb[177].mxu0 }
 0x92d   : > { %v5755_v12 = vpop.f32.mrb[178].mxu0 }
 0x92e   : > { %v10913_v16 = vpop.f32.mrb[179].mxu0 }
 0x930   : > { %v13436_v56 = vpop.f32.mrb[184].mxu1 }
 0x931   : > { %v10918_v60 = vpop.f32.mrb[185].mxu1 }
 0x932   : > { %v5803_v49 = vpop.f32.mrb[186].mxu1 }
 0x933   : > { %v10919_v25 = vpop.f32.mrb[187].mxu1  ;;  %v13438_v61 = vpop.f32.mrb[180].mxu0 }
 0x934   : > { %v10924_v14 = vpop.f32.mrb[181].mxu0 }
 0x935   : > { %v5851_v8 = vpop.f32.mrb[182].mxu0 }
 0x936   : > { %v10925_v11 = vpop.f32.mrb[183].mxu0 }
 0x938   : > { %v13440_v50 = vpop.f32.mrb[188].mxu1 }
 0x939   : > { %v10930_v53 = vpop.f32.mrb[189].mxu1 }
 0x93a   : > { %v5899_v3 = vpop.f32.mrb[190].mxu1 }
 0x93b   : > { %v10931_v1 = vpop.f32.mrb[191].mxu1  ;;  %v13442_v19 = vpop.f32.mrb[184].mxu0 }
 0x93c   : > { %v10936_v13 = vpop.f32.mrb[185].mxu0 }
 0x93d   : > { %v5947_v21 = vpop.f32.mrb[186].mxu0 }
 0x93e   : > { %v10937_v63 = vpop.f32.mrb[187].mxu0 }
 0x940   : > { %v13444_v29 = vpop.f32.mrb[192].mxu1 }
 0x941   : > { %v10942_v31 = vpop.f32.mrb[193].mxu1 }
 0x942   : > { %v5995_v10 = vpop.f32.mrb[194].mxu1 }
 0x943   : > { %v10943_v42 = vpop.f32.mrb[195].mxu1  ;;  %v13446_v45 = vpop.f32.mrb[188].mxu0 }
 0x944   : > { %v10948_v22 = vpop.f32.mrb[189].mxu0 }
 0x945   : > { %v6043_v43 = vpop.f32.mrb[190].mxu0 }
 0x946   : > { %v10949_v17 = vpop.f32.mrb[191].mxu0 }
 0x948   : > { %v13448_v24 = vpop.f32.mrb[196].mxu1 }
 0x949   : > { %v10954_v20 = vpop.f32.mrb[197].mxu1 }
 0x94a   : > { %v6091_v47 = vpop.f32.mrb[198].mxu1 }
 0x94b   : > { %v10955_v34 = vpop.f32.mrb[199].mxu1  ;;  %v13450_v46 = vpop.f32.mrb[192].mxu0 }
 0x94c   : > { %v10960_v6 = vpop.f32.mrb[193].mxu0 }
 0x94d   : > { %v6139_v35 = vpop.f32.mrb[194].mxu0 }
 0x94e   : > { %v10961_v4 = vpop.f32.mrb[195].mxu0 }
 0x950   : > { %v13452_v51 = vpop.f32.mrb[200].mxu1 }
 0x951   : > { %v10966_v26 = vpop.f32.mrb[201].mxu1 }
 0x952   : > { %v6187_v59 = vpop.f32.mrb[202].mxu1 }
 0x953   : > { %v10967_v28 = vpop.f32.mrb[203].mxu1 }
 0x979   : > { %v13454_v33 = vpop.f32.mrb[196].mxu0 }
 0x97a   : > { %v10972_v2 = vpop.f32.mrb[197].mxu0 }
 0x97b   : > { %v6235_v55 = vpop.f32.mrb[198].mxu0 }
 0x97c   : > { %v10973_v30 = vpop.f32.mrb[199].mxu0 }
 0x981   : > { %v6330_v27 = vpop.f32.mrb[200].mxu0 }
 0x982   : > { %v13456_v39 = vmul.f32 0.35355338, %v6330_v27  ;;  %v10984_v32 = vpop.f32.mrb[201].mxu0 }
 0x983   : > { %v6333_v38 = vpop.f32.mrb[202].mxu0 }
 0x984   : > { %v13458_v36 = vpop.f32.mrb[204].mxu1  ;;  %v10985_v48 = vpop.f32.mrb[203].mxu0  ;;  %v7102_v18 = vsel %vm1755_vm4, %v13456_v39, -inf }
 0x985   : > { %7103 = vmax.xlane.f32.xlu0 %v7102_v18  ;;  %v10978_v52 = vpop.f32.mrb[205].mxu1 }
 0x986   : > { %v6283_v41 = vpop.f32.mrb[206].mxu1 }
 0x987   : > { %v10979_v23 = vpop.f32.mrb[207].mxu1 }
 0x989   : > { %v6430_v9 = vpop.f32.mrb[204].mxu0 }
 0x98a   : > { %v13462_v58 = vmul.f32 0.35355338, %v6430_v9  ;;  %v10996_v44 = vpop.f32.mrb[205].mxu0 }
 0x98b   : > { %v6433_v57 = vpop.f32.mrb[206].mxu0 }
 0x98c   : > { %v6380_v12 = vpop.f32.mrb[208].mxu1  ;;  %v10997_v16 = vpop.f32.mrb[207].mxu0  ;;  %v7108_v60 = vsel %vm1755_vm4, %v13462_v58, -inf }
 0x98d   : > { %v13466_v49 = vmul.f32 0.35355338, %v6380_v12  ;;  %7109 = vmax.xlane.f32.xlu0 %v7108_v60  ;;  %v10990_v25 = vpop.f32.mrb[209].mxu1 }
 0x98e   : > { %v6383_v14 = vpop.f32.mrb[210].mxu1 }
 0x98f   : > { %v10991_v8 = vpop.f32.mrb[211].mxu1  ;;  %v7105_v11 = vsel %vm1755_vm4, %v13466_v49, -inf }
 0x990   : > { %7106 = vmax.xlane.f32.xlu1 %v7105_v11 }
 0x991   : > { %v6530_v53 = vpop.f32.mrb[208].mxu0 }
 0x992   : > { %v11008_v3 = vpop.f32.mrb[209].mxu0  ;;  %v13472_v42 = vmul.f32 0.35355338, %v6530_v53 }
 0x993   : > { %v6533_v1 = vpop.f32.mrb[210].mxu0 }
 0x994   : > { %v6480_v13 = vpop.f32.mrb[212].mxu1  ;;  %v11009_v21 = vpop.f32.mrb[211].mxu0  ;;  %v7114_v6 = vsel %vm1755_vm4, %v13472_v42, -inf }
 0x995   : > { %v13470_v63 = vmul.f32 0.35355338, %v6480_v13  ;;  %v11002_v31 = vpop.f32.mrb[213].mxu1 }
 0x996   : > { %v6483_v10 = vpop.f32.mrb[214].mxu1 }
 0x997   : > { %v11003_v22 = vpop.f32.mrb[215].mxu1  ;;  %v7111_v43 = vsel %vm1755_vm4, %v13470_v63, -inf }
 0x998   : > { %7112 = vmax.xlane.f32.xlu0 %v7111_v43 }
 0x999   : > { %v6630_v17 = vpop.f32.mrb[212].mxu0 }
 0x99a   : > { %v11020_v20 = vpop.f32.mrb[213].mxu0  ;;  %v13476_v47 = vmul.f32 0.35355338, %v6630_v17 }
 0x99b   : > { %v6633_v34 = vpop.f32.mrb[214].mxu0 }
 0x99c   : > { %v11021_v35 = vpop.f32.mrb[215].mxu0  ;;  %7115 = vmax.xlane.f32.xlu0 %v7114_v6  ;;  %v6580_v4 = vpop.f32.mrb[216].mxu1  ;;  %v7120_v55 = vsel %vm1755_vm4, %v13476_v47, -inf }
 0x99d   : > { %v13480_v26 = vmul.f32 0.35355338, %v6580_v4  ;;  %v11014_v59 = vpop.f32.mrb[217].mxu1 }
 0x99e   : > { %v6583_v28 = vpop.f32.mrb[218].mxu1 }
 0x99f   : > { %v11015_v2 = vpop.f32.mrb[219].mxu1  ;;  %v7117_v30 = vsel %vm1755_vm4, %v13480_v26, -inf }
 0x9a0   : > { %7121 = vmax.xlane.f32.xlu0 %v7120_v55  ;;  %7118 = vmax.xlane.f32.xlu1 %v7117_v30 }
 0x9a1   : > { %v6730_v27 = vpop.f32.mrb[216].mxu0 }
 0x9a2   : > { %v13486_v32 = vmul.f32 0.35355338, %v6730_v27  ;;  %v11032_v38 = vpop.f32.mrb[217].mxu0 }
 0x9a3   : > { %v6733_v48 = vpop.f32.mrb[218].mxu0 }
 0x9a4   : > { %v6680_v18 = vpop.f32.mrb[220].mxu1  ;;  %v11033_v52 = vpop.f32.mrb[219].mxu0  ;;  %v7126_v41 = vsel %vm1755_vm4, %v13486_v32, -inf }
 0x9a5   : > { %v13490_v23 = vmul.f32 0.35355338, %v6680_v18  ;;  %7127 = vmax.xlane.f32.xlu0 %v7126_v41  ;;  %v11026_v9 = vpop.f32.mrb[221].mxu1 }
 0x9a6   : > { %v6683_v44 = vpop.f32.mrb[222].mxu1 }
 0x9a7   : > { %v11027_v57 = vpop.f32.mrb[223].mxu1  ;;  %v7123_v12 = vsel %vm1755_vm4, %v13490_v23, -inf }
 0x9a8   : > { %7124 = vmax.xlane.f32.xlu1 %v7123_v12 }
 0x9a9   : > { %v6830_v16 = vpop.f32.mrb[220].mxu0 }
 0x9aa   : > { %v13494_v60 = vmul.f32 0.35355338, %v6830_v16  ;;  %v11044_v25 = vpop.f32.mrb[221].mxu0 }
 0x9ab   : > { %v6833_v14 = vpop.f32.mrb[222].mxu0 }
 0x9ac   : > { %v6780_v8 = vpop.f32.mrb[224].mxu1  ;;  %v11045_v11 = vpop.f32.mrb[223].mxu0  ;;  %v7132_v53 = vsel %vm1755_vm4, %v13494_v60, -inf }
 0x9ad   : > { %v13498_v3 = vmul.f32 0.35355338, %v6780_v8  ;;  %7133 = vmax.xlane.f32.xlu0 %v7132_v53  ;;  %v11038_v1 = vpop.f32.mrb[225].mxu1  ;;  %v14788_v11 = vld [vmem:[#allocation21_spill] sm:$0xff] }
 0x9ae   : > { %v6783_v13 = vpop.f32.mrb[226].mxu1  ;;  %v14789_v53 = vld [vmem:[#allocation17_spill] sm:$0xff]  ;;  %v14790_v1 = vld [vmem:[#allocation22_spill] sm:$0xff] }
 0x9af   : > { %v11039_v21 = vpop.f32.mrb[227].mxu1  ;;  %v7129_v31 = vsel %vm1755_vm4, %v13498_v3, -inf  ;;  %v14791_v13 = vld [vmem:[#allocation24_spill] sm:$0xff] }
 0x9b0   : > { %7130 = vmax.xlane.f32.xlu1 %v7129_v31 }
 0x9b1   : > { %v6930_v10 = vpop.f32.mrb[224].mxu0 }
 0x9b2   : > { %v13502_v22 = vmul.f32 0.35355338, %v6930_v10  ;;  %v11056_v43 = vpop.f32.mrb[225].mxu0  ;;  %v13530_v10 = vpop.permute.xlu0 %7390 }
 0x9b3   : > { %v6933_v17 = vpop.f32.mrb[226].mxu0 }
 0x9b4   : > { %v6880_v20 = vpop.f32.mrb[228].mxu1  ;;  %v11057_v34 = vpop.f32.mrb[227].mxu0  ;;  %v7138_v6 = vsel %vm1755_vm4, %v13502_v22, -inf }
 0x9b5   : > { %v13506_v35 = vmul.f32 0.35355338, %v6880_v20  ;;  %7139 = vmax.xlane.f32.xlu0 %v7138_v6  ;;  %v11050_v4 = vpop.f32.mrb[229].mxu1  ;;  %v13534_v17 = vpop.permute.xlu1 %7438 }
 0x9b6   : > { %v6883_v59 = vpop.f32.mrb[230].mxu1  ;;  %v13532_v43 = vpop.permute.xlu0 %7486 }
 0x9b7   : > { %v11051_v28 = vpop.f32.mrb[231].mxu1  ;;  %v7135_v2 = vsel %vm1755_vm4, %v13506_v35, -inf }
 0x9b8   : > { %7136 = vmax.xlane.f32.xlu1 %v7135_v2 }
 0x9b9   : > { %v7030_v55 = vpop.f32.mrb[228].mxu0  ;;  %v13538_v6 = vpop.permute.xlu1 %7534 }
 0x9ba   : > { %v13510_v30 = vmul.f32 0.35355338, %v7030_v55  ;;  %v11068_v27 = vpop.f32.mrb[229].mxu0  ;;  %v13536_v20 = vpop.permute.xlu0 %7582 }
 0x9bb   : > { %v7033_v38 = vpop.f32.mrb[230].mxu0 }
 0x9bc   : > { %v6980_v48 = vpop.f32.mrb[232].mxu1  ;;  %v11069_v18 = vpop.f32.mrb[231].mxu0  ;;  %v7144_v52 = vsel %vm1755_vm4, %v13510_v30, -inf }
 0x9bd   : > { %v13514_v41 = vmul.f32 0.35355338, %v6980_v48  ;;  %7145 = vmax.xlane.f32.xlu0 %v7144_v52  ;;  %v11062_v9 = vpop.f32.mrb[233].mxu1  ;;  %v13541_v28 = vpop.permute.xlu1 %7630 }
 0x9be   : > { %v6983_v44 = vpop.f32.mrb[234].mxu1 }
 0x9bf   : > { %v11063_v57 = vpop.f32.mrb[235].mxu1  ;;  %v7141_v12 = vsel %vm1755_vm4, %v13514_v41, -inf }
 0x9c0   : > { %7142 = vmax.xlane.f32.xlu1 %v7141_v12 }
 0x9c4   : > { %v7080_v16 = vpop.f32.mrb[236].mxu1 }
 0x9c5   : > { %v11074_v25 = vpop.f32.mrb[237].mxu1  ;;  %v13526_v21 = vmul.f32 0.35355338, %v7080_v16 }
 0x9c6   : > { %v7083_v14 = vpop.f32.mrb[238].mxu1 }
 0x9c7   : > { %v11075_v8 = vpop.f32.mrb[239].mxu1  ;;  %v7147_v31 = vsel %vm1755_vm4, %v13526_v21, -inf }
 0x9d1   : > { %7726 = vrot.lane.b32.xlu1 %v14788_v11, %s11572_s30 }
 0x9d3   : > { %7678 = vrot.lane.b32.xlu0 %v14789_v53, %s11572_s30 }
 0x9d5   : > { %7774 = vrot.lane.b32.xlu1 %v14790_v1, %s11572_s30 }
 0x9d9   : > { %7822 = vrot.lane.b32.xlu1 %v14791_v13, %s11572_s30 }
 0x9fd   : > { %7148 = vmax.xlane.f32.xlu1 %v7147_v31 }
 0xa12   : > { %v7104_v34 = vpop.xlane.xlu0 %7103 }
 0xa13   : > { %v7150_v4 = vsub.f32 %v13456_v39, %v7104_v34 }
 0xa15   : > { %v7166_v59 = vmul.f32 1.442695, %v7150_v4 }
 0xa17   : > { %11448 = vpow2.f32 %v7166_v59 }
 0xa1a   : > { %v7110_v2 = vpop.xlane.xlu0 %7109 }
 0xa1b   : > { %v7152_v55 = vsub.f32 %v13462_v58, %v7110_v2 }
 0xa1d   : > { %v7170_v27 = vmul.f32 1.442695, %v7152_v55  ;;  %v7107_v38 = vpop.xlane.xlu1 %7106 }
 0xa1e   : > { %v7151_v48 = vsub.f32 %v13466_v49, %v7107_v38 }
 0xa1f   : > { %11450 = vpow2.f32 %v7170_v27 }
 0xa20   : > { %v7168_v18 = vmul.f32 1.442695, %v7151_v48 }
 0xa21   : > { %v13545_v52 = vpop.eup %11448 }
 0xa22   : > { %11452 = vpow2.f32 %v7168_v18  ;;  %v7198_v9 = vsel %vm1755_vm4, %v13545_v52, 0.0 }
 0xa23   : > { %7199 = vadd.xlane.f32.xlu0 %v7198_v9 }
 0xa25   : > { %v7113_v39 = vpop.xlane.xlu0 %7112 }
 0xa26   : > { %v7153_v44 = vsub.f32 %v13470_v63, %v7113_v39 }
 0xa28   : > { %v7172_v57 = vmul.f32 1.442695, %v7153_v44 }
 0xa29   : > { %v13550_v12 = vpop.eup %11450  ;;  %v7116_v58 = vpop.xlane.xlu0 %7115 }
 0xa2a   : > { %11454 = vpow2.f32 %v7172_v57  ;;  %v7154_v16 = vsub.f32 %v13472_v42, %v7116_v58  ;;  %v7204_v49 = vsel %vm1755_vm4, %v13550_v12, 0.0 }
 0xa2b   : > { %7205 = vadd.xlane.f32.xlu0 %v7204_v49 }
 0xa2c   : > { %v13555_v25 = vpop.eup %11452  ;;  %v7174_v14 = vmul.f32 1.442695, %v7154_v16 }
 0xa2d   : > { %v7122_v8 = vpop.xlane.xlu0 %7121  ;;  %v7119_v11 = vpop.xlane.xlu1 %7118  ;;  %v7201_v53 = vsel %vm1755_vm4, %v13555_v25, 0.0 }
 0xa2e   : > { %11456 = vpow2.f32 %v7174_v14  ;;  %v7156_v63 = vsub.f32 %v13476_v47, %v7122_v8  ;;  %v7155_v1 = vsub.f32 %v13480_v26, %v7119_v11  ;;  %7202 = vadd.xlane.f32.xlu1 %v7201_v53 }
 0xa30   : > { %v7178_v13 = vmul.f32 1.442695, %v7156_v63  ;;  %v7176_v42 = vmul.f32 1.442695, %v7155_v1 }
 0xa32   : > { %11458 = vpow2.f32 %v7178_v13  ;;  %v7128_v31 = vpop.xlane.xlu0 %7127 }
 0xa33   : > { %11460 = vpow2.f32 %v7176_v42  ;;  %v7158_v4 = vsub.f32 %v13486_v32, %v7128_v31 }
 0xa34   : > { %v13561_v34 = vpop.eup %11454 }
 0xa35   : > { %v7125_v59 = vpop.xlane.xlu1 %7124  ;;  %v7207_v2 = vsel %vm1755_vm4, %v13561_v34, 0.0  ;;  %v7182_v26 = vmul.f32 1.442695, %v7158_v4  ;;  %v14792_v4 = vld [vmem:[#allocation25_spill] sm:$0xff] }
 0xa36   : > { %v7157_v55 = vsub.f32 %v13490_v23, %v7125_v59  ;;  %7208 = vadd.xlane.f32.xlu1 %v7207_v2  ;;  %v14793_v2 = vld [vmem:[#allocation23_spill] sm:$0xff] }
 0xa38   : > { %v13567_v47 = vpop.eup %11456  ;;  %v7180_v27 = vmul.f32 1.442695, %v7157_v55 }
 0xa39   : > { %v7210_v38 = vsel %vm1755_vm4, %v13567_v47, 0.0 }
 0xa3a   : > { %11462 = vpow2.f32 %v7180_v27  ;;  %7211 = vadd.xlane.f32.xlu0 %v7210_v38  ;;  %v7134_v48 = vpop.xlane.xlu0 %7133 }
 0xa3b   : > { %v7160_v18 = vsub.f32 %v13494_v60, %v7134_v48  ;;  %11464 = vpow2.f32 %v7182_v26 }
 0xa3c   : > { %v13572_v32 = vpop.eup %11458 }
 0xa3d   : > { %v13574_v9 = vpop.eup %11460  ;;  %v7186_v39 = vmul.f32 1.442695, %v7160_v18  ;;  %v7131_v23 = vpop.xlane.xlu1 %7130  ;;  %v7216_v44 = vsel %vm1755_vm4, %v13572_v32, 0.0 }
 0xa3e   : > { %v7159_v57 = vsub.f32 %v13498_v3, %v7131_v23  ;;  %7217 = vadd.xlane.f32.xlu0 %v7216_v44  ;;  %v7213_v58 = vsel %vm1755_vm4, %v13574_v9, 0.0 }
 0xa3f   : > { %7214 = vadd.xlane.f32.xlu1 %v7213_v58  ;;  %11466 = vpow2.f32 %v7186_v39 }
 0xa40   : > { %v7184_v16 = vmul.f32 1.442695, %v7159_v57 }
 0xa42   : > { %11468 = vpow2.f32 %v7184_v16  ;;  %v7140_v59 = vpop.xlane.xlu0 %7139 }
 0xa43   : > { %v7162_v55 = vsub.f32 %v13502_v22, %v7140_v59  ;;  %v14797_v59 = vld [vmem:[#allocation43_spill] sm:$0xff] }
 0xa44   : > { %v13581_v60 = vpop.eup %11462 }
 0xa45   : > { %v7137_v49 = vpop.xlane.xlu1 %7136  ;;  %v7219_v14 = vsel %vm1755_vm4, %v13581_v60, 0.0  ;;  %v13585_v8 = vpop.eup %11464  ;;  %v7190_v27 = vmul.f32 1.442695, %v7162_v55  ;;  %v14798_v55 = vld [vmem:[#allocation36_spill] sm:$0xff] }
 0xa46   : > { %v7161_v11 = vsub.f32 %v13506_v35, %v7137_v49  ;;  %7220 = vadd.xlane.f32.xlu1 %v7219_v14  ;;  %v7222_v53 = vsel %vm1755_vm4, %v13585_v8, 0.0 }
 0xa48   : > { %v7188_v3 = vmul.f32 1.442695, %v7161_v11 }
 0xa49   : > { %v13590_v63 = vpop.eup %11466 }
 0xa4a   : > { %11470 = vpow2.f32 %v7188_v3  ;;  %7223 = vadd.xlane.f32.xlu1 %v7222_v53  ;;  %v7228_v42 = vsel %vm1755_vm4, %v13590_v63, 0.0  ;;  %v7146_v26 = vpop.xlane.xlu0 %7145 }
 0xa4b   : > { %v7164_v38 = vsub.f32 %v13510_v30, %v7146_v26  ;;  %11472 = vpow2.f32 %v7190_v27 }
 0xa4c   : > { %v13592_v1 = vpop.eup %11468 }
 0xa4d   : > { %v7225_v13 = vsel %vm1755_vm4, %v13592_v1, 0.0  ;;  %v7143_v48 = vpop.xlane.xlu1 %7142  ;;  %v7194_v18 = vmul.f32 1.442695, %v7164_v38  ;;  %v14800_v38 = vld [vmem:[#allocation45_spill] sm:$0xff] }
 0xa4e   : > { %7226 = vadd.xlane.f32.xlu0 %v7225_v13  ;;  %7229 = vadd.xlane.f32.xlu1 %v7228_v42  ;;  %v7163_v39 = vsub.f32 %v13514_v41, %v7143_v48 }
 0xa4f   : > { %11474 = vpow2.f32 %v7194_v18  ;;  %v7396_v18 = vsel %vm1952_vm3, %v13530_v10, 0 }
 0xa50   : > { %v7192_v23 = vmul.f32 1.442695, %v7163_v39  ;;  %v14803_v39 = vld [vmem:[#allocation42_spill] sm:$0xff] }
 0xa51   : > { %v13609_v44 = vpop.permute.xlu1 %7726 }
 0xa52   : > { %11476 = vpow2.f32 %v7192_v23 }
 0xa54   : > { %v13598_v35 = vpop.eup %11470 }
 0xa55   : > { %v7231_v31 = vsel %vm1755_vm4, %v13598_v35, 0.0  ;;  %v13611_v57 = vpop.eup %11472  ;;  %v13613_v58 = vpop.permute.xlu1 %7774 }
 0xa56   : > { %7232 = vadd.xlane.f32.xlu0 %v7231_v31  ;;  %v7234_v22 = vsel %vm1755_vm4, %v13611_v57, 0.0  ;;  %v14794_v31 = vld [vmem:[#allocation37_spill] sm:$0xff] }
 0xa59   : > { %v13617_v16 = vpop.eup %11474  ;;  %v13619_v30 = vpop.permute.xlu1 %7822 }
 0xa5a   : > { %v7240_v41 = vsel %vm1755_vm4, %v13617_v16, 0.0 }
 0xa5c   : > { %v13623_v49 = vpop.eup %11476 }
 0xa5d   : > { %v7237_v11 = vsel %vm1755_vm4, %v13623_v49, 0.0 }
 0xa5f   : > { %7918 = vrot.lane.b32.xlu1 %v14792_v4, %s11572_s30  ;;  %v14795_v4 = vld [vmem:[#allocation39_spill] sm:$0xff] }
 0xa6c   : > { %7870 = vrot.lane.b32.xlu0 %v14793_v2, %s11572_s30 }
 0xa83   : > { %7235 = vadd.xlane.f32.xlu1 %v7234_v22  ;;  %v14804_v22 = vld [vmem:[#allocation49_spill] sm:$0xff] }
 0xa87   : > { %7241 = vadd.xlane.f32.xlu1 %v7240_v41 }
 0xa8a   : > { %v7149_v14 = vpop.xlane.xlu1 %7148 }
 0xa8b   : > { %v7165_v3 = vsub.f32 %v13526_v21, %v7149_v14  ;;  %7238 = vadd.xlane.f32.xlu0 %v7237_v11  ;;  %v14796_v21 = vld [vmem:[#allocation41_spill] sm:$0xff] }
 0xa8d   : > { %v7196_v53 = vmul.f32 1.442695, %v7165_v3 }
 0xa8f   : > { %11478 = vpow2.f32 %v7196_v53  ;;  %v7492_v53 = vsel %vm1952_vm3, %v13532_v43, 0 }
 0xa98   : > { %8014 = vrot.lane.b32.xlu1 %v12373_v15, %s11572_s30  ;;  %v13642_v15 = vpop.permute.xlu0 %7678 }
 0xa99   : > { %v13630_v13 = vpop.eup %11478 }
 0xa9a   : > { %v7243_v42 = vsel %vm1755_vm4, %v13630_v13, 0.0 }
 0xa9b   : > { %7244 = vadd.xlane.f32.xlu0 %v7243_v42  ;;  %v14805_v42 = vld [vmem:[#allocation51_spill] sm:$0xff] }
 0xa9c   : > { %8080 = vrot.lane.b32.xlu1 %v14794_v31, %s11573_s18 }
 0xaa0   : > { %8084 = vrot.lane.b32.xlu1 %v14795_v4, %s11573_s18  ;;  %v7540_v4 = vsel %vm1952_vm3, %v13538_v6, 0 }
 0xaa4   : > { %8088 = vrot.lane.b32.xlu1 %v14796_v21, %s11573_s18 }
 0xaa8   : > { %8092 = vrot.lane.b32.xlu1 %v14797_v59, %s11573_s18 }
 0xaac   : > { %8144 = vrot.lane.b32.xlu1 %v13430_v5, %s11574_s19  ;;  %v14799_v5 = vld [vmem:[#allocation38_spill] sm:$0xff] }
 0xab0   : > { %v7200_v2 = vpop.xlane.xlu0 %7199  ;;  %8148 = vrot.lane.b32.xlu1 %v13432_v37, %s11574_s19 }
 0xab1   : > { %11480 = vrcp.f32 %v7200_v2  ;;  %7966 = vrot.lane.b32.xlu0 %v12316_v7, %s11572_s30 }
 0xab4   : > { %8152 = vrot.lane.b32.xlu1 %v13436_v56, %s11574_s19  ;;  %v14801_v56 = vld [vmem:[#allocation40_spill] sm:$0xff] }
 0xab5   : > { %8078 = vrot.lane.b32.xlu0 %v14798_v55, %s11573_s18  ;;  %v14807_v55 = vld [vmem:[#allocation46_spill] sm:$0xff] }
 0xab8   : > { %v7206_v26 = vpop.xlane.xlu0 %7205  ;;  %8156 = vrot.lane.b32.xlu1 %v13440_v50, %s11574_s19  ;;  %v14802_v50 = vld [vmem:[#allocation47_spill] sm:$0xff] }
 0xab9   : > { %11482 = vrcp.f32 %v7206_v26  ;;  %8082 = vrot.lane.b32.xlu0 %v14799_v5, %s11573_s18 }
 0xabb   : > { %v11481_v27 = vpop.eup %11480  ;;  %v7203_v37 = vpop.xlane.xlu1 %7202 }
 0xabc   : > { %11484 = vrcp.f32 %v7203_v37  ;;  %8096 = vrot.lane.b32.xlu1 %v14800_v38, %s11573_s18  ;;  %v7262_v7 = vmul.f32 %v11481_v27, %v13545_v52  ;;  %v7684_v37 = vsel %vm1952_vm3, %v13642_v15, 0  ;;  %v14809_v38 = vld [vmem:[#allocation50_spill] sm:$0xff]  ;;  %v7732_v15 = vsel %vm1952_vm3, %v13609_v44, 0 }
 0xabd   : > { %8086 = vrot.lane.b32.xlu0 %v14801_v56, %s11573_s18 }
 0xabe   : > { %v7278_v48 = vpack.c.bf16 %v7262_v7, %v7262_v7 }
 0xac0   : > { %11079 = vmatmul.mubr.msk.bf16.vlgmr.msra.gmra.mrb[232].mxu0 %vm1948_vm5, %v7278_v48  ;;  %8100 = vrot.lane.b32.xlu1 %v14802_v50, %s11573_s18 }
 0xac1   : > { %11089 = vmatpush3.bf16.msra.mxu0 %v7396_v18  ;;  %8090 = vrot.lane.b32.xlu0 %v14803_v39, %s11573_s18 }
 0xac2   : > { %11090 = vmatprep.mubr.msk.bf16.mxu0 %vm11569_vm1, %v14690_v40  ;;  %11100 = vmatprep.subr.bf16.mxu0 %v14690_v40 }
 0xac3   : > { %v11483_v52 = vpop.eup %11482  ;;  %v7209_v23 = vpop.xlane.xlu1 %7208 }
 0xac4   : > { %11486 = vrcp.f32 %v7209_v23  ;;  %8104 = vrot.lane.b32.xlu1 %v14804_v22, %s11573_s18  ;;  %v7264_v10 = vmul.f32 %v11483_v52, %v13550_v12  ;;  %v7828_v23 = vsel %vm1952_vm3, %v13619_v30, 0 }
 0xac5   : > { %8142 = vrot.lane.b32.xlu0 %v13426_v0, %s11574_s19  ;;  %v7444_v0 = vsel %vm1952_vm3, %v13534_v17, 0 }
 0xac6   : > { %v11485_v41 = vpop.eup %11484  ;;  %v7280_v14 = vpack.c.bf16 %v7264_v10, %v7264_v10 }
 0xac7   : > { %v7263_v11 = vmul.f32 %v11485_v41, %v13555_v25  ;;  %v7212_v3 = vpop.xlane.xlu0 %7211 }
 0xac8   : > { %11488 = vrcp.f32 %v7212_v3  ;;  %11091 = vmatmul.mubr.msk.bf16.vlgmr.msra.gmra.mrb[236].mxu0 %vm1948_vm5, %v7280_v14  ;;  %8108 = vrot.lane.b32.xlu1 %v14805_v42, %s11573_s18  ;;  %v14810_v42 = vld [vmem:[#allocation7_spill] sm:$0xff] }
 0xac9   : > { %11101 = vmatpush3.bf16.msra.mxu0 %v7492_v53  ;;  %8146 = vrot.lane.b32.xlu0 %v13428_v62, %s11574_s19  ;;  %v7279_v12 = vpack.c.bf16 %v7263_v11, %v7263_v11 }
 0xaca   : > { %11102 = vmatprep.mubr.msk.bf16.mxu0 %vm11569_vm1, %v14690_v40  ;;  %11112 = vmatprep.subr.bf16.mxu0 %v14690_v40 }
 0xacb   : > { %v7218_v43 = vpop.xlane.xlu0 %7217  ;;  %11085 = vmatmul.mubr.msk.bf16.vlgmr.msra.gmra.mrb[240].mxu1 %vm1948_vm5, %v7279_v12 }
 0xacc   : > { %11490 = vrcp.f32 %v7218_v43  ;;  %11095 = vmatpush3.bf16.msra.mxu1 %v7444_v0  ;;  %v7215_v25 = vpop.xlane.xlu1 %7214  ;;  %8160 = vrot.lane.b32.xlu1 %v13444_v29, %s11574_s19 }
 0xacd   : > { %11492 = vrcp.f32 %v7215_v25  ;;  %8150 = vrot.lane.b32.xlu0 %v13434_v54, %s11574_s19  ;;  %11096 = vmatprep.mubr.msk.bf16.mxu1 %vm11569_vm1, %v14690_v40 }
 0xace   : > { %v11487_v62 = vpop.eup %11486  ;;  %11106 = vmatprep.subr.bf16.mxu1 %v14690_v40 }
 0xacf   : > { %v7265_v17 = vmul.f32 %v11487_v62, %v13561_v34 }
 0xad0   : > { %8164 = vrot.lane.b32.xlu1 %v13448_v24, %s11574_s19  ;;  %v14806_v24 = vld [vmem:[#allocation44_spill] sm:$0xff] }
 0xad1   : > { %8154 = vrot.lane.b32.xlu0 %v13438_v61, %s11574_s19  ;;  %v7281_v31 = vpack.c.bf16 %v7265_v17, %v7265_v17 }
 0xad2   : > { %v11489_v29 = vpop.eup %11488 }
 0xad3   : > { %v7266_v54 = vmul.f32 %v11489_v29, %v13567_v47  ;;  %11097 = vmatmul.mubr.msk.bf16.vlgmr.msra.gmra.mrb[244].mxu1 %vm1948_vm5, %v7281_v31  ;;  %v7221_v21 = vpop.xlane.xlu1 %7220  ;;  %v7588_v47 = vsel %vm1952_vm3, %v13536_v20, 0  ;;  %v14811_v31 = vld [vmem:[#allocation11_spill] sm:$0xff] }
 0xad4   : > { %11107 = vmatpush3.bf16.msra.mxu1 %v7540_v4  ;;  %11494 = vrcp.f32 %v7221_v21  ;;  %8168 = vrot.lane.b32.xlu1 %v13452_v51, %s11574_s19 }
 0xad5   : > { %8094 = vrot.lane.b32.xlu0 %v14806_v24, %s11573_s18  ;;  %v7282_v34 = vpack.c.bf16 %v7266_v54, %v7266_v54  ;;  %11108 = vmatprep.mubr.msk.bf16.mxu1 %vm11569_vm1, %v14690_v40 }
 0xad6   : > { %v11491_v61 = vpop.eup %11490  ;;  %11118 = vmatprep.subr.bf16.mxu1 %v14690_v40 }
 0xad7   : > { %v11493_v6 = vpop.eup %11492  ;;  %11103 = vmatmul.mubr.msk.bf16.vlgmr.msra.gmra.mrb[240].mxu0 %vm1948_vm5, %v7282_v34  ;;  %v7224_v59 = vpop.xlane.xlu1 %7223  ;;  %v7268_v51 = vmul.f32 %v11491_v61, %v13572_v32  ;;  %v14812_v34 = vld [vmem:[#allocation27_spill] sm:$0xff] }
 0xad8   : > { %v7267_v2 = vmul.f32 %v11493_v6, %v13574_v9  ;;  %11113 = vmatpush3.bf16.msra.mxu0 %v7588_v47  ;;  %11496 = vrcp.f32 %v7224_v59  ;;  %8172 = vrot.lane.b32.xlu1 %v13458_v36, %s11574_s19  ;;  %v7636_v9 = vsel %vm1952_vm3, %v13541_v28, 0  ;;  %v14808_v36 = vld [vmem:[#allocation48_spill] sm:$0xff] }
 0xad9   : > { %8098 = vrot.lane.b32.xlu0 %v14807_v55, %s11573_s18  ;;  %11114 = vmatprep.mubr.msk.bf16.mxu0 %vm11569_vm1, %v14690_v40  ;;  %v7284_v32 = vpack.c.bf16 %v7268_v51, %v7268_v51 }
 0xada   : > { %v7283_v26 = vpack.c.bf16 %v7267_v2, %v7267_v2  ;;  %11124 = vmatprep.subr.bf16.mxu0 %v14690_v40 }
 0xadb   : > { %v7227_v20 = vpop.xlane.xlu0 %7226  ;;  %v7230_v5 = vpop.xlane.xlu1 %7229 }
 0xadc   : > { %11498 = vrcp.f32 %v7227_v20  ;;  %11109 = vmatmul.mubr.msk.bf16.vlgmr.msra.gmra.mrb[248].mxu1 %vm1948_vm5, %v7283_v26  ;;  %v14813_v26 = vld [vmem:[#allocation3_spill] sm:$0xff] }
 0xadd   : > { %11119 = vmatpush3.bf16.msra.mxu1 %v7636_v9  ;;  %11500 = vrcp.f32 %v7230_v5  ;;  %8102 = vrot.lane.b32.xlu0 %v14808_v36, %s11573_s18 }
 0xade   : > { %v11495_v27 = vpop.eup %11494  ;;  %11120 = vmatprep.mubr.msk.bf16.mxu1 %vm11569_vm1, %v14690_v40  ;;  %11130 = vmatprep.subr.bf16.mxu1 %v14690_v40 }
 0xadf   : > { %v7269_v28 = vmul.f32 %v11495_v27, %v13581_v60  ;;  %11115 = vmatmul.mubr.msk.bf16.vlgmr.msra.gmra.mrb[244].mxu0 %vm1948_vm5, %v7284_v32  ;;  %v7919_v30 = vpop.permute.xlu1 %7918 }
 0xae0   : > { %11125 = vmatpush3.bf16.msra.mxu0 %v7684_v37  ;;  %11126 = vmatprep.mubr.msk.bf16.mxu0 %vm11569_vm1, %v14690_v40  ;;  %v14814_v37 = vld [vmem:[#allocation9_spill] sm:$0xff] }
 0xae1   : > { %8106 = vrot.lane.b32.xlu0 %v14809_v38, %s11573_s18  ;;  %v7285_v7 = vpack.c.bf16 %v7269_v28, %v7269_v28  ;;  %11136 = vmatprep.subr.bf16.mxu0 %v14690_v40 }
 0xae2   : > { %v11497_v56 = vpop.eup %11496 }
 0xae3   : > { %v7270_v48 = vmul.f32 %v11497_v56, %v13585_v8  ;;  %v7233_v18 = vpop.xlane.xlu0 %7232  ;;  %v7780_v8 = vsel %vm1952_vm3, %v13613_v58, 0  ;;  %v14815_v56 = vld [vmem:[#allocation26_spill] sm:$0xff] }
 0xae4   : > { %11502 = vrcp.f32 %v7233_v18  ;;  %11121 = vmatmul.mubr.msk.bf16.vlgmr.msra.gmra.mrb[252].mxu1 %vm1948_vm5, %v7285_v7 }
 0xae5   : > { %11131 = vmatpush3.bf16.msra.mxu1 %v7732_v15  ;;  %8158 = vrot.lane.b32.xlu0 %v13442_v19, %s11574_s19  ;;  %v7286_v60 = vpack.c.bf16 %v7270_v48, %v7270_v48 }
 0xae6   : > { %v11499_v50 = vpop.eup %11498  ;;  %11132 = vmatprep.mubr.msk.bf16.mxu1 %vm11569_vm1, %v14690_v40  ;;  %11142 = vmatprep.subr.bf16.mxu1 %v14690_v40 }
 0xae7   : > { %v11501_v39 = vpop.eup %11500  ;;  %v7271_v44 = vmul.f32 %v11499_v50, %v13592_v1  ;;  %11127 = vmatmul.mubr.msk.bf16.vlgmr.msra.gmra.mrb[248].mxu0 %vm1948_vm5, %v7286_v60  ;;  %v7871_v58 = vpop.permute.xlu0 %7870 }
 0xae8   : > { %11137 = vmatpush3.bf16.msra.mxu0 %v7780_v8  ;;  %11138 = vmatprep.mubr.msk.bf16.mxu0 %vm11569_vm1, %v14690_v40  ;;  %v7272_v52 = vmul.f32 %v11501_v39, %v13590_v63  ;;  %v7876_v63 = vsel %vm1952_vm3, %v7871_v58, 0  ;;  %v14817_v8 = vld [vmem:[#allocation34_spill] sm:$0xff] }
 0xae9   : > { %v7287_v19 = vpack.c.bf16 %v7271_v44, %v7271_v44  ;;  %8162 = vrot.lane.b32.xlu0 %v13446_v45, %s11574_s19  ;;  %11148 = vmatprep.subr.bf16.mxu0 %v14690_v40 }
 0xaea   : > { %v7288_v1 = vpack.c.bf16 %v7272_v52, %v7272_v52 }
 0xaec   : > { %11133 = vmatmul.mubr.msk.bf16.vlgmr.msra.gmra.mrb[0].mxu1 %vm1948_vm5, %v7287_v19 }
 0xaed   : > { %11143 = vmatpush3.bf16.msra.mxu1 %v7828_v23  ;;  %8166 = vrot.lane.b32.xlu0 %v13450_v46, %s11574_s19  ;;  %v7924_v46 = vsel %vm1952_vm3, %v7919_v30, 0  ;;  %v14818_v23 = vld [vmem:[#allocation35_spill] sm:$0xff]  ;;  %v14819_v30 = vld [vmem:[#allocation28_spill] sm:$0xff] }
 0xaee   : > { %v11503_v22 = vpop.eup %11502  ;;  %11144 = vmatprep.mubr.msk.bf16.mxu1 %vm11569_vm1, %v14690_v40  ;;  %11154 = vmatprep.subr.bf16.mxu1 %v14690_v40 }
 0xaef   : > { %v7273_v45 = vmul.f32 %v11503_v22, %v13598_v35  ;;  %11139 = vmatmul.mubr.msk.bf16.vlgmr.msra.gmra.mrb[252].mxu0 %vm1948_vm5, %v7288_v1 }
 0xaf0   : > { %11149 = vmatpush3.bf16.msra.mxu0 %v7876_v63  ;;  %11150 = vmatprep.mubr.msk.bf16.mxu0 %vm11569_vm1, %v14690_v40 }
 0xaf1   : > { %v7289_v10 = vpack.c.bf16 %v7273_v45, %v7273_v45  ;;  %8170 = vrot.lane.b32.xlu0 %v13454_v33, %s11574_s19  ;;  %11160 = vmatprep.subr.bf16.mxu0 %v14690_v40 }
 0xaf4   : > { %11145 = vmatmul.mubr.msk.bf16.vlgmr.msra.gmra.mrb[4].mxu1 %vm1948_vm5, %v7289_v10 }
 0xaf5   : > { %11155 = vmatpush3.bf16.msra.mxu1 %v7924_v46  ;;  %11156 = vmatprep.mubr.msk.bf16.mxu1 %vm11569_vm1, %v14690_v40 }
 0xaf6   : > { %11166 = vmatprep.subr.bf16.mxu1 %v14690_v40 }
 0xb10   : > { %v7236_v35 = vpop.xlane.xlu1 %7235 }
 0xb11   : > { %11504 = vrcp.f32 %v7236_v35 }
 0xb14   : > { %v7242_v41 = vpop.xlane.xlu1 %7241 }
 0xb18   : > { %v7239_v14 = vpop.xlane.xlu0 %7238  ;;  %v8015_v11 = vpop.permute.xlu1 %8014 }
 0xb19   : > { %11506 = vrcp.f32 %v7239_v14  ;;  %v8020_v54 = vsel %vm1952_vm3, %v8015_v11, 0 }
 0xb1a   : > { %11508 = vrcp.f32 %v7242_v41 }
 0xb1b   : > { %v11505_v3 = vpop.eup %11504 }
 0xb1c   : > { %v7274_v33 = vmul.f32 %v11505_v3, %v13611_v57  ;;  %v8081_v53 = vpop.permute.xlu1 %8080  ;;  %v14820_v3 = vld [vmem:[#allocation32_spill] sm:$0xff] }
 0xb1d   : > { %v13787_v12 = vsel %vm1002_vm2, %v14810_v42, %v8081_v53 }
 0xb1e   : > { %v7290_v0 = vpack.c.bf16 %v7274_v33, %v7274_v33 }
 0xb20   : > { %11151 = vmatmul.mubr.msk.bf16.vlgmr.msra.gmra.mrb[0].mxu0 %vm1948_vm5, %v7290_v0  ;;  %v13790_v43 = vpop.permute.xlu1 %8084  ;;  %v14821_v0 = vld [vmem:[#allocation33_spill] sm:$0xff] }
 0xb21   : > { %11162 = vmatprep.mubr.msk.bf16.mxu0 %vm11569_vm1, %v14690_v40 }
 0xb23   : > { %v11507_v25 = vpop.eup %11506 }
 0xb24   : > { %v7275_v62 = vmul.f32 %v11507_v25, %v13623_v49  ;;  %v8089_v17 = vpop.permute.xlu1 %8088  ;;  %v11509_v4 = vpop.eup %11508 }
 0xb25   : > { %v13797_v57 = vsel %vm1002_vm2, %v14811_v31, %v8089_v17  ;;  %v7276_v49 = vmul.f32 %v11509_v4, %v13617_v16 }
 0xb26   : > { %v7291_v29 = vpack.c.bf16 %v7275_v62, %v7275_v62 }
 0xb27   : > { %v7292_v2 = vpack.c.bf16 %v7276_v49, %v7276_v49 }
 0xb28   : > { %v7245_v21 = vpop.xlane.xlu0 %7244  ;;  %11157 = vmatmul.mubr.msk.bf16.vlgmr.msra.gmra.mrb[8].mxu1 %vm1948_vm5, %v7291_v29  ;;  %v8093_v24 = vpop.permute.xlu1 %8092 }
 0xb29   : > { %11510 = vrcp.f32 %v7245_v21  ;;  %11167 = vmatpush3.bf16.msra.mxu1 %v8020_v54  ;;  %v13803_v61 = vsel %vm1002_vm2, %v14812_v34, %v8093_v24  ;;  %11168 = vmatprep.mubr.msk.bf16.mxu1 %vm11569_vm1, %v14690_v40 }
 0xb2c   : > { %v7967_v6 = vpop.permute.xlu0 %7966  ;;  %v13808_v47 = vpop.permute.xlu1 %8144 }
 0xb2d   : > { %v7972_v59 = vsel %vm1952_vm3, %v7967_v6, 0 }
 0xb2e   : > { %11161 = vmatpush3.bf16.msra.mxu0 %v7972_v59 }
 0xb30   : > { %v8079_v51 = vpop.permute.xlu0 %8078  ;;  %v13811_v55 = vpop.permute.xlu1 %8148 }
 0xb31   : > { %v13815_v20 = vsel %vm1002_vm2, %v14813_v26, %v8079_v51  ;;  %11163 = vmatmul.mubr.msk.bf16.vlgmr.msra.gmra.mrb[4].mxu0 %vm1948_vm5, %v7292_v2 }
 0xb33   : > { %v11511_v5 = vpop.eup %11510 }
 0xb34   : > { %v7277_v40 = vmul.f32 %v11511_v5, %v13630_v13  ;;  %v13819_v16 = vpop.permute.xlu0 %8082  ;;  %v13821_v9 = vpop.permute.xlu1 %8152  ;;  %v14816_v13 = vld [vmem:[#allocation29_spill] sm:$0xff] }
 0xb36   : > { %v7293_v36 = vpack.c.bf16 %v7277_v40, %v7277_v40 }
 0xb38   : > { %v8087_v32 = vpop.permute.xlu0 %8086  ;;  %11169 = vmatmul.mubr.msk.bf16.vlgmr.msra.gmra.mrb[12].mxu1 %vm1948_vm5, %v7293_v36  ;;  %v13824_v27 = vpop.permute.xlu1 %8156 }
 0xb39   : > { %v13828_v28 = vsel %vm1002_vm2, %v14814_v37, %v8087_v32  ;;  %v11248_v37 = vld [vmem:[%s14608_s7] sm:$0xff]  }
 0xb3a   : > { %11172 = vmatprep.subr.bf16.mxu0 %v11248_v37 }
 0xb3b   : > { %11173 = vmatpush3.bf16.msra.mxu0 %v11248_v37 }
 0xb3c   : > { %v8091_v38 = vpop.permute.xlu0 %8090  ;;  %v8097_v7 = vpop.permute.xlu1 %8096 }
 0xb3d   : > { %v13832_v48 = vsel %vm1002_vm2, %v14815_v56, %v8091_v38  ;;  %v13836_v18 = vsel %vm1002_vm2, %v14816_v13, %v8097_v7 }
 0xb40   : > { %v13838_v15 = vpop.permute.xlu0 %8142  ;;  %v13840_v60 = vpop.permute.xlu1 %8100 }
 0xb44   : > { %v13842_v50 = vpop.permute.xlu0 %8146  ;;  %v8105_v39 = vpop.permute.xlu1 %8104 }
 0xb45   : > { %v8267_v44 = vsel %vm1002_vm2, %v14817_v8, %v8105_v39  ;;  %v11249_v8 = vld [vmem:[%s14608_s7 + $0x8] sm:$0xff]  }
 0xb46   : > { %11174 = vmatprep.subr.bf16.mxu0 %v11249_v8 }
 0xb47   : > { %11175 = vmatpush3.bf16.msra.mxu0 %v11249_v8 }
 0xb48   : > { %v13846_v19 = vpop.permute.xlu0 %8150  ;;  %v8109_v52 = vpop.permute.xlu1 %8108 }
 0xb49   : > { %v8269_v58 = vsel %vm1002_vm2, %v14818_v23, %v8109_v52 }
 0xb4c   : > { %v13850_v1 = vpop.permute.xlu0 %8154  ;;  %v13852_v22 = vpop.permute.xlu1 %8160 }
 0xb50   : > { %v8095_v45 = vpop.permute.xlu0 %8094  ;;  %v13854_v63 = vpop.permute.xlu1 %8164 }
 0xb51   : > { %v13858_v10 = vsel %vm1002_vm2, %v14819_v30, %v8095_v45 }
 0xb54   : > { %v13860_v46 = vpop.permute.xlu0 %8098  ;;  %v8169_v35 = vpop.permute.xlu1 %8168 }
 0xb55   : > { %v13863_v41 = vsel %vm8270_vm6, %v8267_v44, %v8169_v35 }
 0xb58   : > { %v8103_v14 = vpop.permute.xlu0 %8102  ;;  %v8173_v11 = vpop.permute.xlu1 %8172 }
 0xb59   : > { %v8266_v33 = vsel %vm1002_vm2, %v14820_v3, %v8103_v14  ;;  %v13868_v53 = vsel %vm8270_vm6, %v8269_v58, %v8173_v11 }
 0xb5c   : > { %v8107_v42 = vpop.permute.xlu0 %8106 }
 0xb5d   : > { %v8268_v25 = vsel %vm1002_vm2, %v14821_v0, %v8107_v42 }
 0xb60   : > { %v13872_v62 = vpop.permute.xlu0 %8158 }
 0xb64   : > { %v13874_v17 = vpop.permute.xlu0 %8162 }
 0xb68   : > { %v8167_v31 = vpop.permute.xlu0 %8166 }
 0xb69   : > { %v13877_v29 = vsel %vm8270_vm6, %v8266_v33, %v8167_v31 }
 0xb6c   : > { %v8171_v4 = vpop.permute.xlu0 %8170 }
 0xb6d   : > { %v13880_v54 = vsel %vm8270_vm6, %v8268_v25, %v8171_v4 }
 0xb93   : > { %v7336_v21 = vpop.f32.mrb[232].mxu0 }
 0xb94   : > { %v11080_v24 = vpop.f32.mrb[233].mxu0  ;;  %8206 = vrot.lane.b32.xlu0 %v7336_v21, %s11575_s20 }
 0xb95   : > { %v7339_v34 = vpop.f32.mrb[234].mxu0 }
 0xb96   : > { %v11081_v49 = vpop.f32.mrb[235].mxu0 }
 0xb9b   : > { %v7432_v6 = vpop.f32.mrb[236].mxu0 }
 0xb9c   : > { %v11092_v59 = vpop.f32.mrb[237].mxu0  ;;  %8210 = vrot.lane.b32.xlu0 %v7432_v6, %s11575_s20 }
 0xb9d   : > { %v7435_v2 = vpop.f32.mrb[238].mxu0 }
 0xb9e   : > { %v7384_v51 = vpop.f32.mrb[240].mxu1  ;;  %v11093_v26 = vpop.f32.mrb[239].mxu0 }
 0xb9f   : > { %8208 = vrot.lane.b32.xlu1 %v7384_v51, %s11575_s20  ;;  %v11086_v5 = vpop.f32.mrb[241].mxu1 }
 0xba0   : > { %v7387_v40 = vpop.f32.mrb[242].mxu1 }
 0xba1   : > { %v11087_v36 = vpop.f32.mrb[243].mxu1 }
 0xba6   : > { %v7480_v32 = vpop.f32.mrb[244].mxu1 }
 0xba7   : > { %8212 = vrot.lane.b32.xlu1 %v7480_v32, %s11575_s20  ;;  %v11098_v38 = vpop.f32.mrb[245].mxu1 }
 0xba8   : > { %v7483_v7 = vpop.f32.mrb[246].mxu1 }
 0xba9   : > { %v11099_v56 = vpop.f32.mrb[247].mxu1 }
 0xbaa   : > { %v7528_v13 = vpop.f32.mrb[240].mxu0 }
 0xbab   : > { %v11104_v39 = vpop.f32.mrb[241].mxu0  ;;  %8214 = vrot.lane.b32.xlu0 %v7528_v13, %s11575_s20 }
 0xbac   : > { %v7531_v44 = vpop.f32.mrb[242].mxu0 }
 0xbad   : > { %v11105_v52 = vpop.f32.mrb[243].mxu0 }
 0xbaf   : > { %v7576_v23 = vpop.f32.mrb[248].mxu1 }
 0xbb0   : > { %8216 = vrot.lane.b32.xlu1 %v7576_v23, %s11575_s20  ;;  %v11110_v58 = vpop.f32.mrb[249].mxu1 }
 0xbb1   : > { %v7579_v45 = vpop.f32.mrb[250].mxu1 }
 0xbb2   : > { %v11111_v30 = vpop.f32.mrb[251].mxu1  ;;  %v7624_v35 = vpop.f32.mrb[244].mxu0 }
 0xbb3   : > { %v11116_v14 = vpop.f32.mrb[245].mxu0  ;;  %8218 = vrot.lane.b32.xlu0 %v7624_v35, %s11575_s20 }
 0xbb4   : > { %v7627_v11 = vpop.f32.mrb[246].mxu0 }
 0xbb5   : > { %v11117_v3 = vpop.f32.mrb[247].mxu0 }
 0xbb7   : > { %v7672_v33 = vpop.f32.mrb[252].mxu1 }
 0xbb8   : > { %8220 = vrot.lane.b32.xlu1 %v7672_v33, %s11575_s20  ;;  %v11122_v42 = vpop.f32.mrb[253].mxu1 }
 0xbb9   : > { %v7675_v0 = vpop.f32.mrb[254].mxu1  ;;  %v8272_v42 = vsel %vm8270_vm6, %v13787_v12, %v13808_v47 }
 0xbba   : > { %v11123_v25 = vpop.f32.mrb[255].mxu1  ;;  %v7720_v31 = vpop.f32.mrb[248].mxu0  ;;  %v8271_v0 = vsel %vm8270_vm6, %v13815_v20, %v13838_v15 }
 0xbbb   : > { %8222 = vrot.lane.b32.xlu0 %v7720_v31, %s11575_s20  ;;  %v11128_v4 = vpop.f32.mrb[249].mxu0 }
 0xbbc   : > { %v7723_v21 = vpop.f32.mrb[250].mxu0 }
 0xbbd   : > { %v11129_v24 = vpop.f32.mrb[251].mxu0 }
 0xbbf   : > { %v7768_v34 = vpop.f32.mrb[0].mxu1 }
 0xbc0   : > { %8224 = vrot.lane.b32.xlu1 %v7768_v34, %s11575_s20  ;;  %v11134_v49 = vpop.f32.mrb[1].mxu1  ;;  %v14822_v34 = vld [vmem:[#allocation10_spill] sm:$0xff] }
 0xbc1   : > { %v7771_v6 = vpop.f32.mrb[2].mxu1  ;;  %v8257_v49 = vsel %vm1002_vm2, %v14822_v34, %v13790_v43 }
 0xbc2   : > { %v11135_v59 = vpop.f32.mrb[3].mxu1  ;;  %v7816_v2 = vpop.f32.mrb[252].mxu0  ;;  %v14823_v6 = vld [vmem:[#allocation6_spill] sm:$0xff]  ;;  %v8274_v12 = vsel %vm8270_vm6, %v8257_v49, %v13811_v55  ;;  %v8275_v55 = vsel %vm8270_vm6, %v13828_v28, %v13846_v19 }
 0xbc3   : > { %8226 = vrot.lane.b32.xlu0 %v7816_v2, %s11575_s20  ;;  %v11140_v51 = vpop.f32.mrb[253].mxu0  ;;  %v8256_v59 = vsel %vm1002_vm2, %v14823_v6, %v13819_v16  ;;  %v8276_v16 = vsel %vm8270_vm6, %v13797_v57, %v13821_v9 }
 0xbc4   : > { %v7819_v26 = vpop.f32.mrb[254].mxu0  ;;  %v8273_v47 = vsel %vm8270_vm6, %v8256_v59, %v13842_v50  ;;  %v11544_v59 = vld [vmem:[%s11693_s23] sm:$0xf] }
 0xbc5   : > { %v11141_v5 = vpop.f32.mrb[255].mxu0 }
 0xbc7   : > { %v7864_v40 = vpop.f32.mrb[4].mxu1 }
 0xbc8   : > { %8228 = vrot.lane.b32.xlu1 %v7864_v40, %s11575_s20  ;;  %v11146_v36 = vpop.f32.mrb[5].mxu1 }
 0xbc9   : > { %v7867_v32 = vpop.f32.mrb[6].mxu1 }
 0xbca   : > { %v11147_v37 = vpop.f32.mrb[7].mxu1 }
 0xbcb   : > { %v8278_v37 = vsel %vm8270_vm6, %v13803_v61, %v13824_v27  ;;  %v8279_v61 = vsel %vm8270_vm6, %v13858_v10, %v13872_v62 }
 0xbf3   : > { %v7912_v38 = vpop.f32.mrb[0].mxu0 }
 0xbf4   : > { %8230 = vrot.lane.b32.xlu0 %v7912_v38, %s11575_s20  ;;  %v11152_v7 = vpop.f32.mrb[1].mxu0  ;;  %v8277_v38 = vsel %vm8270_vm6, %v13832_v48, %v13850_v1 }
 0xbf5   : > { %v7915_v56 = vpop.f32.mrb[2].mxu0 }
 0xbf6   : > { %v11153_v13 = vpop.f32.mrb[3].mxu0 }
 0xbf7   : > { %v8280_v13 = vsel %vm8270_vm6, %v13836_v18, %v13852_v22 }
 0xbfb   : > { %v7960_v39 = vpop.f32.mrb[8].mxu1 }
 0xbfc   : > { %8232 = vrot.lane.b32.xlu1 %v7960_v39, %s11575_s20  ;;  %v11158_v8 = vpop.f32.mrb[9].mxu1 }
 0xbfd   : > { %v7963_v44 = vpop.f32.mrb[10].mxu1 }
 0xbfe   : > { %v11159_v52 = vpop.f32.mrb[11].mxu1  ;;  %v14824_v44 = vld [vmem:[#allocation31_spill] sm:$0xff] }
 0xbff   : > { %v8265_v52 = vsel %vm1002_vm2, %v14824_v44, %v13840_v60 }
 0xc00   : > { %v8282_v18 = vsel %vm8270_vm6, %v8265_v52, %v13854_v63 }
 0xc04   : > { %v8008_v23 = vpop.f32.mrb[4].mxu0 }
 0xc05   : > { %8234 = vrot.lane.b32.xlu0 %v8008_v23, %s11575_s20  ;;  %v11164_v58 = vpop.f32.mrb[5].mxu0  ;;  %v14825_v23 = vld [vmem:[#allocation30_spill] sm:$0xff] }
 0xc06   : > { %v8011_v45 = vpop.f32.mrb[6].mxu0  ;;  %v8207_v33 = vpop.permute.xlu0 %8206  ;;  %v8264_v58 = vsel %vm1002_vm2, %v14825_v23, %v13860_v46 }
 0xc07   : > { %v11165_v30 = vpop.f32.mrb[7].mxu0  ;;  %v8288_v31 = vsel %vm8287_vm7, %v8271_v0, %v8207_v33  ;;  %v8281_v22 = vsel %vm8270_vm6, %v8264_v58, %v13874_v17 }
 0xc0b   : > { %v8056_v35 = vpop.f32.mrb[12].mxu1 }
 0xc0c   : > { %8236 = vrot.lane.b32.xlu1 %v8056_v35, %s11575_s20  ;;  %v11170_v14 = vpop.f32.mrb[13].mxu1  ;;  %s14512_s20 = scalar_lea.vmem %s14618_s17, %s9893_s1 }
 0xc0d   : > { %v8059_v11 = vpop.f32.mrb[14].mxu1 }
 0xc0e   : > { %v11171_v3 = vpop.f32.mrb[15].mxu1  ;;  %v8211_v24 = vpop.permute.xlu0 %8210 }
 0xc0f   : > { %v8290_v15 = vsel %vm8287_vm7, %v8273_v47, %v8211_v24  ;;  %v11545_v47 = vld [vmem:[%s11693_s23 + $0x14] sm:$0xf] }
 0xc11   : > { %v8209_v25 = vpop.permute.xlu1 %8208 }
 0xc12   : > { %v8289_v4 = vsel %vm8287_vm7, %v8272_v42, %v8209_v25 }
 0xc13   : > { %v8320_v21 = vcombine.low %v8288_v31, %v8289_v4 }
 0xc19   : > { %v8213_v20 = vpop.permute.xlu1 %8212 }
 0xc1a   : > { %v8291_v2 = vsel %vm8287_vm7, %v8274_v12, %v8213_v20 }
 0xc1b   : > { %v8321_v51 = vcombine.low %v8290_v15, %v8291_v2  ;;  %v11546_v15 = vld [vmem:[%s11693_s23 + $0x4] sm:$0xf] }
 0xc1d   : > { %v8336_v26 = vpack.c.bf16 %v8321_v51, %v8320_v21  ;;  %v8215_v43 = vpop.permute.xlu0 %8214 }
 0xc1e   : > { %v8292_v50 = vsel %vm8287_vm7, %v8275_v55, %v8215_v43  ;;  %v11547_v43 = vld [vmem:[%s11693_s23 + $0x10] sm:$0xf]  ;;  %v11548_v55 = vld [vmem:[%s11693_s23 + $0x8] sm:$0xf] }
 0xc1f   : > { %11176 = vmatprep.mubr.msk.bf16.mxu0 %vm628_vm0, %v8336_v26 }
 0xc22   : > { %v8217_v5 = vpop.permute.xlu1 %8216 }
 0xc23   : > { %v8293_v40 = vsel %vm8287_vm7, %v8276_v16, %v8217_v5 }
 0xc24   : > { %v8322_v36 = vcombine.low %v8292_v50, %v8293_v40  ;;  %v11549_v50 = vld [vmem:[%s11693_s23 + $0xc] sm:$0xf] }
 0xc25   : > { %v8219_v32 = vpop.permute.xlu0 %8218 }
 0xc26   : > { %v8294_v9 = vsel %vm8287_vm7, %v8277_v38, %v8219_v32  ;;  %v11550_v32 = vld [vmem:[%s11693_s23 + $0x1c] sm:$0xf] }
 0xc2a   : > { %v8221_v57 = vpop.permute.xlu1 %8220 }
 0xc2b   : > { %v8295_v28 = vsel %vm8287_vm7, %v8278_v37, %v8221_v57 }
 0xc2c   : > { %v8323_v19 = vcombine.low %v8294_v9, %v8295_v28  ;;  %v11551_v28 = vld [vmem:[%s11693_s23 + $0x18] sm:$0xf] }
 0xc2d   : > { %v8223_v56 = vpop.permute.xlu0 %8222 }
 0xc2e   : > { %v8337_v7 = vpack.c.bf16 %v8323_v19, %v8322_v36  ;;  %v8296_v48 = vsel %vm8287_vm7, %v8279_v61, %v8223_v56 }
 0xc30   : > { %11177 = vmatmul.mubr.msk.bf16.vlgmr.msra.gmra.mrb[8].mxu0 %vm628_vm0, %v8337_v7 }
 0xc32   : > { %v8225_v27 = vpop.permute.xlu1 %8224 }
 0xc33   : > { %v8297_v1 = vsel %vm8287_vm7, %v8280_v13, %v8225_v27 }
 0xc34   : > { %v8324_v39 = vcombine.low %v8296_v48, %v8297_v1 }
 0xc35   : > { %v8227_v8 = vpop.permute.xlu0 %8226 }
 0xc36   : > { %v8298_v62 = vsel %vm8287_vm7, %v8281_v22, %v8227_v8 }
 0xc3a   : > { %v8229_v10 = vpop.permute.xlu1 %8228 }
 0xc3b   : > { %v8299_v45 = vsel %vm8287_vm7, %v8282_v18, %v8229_v10  ;;  %v11552_v10 = vld [vmem:[%s11693_s23 + $0x34] sm:$0xf] }
 0xc3c   : > { %v8325_v30 = vcombine.low %v8298_v62, %v8299_v45  ;;  %v11553_v45 = vld [vmem:[%s11693_s23 + $0x20] sm:$0xf] }
 0xc3e   : > { %v8338_v35 = vpack.c.bf16 %v8325_v30, %v8324_v39 }
 0xc40   : > { %11180 = vmatprep.mubr.msk.bf16.mxu0 %vm628_vm0, %v8338_v35  ;;  %v11554_v35 = vld [vmem:[%s11693_s23 + $0x24] sm:$0xf] }
 0xc66   : > { %v8231_v60 = vpop.permute.xlu0 %8230 }
 0xc67   : > { %v8300_v46 = vsel %vm8287_vm7, %v13877_v29, %v8231_v60 }
 0xc6e   : > { %v8233_v14 = vpop.permute.xlu1 %8232 }
 0xc6f   : > { %v8301_v63 = vsel %vm8287_vm7, %v13863_v41, %v8233_v14  ;;  %v10045_v41 = vld [vmem:[%s14609_s8] ss:$0 sm:$0xff] }
 0xc70   : > { %v8326_v11 = vcombine.low %v8300_v46, %v8301_v63  ;;  %v11555_v46 = vld [vmem:[%s11693_s23 + $0x30] sm:$0xf] }
 0xc77   : > { %v8235_v3 = vpop.permute.xlu0 %8234 }
 0xc78   : > { %v8302_v33 = vsel %vm8287_vm7, %v13880_v54, %v8235_v3 }
 0xc7e   : > { %v8237_v17 = vpop.permute.xlu1 %8236 }
 0xc7f   : > { %v8303_v42 = vsel %vm8287_vm7, %v13868_v53, %v8237_v17  ;;  %v11557_v17 = vld [vmem:[%s11693_s23 + $0x28] sm:$0xf] }
 0xc80   : > { %v8327_v0 = vcombine.low %v8302_v33, %v8303_v42  ;;  %v11558_v42 = vld [vmem:[%s11693_s23 + $0x2c] sm:$0xf] }
 0xc82   : > { %v8339_v25 = vpack.c.bf16 %v8327_v0, %v8326_v11  ;;  %v11556_v11 = vld [vmem:[%s11693_s23 + $0x3c] sm:$0xf] }
 0xc84   : > { %11181 = vmatmul.mubr.msk.bf16.gmra.mrb[12].mxu0 %vm628_vm0, %v8339_v25 }
 0xd03   : > { %v11178_v29 = vpop.f32.mrb[8].mxu0 }
 0xd04   : > { %v8418_v31 = vadd.f32 %v11178_v29, %v10045_v41  ;;  %v8409_v4 = vpop.f32.mrb[9].mxu0 }
 0xd05   : > { %v8410_v21 = vadd.f32 %v10045_v41, %v8409_v4  ;;  %v11179_v54 = vpop.f32.mrb[10].mxu0 }
 0xd06   : > { %v8450_v24 = vcombine.high %v8418_v31, %v8418_v31  ;;  %v8421_v34 = vadd.f32 %v11179_v54, %v10045_v41  ;;  %v8412_v53 = vpop.f32.mrb[11].mxu0  ;;  %v13985_v16 = vadd.f32 %v11547_v43, %v8418_v31 }
 0xd07   : > { %v8448_v49 = vcombine.high %v8410_v21, %v8410_v21  ;;  %v8413_v6 = vadd.f32 %v10045_v41, %v8412_v53  ;;  %v13976_v12 = vadd.f32 %v11544_v59, %v8410_v21  ;;  %v8558_v59 = vlaneseq }
 0xd08   : > { %v13979_v20 = vadd.f32 %v11545_v47, %v8450_v24  ;;  %v8451_v51 = vcombine.high %v8421_v34, %v8421_v34  ;;  %v14004_v19 = vadd.f32 %v11551_v28, %v8421_v34  ;;  %v11577_v47 = vmov 1985246804  }
 0xd09   : > { %v13982_v2 = vadd.f32 %v11546_v15, %v8448_v49  ;;  %v8449_v26 = vcombine.high %v8413_v6, %v8413_v6  ;;  %v13988_v5 = vadd.f32 %v11548_v55, %v8413_v6  ;;  %v11576_v49 = vmov 839922192  }
 0xd0a   : > { %v13996_v37 = vadd.f32 %v11550_v32, %v8451_v51  ;;  %v8500_v9 = vcombine.low %v13985_v16, %v13979_v20  ;;  %v8556_v6 = vunpack.c.l.s4 %v11576_v49  ;;  %v8563_v15 = vunpack.c.l.s4 %v11577_v47 }
 0xd0b   : > { %v13991_v40 = vadd.f32 %v11549_v50, %v8449_v26  ;;  %v8498_v36 = vcombine.low %v13976_v12, %v13982_v2  ;;  %v8559_v26 = vshrl.u32 %v8558_v59, 7 }
 0xd0c   : > { %v8520_v56 = vsel %vm628_vm0, %v8500_v9, 0.0  ;;  %v8501_v13 = vcombine.low %v14004_v19, %v13996_v37  ;;  %v8557_v51 = vunpack.c.0.s8 %v8556_v6  ;;  %v8564_v43 = vunpack.c.0.s8 %v8563_v15 }
 0xd0d   : > { %v8514_v38 = vsel %vm628_vm0, %v8498_v36, 0.0  ;;  %v8499_v57 = vcombine.low %v13988_v5, %v13991_v40 }
 0xd0e   : > { %8515 = vadd.xlane.f32.xlu0 %v8514_v38  ;;  %v8523_v61 = vsel %vm628_vm0, %v8501_v13, 0.0  ;;  %v14047_v55 = vsub.s32 %v8557_v51, %v8559_v26  ;;  %v14049_v50 = vsub.s32 %v8564_v43, %v8559_v26 }
 0xd0f   : > { %v8517_v7 = vsel %vm628_vm0, %v8499_v57, 0.0 }
 0xd10   : > { %8518 = vadd.xlane.f32.xlu1 %v8517_v7 }
 0xd12   : > { %8521 = vadd.xlane.f32.xlu0 %v8520_v56 }
 0xd16   : > { %8524 = vadd.xlane.f32.xlu0 %v8523_v61 }
 0xd57   : > { %v11182_v27 = vpop.f32.mrb[12].mxu0 }
 0xd58   : > { %v8434_v48 = vadd.f32 %v11182_v27, %v10045_v41  ;;  %v8425_v1 = vpop.f32.mrb[13].mxu0 }
 0xd59   : > { %v8426_v39 = vadd.f32 %v10045_v41, %v8425_v1  ;;  %v11183_v8 = vpop.f32.mrb[14].mxu0 }
 0xd5a   : > { %v8454_v44 = vcombine.high %v8434_v48, %v8434_v48  ;;  %v8437_v52 = vadd.f32 %v11183_v8, %v10045_v41  ;;  %v8428_v23 = vpop.f32.mrb[15].mxu0  ;;  %v14021_v63 = vadd.f32 %v11555_v46, %v8434_v48 }
 0xd5b   : > { %v8452_v58 = vcombine.high %v8426_v39, %v8426_v39  ;;  %v8429_v18 = vadd.f32 %v10045_v41, %v8428_v23  ;;  %v14015_v30 = vadd.f32 %v11553_v45, %v8426_v39  ;;  %v11559_v41 = vld [vmem:[%s11693_s23 + $0x38] sm:$0xf] }
 0xd5c   : > { %v8455_v22 = vcombine.high %v8437_v52, %v8437_v52  ;;  %v14012_v62 = vadd.f32 %v11552_v10, %v8454_v44  ;;  %v14035_v29 = vadd.f32 %v11559_v41, %v8437_v52 }
 0xd5d   : > { %v14018_v60 = vadd.f32 %v11554_v35, %v8452_v58  ;;  %v8453_v14 = vcombine.high %v8429_v18, %v8429_v18  ;;  %v14027_v33 = vadd.f32 %v11557_v17, %v8429_v18 }
 0xd5e   : > { %v14024_v3 = vadd.f32 %v11556_v11, %v8455_v22  ;;  %v8504_v21 = vcombine.low %v14021_v63, %v14012_v62 }
 0xd5f   : > { %v14030_v0 = vadd.f32 %v11558_v42, %v8453_v14  ;;  %v8502_v25 = vcombine.low %v14015_v30, %v14018_v60 }
 0xd60   : > { %v8505_v24 = vcombine.low %v14035_v29, %v14024_v3  ;;  %v8532_v34 = vsel %vm628_vm0, %v8504_v21, 0.0  ;;  %v11251_v21 = vld [vmem:[%s14610_s9 + $0x8] sm:$0xff]  }
 0xd61   : > { %v8526_v31 = vsel %vm628_vm0, %v8502_v25, 0.0  ;;  %v8503_v4 = vcombine.low %v14027_v33, %v14030_v0 }
 0xd62   : > { %8527 = vadd.xlane.f32.xlu0 %v8526_v31  ;;  %v8535_v53 = vsel %vm628_vm0, %v8505_v24, 0.0 }
 0xd63   : > { %v8529_v54 = vsel %vm628_vm0, %v8503_v4, 0.0 }
 0xd64   : > { %8530 = vadd.xlane.f32.xlu1 %v8529_v54 }
 0xd66   : > { %8533 = vadd.xlane.f32.xlu0 %v8532_v34 }
 0xd68   : > { %8536 = vadd.xlane.f32.xlu1 %v8535_v53 }
 0xd9b   : > { %v8516_v36 = vpop.xlane.xlu0 %8515 }
 0xd9c   : > { %v8539_v32 = vmul.f32 0.03125, %v8516_v36 }
 0xd9d   : > { %v8519_v38 = vpop.xlane.xlu1 %8518 }
 0xd9e   : > { %v8561_v57 = vrot.slane %v8539_v32, %v14047_v55  ;;  %v8568_v9 = vrot.slane %v8539_v32, %v14049_v50  ;;  %v8540_v28 = vmul.f32 0.03125, %v8519_v38 }
 0xd9f   : > { %v8522_v7 = vpop.xlane.xlu0 %8521 }
 0xda0   : > { %v14054_v56 = vsub.f32 %v13976_v12, %v8561_v57  ;;  %v14057_v13 = vsub.f32 %v13982_v2, %v8568_v9  ;;  %v8575_v61 = vrot.slane %v8540_v28, %v14047_v55  ;;  %v8582_v27 = vrot.slane %v8540_v28, %v14049_v50 }
 0xda1   : > { %v8541_v48 = vmul.f32 0.03125, %v8522_v7 }
 0xda2   : > { %v14062_v1 = vsub.f32 %v13988_v5, %v8575_v61  ;;  %v14065_v39 = vsub.f32 %v13991_v40, %v8582_v27  ;;  %v8699_v8 = vmul.f32 %v14054_v56, %v14054_v56  ;;  %v8700_v12 = vmul.f32 %v14057_v13, %v14057_v13 }
 0xda3   : > { %v8589_v2 = vrot.slane %v8541_v48, %v14047_v55  ;;  %v8596_v44 = vrot.slane %v8541_v48, %v14049_v50  ;;  %v8525_v52 = vpop.xlane.xlu0 %8524 }
 0xda4   : > { %v8542_v23 = vmul.f32 0.03125, %v8525_v52  ;;  %v8731_v58 = vcombine.low %v8699_v8, %v8700_v12  ;;  %v8701_v5 = vmul.f32 %v14062_v1, %v14062_v1  ;;  %v8702_v40 = vmul.f32 %v14065_v39, %v14065_v39 }
 0xda5   : > { %v14078_v18 = vsub.f32 %v13985_v16, %v8589_v2  ;;  %v14081_v22 = vsub.f32 %v13979_v20, %v8596_v44 }
 0xda6   : > { %v8603_v10 = vrot.slane %v8542_v23, %v14047_v55  ;;  %v8610_v45 = vrot.slane %v8542_v23, %v14049_v50  ;;  %v8747_v35 = vsel %vm628_vm0, %v8731_v58, 0.0  ;;  %v8732_v14 = vcombine.low %v8701_v5, %v8702_v40 }
 0xda7   : > { %8748 = vadd.xlane.f32.xlu0 %v8747_v35  ;;  %v8703_v46 = vmul.f32 %v14078_v18, %v14078_v18  ;;  %v8704_v11 = vmul.f32 %v14081_v22, %v14081_v22  ;;  %v11253_v35 = vld [vmem:[%s14612_s11 + $0x8] sm:$0xff]  }
 0xda8   : > { %v14091_v16 = vsub.f32 %v14004_v19, %v8603_v10  ;;  %v14094_v20 = vsub.f32 %v13996_v37, %v8610_v45  ;;  %v8750_v17 = vsel %vm628_vm0, %v8732_v14, 0.0  ;;  %v11250_v37 = vld [vmem:[%s14610_s9] sm:$0xff]  }
 0xda9   : > { %8751 = vadd.xlane.f32.xlu1 %v8750_v17  ;;  %v8733_v42 = vcombine.low %v8703_v46, %v8704_v11  ;;  %11184 = vmatprep.subr.bf16.mxu1 %v11250_v37  ;;  %v11252_v45 = vld [vmem:[%s14612_s11] sm:$0xff]  }
 0xdaa   : > { %v8705_v25 = vmul.f32 %v14091_v16, %v14091_v16  ;;  %v8706_v41 = vmul.f32 %v14094_v20, %v14094_v20  ;;  %11185 = vmatpush3.bf16.msra.mxu1 %v11250_v37  ;;  %11196 = vmatprep.subr.bf16.mxu0 %v11252_v45 }
 0xdab   : > { %v8753_v31 = vsel %vm628_vm0, %v8733_v42, 0.0  ;;  %11186 = vmatprep.subr.bf16.mxu1 %v11251_v21  ;;  %11197 = vmatpush3.bf16.msra.mxu0 %v11252_v45 }
 0xdac   : > { %8754 = vadd.xlane.f32.xlu0 %v8753_v31  ;;  %v8734_v4 = vcombine.low %v8705_v25, %v8706_v41  ;;  %11198 = vmatprep.subr.bf16.mxu0 %v11253_v35 }
 0xdae   : > { %v8756_v19 = vsel %vm628_vm0, %v8734_v4, 0.0  ;;  %11187 = vmatpush3.bf16.msra.mxu1 %v11251_v21 }
 0xdaf   : > { %8757 = vadd.xlane.f32.xlu1 %v8756_v19  ;;  %11199 = vmatpush3.bf16.msra.mxu0 %v11253_v35 }
 0xdef   : > { %v8528_v54 = vpop.xlane.xlu0 %8527 }
 0xdf0   : > { %v8543_v24 = vmul.f32 0.03125, %v8528_v54  ;;  %v14170_v54 = vld [vmem:[%s14614_s13] ss:$0 sm:$0xff] }
 0xdf1   : > { %v8531_v34 = vpop.xlane.xlu1 %8530 }
 0xdf2   : > { %v8617_v53 = vrot.slane %v8543_v24, %v14047_v55  ;;  %v8624_v49 = vrot.slane %v8543_v24, %v14049_v50  ;;  %v8544_v6 = vmul.f32 0.03125, %v8531_v34  ;;  %v14175_v24 = vld [vmem:[%s14615_s14] ss:$0 sm:$0xff] }
 0xdf3   : > { %v8534_v59 = vpop.xlane.xlu0 %8533 }
 0xdf4   : > { %v14112_v47 = vsub.f32 %v14015_v30, %v8617_v53  ;;  %v14115_v15 = vsub.f32 %v14018_v60, %v8624_v49  ;;  %v8631_v51 = vrot.slane %v8544_v6, %v14047_v55  ;;  %v8638_v26 = vrot.slane %v8544_v6, %v14049_v50 }
 0xdf5   : > { %v8545_v43 = vmul.f32 0.03125, %v8534_v59  ;;  %v8537_v36 = vpop.xlane.xlu1 %8536  ;;  %v14181_v6 = vcombine.high %v14170_v54, %v14170_v54 }
 0xdf6   : > { %v14120_v32 = vsub.f32 %v14027_v33, %v8631_v51  ;;  %v14123_v38 = vsub.f32 %v14030_v0, %v8638_v26  ;;  %v8546_v57 = vmul.f32 0.03125, %v8537_v36  ;;  %v8707_v30 = vmul.f32 %v14112_v47, %v14112_v47 }
 0xdf7   : > { %v8645_v9 = vrot.slane %v8545_v43, %v14047_v55  ;;  %v8652_v60 = vrot.slane %v8545_v43, %v14049_v50  ;;  %v8708_v28 = vmul.f32 %v14115_v15, %v14115_v15  ;;  %v14185_v51 = vcombine.high %v14175_v24, %v14175_v24 }
 0xdf8   : > { %v8659_v7 = vrot.slane %v8546_v57, %v14047_v55  ;;  %v8666_v61 = vrot.slane %v8546_v57, %v14049_v50  ;;  %v8709_v33 = vmul.f32 %v14120_v32, %v14120_v32  ;;  %v8710_v0 = vmul.f32 %v14123_v38, %v14123_v38 }
 0xdf9   : > { %v14138_v27 = vsub.f32 %v14021_v63, %v8645_v9  ;;  %v14141_v48 = vsub.f32 %v14012_v62, %v8652_v60  ;;  %v8735_v8 = vcombine.low %v8707_v30, %v8708_v28 }
 0xdfa   : > { %v14144_v12 = vsub.f32 %v14035_v29, %v8659_v7  ;;  %v14147_v2 = vsub.f32 %v14024_v3, %v8666_v61  ;;  %v8736_v44 = vcombine.low %v8709_v33, %v8710_v0 }
 0xdfb   : > { %v8759_v52 = vsel %vm628_vm0, %v8735_v8, 0.0  ;;  %v8711_v23 = vmul.f32 %v14138_v27, %v14138_v27  ;;  %v8712_v63 = vmul.f32 %v14141_v48, %v14141_v48 }
 0xdfc   : > { %8760 = vadd.xlane.f32.xlu0 %v8759_v52  ;;  %v8762_v62 = vsel %vm628_vm0, %v8736_v44, 0.0  ;;  %v8713_v58 = vmul.f32 %v14144_v12, %v14144_v12  ;;  %v8714_v29 = vmul.f32 %v14147_v2, %v14147_v2 }
 0xdfd   : > { %8763 = vadd.xlane.f32.xlu1 %v8762_v62  ;;  %v8737_v3 = vcombine.low %v8711_v23, %v8712_v63 }
 0xdfe   : > { %v8738_v5 = vcombine.low %v8713_v58, %v8714_v29 }
 0xdff   : > { %v8765_v40 = vsel %vm628_vm0, %v8737_v3, 0.0 }
 0xe00   : > { %8766 = vadd.xlane.f32.xlu0 %v8765_v40  ;;  %v8768_v10 = vsel %vm628_vm0, %v8738_v5, 0.0 }
 0xe01   : > { %8769 = vadd.xlane.f32.xlu1 %v8768_v10 }
 0xe34   : > { %v8749_v14 = vpop.xlane.xlu0 %8748 }
 0xe35   : > { %v8771_v46 = vmul.f32 0.03125, %v8749_v14 }
 0xe36   : > { %v8752_v11 = vpop.xlane.xlu1 %8751 }
 0xe37   : > { %v8779_v17 = vadd.f32 1e-05, %v8771_v46  ;;  %v8772_v42 = vmul.f32 0.03125, %v8752_v11 }
 0xe39   : > { %11512 = vrsqrt.f32 %v8779_v17  ;;  %v8780_v25 = vadd.f32 1e-05, %v8772_v42  ;;  %v8755_v41 = vpop.xlane.xlu0 %8754 }
 0xe3a   : > { %v8773_v31 = vmul.f32 0.03125, %v8755_v41 }
 0xe3b   : > { %11514 = vrsqrt.f32 %v8780_v25 }
 0xe3c   : > { %v8781_v4 = vadd.f32 1e-05, %v8773_v31  ;;  %v8758_v19 = vpop.xlane.xlu1 %8757 }
 0xe3d   : > { %v8774_v37 = vmul.f32 0.03125, %v8758_v19 }
 0xe3e   : > { %11516 = vrsqrt.f32 %v8781_v4 }
 0xe3f   : > { %v8782_v21 = vadd.f32 1e-05, %v8774_v37 }
 0xe41   : > { %11518 = vrsqrt.f32 %v8782_v21 }
 0xe43   : > { %v11513_v34 = vpop.eup %11512 }
 0xe44   : > { %v8809_v53 = vrot.slane %v11513_v34, %v14047_v55  ;;  %v8816_v49 = vrot.slane %v11513_v34, %v14049_v50 }
 0xe45   : > { %v11515_v59 = vpop.eup %11514 }
 0xe46   : > { %v8931_v26 = vmul.f32 %v8809_v53, %v14054_v56  ;;  %v8932_v43 = vmul.f32 %v8816_v49, %v14057_v13  ;;  %v8823_v36 = vrot.slane %v11515_v59, %v14047_v55  ;;  %v8830_v57 = vrot.slane %v11515_v59, %v14049_v50 }
 0xe48   : > { %v11517_v30 = vpop.eup %11516  ;;  %v8933_v9 = vmul.f32 %v8823_v36, %v14062_v1  ;;  %v8934_v60 = vmul.f32 %v8830_v57, %v14065_v39  ;;  %v8955_v28 = vmul.f32 %v14170_v54, %v8931_v26  ;;  %v8956_v7 = vmul.f32 %v14181_v6, %v8932_v43 }
 0xe49   : > { %v8837_v61 = vrot.slane %v11517_v30, %v14047_v55  ;;  %v8844_v33 = vrot.slane %v11517_v30, %v14049_v50 }
 0xe4a   : > { %v8957_v56 = vmul.f32 %v14170_v54, %v8933_v9  ;;  %v8958_v13 = vmul.f32 %v14181_v6, %v8934_v60  ;;  %v14200_v0 = vadd.f32 %v14175_v24, %v8955_v28  ;;  %v14203_v8 = vadd.f32 %v14185_v51, %v8956_v7 }
 0xe4b   : > { %v11519_v1 = vpop.eup %11518  ;;  %v8935_v39 = vmul.f32 %v8837_v61, %v14078_v18  ;;  %v8936_v44 = vmul.f32 %v8844_v33, %v14081_v22 }
 0xe4c   : > { %v8851_v52 = vrot.slane %v11519_v1, %v14047_v55  ;;  %v8858_v23 = vrot.slane %v11519_v1, %v14049_v50  ;;  %v14210_v63 = vadd.f32 %v14175_v24, %v8957_v56  ;;  %v14213_v62 = vadd.f32 %v14185_v51, %v8958_v13 }
 0xe4d   : > { %v8959_v58 = vmul.f32 %v14170_v54, %v8935_v39  ;;  %v8960_v29 = vmul.f32 %v14181_v6, %v8936_v44  ;;  %v9011_v22 = vcombine.low %v14200_v0, %v14203_v8 }
 0xe4e   : > { %v8937_v3 = vmul.f32 %v8851_v52, %v14091_v16  ;;  %v8938_v18 = vmul.f32 %v8858_v23, %v14094_v20  ;;  %v9012_v5 = vcombine.low %v14210_v63, %v14213_v62 }
 0xe4f   : > { %v14224_v40 = vadd.f32 %v14175_v24, %v8959_v58  ;;  %v14227_v10 = vadd.f32 %v14185_v51, %v8960_v29 }
 0xe50   : > { %v8961_v45 = vmul.f32 %v14170_v54, %v8937_v3  ;;  %v8962_v35 = vmul.f32 %v14181_v6, %v8938_v18  ;;  %v9027_v14 = vpack.c.bf16 %v9012_v5, %v9011_v22 }
 0xe51   : > { %v9013_v46 = vcombine.low %v14224_v40, %v14227_v10 }
 0xe52   : > { %v14232_v16 = vadd.f32 %v14175_v24, %v8961_v45  ;;  %v14235_v20 = vadd.f32 %v14185_v51, %v8962_v35  ;;  %11188 = vmatprep.mubr.msk.bf16.mxu1 %vm628_vm0, %v9027_v14 }
 0xe54   : > { %v9014_v11 = vcombine.low %v14232_v16, %v14235_v20 }
 0xe56   : > { %v9028_v17 = vpack.c.bf16 %v9014_v11, %v9013_v46 }
 0xe58   : > { %11189 = vmatmul.mubr.msk.bf16.vlgmr.msra.gmra.mrb[16].mxu1 %vm628_vm0, %v9028_v17 }
 0xe89   : > { %v8761_v42 = vpop.xlane.xlu0 %8760 }
 0xe8a   : > { %v8775_v25 = vmul.f32 0.03125, %v8761_v42  ;;  %v8764_v41 = vpop.xlane.xlu1 %8763 }
 0xe8b   : > { %v8776_v31 = vmul.f32 0.03125, %v8764_v41  ;;  %v10054_v41 = vld [vmem:[%s14611_s10] ss:$0 sm:$0xff] }
 0xe8c   : > { %v8783_v4 = vadd.f32 1e-05, %v8775_v25 }
 0xe8d   : > { %v8784_v19 = vadd.f32 1e-05, %v8776_v31  ;;  %v8767_v37 = vpop.xlane.xlu0 %8766 }
 0xe8e   : > { %11520 = vrsqrt.f32 %v8783_v4  ;;  %v8777_v21 = vmul.f32 0.03125, %v8767_v37  ;;  %v8770_v34 = vpop.xlane.xlu1 %8769 }
 0xe8f   : > { %11522 = vrsqrt.f32 %v8784_v19  ;;  %v8778_v53 = vmul.f32 0.03125, %v8770_v34 }
 0xe90   : > { %v8785_v49 = vadd.f32 1e-05, %v8777_v21 }
 0xe91   : > { %v8786_v59 = vadd.f32 1e-05, %v8778_v53 }
 0xe92   : > { %11524 = vrsqrt.f32 %v8785_v49 }
 0xe93   : > { %11526 = vrsqrt.f32 %v8786_v59 }
 0xe98   : > { %v11521_v26 = vpop.eup %11520 }
 0xe99   : > { %v11523_v43 = vpop.eup %11522  ;;  %v8865_v36 = vrot.slane %v11521_v26, %v14047_v55  ;;  %v8872_v57 = vrot.slane %v11521_v26, %v14049_v50 }
 0xe9a   : > { %v8879_v30 = vrot.slane %v11523_v43, %v14047_v55  ;;  %v8886_v9 = vrot.slane %v11523_v43, %v14049_v50 }
 0xe9b   : > { %v8939_v60 = vmul.f32 %v8865_v36, %v14112_v47  ;;  %v8940_v28 = vmul.f32 %v8872_v57, %v14115_v15 }
 0xe9c   : > { %v11525_v7 = vpop.eup %11524  ;;  %v8941_v61 = vmul.f32 %v8879_v30, %v14120_v32  ;;  %v8942_v33 = vmul.f32 %v8886_v9, %v14123_v38 }
 0xe9d   : > { %v11527_v56 = vpop.eup %11526  ;;  %v8893_v13 = vrot.slane %v11525_v7, %v14047_v55  ;;  %v8900_v1 = vrot.slane %v11525_v7, %v14049_v50  ;;  %v8963_v39 = vmul.f32 %v14170_v54, %v8939_v60  ;;  %v8964_v44 = vmul.f32 %v14181_v6, %v8940_v28 }
 0xe9e   : > { %v8907_v52 = vrot.slane %v11527_v56, %v14047_v55  ;;  %v8914_v47 = vrot.slane %v11527_v56, %v14049_v50  ;;  %v8965_v15 = vmul.f32 %v14170_v54, %v8941_v61  ;;  %v8966_v23 = vmul.f32 %v14181_v6, %v8942_v33 }
 0xe9f   : > { %v8943_v32 = vmul.f32 %v8893_v13, %v14138_v27  ;;  %v8944_v38 = vmul.f32 %v8900_v1, %v14141_v48  ;;  %v14262_v58 = vadd.f32 %v14175_v24, %v8963_v39  ;;  %v14265_v29 = vadd.f32 %v14185_v51, %v8964_v44 }
 0xea0   : > { %v8945_v3 = vmul.f32 %v8907_v52, %v14144_v12  ;;  %v8946_v18 = vmul.f32 %v8914_v47, %v14147_v2  ;;  %v14270_v22 = vadd.f32 %v14175_v24, %v8965_v15  ;;  %v14273_v5 = vadd.f32 %v14185_v51, %v8966_v23  ;;  %v10061_v23 = vld [vmem:[%s14613_s12] ss:$0 sm:$0xff] }
 0xea1   : > { %v8967_v27 = vmul.f32 %v14170_v54, %v8943_v32  ;;  %v8968_v48 = vmul.f32 %v14181_v6, %v8944_v38  ;;  %v9015_v14 = vcombine.low %v14262_v58, %v14265_v29 }
 0xea2   : > { %v8969_v45 = vmul.f32 %v14170_v54, %v8945_v3  ;;  %v8970_v35 = vmul.f32 %v14181_v6, %v8946_v18  ;;  %v9016_v12 = vcombine.low %v14270_v22, %v14273_v5 }
 0xea3   : > { %v14284_v2 = vadd.f32 %v14175_v24, %v8967_v27  ;;  %v14287_v46 = vadd.f32 %v14185_v51, %v8968_v48 }
 0xea4   : > { %v14290_v11 = vadd.f32 %v14175_v24, %v8969_v45  ;;  %v14293_v17 = vadd.f32 %v14185_v51, %v8970_v35  ;;  %v9029_v54 = vpack.c.bf16 %v9016_v12, %v9015_v14  ;;  %v11254_v24 = vld [vmem:[%s14612_s11 + $0x10] sm:$0xff]   ;;  %v11255_v51 = vld [vmem:[%s14612_s11 + $0x18] sm:$0xff]  }
 0xea5   : > { %v9017_v6 = vcombine.low %v14284_v2, %v14287_v46  ;;  %11200 = vmatprep.subr.bf16.mxu0 %v11254_v24 }
 0xea6   : > { %v9018_v42 = vcombine.low %v14290_v11, %v14293_v17  ;;  %11192 = vmatprep.mubr.msk.bf16.mxu1 %vm628_vm0, %v9029_v54  ;;  %11201 = vmatpush3.bf16.msra.mxu0 %v11254_v24 }
 0xea7   : > { %11202 = vmatprep.subr.bf16.mxu0 %v11255_v51 }
 0xea8   : > { %v9030_v25 = vpack.c.bf16 %v9018_v42, %v9017_v6 }
 0xeaa   : > { %11193 = vmatmul.mubr.msk.bf16.gmra.mrb[20].mxu1 %vm628_vm0, %v9030_v25  ;;  %11203 = vmatpush3.bf16.msra.mxu0 %v11255_v51 }
 0xf2b   : > { %v11190_v31 = vpop.f32.mrb[16].mxu1 }
 0xf2c   : > { %v9109_v4 = vadd.f32 %v11190_v31, %v10054_v41  ;;  %v9100_v19 = vpop.f32.mrb[17].mxu1 }
 0xf2d   : > { %v9101_v37 = vadd.f32 %v10054_v41, %v9100_v19  ;;  %v11191_v21 = vpop.f32.mrb[18].mxu1 }
 0xf2e   : > { %v9112_v34 = vadd.f32 %v11191_v21, %v10054_v41  ;;  %v9103_v53 = vpop.f32.mrb[19].mxu1  ;;  %v9133_v59 = vmax.f32 %v9109_v4, 0.0 }
 0xf2f   : > { %v9104_v49 = vadd.f32 %v10054_v41, %v9103_v53  ;;  %v9131_v43 = vmax.f32 %v9101_v37, 0.0 }
 0xf30   : > { %v9134_v26 = vmax.f32 %v9112_v34, 0.0 }
 0xf31   : > { %v9132_v36 = vmax.f32 %v9104_v49, 0.0 }
 0xf32   : > { %v9140_v57 = vpack.c.bf16 %v9134_v26, %v9133_v59 }
 0xf33   : > { %v9139_v30 = vpack.c.bf16 %v9132_v36, %v9131_v43 }
 0xf35   : > { %11204 = vmatprep.mubr.msk.bf16.mxu0 %vm9182_vm8, %v9139_v30 }
 0xf36   : > { %11205 = vmatmul.mubr.msk.bf16.vlgmr.msra.gmra.mrb[16].mxu0 %vm9182_vm8, %v9140_v57 }
 0xf7d   : > { %v11194_v9 = vpop.f32.mrb[20].mxu1 }
 0xf7e   : > { %v9125_v60 = vadd.f32 %v11194_v9, %v10054_v41  ;;  %v9116_v28 = vpop.f32.mrb[21].mxu1 }
 0xf7f   : > { %v9117_v7 = vadd.f32 %v10054_v41, %v9116_v28  ;;  %v11195_v61 = vpop.f32.mrb[22].mxu1 }
 0xf80   : > { %v9128_v33 = vadd.f32 %v11195_v61, %v10054_v41  ;;  %v9119_v56 = vpop.f32.mrb[23].mxu1  ;;  %v9137_v1 = vmax.f32 %v9125_v60, 0.0 }
 0xf81   : > { %v9120_v13 = vadd.f32 %v10054_v41, %v9119_v56  ;;  %v9135_v44 = vmax.f32 %v9117_v7, 0.0 }
 0xf82   : > { %v9138_v39 = vmax.f32 %v9128_v33, 0.0 }
 0xf83   : > { %v9136_v52 = vmax.f32 %v9120_v13, 0.0 }
 0xf84   : > { %v9142_v47 = vpack.c.bf16 %v9138_v39, %v9137_v1 }
 0xf85   : > { %v9141_v15 = vpack.c.bf16 %v9136_v52, %v9135_v44 }
 0xf87   : > { %11208 = vmatprep.mubr.msk.bf16.mxu0 %vm9182_vm8, %v9141_v15 }
 0xf88   : > { %11209 = vmatmul.mubr.msk.bf16.gmra.mrb[20].mxu0 %vm9182_vm8, %v9142_v47 }
0x1009   : > { %v11206_v32 = vpop.f32.mrb[16].mxu0 }
0x100a   : > { %v9238_v38 = vadd.f32 %v11206_v32, %v10061_v23  ;;  %v9229_v3 = vpop.f32.mrb[17].mxu0 }
0x100b   : > { %v9230_v18 = vadd.f32 %v10061_v23, %v9229_v3  ;;  %v11207_v27 = vpop.f32.mrb[18].mxu0 }
0x100c   : > { %v9270_v48 = vcombine.high %v9238_v38, %v9238_v38  ;;  %v9241_v45 = vadd.f32 %v11207_v27, %v10061_v23  ;;  %v9232_v35 = vpop.f32.mrb[19].mxu0  ;;  %v9288_v54 = vadd.f32 %v9238_v38, %v14224_v40 }
0x100d   : > { %v9268_v14 = vcombine.high %v9230_v18, %v9230_v18  ;;  %v9233_v12 = vadd.f32 %v10061_v23, %v9232_v35  ;;  %v14323_v51 = vadd.f32 %v9230_v18, %v14200_v0 }
0x100e   : > { %v9289_v6 = vadd.f32 %v9270_v48, %v14227_v10  ;;  %v9271_v42 = vcombine.high %v9241_v45, %v9241_v45  ;;  %v9290_v41 = vadd.f32 %v9241_v45, %v14232_v16 }
0x100f   : > { %v14320_v25 = vadd.f32 %v9268_v14, %v14203_v8  ;;  %v9269_v24 = vcombine.high %v9233_v12, %v9233_v12  ;;  %v14331_v40 = vadd.f32 %v9233_v12, %v14210_v63 }
0x1010   : > { %v9291_v31 = vadd.f32 %v9271_v42, %v14235_v20  ;;  %v9320_v4 = vcombine.low %v9288_v54, %v9289_v6 }
0x1011   : > { %v14328_v19 = vadd.f32 %v9269_v24, %v14213_v62  ;;  %v9318_v8 = vcombine.low %v14323_v51, %v14320_v25 }
0x1012   : > { %v9340_v10 = vsel %vm628_vm0, %v9320_v4, 0.0  ;;  %v9321_v37 = vcombine.low %v9290_v41, %v9291_v31 }
0x1013   : > { %9341 = vadd.xlane.f32.xlu0 %v9340_v10  ;;  %v9319_v16 = vcombine.low %v14331_v40, %v14328_v19  ;;  %v9334_v20 = vsel %vm628_vm0, %v9318_v8, 0.0 }
0x1014   : > { %v9343_v0 = vsel %vm628_vm0, %v9321_v37, 0.0 }
0x1015   : > { %9344 = vadd.xlane.f32.xlu1 %v9343_v0  ;;  %v9337_v62 = vsel %vm628_vm0, %v9319_v16, 0.0 }
0x1017   : > { %9335 = vadd.xlane.f32.xlu0 %v9334_v20 }
0x1019   : > { %9338 = vadd.xlane.f32.xlu1 %v9337_v62 }
0x105b   : > { %v11210_v63 = vpop.f32.mrb[20].mxu0 }
0x105c   : > { %v9254_v21 = vadd.f32 %v11210_v63, %v10061_v23  ;;  %v9245_v34 = vpop.f32.mrb[21].mxu0 }
0x105d   : > { %v9246_v53 = vadd.f32 %v10061_v23, %v9245_v34  ;;  %v11211_v49 = vpop.f32.mrb[22].mxu0 }
0x105e   : > { %v9274_v59 = vcombine.high %v9254_v21, %v9254_v21  ;;  %v9257_v26 = vadd.f32 %v11211_v49, %v10061_v23  ;;  %v9248_v43 = vpop.f32.mrb[23].mxu0  ;;  %v14351_v61 = vadd.f32 %v9254_v21, %v14284_v2 }
0x105f   : > { %v9272_v36 = vcombine.high %v9246_v53, %v9246_v53  ;;  %v9249_v57 = vadd.f32 %v10061_v23, %v9248_v43  ;;  %v14345_v60 = vadd.f32 %v9246_v53, %v14262_v58 }
0x1060   : > { %v9275_v30 = vcombine.high %v9257_v26, %v9257_v26  ;;  %v14342_v9 = vadd.f32 %v9274_v59, %v14287_v46  ;;  %v14365_v46 = vadd.f32 %v9257_v26, %v14290_v11 }
0x1061   : > { %v14348_v28 = vadd.f32 %v9272_v36, %v14265_v29  ;;  %v9273_v7 = vcombine.high %v9249_v57, %v9249_v57  ;;  %v14357_v56 = vadd.f32 %v9249_v57, %v14270_v22 }
0x1062   : > { %v14354_v33 = vadd.f32 %v9275_v30, %v14293_v17  ;;  %v9324_v17 = vcombine.low %v14351_v61, %v14342_v9 }
0x1063   : > { %v14360_v13 = vadd.f32 %v9273_v7, %v14273_v5  ;;  %v9322_v58 = vcombine.low %v14345_v60, %v14348_v28 }
0x1064   : > { %v9325_v5 = vcombine.low %v14365_v46, %v14354_v33  ;;  %v9352_v1 = vsel %vm628_vm0, %v9324_v17, 0.0 }
0x1065   : > { %v9346_v29 = vsel %vm628_vm0, %v9322_v58, 0.0  ;;  %v9323_v2 = vcombine.low %v14357_v56, %v14360_v13 }
0x1066   : > { %9347 = vadd.xlane.f32.xlu0 %v9346_v29  ;;  %v9355_v11 = vsel %vm628_vm0, %v9325_v5, 0.0 }
0x1067   : > { %v9349_v22 = vsel %vm628_vm0, %v9323_v2, 0.0 }
0x1068   : > { %9350 = vadd.xlane.f32.xlu1 %v9349_v22 }
0x106a   : > { %9353 = vadd.xlane.f32.xlu0 %v9352_v1 }
0x106c   : > { %9356 = vadd.xlane.f32.xlu1 %v9355_v11 }
0x10a0   : > { %v9342_v39 = vpop.xlane.xlu0 %9341 }
0x10a1   : > { %v9360_v44 = vmul.f32 0.03125, %v9342_v39 }
0x10a2   : > { %v9345_v52 = vpop.xlane.xlu1 %9344 }
0x10a3   : > { %v9408_v47 = vrot.slane %v9360_v44, %v14047_v55  ;;  %v9415_v15 = vrot.slane %v9360_v44, %v14049_v50  ;;  %v9361_v23 = vmul.f32 0.03125, %v9345_v52 }
0x10a4   : > { %v9336_v32 = vpop.xlane.xlu0 %9335 }
0x10a5   : > { %v14379_v38 = vsub.f32 %v9288_v54, %v9408_v47  ;;  %v14381_v3 = vsub.f32 %v9289_v6, %v9415_v15  ;;  %v9422_v18 = vrot.slane %v9361_v23, %v14047_v55  ;;  %v9429_v27 = vrot.slane %v9361_v23, %v14049_v50 }
0x10a6   : > { %v9358_v48 = vmul.f32 0.03125, %v9336_v32  ;;  %v9339_v45 = vpop.xlane.xlu1 %9338 }
0x10a7   : > { %v14385_v35 = vsub.f32 %v9290_v41, %v9422_v18  ;;  %v14387_v14 = vsub.f32 %v9291_v31, %v9429_v27  ;;  %v9359_v12 = vmul.f32 0.03125, %v9339_v45  ;;  %v9522_v42 = vmul.f32 %v14379_v38, %v14379_v38 }
0x10a8   : > { %v9380_v24 = vrot.slane %v9358_v48, %v14047_v55  ;;  %v9387_v54 = vrot.slane %v9358_v48, %v14049_v50  ;;  %v9523_v6 = vmul.f32 %v14381_v3, %v14381_v3 }
0x10a9   : > { %v9394_v4 = vrot.slane %v9359_v12, %v14047_v55  ;;  %v9401_v10 = vrot.slane %v9359_v12, %v14049_v50  ;;  %v9524_v41 = vmul.f32 %v14385_v35, %v14385_v35  ;;  %v9525_v31 = vmul.f32 %v14387_v14, %v14387_v14 }
0x10aa   : > { %v14402_v37 = vsub.f32 %v14323_v51, %v9380_v24  ;;  %v14405_v8 = vsub.f32 %v14320_v25, %v9387_v54  ;;  %v9552_v0 = vcombine.low %v9522_v42, %v9523_v6 }
0x10ab   : > { %v14408_v16 = vsub.f32 %v14331_v40, %v9394_v4  ;;  %v14411_v20 = vsub.f32 %v14328_v19, %v9401_v10  ;;  %v9553_v62 = vcombine.low %v9524_v41, %v9525_v31 }
0x10ac   : > { %v9572_v63 = vsel %vm628_vm0, %v9552_v0, 0.0  ;;  %v9518_v21 = vmul.f32 %v14402_v37, %v14402_v37  ;;  %v9519_v51 = vmul.f32 %v14405_v8, %v14405_v8 }
0x10ad   : > { %9573 = vadd.xlane.f32.xlu0 %v9572_v63  ;;  %v9575_v25 = vsel %vm628_vm0, %v9553_v62, 0.0  ;;  %v9520_v34 = vmul.f32 %v14408_v16, %v14408_v16  ;;  %v9521_v40 = vmul.f32 %v14411_v20, %v14411_v20 }
0x10ae   : > { %9576 = vadd.xlane.f32.xlu1 %v9575_v25  ;;  %v9550_v19 = vcombine.low %v9518_v21, %v9519_v51 }
0x10af   : > { %v9551_v53 = vcombine.low %v9520_v34, %v9521_v40 }
0x10b0   : > { %v9566_v49 = vsel %vm628_vm0, %v9550_v19, 0.0 }
0x10b1   : > { %9567 = vadd.xlane.f32.xlu0 %v9566_v49  ;;  %v9569_v59 = vsel %vm628_vm0, %v9551_v53, 0.0  ;;  %v14480_v49 = vld [vmem:[%s14616_s15] ss:$0 sm:$0xff] }
0x10b2   : > { %9570 = vadd.xlane.f32.xlu1 %v9569_v59 }
0x10f3   : > { %v9348_v26 = vpop.xlane.xlu0 %9347 }
0x10f4   : > { %v9362_v43 = vmul.f32 0.03125, %v9348_v26  ;;  %v14485_v26 = vld [vmem:[%s14617_s16] ss:$0 sm:$0xff] }
0x10f5   : > { %v9351_v36 = vpop.xlane.xlu1 %9350 }
0x10f6   : > { %v9436_v57 = vrot.slane %v9362_v43, %v14047_v55  ;;  %v9443_v30 = vrot.slane %v9362_v43, %v14049_v50  ;;  %v9363_v7 = vmul.f32 0.03125, %v9351_v36  ;;  %v14489_v36 = vcombine.high %v14480_v49, %v14480_v49 }
0x10f7   : > { %v9354_v58 = vpop.xlane.xlu0 %9353 }
0x10f8   : > { %v14428_v29 = vsub.f32 %v14345_v60, %v9436_v57  ;;  %v14431_v2 = vsub.f32 %v14348_v28, %v9443_v30  ;;  %v9450_v17 = vrot.slane %v9363_v7, %v14047_v55  ;;  %v9457_v22 = vrot.slane %v9363_v7, %v14049_v50 }
0x10f9   : > { %v9364_v5 = vmul.f32 0.03125, %v9354_v58  ;;  %v9357_v1 = vpop.xlane.xlu1 %9356 }
0x10fa   : > { %v14436_v11 = vsub.f32 %v14357_v56, %v9450_v17  ;;  %v14439_v39 = vsub.f32 %v14360_v13, %v9457_v22  ;;  %v9365_v44 = vmul.f32 0.03125, %v9357_v1  ;;  %v9526_v60 = vmul.f32 %v14428_v29, %v14428_v29 }
0x10fb   : > { %v9464_v52 = vrot.slane %v9364_v5, %v14047_v55  ;;  %v9471_v28 = vrot.slane %v9364_v5, %v14049_v50  ;;  %v9527_v47 = vmul.f32 %v14431_v2, %v14431_v2  ;;  %v14497_v17 = vcombine.high %v14485_v26, %v14485_v26 }
0x10fc   : > { %v9478_v15 = vrot.slane %v9365_v44, %v14047_v55  ;;  %v9485_v23 = vrot.slane %v9365_v44, %v14049_v50  ;;  %v9528_v56 = vmul.f32 %v14436_v11, %v14436_v11  ;;  %v9529_v13 = vmul.f32 %v14439_v39, %v14439_v39 }
0x10fd   : > { %v14454_v32 = vsub.f32 %v14351_v61, %v9464_v52  ;;  %v14457_v18 = vsub.f32 %v14342_v9, %v9471_v28  ;;  %v9554_v27 = vcombine.low %v9526_v60, %v9527_v47 }
0x10fe   : > { %v14460_v48 = vsub.f32 %v14365_v46, %v9478_v15  ;;  %v14463_v45 = vsub.f32 %v14354_v33, %v9485_v23  ;;  %v9555_v12 = vcombine.low %v9528_v56, %v9529_v13 }
0x10ff   : > { %v9578_v42 = vsel %vm628_vm0, %v9554_v27, 0.0  ;;  %v9530_v24 = vmul.f32 %v14454_v32, %v14454_v32  ;;  %v9531_v61 = vmul.f32 %v14457_v18, %v14457_v18 }
0x1100   : > { %9579 = vadd.xlane.f32.xlu0 %v9578_v42  ;;  %v9581_v9 = vsel %vm628_vm0, %v9555_v12, 0.0  ;;  %v9532_v54 = vmul.f32 %v14460_v48, %v14460_v48  ;;  %v9533_v46 = vmul.f32 %v14463_v45, %v14463_v45 }
0x1101   : > { %9582 = vadd.xlane.f32.xlu1 %v9581_v9  ;;  %v9556_v33 = vcombine.low %v9530_v24, %v9531_v61 }
0x1102   : > { %v9557_v6 = vcombine.low %v9532_v54, %v9533_v46 }
0x1103   : > { %v9584_v4 = vsel %vm628_vm0, %v9556_v33, 0.0 }
0x1104   : > { %9585 = vadd.xlane.f32.xlu0 %v9584_v4  ;;  %v9587_v10 = vsel %vm628_vm0, %v9557_v6, 0.0 }
0x1105   : > { %9588 = vadd.xlane.f32.xlu1 %v9587_v10 }
0x113a   : > { %v9574_v41 = vpop.xlane.xlu0 %9573 }
0x113b   : > { %v9592_v31 = vmul.f32 0.03125, %v9574_v41  ;;  %v9577_v0 = vpop.xlane.xlu1 %9576 }
0x113c   : > { %v9593_v62 = vmul.f32 0.03125, %v9577_v0 }
0x113d   : > { %v9600_v63 = vadd.f32 1e-05, %v9592_v31 }
0x113e   : > { %v9601_v21 = vadd.f32 1e-05, %v9593_v62  ;;  %v9568_v51 = vpop.xlane.xlu0 %9567 }
0x113f   : > { %11528 = vrsqrt.f32 %v9600_v63  ;;  %v9590_v25 = vmul.f32 0.03125, %v9568_v51  ;;  %v9571_v34 = vpop.xlane.xlu1 %9570 }
0x1140   : > { %11530 = vrsqrt.f32 %v9601_v21  ;;  %v9591_v40 = vmul.f32 0.03125, %v9571_v34 }
0x1141   : > { %v9598_v19 = vadd.f32 1e-05, %v9590_v25 }
0x1142   : > { %v9599_v53 = vadd.f32 1e-05, %v9591_v40 }
0x1143   : > { %11532 = vrsqrt.f32 %v9598_v19 }
0x1144   : > { %11534 = vrsqrt.f32 %v9599_v53 }
0x1149   : > { %v11529_v59 = vpop.eup %11528 }
0x114a   : > { %v11531_v43 = vpop.eup %11530  ;;  %v9656_v57 = vrot.slane %v11529_v59, %v14047_v55  ;;  %v9663_v30 = vrot.slane %v11529_v59, %v14049_v50 }
0x114b   : > { %v9670_v7 = vrot.slane %v11531_v43, %v14047_v55  ;;  %v9677_v58 = vrot.slane %v11531_v43, %v14049_v50 }
0x114c   : > { %v9754_v22 = vmul.f32 %v9656_v57, %v14379_v38  ;;  %v9755_v5 = vmul.f32 %v9663_v30, %v14381_v3 }
0x114d   : > { %v11533_v1 = vpop.eup %11532  ;;  %v9756_v44 = vmul.f32 %v9670_v7, %v14385_v35  ;;  %v9757_v60 = vmul.f32 %v9677_v58, %v14387_v14 }
0x114e   : > { %v11535_v52 = vpop.eup %11534  ;;  %v9778_v28 = vmul.f32 %v14480_v49, %v9754_v22  ;;  %v9779_v47 = vmul.f32 %v14489_v36, %v9755_v5  ;;  %v9628_v15 = vrot.slane %v11533_v1, %v14047_v55  ;;  %v9635_v23 = vrot.slane %v11533_v1, %v14049_v50 }
0x114f   : > { %v9780_v38 = vmul.f32 %v14480_v49, %v9756_v44  ;;  %v9781_v3 = vmul.f32 %v14489_v36, %v9757_v60  ;;  %v9642_v35 = vrot.slane %v11535_v52, %v14047_v55  ;;  %v9649_v14 = vrot.slane %v11535_v52, %v14049_v50 }
0x1150   : > { %v9802_v56 = vadd.f32 %v14485_v26, %v9778_v28  ;;  %v9803_v13 = vadd.f32 %v14497_v17, %v9779_v47  ;;  %v9750_v27 = vmul.f32 %v9628_v15, %v14402_v37  ;;  %v9751_v12 = vmul.f32 %v9635_v23, %v14405_v8 }
0x1151   : > { %v9804_v42 = vadd.f32 %v14485_v26, %v9780_v38  ;;  %v9805_v24 = vadd.f32 %v14497_v17, %v9781_v3  ;;  %v9752_v61 = vmul.f32 %v9642_v35, %v14408_v16  ;;  %v9753_v9 = vmul.f32 %v9649_v14, %v14411_v20 }
0x1152   : > { %9819 = vst.msk [vmem:[%s14512_s20 + $0x10] sm:$0xf] %vm9814_vm9, %v9802_v56  ;;  %9820 = vst.msk [vmem:[%s14512_s20 + $0x14] sm:$0xf] %vm9814_vm9, %v9803_v13  ;;  %v9774_v37 = vmul.f32 %v14480_v49, %v9750_v27  ;;  %v9775_v8 = vmul.f32 %v14489_v36, %v9751_v12 }
0x1153   : > { %9821 = vst.msk [vmem:[%s14512_s20 + $0x18] sm:$0xf] %vm9814_vm9, %v9804_v42  ;;  %9822 = vst.msk [vmem:[%s14512_s20 + $0x1c] sm:$0xf] %vm9814_vm9, %v9805_v24  ;;  %v9776_v54 = vmul.f32 %v14480_v49, %v9752_v61  ;;  %v9777_v16 = vmul.f32 %v14489_v36, %v9753_v9 }
0x1154   : > { %v9798_v46 = vadd.f32 %v14485_v26, %v9774_v37  ;;  %v9799_v20 = vadd.f32 %v14497_v17, %v9775_v8 }
0x1155   : > { %v9800_v33 = vadd.f32 %v14485_v26, %v9776_v54  ;;  %v9801_v6 = vadd.f32 %v14497_v17, %v9777_v16 }
0x1156   : > { %9815 = vst.msk [vmem:[%s14512_s20] sm:$0xf] %vm9814_vm9, %v9798_v46  ;;  %9816 = vst.msk [vmem:[%s14512_s20 + $0x4] sm:$0xf] %vm9814_vm9, %v9799_v20 }
0x1157   : > { %9817 = vst.msk [vmem:[%s14512_s20 + $0x8] sm:$0xf] %vm9814_vm9, %v9800_v33  ;;  %9818 = vst.msk [vmem:[%s14512_s20 + $0xc] sm:$0xf] %vm9814_vm9, %v9801_v6 }
0x118d   : > { %v9580_v4 = vpop.xlane.xlu0 %9579 }
0x118e   : > { %v9594_v10 = vmul.f32 0.03125, %v9580_v4  ;;  %v9583_v41 = vpop.xlane.xlu1 %9582 }
0x118f   : > { %v9595_v31 = vmul.f32 0.03125, %v9583_v41 }
0x1190   : > { %v9602_v0 = vadd.f32 1e-05, %v9594_v10 }
0x1191   : > { %v9603_v62 = vadd.f32 1e-05, %v9595_v31  ;;  %v9586_v63 = vpop.xlane.xlu0 %9585 }
0x1192   : > { %11536 = vrsqrt.f32 %v9602_v0  ;;  %v9596_v21 = vmul.f32 0.03125, %v9586_v63  ;;  %v9589_v51 = vpop.xlane.xlu1 %9588 }
0x1193   : > { %11538 = vrsqrt.f32 %v9603_v62  ;;  %v9597_v25 = vmul.f32 0.03125, %v9589_v51 }
0x1194   : > { %v9604_v34 = vadd.f32 1e-05, %v9596_v21 }
0x1195   : > { %v9605_v40 = vadd.f32 1e-05, %v9597_v25 }
0x1196   : > { %11540 = vrsqrt.f32 %v9604_v34 }
0x1197   : > { %11542 = vrsqrt.f32 %v9605_v40 }
0x119c   : > { %v11537_v19 = vpop.eup %11536 }
0x119d   : > { %v11539_v53 = vpop.eup %11538  ;;  %v9684_v59 = vrot.slane %v11537_v19, %v14047_v55  ;;  %v9691_v43 = vrot.slane %v11537_v19, %v14049_v50 }
0x119e   : > { %v9698_v57 = vrot.slane %v11539_v53, %v14047_v55  ;;  %v9705_v30 = vrot.slane %v11539_v53, %v14049_v50 }
0x119f   : > { %v9758_v7 = vmul.f32 %v9684_v59, %v14428_v29  ;;  %v9759_v58 = vmul.f32 %v9691_v43, %v14431_v2 }
0x11a0   : > { %v11541_v22 = vpop.eup %11540  ;;  %v9760_v5 = vmul.f32 %v9698_v57, %v14436_v11  ;;  %v9761_v1 = vmul.f32 %v9705_v30, %v14439_v39 }
0x11a1   : > { %v11543_v44 = vpop.eup %11542  ;;  %v9782_v60 = vmul.f32 %v14480_v49, %v9758_v7  ;;  %v9783_v52 = vmul.f32 %v14489_v36, %v9759_v58  ;;  %v9712_v28 = vrot.slane %v11541_v22, %v14047_v55  ;;  %v9719_v47 = vrot.slane %v11541_v22, %v14049_v50 }
0x11a2   : > { %v9784_v29 = vmul.f32 %v14480_v49, %v9760_v5  ;;  %v9785_v2 = vmul.f32 %v14489_v36, %v9761_v1  ;;  %v9726_v11 = vrot.slane %v11543_v44, %v14047_v55  ;;  %v9733_v39 = vrot.slane %v11543_v44, %v14049_v50 }
0x11a3   : > { %v9806_v15 = vadd.f32 %v14485_v26, %v9782_v60  ;;  %v9807_v23 = vadd.f32 %v14497_v17, %v9783_v52  ;;  %v9762_v38 = vmul.f32 %v9712_v28, %v14454_v32  ;;  %v9763_v3 = vmul.f32 %v9719_v47, %v14457_v18 }
0x11a4   : > { %v9808_v35 = vadd.f32 %v14485_v26, %v9784_v29  ;;  %v9809_v14 = vadd.f32 %v14497_v17, %v9785_v2  ;;  %v9764_v56 = vmul.f32 %v9726_v11, %v14460_v48  ;;  %v9765_v55 = vmul.f32 %v9733_v39, %v14463_v45 }
0x11a5   : > { %9823 = vst.msk [vmem:[%s14512_s20 + $0x20] sm:$0xf] %vm9814_vm9, %v9806_v15  ;;  %9824 = vst.msk [vmem:[%s14512_s20 + $0x24] sm:$0xf] %vm9814_vm9, %v9807_v23  ;;  %v9786_v50 = vmul.f32 %v14480_v49, %v9762_v38  ;;  %v9787_v32 = vmul.f32 %v14489_v36, %v9763_v3 }
0x11a6   : > { %9825 = vst.msk [vmem:[%s14512_s20 + $0x28] sm:$0xf] %vm9814_vm9, %v9808_v35  ;;  %9826 = vst.msk [vmem:[%s14512_s20 + $0x2c] sm:$0xf] %vm9814_vm9, %v9809_v14  ;;  %v9788_v18 = vmul.f32 %v14480_v49, %v9764_v56  ;;  %v9789_v48 = vmul.f32 %v14489_v36, %v9765_v55 }
0x11a7   : > { %v9810_v13 = vadd.f32 %v14485_v26, %v9786_v50  ;;  %v9811_v45 = vadd.f32 %v14497_v17, %v9787_v32 }
0x11a8   : > { %v9812_v27 = vadd.f32 %v14485_v26, %v9788_v18  ;;  %v9813_v12 = vadd.f32 %v14497_v17, %v9789_v48 }
0x11a9   : > { %9827 = vst.msk [vmem:[%s14512_s20 + $0x30] sm:$0xf] %vm9814_vm9, %v9810_v13  ;;  %9828 = vst.msk [vmem:[%s14512_s20 + $0x34] sm:$0xf] %vm9814_vm9, %v9811_v45 }
0x11aa   : > { %9829 = vst.msk [vmem:[%s14512_s20 + $0x38] sm:$0xf] %vm9814_vm9, %v9812_v27  ;;  %9830 = vst.msk [vmem:[%s14512_s20 + $0x3c] sm:$0xf] %vm9814_vm9, %v9813_v12 }
0x11ab PF: > { %s27_s24 = sadd.s32 1, %s11566_s24  }
0x11ac   : > { %p24_p4 = scmp.ge.s32.totalorder %s27_s24, 4  }
0x11ae   :  { %26 = sbr.rel (!%p24_p4) target bundleno = 3 (0x3), region = 118 }

</bundles_post_ra>
